<compile_context>
chip_gen: v5e
topology: v5e:2x2
jax: 0.10.0
libtpu: 0.0.40
codegen_flags: <defaults>
</compile_context>

<pallas_src>
import functools

import jax
import jax.numpy as jnp
from jax import lax
from jax.experimental import pallas as pl
from jax.experimental.pallas import tpu as pltpu


# ----------------------------- Pallas kernel ------------------------------ #
def _resblock_conv_kernel(*refs, H, W, C, apply_relu, add_residual, eps=1e-5):
    """Fused ReflPad'd-3x3-Conv + InstanceNorm (+ReLU) (+residual) per sample.

    Inputs (per grid step, batch squeezed):
      xpad_ref : (H+2, W+2, C) bf16   reflection-padded channel-last activation
      w_ref    : (9, C, C)     bf16   per-tap weights, w_taps[t] = W[:,:,di,dj].T
      b_ref    : (1, C)        f32    conv bias
      res_ref  : (H*W, C)      f32    residual (only when add_residual)
      o_ref    : (H*W, C)             output
    """
    if add_residual:
        xpad_ref, w_ref, b_ref, res_ref, o_ref = refs
    else:
        xpad_ref, w_ref, b_ref, o_ref = refs
        res_ref = None

    HW = H * W
    acc = jnp.zeros((HW, C), jnp.float32)
    # Tap-decomposed conv: 9 shifted windows, each a bf16 MXU matmul.
    for di in range(3):
        for dj in range(3):
            xt = xpad_ref[di:di + H, dj:dj + W, :]          # (H, W, C) bf16
            xt = xt.reshape(HW, C)
            acc = acc + jnp.dot(xt, w_ref[di * 3 + dj],
                                preferred_element_type=jnp.float32)

    y = acc + b_ref[...]                                    # (HW, C) f32

    # One-pass InstanceNorm2d (affine=False): per-channel over spatial (HW).
    inv_hw = 1.0 / HW
    s = jnp.sum(y, axis=0, keepdims=True)
    ss = jnp.sum(y * y, axis=0, keepdims=True)
    mean = s * inv_hw
    var = ss * inv_hw - mean * mean
    y = (y - mean) * lax.rsqrt(var + eps)

    if apply_relu:
        y = jnp.maximum(y, 0.0)
    if add_residual:
        y = y + res_ref[...]

    o_ref[...] = y.astype(o_ref.dtype)


# ------------------------------- glue (JAX) -------------------------------- #
def _conv_in_block(xpad_cl, w, b, *, apply_relu, residual=None,
                   out_dtype=jnp.float32):
    """xpad_cl: (N, H+2, W+2, C) channel-last, already reflection-padded.
    w: (Cout=C, Cin=C, 3, 3) PyTorch layout, b: (C,).
    Returns (N, H*W, C) in `out_dtype`."""
    N, Hp, Wp, C = xpad_cl.shape
    H, W = Hp - 2, Wp - 2
    HW = H * W

    # per-tap weights: taps[t=di*3+dj] = W[:, :, di, dj].T  -> (Cin, Cout)
    w_taps = jnp.transpose(w, (2, 3, 1, 0)).reshape(9, C, C).astype(jnp.bfloat16)
    b2 = b.reshape(1, C).astype(jnp.float32)
    x_bf = xpad_cl.astype(jnp.bfloat16)

    in_specs = [
        pl.BlockSpec((None, Hp, Wp, C), lambda n: (n, 0, 0, 0)),
        pl.BlockSpec((9, C, C), lambda n: (0, 0, 0)),
        pl.BlockSpec((1, C), lambda n: (0, 0)),
    ]
    inputs = [x_bf, w_taps, b2]
    if residual is not None:
        in_specs.append(pl.BlockSpec((None, HW, C), lambda n: (n, 0, 0)))
        inputs.append(residual.astype(jnp.float32))

    kernel = functools.partial(
        _resblock_conv_kernel, H=H, W=W, C=C,
        apply_relu=apply_relu, add_residual=residual is not None)

    out = pl.pallas_call(
        kernel,
        out_shape=jax.ShapeDtypeStruct((N, HW, C), out_dtype),
        grid_spec=pltpu.PrefetchScalarGridSpec(
            num_scalar_prefetch=0,
            grid=(N,),
            in_specs=in_specs,
            out_specs=pl.BlockSpec((None, HW, C), lambda n: (n, 0, 0)),
        ),
        compiler_params=pltpu.CompilerParams(
            dimension_semantics=("parallel",)),   # shardable across v7x TCs
    )(*inputs)
    return out


def resblock_forward(params, x):
    """x: (N, C, H, W) NCHW at the module boundary (PyTorch convention)."""
    (w1, b1), (w2, b2) = params
    N, C, H, W = x.shape

    # channel-last inside; single transpose in / out of the block.
    x_cl = jnp.transpose(x, (0, 2, 3, 1))                       # (N, H, W, C)

    # conv1: ReflectionPad2d(1) + Conv3x3 + InstanceNorm + ReLU (bf16 out)
    xp = jnp.pad(x_cl, ((0, 0), (1, 1), (1, 1), (0, 0)), mode="reflect")
    h = _conv_in_block(xp, w1, b1, apply_relu=True, out_dtype=jnp.bfloat16)
    h = h.reshape(N, H, W, C)

    # conv2: ReflectionPad2d(1) + Conv3x3 + InstanceNorm + residual add (f32)
    hp = jnp.pad(h, ((0, 0), (1, 1), (1, 1), (0, 0)), mode="reflect")
    res = x_cl.reshape(N, H * W, C)
    o = _conv_in_block(hp, w2, b2, apply_relu=False, residual=res,
                       out_dtype=jnp.float32)
    o = o.reshape(N, H, W, C)
    return jnp.transpose(o, (0, 3, 1, 2))                       # back to NCHW


# ------------------------------ params init -------------------------------- #
def init_resblock_params(key, c):
    k1, k2, k3, k4 = jax.random.split(key, 4)
    w1 = 0.05 * jax.random.normal(k1, (c, c, 3, 3), jnp.float32)
    b1 = 0.05 * jax.random.normal(k2, (c,), jnp.float32)
    w2 = 0.05 * jax.random.normal(k3, (c, c, 3, 3), jnp.float32)
    b2 = 0.05 * jax.random.normal(k4, (c,), jnp.float32)
    return [(w1, b1), (w2, b2)]


# -------------------------- pure-JAX reference ----------------------------- #
def _ref_forward(params, x):
    (w1, b1), (w2, b2) = params

    def conv_in(h, w, b, relu):
        hp = jnp.pad(h, ((0, 0), (0, 0), (1, 1), (1, 1)), mode="reflect")
        y = lax.conv_general_dilated(
            hp, w, (1, 1), [(0, 0), (0, 0)],
            dimension_numbers=("NCHW", "OIHW", "NCHW"),
            precision=lax.Precision.HIGHEST)
        y = y + b.reshape(1, -1, 1, 1)
        m = y.mean(axis=(2, 3), keepdims=True)
        v = jnp.square(y - m).mean(axis=(2, 3), keepdims=True)
        y = (y - m) * lax.rsqrt(v + 1e-5)
        if relu:
            y = jnp.maximum(y, 0.0)
        return y

    return x + conv_in(conv_in(x, w1, b1, True), w2, b2, False)


if __name__ == "__main__":
    key = jax.random.PRNGKey(0)
    kp, kx = jax.random.split(key)

    N, C, H, W = 2, 8, 16, 16          # small ResBlock: in_f = 8, 16x16 maps
    params = init_resblock_params(kp, C)
    x = jax.random.normal(kx, (N, C, H, W), jnp.float32)

    out = jax.block_until_ready(jax.jit(resblock_forward)(params, x))
    ref = jax.block_until_ready(_ref_forward(params, x))

    assert out.shape == (N, C, H, W), out.shape
    assert bool(jnp.all(jnp.isfinite(out)))
    max_err = float(jnp.max(jnp.abs(out - ref)))
    assert bool(jnp.allclose(out, ref, atol=5e-2, rtol=5e-2)), max_err
    print("KERNEL_OK")
</pallas_src>

<mosaic_0001>
module attributes {stable_mosaic.version = 11 : i64} {
  func.func @_resblock_conv_kernel(%arg0: i32, %arg1: memref<1x18x18x8xbf16, #tpu.memory_space<vmem>>, %arg2: memref<9x8x8xbf16, #tpu.memory_space<vmem>>, %arg3: memref<1x8xf32, #tpu.memory_space<vmem>>, %arg4: memref<1x256x8xbf16, #tpu.memory_space<vmem>>) attributes {dimension_semantics = [#tpu.dimension_semantics<parallel>], iteration_bounds = array<i64: 2>, scalar_prefetch = 0 : i64, scratch_operands = 0 : i64, tpu.core_type = #tpu.core_type<tc>, window_params = [{transform_indices = @transform_0, window_bounds = array<i64: 1, 18, 18, 8>}, {pipeline_mode = #tpu.pipeline_mode<synchronous>, transform_indices = @transform_1, window_bounds = array<i64: 9, 8, 8>}, {pipeline_mode = #tpu.pipeline_mode<synchronous>, transform_indices = @transform_2, window_bounds = array<i64: 1, 8>}, {transform_indices = @transform_3, window_bounds = array<i64: 1, 256, 8>}]} {
    %cst = arith.constant 0.000000e+00 : f32
    %0 = vector.broadcast %cst : f32 to vector<256x8xf32>
    %c0 = arith.constant 0 : index
    %c0_0 = arith.constant 0 : index
    %c0_1 = arith.constant 0 : index
    %c0_2 = arith.constant 0 : index
    %1 = vector.load %arg1[%c0, %c0_0, %c0_1, %c0_2] : memref<1x18x18x8xbf16, #tpu.memory_space<vmem>>, vector<1x16x16x8xbf16>
    %2 = vector.shape_cast %1 : vector<1x16x16x8xbf16> to vector<16x16x8xbf16>
    %3 = vector.shape_cast %2 : vector<16x16x8xbf16> to vector<256x8xbf16>
    %c0_3 = arith.constant 0 : index
    %c0_4 = arith.constant 0 : index
    %c0_5 = arith.constant 0 : index
    %4 = vector.load %arg2[%c0_3, %c0_4, %c0_5] : memref<9x8x8xbf16, #tpu.memory_space<vmem>>, vector<1x8x8xbf16>
    %5 = vector.shape_cast %4 : vector<1x8x8xbf16> to vector<8x8xbf16>
    %cst_6 = arith.constant dense<0.000000e+00> : vector<256x8xf32>
    %6 = tpu.matmul %3, %5, %cst_6 {dimension_numbers = #tpu.dot_dimension_numbers<[1], [0], [0], [1], [0, 0, 1, 1], [], []>} : vector<256x8xbf16>, vector<8x8xbf16>, vector<256x8xf32> -> vector<256x8xf32>
    %7 = arith.addf %0, %6 : vector<256x8xf32>
    %c0_7 = arith.constant 0 : index
    %c0_8 = arith.constant 0 : index
    %c1 = arith.constant 1 : index
    %c0_9 = arith.constant 0 : index
    %8 = vector.load %arg1[%c0_7, %c0_8, %c1, %c0_9] : memref<1x18x18x8xbf16, #tpu.memory_space<vmem>>, vector<1x16x16x8xbf16>
    %9 = vector.shape_cast %8 : vector<1x16x16x8xbf16> to vector<16x16x8xbf16>
    %10 = vector.shape_cast %9 : vector<16x16x8xbf16> to vector<256x8xbf16>
    %c1_10 = arith.constant 1 : index
    %c0_11 = arith.constant 0 : index
    %c0_12 = arith.constant 0 : index
    %11 = vector.load %arg2[%c1_10, %c0_11, %c0_12] : memref<9x8x8xbf16, #tpu.memory_space<vmem>>, vector<1x8x8xbf16>
    %12 = vector.shape_cast %11 : vector<1x8x8xbf16> to vector<8x8xbf16>
    %cst_13 = arith.constant dense<0.000000e+00> : vector<256x8xf32>
    %13 = tpu.matmul %10, %12, %cst_13 {dimension_numbers = #tpu.dot_dimension_numbers<[1], [0], [0], [1], [0, 0, 1, 1], [], []>} : vector<256x8xbf16>, vector<8x8xbf16>, vector<256x8xf32> -> vector<256x8xf32>
    %14 = arith.addf %7, %13 : vector<256x8xf32>
    %c0_14 = arith.constant 0 : index
    %c0_15 = arith.constant 0 : index
    %c2 = arith.constant 2 : index
    %c0_16 = arith.constant 0 : index
    %15 = vector.load %arg1[%c0_14, %c0_15, %c2, %c0_16] : memref<1x18x18x8xbf16, #tpu.memory_space<vmem>>, vector<1x16x16x8xbf16>
    %16 = vector.shape_cast %15 : vector<1x16x16x8xbf16> to vector<16x16x8xbf16>
    %17 = vector.shape_cast %16 : vector<16x16x8xbf16> to vector<256x8xbf16>
    %c2_17 = arith.constant 2 : index
    %c0_18 = arith.constant 0 : index
    %c0_19 = arith.constant 0 : index
    %18 = vector.load %arg2[%c2_17, %c0_18, %c0_19] : memref<9x8x8xbf16, #tpu.memory_space<vmem>>, vector<1x8x8xbf16>
    %19 = vector.shape_cast %18 : vector<1x8x8xbf16> to vector<8x8xbf16>
    %cst_20 = arith.constant dense<0.000000e+00> : vector<256x8xf32>
    %20 = tpu.matmul %17, %19, %cst_20 {dimension_numbers = #tpu.dot_dimension_numbers<[1], [0], [0], [1], [0, 0, 1, 1], [], []>} : vector<256x8xbf16>, vector<8x8xbf16>, vector<256x8xf32> -> vector<256x8xf32>
    %21 = arith.addf %14, %20 : vector<256x8xf32>
    %c0_21 = arith.constant 0 : index
    %c1_22 = arith.constant 1 : index
    %c0_23 = arith.constant 0 : index
    %c0_24 = arith.constant 0 : index
    %22 = vector.load %arg1[%c0_21, %c1_22, %c0_23, %c0_24] : memref<1x18x18x8xbf16, #tpu.memory_space<vmem>>, vector<1x16x16x8xbf16>
    %23 = vector.shape_cast %22 : vector<1x16x16x8xbf16> to vector<16x16x8xbf16>
    %24 = vector.shape_cast %23 : vector<16x16x8xbf16> to vector<256x8xbf16>
    %c3 = arith.constant 3 : index
    %c0_25 = arith.constant 0 : index
    %c0_26 = arith.constant 0 : index
    %25 = vector.load %arg2[%c3, %c0_25, %c0_26] : memref<9x8x8xbf16, #tpu.memory_space<vmem>>, vector<1x8x8xbf16>
    %26 = vector.shape_cast %25 : vector<1x8x8xbf16> to vector<8x8xbf16>
    %cst_27 = arith.constant dense<0.000000e+00> : vector<256x8xf32>
    %27 = tpu.matmul %24, %26, %cst_27 {dimension_numbers = #tpu.dot_dimension_numbers<[1], [0], [0], [1], [0, 0, 1, 1], [], []>} : vector<256x8xbf16>, vector<8x8xbf16>, vector<256x8xf32> -> vector<256x8xf32>
    %28 = arith.addf %21, %27 : vector<256x8xf32>
    %c0_28 = arith.constant 0 : index
    %c1_29 = arith.constant 1 : index
    %c1_30 = arith.constant 1 : index
    %c0_31 = arith.constant 0 : index
    %29 = vector.load %arg1[%c0_28, %c1_29, %c1_30, %c0_31] : memref<1x18x18x8xbf16, #tpu.memory_space<vmem>>, vector<1x16x16x8xbf16>
    %30 = vector.shape_cast %29 : vector<1x16x16x8xbf16> to vector<16x16x8xbf16>
    %31 = vector.shape_cast %30 : vector<16x16x8xbf16> to vector<256x8xbf16>
    %c4 = arith.constant 4 : index
    %c0_32 = arith.constant 0 : index
    %c0_33 = arith.constant 0 : index
    %32 = vector.load %arg2[%c4, %c0_32, %c0_33] : memref<9x8x8xbf16, #tpu.memory_space<vmem>>, vector<1x8x8xbf16>
    %33 = vector.shape_cast %32 : vector<1x8x8xbf16> to vector<8x8xbf16>
    %cst_34 = arith.constant dense<0.000000e+00> : vector<256x8xf32>
    %34 = tpu.matmul %31, %33, %cst_34 {dimension_numbers = #tpu.dot_dimension_numbers<[1], [0], [0], [1], [0, 0, 1, 1], [], []>} : vector<256x8xbf16>, vector<8x8xbf16>, vector<256x8xf32> -> vector<256x8xf32>
    %35 = arith.addf %28, %34 : vector<256x8xf32>
    %c0_35 = arith.constant 0 : index
    %c1_36 = arith.constant 1 : index
    %c2_37 = arith.constant 2 : index
    %c0_38 = arith.constant 0 : index
    %36 = vector.load %arg1[%c0_35, %c1_36, %c2_37, %c0_38] : memref<1x18x18x8xbf16, #tpu.memory_space<vmem>>, vector<1x16x16x8xbf16>
    %37 = vector.shape_cast %36 : vector<1x16x16x8xbf16> to vector<16x16x8xbf16>
    %38 = vector.shape_cast %37 : vector<16x16x8xbf16> to vector<256x8xbf16>
    %c5 = arith.constant 5 : index
    %c0_39 = arith.constant 0 : index
    %c0_40 = arith.constant 0 : index
    %39 = vector.load %arg2[%c5, %c0_39, %c0_40] : memref<9x8x8xbf16, #tpu.memory_space<vmem>>, vector<1x8x8xbf16>
    %40 = vector.shape_cast %39 : vector<1x8x8xbf16> to vector<8x8xbf16>
    %cst_41 = arith.constant dense<0.000000e+00> : vector<256x8xf32>
    %41 = tpu.matmul %38, %40, %cst_41 {dimension_numbers = #tpu.dot_dimension_numbers<[1], [0], [0], [1], [0, 0, 1, 1], [], []>} : vector<256x8xbf16>, vector<8x8xbf16>, vector<256x8xf32> -> vector<256x8xf32>
    %42 = arith.addf %35, %41 : vector<256x8xf32>
    %c0_42 = arith.constant 0 : index
    %c2_43 = arith.constant 2 : index
    %c0_44 = arith.constant 0 : index
    %c0_45 = arith.constant 0 : index
    %43 = vector.load %arg1[%c0_42, %c2_43, %c0_44, %c0_45] : memref<1x18x18x8xbf16, #tpu.memory_space<vmem>>, vector<1x16x16x8xbf16>
    %44 = vector.shape_cast %43 : vector<1x16x16x8xbf16> to vector<16x16x8xbf16>
    %45 = vector.shape_cast %44 : vector<16x16x8xbf16> to vector<256x8xbf16>
    %c6 = arith.constant 6 : index
    %c0_46 = arith.constant 0 : index
    %c0_47 = arith.constant 0 : index
    %46 = vector.load %arg2[%c6, %c0_46, %c0_47] : memref<9x8x8xbf16, #tpu.memory_space<vmem>>, vector<1x8x8xbf16>
    %47 = vector.shape_cast %46 : vector<1x8x8xbf16> to vector<8x8xbf16>
    %cst_48 = arith.constant dense<0.000000e+00> : vector<256x8xf32>
    %48 = tpu.matmul %45, %47, %cst_48 {dimension_numbers = #tpu.dot_dimension_numbers<[1], [0], [0], [1], [0, 0, 1, 1], [], []>} : vector<256x8xbf16>, vector<8x8xbf16>, vector<256x8xf32> -> vector<256x8xf32>
    %49 = arith.addf %42, %48 : vector<256x8xf32>
    %c0_49 = arith.constant 0 : index
    %c2_50 = arith.constant 2 : index
    %c1_51 = arith.constant 1 : index
    %c0_52 = arith.constant 0 : index
    %50 = vector.load %arg1[%c0_49, %c2_50, %c1_51, %c0_52] : memref<1x18x18x8xbf16, #tpu.memory_space<vmem>>, vector<1x16x16x8xbf16>
    %51 = vector.shape_cast %50 : vector<1x16x16x8xbf16> to vector<16x16x8xbf16>
    %52 = vector.shape_cast %51 : vector<16x16x8xbf16> to vector<256x8xbf16>
    %c7 = arith.constant 7 : index
    %c0_53 = arith.constant 0 : index
    %c0_54 = arith.constant 0 : index
    %53 = vector.load %arg2[%c7, %c0_53, %c0_54] : memref<9x8x8xbf16, #tpu.memory_space<vmem>>, vector<1x8x8xbf16>
    %54 = vector.shape_cast %53 : vector<1x8x8xbf16> to vector<8x8xbf16>
    %cst_55 = arith.constant dense<0.000000e+00> : vector<256x8xf32>
    %55 = tpu.matmul %52, %54, %cst_55 {dimension_numbers = #tpu.dot_dimension_numbers<[1], [0], [0], [1], [0, 0, 1, 1], [], []>} : vector<256x8xbf16>, vector<8x8xbf16>, vector<256x8xf32> -> vector<256x8xf32>
    %56 = arith.addf %49, %55 : vector<256x8xf32>
    %c0_56 = arith.constant 0 : index
    %c2_57 = arith.constant 2 : index
    %c2_58 = arith.constant 2 : index
    %c0_59 = arith.constant 0 : index
    %57 = vector.load %arg1[%c0_56, %c2_57, %c2_58, %c0_59] : memref<1x18x18x8xbf16, #tpu.memory_space<vmem>>, vector<1x16x16x8xbf16>
    %58 = vector.shape_cast %57 : vector<1x16x16x8xbf16> to vector<16x16x8xbf16>
    %59 = vector.shape_cast %58 : vector<16x16x8xbf16> to vector<256x8xbf16>
    %c8 = arith.constant 8 : index
    %c0_60 = arith.constant 0 : index
    %c0_61 = arith.constant 0 : index
    %60 = vector.load %arg2[%c8, %c0_60, %c0_61] : memref<9x8x8xbf16, #tpu.memory_space<vmem>>, vector<1x8x8xbf16>
    %61 = vector.shape_cast %60 : vector<1x8x8xbf16> to vector<8x8xbf16>
    %cst_62 = arith.constant dense<0.000000e+00> : vector<256x8xf32>
    %62 = tpu.matmul %59, %61, %cst_62 {dimension_numbers = #tpu.dot_dimension_numbers<[1], [0], [0], [1], [0, 0, 1, 1], [], []>} : vector<256x8xbf16>, vector<8x8xbf16>, vector<256x8xf32> -> vector<256x8xf32>
    %63 = arith.addf %56, %62 : vector<256x8xf32>
    %c0_63 = arith.constant 0 : index
    %c0_64 = arith.constant 0 : index
    %64 = vector.load %arg3[%c0_63, %c0_64] : memref<1x8xf32, #tpu.memory_space<vmem>>, vector<1x8xf32>
    %65 = vector.broadcast %64 : vector<1x8xf32> to vector<256x8xf32>
    %66 = arith.addf %63, %65 : vector<256x8xf32>
    %cst_65 = arith.constant dense<0.000000e+00> : vector<8xf32>
    %67 = vector.multi_reduction <add>, %66, %cst_65 [0] : vector<256x8xf32> to vector<8xf32>
    %68 = vector.shape_cast %67 : vector<8xf32> to vector<1x8xf32>
    %69 = arith.mulf %66, %66 : vector<256x8xf32>
    %cst_66 = arith.constant dense<0.000000e+00> : vector<8xf32>
    %70 = vector.multi_reduction <add>, %69, %cst_66 [0] : vector<256x8xf32> to vector<8xf32>
    %71 = vector.shape_cast %70 : vector<8xf32> to vector<1x8xf32>
    %cst_67 = arith.constant 3.906250e-03 : f32
    %72 = vector.broadcast %cst_67 : f32 to vector<1x8xf32>
    %73 = arith.mulf %68, %72 : vector<1x8xf32>
    %cst_68 = arith.constant 3.906250e-03 : f32
    %74 = vector.broadcast %cst_68 : f32 to vector<1x8xf32>
    %75 = arith.mulf %71, %74 : vector<1x8xf32>
    %76 = arith.mulf %73, %73 : vector<1x8xf32>
    %77 = arith.subf %75, %76 : vector<1x8xf32>
    %78 = vector.broadcast %73 : vector<1x8xf32> to vector<256x8xf32>
    %79 = arith.subf %66, %78 : vector<256x8xf32>
    %cst_69 = arith.constant 9.99999974E-6 : f32
    %80 = vector.broadcast %cst_69 : f32 to vector<1x8xf32>
    %81 = arith.addf %77, %80 : vector<1x8xf32>
    %82 = math.rsqrt %81 : vector<1x8xf32>
    %83 = vector.broadcast %82 : vector<1x8xf32> to vector<256x8xf32>
    %84 = arith.mulf %79, %83 : vector<256x8xf32>
    %cst_70 = arith.constant 0.000000e+00 : f32
    %85 = vector.broadcast %cst_70 : f32 to vector<256x8xf32>
    %86 = arith.maximumf %84, %85 : vector<256x8xf32>
    %87 = arith.truncf %86 : vector<256x8xf32> to vector<256x8xbf16>
    %c0_71 = arith.constant 0 : index
    %c0_72 = arith.constant 0 : index
    %c0_73 = arith.constant 0 : index
    %88 = vector.load %arg4[%c0_71, %c0_72, %c0_73] : memref<1x256x8xbf16, #tpu.memory_space<vmem>>, vector<1x256x8xbf16>
    %89 = vector.shape_cast %88 : vector<1x256x8xbf16> to vector<256x8xbf16>
    %90 = vector.shape_cast %87 : vector<256x8xbf16> to vector<1x256x8xbf16>
    tpu.vector_store %arg4[%c0_71, %c0_72, %c0_73], %90 {strides = array<i32>} : memref<1x256x8xbf16, #tpu.memory_space<vmem>>, vector<1x256x8xbf16>,
    return
  }
  func.func @transform_0(%arg0: i32) -> (i32, i32, i32, i32) {
    %c0_i32 = arith.constant 0 : i32
    %c0_i32_0 = arith.constant 0 : i32
    %c0_i32_1 = arith.constant 0 : i32
    %c0_i32_2 = arith.constant 0 : i32
    return %arg0, %c0_i32, %c0_i32_0, %c0_i32_1 : i32, i32, i32, i32
  }
  func.func @transform_1(%arg0: i32) -> (i32, i32, i32) {
    %c0_i32 = arith.constant 0 : i32
    %c0_i32_0 = arith.constant 0 : i32
    %c0_i32_1 = arith.constant 0 : i32
    %c0_i32_2 = arith.constant 0 : i32
    return %c0_i32, %c0_i32_0, %c0_i32_1 : i32, i32, i32
  }
  func.func @transform_2(%arg0: i32) -> (i32, i32) {
    %c0_i32 = arith.constant 0 : i32
    %c0_i32_0 = arith.constant 0 : i32
    %c0_i32_1 = arith.constant 0 : i32
    return %c0_i32, %c0_i32_0 : i32, i32
  }
  func.func @transform_3(%arg0: i32) -> (i32, i32, i32) {
    %c0_i32 = arith.constant 0 : i32
    %c0_i32_0 = arith.constant 0 : i32
    %c0_i32_1 = arith.constant 0 : i32
    return %arg0, %c0_i32, %c0_i32_0 : i32, i32, i32
  }
}

module attributes {stable_mosaic.version = 11 : i64} {
  func.func @_resblock_conv_kernel(%arg0: i32, %arg1: memref<1x18x18x8xbf16, #tpu.memory_space<vmem>>, %arg2: memref<9x8x8xbf16, #tpu.memory_space<vmem>>, %arg3: memref<1x8xf32, #tpu.memory_space<vmem>>, %arg4: memref<1x256x8xf32, #tpu.memory_space<vmem>>, %arg5: memref<1x256x8xf32, #tpu.memory_space<vmem>>) attributes {dimension_semantics = [#tpu.dimension_semantics<parallel>], iteration_bounds = array<i64: 2>, scalar_prefetch = 0 : i64, scratch_operands = 0 : i64, tpu.core_type = #tpu.core_type<tc>, window_params = [{transform_indices = @transform_0, window_bounds = array<i64: 1, 18, 18, 8>}, {pipeline_mode = #tpu.pipeline_mode<synchronous>, transform_indices = @transform_1, window_bounds = array<i64: 9, 8, 8>}, {pipeline_mode = #tpu.pipeline_mode<synchronous>, transform_indices = @transform_2, window_bounds = array<i64: 1, 8>}, {transform_indices = @transform_3, window_bounds = array<i64: 1, 256, 8>}, {transform_indices = @transform_4, window_bounds = array<i64: 1, 256, 8>}]} {
    %cst = arith.constant 0.000000e+00 : f32
    %0 = vector.broadcast %cst : f32 to vector<256x8xf32>
    %c0 = arith.constant 0 : index
    %c0_0 = arith.constant 0 : index
    %c0_1 = arith.constant 0 : index
    %c0_2 = arith.constant 0 : index
    %1 = vector.load %arg1[%c0, %c0_0, %c0_1, %c0_2] : memref<1x18x18x8xbf16, #tpu.memory_space<vmem>>, vector<1x16x16x8xbf16>
    %2 = vector.shape_cast %1 : vector<1x16x16x8xbf16> to vector<16x16x8xbf16>
    %3 = vector.shape_cast %2 : vector<16x16x8xbf16> to vector<256x8xbf16>
    %c0_3 = arith.constant 0 : index
    %c0_4 = arith.constant 0 : index
    %c0_5 = arith.constant 0 : index
    %4 = vector.load %arg2[%c0_3, %c0_4, %c0_5] : memref<9x8x8xbf16, #tpu.memory_space<vmem>>, vector<1x8x8xbf16>
    %5 = vector.shape_cast %4 : vector<1x8x8xbf16> to vector<8x8xbf16>
    %cst_6 = arith.constant dense<0.000000e+00> : vector<256x8xf32>
    %6 = tpu.matmul %3, %5, %cst_6 {dimension_numbers = #tpu.dot_dimension_numbers<[1], [0], [0], [1], [0, 0, 1, 1], [], []>} : vector<256x8xbf16>, vector<8x8xbf16>, vector<256x8xf32> -> vector<256x8xf32>
    %7 = arith.addf %0, %6 : vector<256x8xf32>
    %c0_7 = arith.constant 0 : index
    %c0_8 = arith.constant 0 : index
    %c1 = arith.constant 1 : index
    %c0_9 = arith.constant 0 : index
    %8 = vector.load %arg1[%c0_7, %c0_8, %c1, %c0_9] : memref<1x18x18x8xbf16, #tpu.memory_space<vmem>>, vector<1x16x16x8xbf16>
    %9 = vector.shape_cast %8 : vector<1x16x16x8xbf16> to vector<16x16x8xbf16>
    %10 = vector.shape_cast %9 : vector<16x16x8xbf16> to vector<256x8xbf16>
    %c1_10 = arith.constant 1 : index
    %c0_11 = arith.constant 0 : index
    %c0_12 = arith.constant 0 : index
    %11 = vector.load %arg2[%c1_10, %c0_11, %c0_12] : memref<9x8x8xbf16, #tpu.memory_space<vmem>>, vector<1x8x8xbf16>
    %12 = vector.shape_cast %11 : vector<1x8x8xbf16> to vector<8x8xbf16>
    %cst_13 = arith.constant dense<0.000000e+00> : vector<256x8xf32>
    %13 = tpu.matmul %10, %12, %cst_13 {dimension_numbers = #tpu.dot_dimension_numbers<[1], [0], [0], [1], [0, 0, 1, 1], [], []>} : vector<256x8xbf16>, vector<8x8xbf16>, vector<256x8xf32> -> vector<256x8xf32>
    %14 = arith.addf %7, %13 : vector<256x8xf32>
    %c0_14 = arith.constant 0 : index
    %c0_15 = arith.constant 0 : index
    %c2 = arith.constant 2 : index
    %c0_16 = arith.constant 0 : index
    %15 = vector.load %arg1[%c0_14, %c0_15, %c2, %c0_16] : memref<1x18x18x8xbf16, #tpu.memory_space<vmem>>, vector<1x16x16x8xbf16>
    %16 = vector.shape_cast %15 : vector<1x16x16x8xbf16> to vector<16x16x8xbf16>
    %17 = vector.shape_cast %16 : vector<16x16x8xbf16> to vector<256x8xbf16>
    %c2_17 = arith.constant 2 : index
    %c0_18 = arith.constant 0 : index
    %c0_19 = arith.constant 0 : index
    %18 = vector.load %arg2[%c2_17, %c0_18, %c0_19] : memref<9x8x8xbf16, #tpu.memory_space<vmem>>, vector<1x8x8xbf16>
    %19 = vector.shape_cast %18 : vector<1x8x8xbf16> to vector<8x8xbf16>
    %cst_20 = arith.constant dense<0.000000e+00> : vector<256x8xf32>
    %20 = tpu.matmul %17, %19, %cst_20 {dimension_numbers = #tpu.dot_dimension_numbers<[1], [0], [0], [1], [0, 0, 1, 1], [], []>} : vector<256x8xbf16>, vector<8x8xbf16>, vector<256x8xf32> -> vector<256x8xf32>
    %21 = arith.addf %14, %20 : vector<256x8xf32>
    %c0_21 = arith.constant 0 : index
    %c1_22 = arith.constant 1 : index
    %c0_23 = arith.constant 0 : index
    %c0_24 = arith.constant 0 : index
    %22 = vector.load %arg1[%c0_21, %c1_22, %c0_23, %c0_24] : memref<1x18x18x8xbf16, #tpu.memory_space<vmem>>, vector<1x16x16x8xbf16>
    %23 = vector.shape_cast %22 : vector<1x16x16x8xbf16> to vector<16x16x8xbf16>
    %24 = vector.shape_cast %23 : vector<16x16x8xbf16> to vector<256x8xbf16>
    %c3 = arith.constant 3 : index
    %c0_25 = arith.constant 0 : index
    %c0_26 = arith.constant 0 : index
    %25 = vector.load %arg2[%c3, %c0_25, %c0_26] : memref<9x8x8xbf16, #tpu.memory_space<vmem>>, vector<1x8x8xbf16>
    %26 = vector.shape_cast %25 : vector<1x8x8xbf16> to vector<8x8xbf16>
    %cst_27 = arith.constant dense<0.000000e+00> : vector<256x8xf32>
    %27 = tpu.matmul %24, %26, %cst_27 {dimension_numbers = #tpu.dot_dimension_numbers<[1], [0], [0], [1], [0, 0, 1, 1], [], []>} : vector<256x8xbf16>, vector<8x8xbf16>, vector<256x8xf32> -> vector<256x8xf32>
    %28 = arith.addf %21, %27 : vector<256x8xf32>
    %c0_28 = arith.constant 0 : index
    %c1_29 = arith.constant 1 : index
    %c1_30 = arith.constant 1 : index
    %c0_31 = arith.constant 0 : index
    %29 = vector.load %arg1[%c0_28, %c1_29, %c1_30, %c0_31] : memref<1x18x18x8xbf16, #tpu.memory_space<vmem>>, vector<1x16x16x8xbf16>
    %30 = vector.shape_cast %29 : vector<1x16x16x8xbf16> to vector<16x16x8xbf16>
    %31 = vector.shape_cast %30 : vector<16x16x8xbf16> to vector<256x8xbf16>
    %c4 = arith.constant 4 : index
    %c0_32 = arith.constant 0 : index
    %c0_33 = arith.constant 0 : index
    %32 = vector.load %arg2[%c4, %c0_32, %c0_33] : memref<9x8x8xbf16, #tpu.memory_space<vmem>>, vector<1x8x8xbf16>
    %33 = vector.shape_cast %32 : vector<1x8x8xbf16> to vector<8x8xbf16>
    %cst_34 = arith.constant dense<0.000000e+00> : vector<256x8xf32>
    %34 = tpu.matmul %31, %33, %cst_34 {dimension_numbers = #tpu.dot_dimension_numbers<[1], [0], [0], [1], [0, 0, 1, 1], [], []>} : vector<256x8xbf16>, vector<8x8xbf16>, vector<256x8xf32> -> vector<256x8xf32>
    %35 = arith.addf %28, %34 : vector<256x8xf32>
    %c0_35 = arith.constant 0 : index
    %c1_36 = arith.constant 1 : index
    %c2_37 = arith.constant 2 : index
    %c0_38 = arith.constant 0 : index
    %36 = vector.load %arg1[%c0_35, %c1_36, %c2_37, %c0_38] : memref<1x18x18x8xbf16, #tpu.memory_space<vmem>>, vector<1x16x16x8xbf16>
    %37 = vector.shape_cast %36 : vector<1x16x16x8xbf16> to vector<16x16x8xbf16>
    %38 = vector.shape_cast %37 : vector<16x16x8xbf16> to vector<256x8xbf16>
    %c5 = arith.constant 5 : index
    %c0_39 = arith.constant 0 : index
    %c0_40 = arith.constant 0 : index
    %39 = vector.load %arg2[%c5, %c0_39, %c0_40] : memref<9x8x8xbf16, #tpu.memory_space<vmem>>, vector<1x8x8xbf16>
    %40 = vector.shape_cast %39 : vector<1x8x8xbf16> to vector<8x8xbf16>
    %cst_41 = arith.constant dense<0.000000e+00> : vector<256x8xf32>
    %41 = tpu.matmul %38, %40, %cst_41 {dimension_numbers = #tpu.dot_dimension_numbers<[1], [0], [0], [1], [0, 0, 1, 1], [], []>} : vector<256x8xbf16>, vector<8x8xbf16>, vector<256x8xf32> -> vector<256x8xf32>
    %42 = arith.addf %35, %41 : vector<256x8xf32>
    %c0_42 = arith.constant 0 : index
    %c2_43 = arith.constant 2 : index
    %c0_44 = arith.constant 0 : index
    %c0_45 = arith.constant 0 : index
    %43 = vector.load %arg1[%c0_42, %c2_43, %c0_44, %c0_45] : memref<1x18x18x8xbf16, #tpu.memory_space<vmem>>, vector<1x16x16x8xbf16>
    %44 = vector.shape_cast %43 : vector<1x16x16x8xbf16> to vector<16x16x8xbf16>
    %45 = vector.shape_cast %44 : vector<16x16x8xbf16> to vector<256x8xbf16>
    %c6 = arith.constant 6 : index
    %c0_46 = arith.constant 0 : index
    %c0_47 = arith.constant 0 : index
    %46 = vector.load %arg2[%c6, %c0_46, %c0_47] : memref<9x8x8xbf16, #tpu.memory_space<vmem>>, vector<1x8x8xbf16>
    %47 = vector.shape_cast %46 : vector<1x8x8xbf16> to vector<8x8xbf16>
    %cst_48 = arith.constant dense<0.000000e+00> : vector<256x8xf32>
    %48 = tpu.matmul %45, %47, %cst_48 {dimension_numbers = #tpu.dot_dimension_numbers<[1], [0], [0], [1], [0, 0, 1, 1], [], []>} : vector<256x8xbf16>, vector<8x8xbf16>, vector<256x8xf32> -> vector<256x8xf32>
    %49 = arith.addf %42, %48 : vector<256x8xf32>
    %c0_49 = arith.constant 0 : index
    %c2_50 = arith.constant 2 : index
    %c1_51 = arith.constant 1 : index
    %c0_52 = arith.constant 0 : index
    %50 = vector.load %arg1[%c0_49, %c2_50, %c1_51, %c0_52] : memref<1x18x18x8xbf16, #tpu.memory_space<vmem>>, vector<1x16x16x8xbf16>
    %51 = vector.shape_cast %50 : vector<1x16x16x8xbf16> to vector<16x16x8xbf16>
    %52 = vector.shape_cast %51 : vector<16x16x8xbf16> to vector<256x8xbf16>
    %c7 = arith.constant 7 : index
    %c0_53 = arith.constant 0 : index
    %c0_54 = arith.constant 0 : index
    %53 = vector.load %arg2[%c7, %c0_53, %c0_54] : memref<9x8x8xbf16, #tpu.memory_space<vmem>>, vector<1x8x8xbf16>
    %54 = vector.shape_cast %53 : vector<1x8x8xbf16> to vector<8x8xbf16>
    %cst_55 = arith.constant dense<0.000000e+00> : vector<256x8xf32>
    %55 = tpu.matmul %52, %54, %cst_55 {dimension_numbers = #tpu.dot_dimension_numbers<[1], [0], [0], [1], [0, 0, 1, 1], [], []>} : vector<256x8xbf16>, vector<8x8xbf16>, vector<256x8xf32> -> vector<256x8xf32>
    %56 = arith.addf %49, %55 : vector<256x8xf32>
    %c0_56 = arith.constant 0 : index
    %c2_57 = arith.constant 2 : index
    %c2_58 = arith.constant 2 : index
    %c0_59 = arith.constant 0 : index
    %57 = vector.load %arg1[%c0_56, %c2_57, %c2_58, %c0_59] : memref<1x18x18x8xbf16, #tpu.memory_space<vmem>>, vector<1x16x16x8xbf16>
    %58 = vector.shape_cast %57 : vector<1x16x16x8xbf16> to vector<16x16x8xbf16>
    %59 = vector.shape_cast %58 : vector<16x16x8xbf16> to vector<256x8xbf16>
    %c8 = arith.constant 8 : index
    %c0_60 = arith.constant 0 : index
    %c0_61 = arith.constant 0 : index
    %60 = vector.load %arg2[%c8, %c0_60, %c0_61] : memref<9x8x8xbf16, #tpu.memory_space<vmem>>, vector<1x8x8xbf16>
    %61 = vector.shape_cast %60 : vector<1x8x8xbf16> to vector<8x8xbf16>
    %cst_62 = arith.constant dense<0.000000e+00> : vector<256x8xf32>
    %62 = tpu.matmul %59, %61, %cst_62 {dimension_numbers = #tpu.dot_dimension_numbers<[1], [0], [0], [1], [0, 0, 1, 1], [], []>} : vector<256x8xbf16>, vector<8x8xbf16>, vector<256x8xf32> -> vector<256x8xf32>
    %63 = arith.addf %56, %62 : vector<256x8xf32>
    %c0_63 = arith.constant 0 : index
    %c0_64 = arith.constant 0 : index
    %64 = vector.load %arg3[%c0_63, %c0_64] : memref<1x8xf32, #tpu.memory_space<vmem>>, vector<1x8xf32>
    %65 = vector.broadcast %64 : vector<1x8xf32> to vector<256x8xf32>
    %66 = arith.addf %63, %65 : vector<256x8xf32>
    %cst_65 = arith.constant dense<0.000000e+00> : vector<8xf32>
    %67 = vector.multi_reduction <add>, %66, %cst_65 [0] : vector<256x8xf32> to vector<8xf32>
    %68 = vector.shape_cast %67 : vector<8xf32> to vector<1x8xf32>
    %69 = arith.mulf %66, %66 : vector<256x8xf32>
    %cst_66 = arith.constant dense<0.000000e+00> : vector<8xf32>
    %70 = vector.multi_reduction <add>, %69, %cst_66 [0] : vector<256x8xf32> to vector<8xf32>
    %71 = vector.shape_cast %70 : vector<8xf32> to vector<1x8xf32>
    %cst_67 = arith.constant 3.906250e-03 : f32
    %72 = vector.broadcast %cst_67 : f32 to vector<1x8xf32>
    %73 = arith.mulf %68, %72 : vector<1x8xf32>
    %cst_68 = arith.constant 3.906250e-03 : f32
    %74 = vector.broadcast %cst_68 : f32 to vector<1x8xf32>
    %75 = arith.mulf %71, %74 : vector<1x8xf32>
    %76 = arith.mulf %73, %73 : vector<1x8xf32>
    %77 = arith.subf %75, %76 : vector<1x8xf32>
    %78 = vector.broadcast %73 : vector<1x8xf32> to vector<256x8xf32>
    %79 = arith.subf %66, %78 : vector<256x8xf32>
    %cst_69 = arith.constant 9.99999974E-6 : f32
    %80 = vector.broadcast %cst_69 : f32 to vector<1x8xf32>
    %81 = arith.addf %77, %80 : vector<1x8xf32>
    %82 = math.rsqrt %81 : vector<1x8xf32>
    %83 = vector.broadcast %82 : vector<1x8xf32> to vector<256x8xf32>
    %84 = arith.mulf %79, %83 : vector<256x8xf32>
    %c0_70 = arith.constant 0 : index
    %c0_71 = arith.constant 0 : index
    %c0_72 = arith.constant 0 : index
    %85 = vector.load %arg4[%c0_70, %c0_71, %c0_72] : memref<1x256x8xf32, #tpu.memory_space<vmem>>, vector<1x256x8xf32>
    %86 = vector.shape_cast %85 : vector<1x256x8xf32> to vector<256x8xf32>
    %87 = arith.addf %84, %86 : vector<256x8xf32>
    %c0_73 = arith.constant 0 : index
    %c0_74 = arith.constant 0 : index
    %c0_75 = arith.constant 0 : index
    %88 = vector.load %arg5[%c0_73, %c0_74, %c0_75] : memref<1x256x8xf32, #tpu.memory_space<vmem>>, vector<1x256x8xf32>
    %89 = vector.shape_cast %88 : vector<1x256x8xf32> to vector<256x8xf32>
    %90 = vector.shape_cast %87 : vector<256x8xf32> to vector<1x256x8xf32>
    tpu.vector_store %arg5[%c0_73, %c0_74, %c0_75], %90 {strides = array<i32>} : memref<1x256x8xf32, #tpu.memory_space<vmem>>, vector<1x256x8xf32>,
    return
  }
  func.func @transform_0(%arg0: i32) -> (i32, i32, i32, i32) {
    %c0_i32 = arith.constant 0 : i32
    %c0_i32_0 = arith.constant 0 : i32
    %c0_i32_1 = arith.constant 0 : i32
    %c0_i32_2 = arith.constant 0 : i32
    return %arg0, %c0_i32, %c0_i32_0, %c0_i32_1 : i32, i32, i32, i32
  }
  func.func @transform_1(%arg0: i32) -> (i32, i32, i32) {
    %c0_i32 = arith.constant 0 : i32
    %c0_i32_0 = arith.constant 0 : i32
    %c0_i32_1 = arith.constant 0 : i32
    %c0_i32_2 = arith.constant 0 : i32
    return %c0_i32, %c0_i32_0, %c0_i32_1 : i32, i32, i32
  }
  func.func @transform_2(%arg0: i32) -> (i32, i32) {
    %c0_i32 = arith.constant 0 : i32
    %c0_i32_0 = arith.constant 0 : i32
    %c0_i32_1 = arith.constant 0 : i32
    return %c0_i32, %c0_i32_0 : i32, i32
  }
  func.func @transform_3(%arg0: i32) -> (i32, i32, i32) {
    %c0_i32 = arith.constant 0 : i32
    %c0_i32_0 = arith.constant 0 : i32
    %c0_i32_1 = arith.constant 0 : i32
    return %arg0, %c0_i32, %c0_i32_0 : i32, i32, i32
  }
  func.func @transform_4(%arg0: i32) -> (i32, i32, i32) {
    %c0_i32 = arith.constant 0 : i32
    %c0_i32_0 = arith.constant 0 : i32
    %c0_i32_1 = arith.constant 0 : i32
    return %arg0, %c0_i32, %c0_i32_0 : i32, i32, i32
  }
}

</mosaic_0001>

<bundles_post_ra>
// kernel: resblock_forward.2
= control target key start
LH: loop header
LB: loop body
LE: loop exit
PB: predicated region body
PF: predicated region fallthrough
CT: control target
= control target key end

     0   :  { %s5256_s12 = smov 0   ;;  %s7151_s0 = inlined_call_operand.vmem [shape: bf16[2,18,18,8], index: 0, kind: input, shape index: {}]   ;;  %s7152_s1 = inlined_call_operand.vmem [shape: bf16[9,8,8], index: 1, kind: input, shape index: {}]   ;;  %s7153_s2 = inlined_call_operand.vmem [shape: f32[1,8], index: 2, kind: input, shape index: {}]   ;;  %s7154_s3 = inlined_call_operand.vmem [shape: bf16[2,256,8], index: 3, kind: output, shape index: {}]  }
   0x1 LB: > { %s4520_s13 = sadd.s32 4294967295, %s5234_s12   ;;  %p4524_p0 = scmp.ge.s32.totalorder %s5234_s12, 1  ;;  %s5234_s12 = sphi %s5256_s12, %s13_s12  }
   0x2   : > { %p137_p1 = scmp.lt.s32.totalorder %s5234_s12, 3 }
   0x4   : > { %p138_p2 = pnand %p4524_p0, %p137_p1 }
   0x6   : > { %141 = sbr.rel (%p138_p2) target bundleno = 840 (0x348), region = 32 }
   0xb   : > { %v4528_v0 = vld [vmem:[%s7152_s1 + $0x4] sm:$0xf]  ;;  %vm707_vm0 = vcmask 1043456   ;;  %p161_p3 = scmp.lt.s32.totalorder %s4520_s13, 1  ;;  %v4641_v2 = vld [vmem:[%s7152_s1 + $0x8] sm:$0xf] }
   0xc   : > { %v709_v1 = vsel %vm707_vm0, %v4528_v0, 0  ;;  %v1282_v3 = vsel %vm707_vm0, %v4641_v2, 0  ;;  %v4690_v4 = vld [vmem:[%s7152_s1 + $0xc] sm:$0xf]  ;;  %v204_v5 = vld [vmem:[%s7152_s1] sm:$0xf] }
   0xd   : > { %5163 = vmatpush.bf16.msra.mxu1 %v709_v1  ;;  %5164 = vmatpush.bf16.msra.mxu2 %v709_v1  ;;  %s7168_s13 = smov (!%p161_p3, %s4520_s13), 1  ;;  %v4819_v6 = vld [vmem:[%s7152_s1 + $0x10] sm:$0xf]  ;;  %v1569_v7 = vsel %vm707_vm0, %v4690_v4, 0  ;;  %v929_v8 = vsel %vm707_vm0, %v204_v5, 0  ;;  %vm658_vm4 = vcmask 64512  }
   0xe   : > { %5165 = vmatpush.bf16.msra.mxu3 %v709_v1  ;;  %718 = vmatpush.bf16.msra.mxu0 %v709_v1  ;;  %s5166_s24 = smul.u32 216, %s7168_s13  ;;  %v2223_v9 = vsel %vm707_vm0, %v4819_v6, 0  ;;  %vm221_vm1 = vsmask.f32 3328  ;;  %vm222_vm2 = vsmask.f32 7440 }
   0xf   : > { %vm5302_vm3 = vmor %vm221_vm1, %vm222_vm2  ;;  %vm1068_vm5 = vcmask 1042432   ;;  %vm1069_vm6 = vcmask 1046532   ;;  %s5114_s11 = sshll.u32 %s7168_s13, 7  ;;  %vm4432_vm11 = vcmask 60416  }
  0x10   : > { %s5290_s27 = scalar_lea.vmem %s7151_s0, %s5166_s24  ;;  %vm5476_vm7 = vmor %vm1068_vm5, %vm1069_vm6  ;;  %s7063_s16 = scalar_lea.vmem %s7154_s3, %s5114_s11 }
  0x11   : > { %1291 = vmatpush.bf16.msrb.mxu2 %v1282_v3  ;;  %938 = vmatpush.bf16.msrb.mxu1 %v929_v8  ;;  %v180_v10 = vld [vmem:[%s5290_s27 + $0x30] sm:$0xf]  ;;  %v181_v11 = vld [vmem:[%s5290_s27 + $0x34] sm:$0xf]  ;;  %v209_v12 = vld [vmem:[%s5290_s27 + $0x38] sm:$0x1] }
  0x12   : > { %1578 = vmatpush.bf16.msrb.mxu3 %v1569_v7  ;;  %2232 = vmatpush.bf16.msrb.mxu0 %v2223_v9  ;;  %v321_v13 = vshrl.u32 %v180_v10, 16  ;;  %v324_v14 = vshll.u32 %v180_v10, 16  ;;  %v330_v15 = vshll.u32 %v181_v11, 16  ;;  %v334_v16 = vshrl.u32 %v181_v11, 16  ;;  %v188_v17 = vld [vmem:[%s5290_s27 + $0x60] sm:$0xf] }
  0x13   : > { %v340_v18 = vshll.u32 %v209_v12, 16  ;;  %v189_v19 = vld [vmem:[%s5290_s27 + $0x64] sm:$0xf]  ;;  %v213_v20 = vld [vmem:[%s5290_s27 + $0x68] sm:$0x1]  ;;  %v417_v21 = vshrl.u32 %v188_v17, 16 }
  0x14   : > { %v323_v22 = vrot.slane %v321_v13, 4  ;;  %v326_v23 = vrot.slane %v324_v14, 5  ;;  %v332_v24 = vrot.slane %v330_v15, 5  ;;  %v336_v25 = vrot.slane %v334_v16, 4  ;;  %v196_v26 = vld [vmem:[%s5290_s27 + $0x90] sm:$0xf] }
  0x15   : > { %v342_v27 = vrot.slane %v340_v18, 5  ;;  %v419_v28 = vrot.slane %v417_v21, 4  ;;  %v420_v29 = vshll.u32 %v188_v17, 16  ;;  %v426_v30 = vshll.u32 %v189_v19, 16  ;;  %v197_v35 = vld [vmem:[%s5290_s27 + $0x94] sm:$0xf] }
  0x16   : > { %v327_v31 = vor.u32 %v326_v23, %v323_v22  ;;  %v337_v32 = vor.u32 %v336_v25, %v332_v24  ;;  %v430_v33 = vshrl.u32 %v189_v19, 16  ;;  %v436_v34 = vshll.u32 %v213_v20, 16  ;;  %v217_v45 = vld [vmem:[%s5290_s27 + $0x98] sm:$0x1]  ;;  %v172_v61 = vld [vmem:[%s5290_s27] sm:$0xf] }
  0x17   : > { %v422_v37 = vrot.slane %v420_v29, 5  ;;  %v428_v38 = vrot.slane %v426_v30, 5  ;;  %v513_v39 = vshrl.u32 %v196_v26, 16  ;;  %v516_v47 = vshll.u32 %v196_v26, 16  ;;  %v5315_v1 = vld [vmem:[%s5290_s27 + $0x4] sm:$0xf] }
  0x18   : > { %v328_v40 = vrot.slane %v327_v31, 4  ;;  %v338_v41 = vrot.slane %v337_v32, 4  ;;  %v432_v42 = vrot.slane %v430_v33, 4  ;;  %v438_v43 = vrot.slane %v436_v34, 5  ;;  %v5318_v2 = vld [vmem:[%s5290_s27 + $0x8] sm:$0x1] }
  0x19   : > { %v423_v44 = vor.u32 %v422_v37, %v419_v28  ;;  %v515_v46 = vrot.slane %v513_v39, 4  ;;  %v522_v48 = vshll.u32 %v197_v35, 16  ;;  %v526_v52 = vshrl.u32 %v197_v35, 16  ;;  %v182_v19 = vld [vmem:[%s5290_s27 + $0x3c] sm:$0xf] }
  0x1a   : > { %v333_v49 = vsel %vm5302_vm3, %v328_v40, %v332_v24  ;;  %v343_v50 = vsel %vm5302_vm3, %v338_v41, %v342_v27  ;;  %v433_v51 = vor.u32 %v432_v42, %v428_v38  ;;  %v518_v56 = vrot.slane %v516_v47, 5  ;;  %v5330_v20 = vld [vmem:[%s5290_s27 + $0x40] sm:$0xf]  ;;  %v5335_v25 = vld [vmem:[%s5290_s27 + $0x44] sm:$0x1] }
  0x1b   : > { %v618_v53 = vunpack.c.l.b16 %v333_v49  ;;  %v619_v54 = vunpack.c.l.b16 %v343_v50  ;;  %v424_v55 = vrot.slane %v423_v44, 4  ;;  %v524_v58 = vrot.slane %v522_v48, 5  ;;  %v190_v33 = vld [vmem:[%s5290_s27 + $0x6c] sm:$0xf]  ;;  %v214_v47 = vld [vmem:[%s5290_s27 + $0x74] sm:$0x1] }
  0x1c   : > { %v434_v57 = vrot.slane %v433_v51, 4  ;;  %v528_v59 = vrot.slane %v526_v52, 4  ;;  %v532_v60 = vshll.u32 %v217_v45, 16  ;;  %v519_v0 = vor.u32 %v518_v56, %v515_v46 }
  0x1d   : > { %v646_v62 = vpack.c.b16 %v619_v54, %v618_v53  ;;  %v429_v63 = vsel %vm5302_vm3, %v424_v55, %v428_v38  ;;  %v225_v9 = vshrl.u32 %v172_v61, 16  ;;  %v228_v10 = vshll.u32 %v172_v61, 16  ;;  %v198_v61 = vld [vmem:[%s5290_s27 + $0x9c] sm:$0xf] }
  0x1e   : > { %v439_v3 = vsel %vm5302_vm3, %v434_v57, %v438_v43  ;;  %v626_v4 = vunpack.c.l.b16 %v429_v63  ;;  %v529_v5 = vor.u32 %v528_v59, %v524_v58  ;;  %v534_v6 = vrot.slane %v532_v60, 5  ;;  %v191_v43 = vld [vmem:[%s5290_s27 + $0x70] sm:$0xf] }
  0x1f   : > { %4533 = vmatmul.msk.bf16.vlgmr.msra.gmra.mxu1 %vm658_vm4, %v646_v62  ;;  %v627_v7 = vunpack.c.l.b16 %v439_v3  ;;  %v520_v8 = vrot.slane %v519_v0, 4  ;;  %v234_v12 = vshll.u32 %v5315_v1, 16  ;;  %v238_v13 = vshrl.u32 %v5315_v1, 16  ;;  %v199_v3 = vld [vmem:[%s5290_s27 + $0xa0] sm:$0xf] }
  0x20   : > { %v530_v11 = vrot.slane %v529_v5, 4  ;;  %v244_v14 = vshll.u32 %v5318_v2, 16  ;;  %v227_v17 = vrot.slane %v225_v9, 4  ;;  %v230_v18 = vrot.slane %v228_v10, 5 }
  0x21   : > { %v650_v15 = vpack.c.b16 %v627_v7, %v626_v4  ;;  %v525_v16 = vsel %vm5302_vm3, %v520_v8, %v524_v58  ;;  %v236_v23 = vrot.slane %v234_v12, 5  ;;  %v240_v24 = vrot.slane %v238_v13, 4  ;;  %v218_v8 = vld [vmem:[%s5290_s27 + $0xa4] sm:$0x1] }
  0x22   : > { %v535_v21 = vsel %vm5302_vm3, %v530_v11, %v534_v6  ;;  %v634_v22 = vunpack.c.l.b16 %v525_v16  ;;  %v231_v27 = vor.u32 %v230_v18, %v227_v17  ;;  %v246_v28 = vrot.slane %v244_v14, 5 }
  0x23   : > { %4537 = vmatmul.msk.bf16.vlgmr.msra.gmra.mxu2 %vm658_vm4, %v650_v15  ;;  %v635_v26 = vunpack.c.l.b16 %v535_v21  ;;  %v241_v29 = vor.u32 %v240_v24, %v236_v23  ;;  %v345_v30 = vshrl.u32 %v182_v19, 16  ;;  %v348_v31 = vshll.u32 %v182_v19, 16 }
  0x24   : > { %v354_v32 = vshll.u32 %v5330_v20, 16  ;;  %v232_v35 = vrot.slane %v231_v27, 4  ;;  %v358_v37 = vshrl.u32 %v5330_v20, 16  ;;  %v364_v38 = vshll.u32 %v5335_v25, 16 }
  0x25   : > { %v654_v34 = vpack.c.b16 %v635_v26, %v634_v22  ;;  %v242_v39 = vrot.slane %v241_v29, 4  ;;  %v347_v40 = vrot.slane %v345_v30, 4  ;;  %v350_v41 = vrot.slane %v348_v31, 5  ;;  %v174_v22 = vld [vmem:[%s5290_s27 + $0xc] sm:$0xf] }
  0x26   : > { %v356_v42 = vrot.slane %v354_v32, 5  ;;  %v237_v44 = vsel %vm5302_vm3, %v232_v35, %v236_v23  ;;  %v360_v45 = vrot.slane %v358_v37, 4  ;;  %v366_v46 = vrot.slane %v364_v38, 5  ;;  %v5364_v32 = vld [vmem:[%s5290_s27 + $0x14] sm:$0x1] }
  0x27   : > { %4541 = vmatmul.msk.bf16.vlgmr.msra.gmra.mxu3 %vm658_vm4, %v654_v34  ;;  %v441_v48 = vshrl.u32 %v190_v33, 16  ;;  %v247_v49 = vsel %vm5302_vm3, %v242_v39, %v246_v28  ;;  %v610_v50 = vunpack.c.l.b16 %v237_v44  ;;  %v351_v51 = vor.u32 %v350_v41, %v347_v40  ;;  %v5361_v28 = vld [vmem:[%s5290_s27 + $0x10] sm:$0xf] }
  0x28   : > { %v444_v52 = vshll.u32 %v190_v33, 16  ;;  %v611_v53 = vunpack.c.l.b16 %v247_v49  ;;  %v361_v54 = vor.u32 %v360_v45, %v356_v42  ;;  %v450_v56 = vshll.u32 %v191_v43, 16 }
  0x29   : > { %v443_v55 = vrot.slane %v441_v48, 4  ;;  %v352_v57 = vrot.slane %v351_v51, 4  ;;  %v454_v59 = vshrl.u32 %v191_v43, 16  ;;  %v460_v60 = vshll.u32 %v214_v47, 16  ;;  %v5374_v47 = vld [vmem:[%s5290_s27 + $0x4c] sm:$0xf] }
  0x2a   : > { %v446_v58 = vrot.slane %v444_v52, 5  ;;  %v642_v62 = vpack.c.b16 %v611_v53, %v610_v50  ;;  %v362_v63 = vrot.slane %v361_v54, 4  ;;  %v452_v0 = vrot.slane %v450_v56, 5  ;;  %v5379_v56 = vld [vmem:[%s5290_s27 + $0x50] sm:$0x1] }
  0x2b   : > { %v357_v4 = vsel %vm5302_vm3, %v352_v57, %v356_v42  ;;  %v456_v6 = vrot.slane %v454_v59, 4  ;;  %v462_v7 = vrot.slane %v460_v60, 5  ;;  %v537_v11 = vshrl.u32 %v198_v61, 16  ;;  %v184_v42 = vld [vmem:[%s5290_s27 + $0x48] sm:$0xf] }
  0x2c   : > { %v447_v5 = vor.u32 %v446_v58, %v443_v55  ;;  %4529 = vmatmul.msk.bf16.vlgmr.msra.gmra.mxu0 %vm658_vm4, %v642_v62  ;;  %v367_v9 = vsel %vm5302_vm3, %v362_v63, %v366_v46  ;;  %v620_v10 = vunpack.c.l.b16 %v357_v4  ;;  %v540_v12 = vshll.u32 %v198_v61, 16 }
  0x2d   : > { %v621_v13 = vunpack.c.l.b16 %v367_v9  ;;  %v457_v15 = vor.u32 %v456_v6, %v452_v0  ;;  %v546_v16 = vshll.u32 %v199_v3, 16  ;;  %v539_v17 = vrot.slane %v537_v11, 4 }
  0x2e   : > { %v448_v14 = vrot.slane %v447_v5, 4  ;;  %v542_v18 = vrot.slane %v540_v12, 5  ;;  %v550_v19 = vshrl.u32 %v199_v3, 16  ;;  %v556_v21 = vshll.u32 %v218_v8, 16  ;;  %v192_v3 = vld [vmem:[%s5290_s27 + $0x78] sm:$0xf] }
  0x2f   : > { %v647_v23 = vpack.c.b16 %v621_v13, %v620_v10  ;;  %v458_v26 = vrot.slane %v457_v15, 4  ;;  %v548_v27 = vrot.slane %v546_v16, 5  ;;  %v249_v35 = vshrl.u32 %v174_v22, 16  ;;  %v193_v8 = vld [vmem:[%s5290_s27 + $0x7c] sm:$0xf] }
  0x30   : > { %v453_v24 = vsel %vm5302_vm3, %v448_v14, %v452_v0  ;;  %v543_v30 = vor.u32 %v542_v18, %v539_v17  ;;  %v552_v31 = vrot.slane %v550_v19, 4  ;;  %v558_v34 = vrot.slane %v556_v21, 5  ;;  %v215_v16 = vld [vmem:[%s5290_s27 + $0x80] sm:$0x1] }
  0x31   : > { %v628_v29 = vunpack.c.l.b16 %v453_v24  ;;  %4534 = vmatmul.msk.bf16.gmra.mxu1 %vm658_vm4, %v647_v23  ;;  %v463_v33 = vsel %vm5302_vm3, %v458_v26, %v462_v7  ;;  %v252_v37 = vshll.u32 %v174_v22, 16  ;;  %v258_v41 = vshll.u32 %v5361_v28, 16 }
  0x32   : > { %v629_v38 = vunpack.c.l.b16 %v463_v33  ;;  %v544_v39 = vrot.slane %v543_v30, 4  ;;  %v553_v40 = vor.u32 %v552_v31, %v548_v27  ;;  %v251_v43 = vrot.slane %v249_v35, 4 }
  0x33   : > { %v254_v44 = vrot.slane %v252_v37, 5  ;;  %v262_v45 = vshrl.u32 %v5361_v28, 16  ;;  %v268_v46 = vshll.u32 %v5364_v32, 16  ;;  %v260_v51 = vrot.slane %v258_v41, 5 }
  0x34   : > { %v651_v48 = vpack.c.b16 %v629_v38, %v628_v29  ;;  %v549_v49 = vsel %vm5302_vm3, %v544_v39, %v548_v27  ;;  %v554_v50 = vrot.slane %v553_v40, 4  ;;  %v369_v58 = vshrl.u32 %v184_v42, 16  ;;  %v201_v39 = vld [vmem:[%s5290_s27 + $0xac] sm:$0xf]  ;;  %v219_v40 = vld [vmem:[%s5290_s27 + $0xb0] sm:$0x1] }
  0x35   : > { %v636_v52 = vunpack.c.l.b16 %v549_v49  ;;  %v255_v53 = vor.u32 %v254_v44, %v251_v43  ;;  %v264_v54 = vrot.slane %v262_v45, 4  ;;  %v270_v55 = vrot.slane %v268_v46, 5 }
  0x36   : > { %4538 = vmatmul.msk.bf16.gmra.mxu2 %vm658_vm4, %v651_v48  ;;  %v559_v57 = vsel %vm5302_vm3, %v554_v50, %v558_v34  ;;  %v372_v59 = vshll.u32 %v184_v42, 16  ;;  %v378_v60 = vshll.u32 %v5374_v47, 16  ;;  %v382_v0 = vshrl.u32 %v5374_v47, 16  ;;  %v200_v34 = vld [vmem:[%s5290_s27 + $0xa8] sm:$0xf] }
  0x37   : > { %v637_v61 = vunpack.c.l.b16 %v559_v57  ;;  %v256_v62 = vrot.slane %v255_v53, 4  ;;  %v265_v63 = vor.u32 %v264_v54, %v260_v51  ;;  %v371_v4 = vrot.slane %v369_v58, 4 }
  0x38   : > { %v374_v5 = vrot.slane %v372_v59, 5  ;;  %v380_v6 = vrot.slane %v378_v60, 5  ;;  %v388_v7 = vshll.u32 %v5379_v56, 16  ;;  %v384_v12 = vrot.slane %v382_v0, 4  ;;  %v176_v59 = vld [vmem:[%s5290_s27 + $0x18] sm:$0xf] }
  0x39   : > { %v655_v9 = vpack.c.b16 %v637_v61, %v636_v52  ;;  %v261_v10 = vsel %vm5302_vm3, %v256_v62, %v260_v51  ;;  %v266_v11 = vrot.slane %v265_v63, 4  ;;  %v465_v17 = vshrl.u32 %v192_v3, 16  ;;  %v5407_v63 = vld [vmem:[%s5290_s27 + $0x1c] sm:$0xf]  ;;  %v5410_v0 = vld [vmem:[%s5290_s27 + $0x20] sm:$0x1] }
  0x3a   : > { %v612_v13 = vunpack.c.l.b16 %v261_v10  ;;  %v375_v14 = vor.u32 %v374_v5, %v371_v4  ;;  %v390_v15 = vrot.slane %v388_v7, 5  ;;  %v385_v19 = vor.u32 %v384_v12, %v380_v6 }
  0x3b   : > { %4542 = vmatmul.msk.bf16.gmra.mxu3 %vm658_vm4, %v655_v9  ;;  %v271_v18 = vsel %vm5302_vm3, %v266_v11, %v270_v55  ;;  %v468_v21 = vshll.u32 %v192_v3, 16  ;;  %v474_v22 = vshll.u32 %v193_v8, 16  ;;  %v467_v26 = vrot.slane %v465_v17, 4 }
  0x3c   : > { %v613_v23 = vunpack.c.l.b16 %v271_v18  ;;  %v376_v24 = vrot.slane %v375_v14, 4  ;;  %v478_v27 = vshrl.u32 %v193_v8, 16  ;;  %v386_v29 = vrot.slane %v385_v19, 4 }
  0x3d   : > { %v470_v30 = vrot.slane %v468_v21, 5  ;;  %v476_v31 = vrot.slane %v474_v22, 5  ;;  %v484_v33 = vshll.u32 %v215_v16, 16  ;;  %v561_v48 = vshrl.u32 %v200_v34, 16  ;;  %v5420_v21 = vld [vmem:[%s5290_s27 + $0x58] sm:$0xf] }
  0x3e   : > { %v643_v35 = vpack.c.b16 %v613_v23, %v612_v13  ;;  %v381_v37 = vsel %vm5302_vm3, %v376_v24, %v380_v6  ;;  %v480_v38 = vrot.slane %v478_v27, 4  ;;  %v391_v41 = vsel %vm5302_vm3, %v386_v29, %v390_v15  ;;  %v186_v15 = vld [vmem:[%s5290_s27 + $0x54] sm:$0xf]  ;;  %v5425_v27 = vld [vmem:[%s5290_s27 + $0x5c] sm:$0x1] }
  0x3f   : > { %v622_v42 = vunpack.c.l.b16 %v381_v37  ;;  %v471_v43 = vor.u32 %v470_v30, %v467_v26  ;;  %v486_v44 = vrot.slane %v484_v33, 5  ;;  %v623_v45 = vunpack.c.l.b16 %v391_v41 }
  0x40   : > { %4530 = vmatmul.msk.bf16.gmra.mxu0 %vm658_vm4, %v643_v35  ;;  %v481_v46 = vor.u32 %v480_v38, %v476_v31  ;;  %v564_v49 = vshll.u32 %v200_v34, 16  ;;  %v570_v51 = vshll.u32 %v201_v39, 16  ;;  %v574_v52 = vshrl.u32 %v201_v39, 16  ;;  %v194_v39 = vld [vmem:[%s5290_s27 + $0x84] sm:$0xf] }
  0x41   : > { %v472_v50 = vrot.slane %v471_v43, 4  ;;  %v580_v53 = vshll.u32 %v219_v40, 16  ;;  %v648_v54 = vpack.c.b16 %v623_v45, %v622_v42  ;;  %v563_v57 = vrot.slane %v561_v48, 4 }
  0x42   : > { %v482_v55 = vrot.slane %v481_v46, 4  ;;  %v566_v58 = vrot.slane %v564_v49, 5  ;;  %v572_v61 = vrot.slane %v570_v51, 5  ;;  %v576_v62 = vrot.slane %v574_v52, 4  ;;  %v195_v49 = vld [vmem:[%s5290_s27 + $0x88] sm:$0xf] }
  0x43   : > { %v477_v60 = vsel %vm5302_vm3, %v472_v50, %v476_v31  ;;  %4535 = vmatmul.msk.bf16.gmra.mxu1 %vm658_vm4, %v648_v54  ;;  %v582_v6 = vrot.slane %v580_v53, 5  ;;  %v273_v9 = vshrl.u32 %v176_v59, 16  ;;  %v276_v10 = vshll.u32 %v176_v59, 16  ;;  %v216_v53 = vld [vmem:[%s5290_s27 + $0x8c] sm:$0x1] }
  0x44   : > { %v487_v3 = vsel %vm5302_vm3, %v482_v55, %v486_v44  ;;  %v630_v4 = vunpack.c.l.b16 %v477_v60  ;;  %v567_v5 = vor.u32 %v566_v58, %v563_v57  ;;  %v577_v8 = vor.u32 %v576_v62, %v572_v61 }
  0x45   : > { %v631_v7 = vunpack.c.l.b16 %v487_v3  ;;  %v282_v12 = vshll.u32 %v5407_v63, 16  ;;  %v286_v13 = vshrl.u32 %v5407_v63, 16  ;;  %v292_v14 = vshll.u32 %v5410_v0, 16 }
  0x46   : > { %v568_v11 = vrot.slane %v567_v5, 4  ;;  %v578_v17 = vrot.slane %v577_v8, 4  ;;  %v275_v18 = vrot.slane %v273_v9, 4  ;;  %v278_v19 = vrot.slane %v276_v10, 5  ;;  %v202_v8 = vld [vmem:[%s5290_s27 + $0xb4] sm:$0xf] }
  0x47   : > { %v652_v16 = vpack.c.b16 %v631_v7, %v630_v4  ;;  %v284_v23 = vrot.slane %v282_v12, 5  ;;  %v288_v24 = vrot.slane %v286_v13, 4  ;;  %v294_v26 = vrot.slane %v292_v14, 5  ;;  %v203_v12 = vld [vmem:[%s5290_s27 + $0xb8] sm:$0xf] }
  0x48   : > { %v573_v22 = vsel %vm5302_vm3, %v568_v11, %v572_v61  ;;  %v583_v29 = vsel %vm5302_vm3, %v578_v17, %v582_v6  ;;  %v279_v31 = vor.u32 %v278_v19, %v275_v18  ;;  %v393_v33 = vshrl.u32 %v186_v15, 16  ;;  %v220_v17 = vld [vmem:[%s5290_s27 + $0xbc] sm:$0x1] }
  0x49   : > { %4539 = vmatmul.msk.bf16.gmra.mxu2 %vm658_vm4, %v652_v16  ;;  %v638_v30 = vunpack.c.l.b16 %v573_v22  ;;  %v639_v34 = vunpack.c.l.b16 %v583_v29  ;;  %v289_v35 = vor.u32 %v288_v24, %v284_v23  ;;  %v396_v37 = vshll.u32 %v186_v15, 16 }
  0x4a   : > { %v402_v38 = vshll.u32 %v5420_v21, 16  ;;  %v280_v40 = vrot.slane %v279_v31, 4  ;;  %v395_v41 = vrot.slane %v393_v33, 4  ;;  %v406_v42 = vshrl.u32 %v5420_v21, 16 }
  0x4b   : > { %v412_v43 = vshll.u32 %v5425_v27, 16  ;;  %v656_v44 = vpack.c.b16 %v639_v34, %v638_v30  ;;  %v290_v45 = vrot.slane %v289_v35, 4  ;;  %v398_v46 = vrot.slane %v396_v37, 5  ;;  %v178_v37 = vld [vmem:[%s5290_s27 + $0x24] sm:$0xf] }
  0x4c   : > { %v404_v48 = vrot.slane %v402_v38, 5  ;;  %v285_v50 = vsel %vm5302_vm3, %v280_v40, %v284_v23  ;;  %v408_v51 = vrot.slane %v406_v42, 4  ;;  %v489_v54 = vshrl.u32 %v194_v39, 16  ;;  %v5453_v42 = vld [vmem:[%s5290_s27 + $0x28] sm:$0xf] }
  0x4d   : > { %v414_v52 = vrot.slane %v412_v43, 5  ;;  %4543 = vmatmul.msk.bf16.gmra.mxu3 %vm658_vm4, %v656_v44  ;;  %v295_v55 = vsel %vm5302_vm3, %v290_v45, %v294_v26  ;;  %v614_v57 = vunpack.c.l.b16 %v285_v50  ;;  %v399_v58 = vor.u32 %v398_v46, %v395_v41 }
  0x4e   : > { %v492_v59 = vshll.u32 %v194_v39, 16  ;;  %v615_v60 = vunpack.c.l.b16 %v295_v55  ;;  %v409_v61 = vor.u32 %v408_v51, %v404_v48  ;;  %v491_v62 = vrot.slane %v489_v54, 4 }
  0x4f   : > { %v498_v3 = vshll.u32 %v195_v49, 16  ;;  %v400_v4 = vrot.slane %v399_v58, 4  ;;  %v502_v6 = vshrl.u32 %v195_v49, 16  ;;  %v508_v7 = vshll.u32 %v216_v53, 16 }
  0x50   : > { %v494_v5 = vrot.slane %v492_v59, 5  ;;  %v644_v9 = vpack.c.b16 %v615_v60, %v614_v57  ;;  %v410_v10 = vrot.slane %v409_v61, 4  ;;  %v585_v22 = vshrl.u32 %v202_v8, 16  ;;  %v1020_v61 = vld [vmem:[%s5290_s27] sm:$0xe] }
  0x51   : > { %v500_v11 = vrot.slane %v498_v3, 5  ;;  %v405_v13 = vsel %vm5302_vm3, %v400_v4, %v404_v48  ;;  %v504_v15 = vrot.slane %v502_v6, 4  ;;  %v510_v16 = vrot.slane %v508_v7, 5  ;;  %v5457_v48 = vld [vmem:[%s5290_s27 + $0x2c] sm:$0x1] }
  0x52   : > { %v495_v14 = vor.u32 %v494_v5, %v491_v62  ;;  %4531 = vmatmul.msk.bf16.gmra.mxu0 %vm658_vm4, %v644_v9  ;;  %v415_v18 = vsel %vm5302_vm3, %v410_v10, %v414_v52  ;;  %v624_v19 = vunpack.c.l.b16 %v405_v13  ;;  %v588_v23 = vshll.u32 %v202_v8, 16  ;;  %v4771_v6 = vld [vmem:[%s5290_s27 + $0xc] sm:$0xf] }
  0x53   : > { %v625_v24 = vunpack.c.l.b16 %v415_v18  ;;  %v505_v29 = vor.u32 %v504_v15, %v500_v11  ;;  %v594_v30 = vshll.u32 %v203_v12, 16  ;;  %v587_v31 = vrot.slane %v585_v22, 4 }
  0x54   : > { %v496_v26 = vrot.slane %v495_v14, 4  ;;  %v590_v33 = vrot.slane %v588_v23, 5  ;;  %v598_v34 = vshrl.u32 %v203_v12, 16  ;;  %v604_v35 = vshll.u32 %v220_v17, 16  ;;  %v4772_v12 = vld [vmem:[%s5290_s27 + $0x10] sm:$0xf] }
  0x55   : > { %v649_v38 = vpack.c.b16 %v625_v24, %v624_v19  ;;  %v506_v40 = vrot.slane %v505_v29, 4  ;;  %v596_v41 = vrot.slane %v594_v30, 5  ;;  %v1076_v43 = vrot.slane %v5318_v2, 5 }
  0x56   : > { %v501_v39 = vsel %vm5302_vm3, %v496_v26, %v500_v11  ;;  %v591_v45 = vor.u32 %v590_v33, %v587_v31  ;;  %v600_v46 = vrot.slane %v598_v34, 4  ;;  %v606_v50 = vrot.slane %v604_v35, 5  ;;  %v4917_v11 = vld [vmem:[%s7152_s1 + $0x18] sm:$0xf] }
  0x57   : > { %v632_v44 = vunpack.c.l.b16 %v501_v39  ;;  %4536 = vmatmul.msk.bf16.gmra.mxu1 %vm658_vm4, %v649_v38  ;;  %v511_v49 = vsel %vm5302_vm3, %v506_v40, %v510_v16  ;;  %v297_v51 = vshrl.u32 %v178_v37, 16  ;;  %v300_v52 = vshll.u32 %v178_v37, 16  ;;  %v4773_v38 = vld [vmem:[%s5290_s27 + $0x14] sm:$0x1] }
  0x58   : > { %v633_v53 = vunpack.c.l.b16 %v511_v49  ;;  %v592_v54 = vrot.slane %v591_v45, 4  ;;  %v601_v55 = vor.u32 %v600_v46, %v596_v41  ;;  %v306_v2 = vshll.u32 %v5453_v42, 16  ;;  %v5046_v45 = vld [vmem:[%s7152_s1 + $0x1c] sm:$0xf] }
  0x59   : > { %v299_v57 = vrot.slane %v297_v51, 4  ;;  %v302_v58 = vrot.slane %v300_v52, 5  ;;  %v310_v59 = vshrl.u32 %v5453_v42, 16  ;;  %v316_v60 = vshll.u32 %v5457_v48, 16  ;;  %v5115_v51 = vld [vmem:[%s5290_s27] sm:$0xff] }
  0x5a   : > { %v653_v62 = vpack.c.b16 %v633_v53, %v632_v44  ;;  %v597_v3 = vsel %vm5302_vm3, %v592_v54, %v596_v41  ;;  %v602_v4 = vrot.slane %v601_v55, 4  ;;  %v308_v5 = vrot.slane %v306_v2, 5  ;;  %v5095_v2 = vld [vmem:[%s7152_s1 + $0x20] sm:$0xf] }
  0x5b   : > { %v640_v7 = vunpack.c.l.b16 %v597_v3  ;;  %v303_v8 = vor.u32 %v302_v58, %v299_v57  ;;  %v312_v9 = vrot.slane %v310_v59, 4  ;;  %v318_v10 = vrot.slane %v316_v60, 5 }
  0x5c   : > { %4540 = vmatmul.msk.bf16.gmra.mxu2 %vm658_vm4, %v653_v62  ;;  %v607_v13 = vsel %vm5302_vm3, %v602_v4, %v606_v50  ;;  %v4625_v14 = vrot.slane %v1020_v61, 9  ;;  %v1073_v19 = vrot.slane %v5315_v1, 5  ;;  %v2908_v22 = vsel %vm707_vm0, %v4917_v11, 0  ;;  %v4868_v50 = vld [vmem:[%s7152_s1 + $0x14] sm:$0xf] }
  0x5d   : > { %v641_v15 = vunpack.c.l.b16 %v607_v13  ;;  %v304_v16 = vrot.slane %v303_v8, 4  ;;  %v313_v17 = vor.u32 %v312_v9, %v308_v5  ;;  %v1741_v23 = vshrl.u32 %v4771_v6, 16  ;;  %2917 = vmatpush.bf16.msra.mxu2 %v2908_v22  ;;  %v1021_v8 = vld [vmem:[%s5290_s27 + $0xc] sm:$0xe] }
  0x5e   : > { %v1744_v24 = vshll.u32 %v4771_v6, 16  ;;  %v1750_v26 = vshll.u32 %v4772_v12, 16  ;;  %v1074_v33 = vsel %vm5476_vm7, %v4625_v14, %v1073_v19  ;;  %v1075_v35 = vrot.slane %v1073_v19, 4  ;;  %v4775_v6 = vld [vmem:[%s5290_s27 + $0x1c] sm:$0xf] }
  0x5f   : > { %v657_v29 = vpack.c.b16 %v641_v15, %v640_v7  ;;  %v309_v30 = vsel %vm5302_vm3, %v304_v16, %v308_v5  ;;  %v314_v31 = vrot.slane %v313_v17, 4  ;;  %v1185_v37 = vunpack.c.l.b16 %v1074_v33  ;;  %v4774_v5 = vld [vmem:[%s5290_s27 + $0x18] sm:$0xf]  ;;  %v5131_v15 = vld [vmem:[%s5290_s27 + $0xc] sm:$0xff] }
  0x60   : > { %v616_v34 = vunpack.c.l.b16 %v309_v30  ;;  %v1743_v1 = vrot.slane %v1741_v23, 4  ;;  %v1746_v40 = vrot.slane %v1744_v24, 5  ;;  %v1752_v41 = vrot.slane %v1750_v26, 5  ;;  %v4776_v30 = vld [vmem:[%s5290_s27 + $0x20] sm:$0x1] }
  0x61   : > { %4544 = vmatmul.msk.bf16.gmra.mxu3 %vm658_vm4, %v657_v29  ;;  %v319_v39 = vsel %vm5302_vm3, %v314_v31, %v318_v10  ;;  %v1754_v44 = vshrl.u32 %v4772_v12, 16  ;;  %v1077_v49 = vsel %vm5476_vm7, %v1075_v35, %v1076_v43  ;;  %v1760_v55 = vshll.u32 %v4773_v38, 16  ;;  %v5116_v35 = vld [vmem:[%s5290_s27 + $0xc] sm:$0xff] }
  0x62   : > { %v617_v46 = vunpack.c.l.b16 %v319_v39  ;;  %v1186_v52 = vunpack.c.l.b16 %v1077_v49  ;;  %v1747_v53 = vor.u32 %v1746_v40, %v1743_v1  ;;  %v3562_v58 = vsel %vm707_vm0, %v5046_v45, 0 }
  0x63   : > { %v1756_v54 = vrot.slane %v1754_v44, 4  ;;  %3571 = vmatpush.bf16.msra.mxu3 %v3562_v58  ;;  %v2621_v60 = vsel %vm707_vm0, %v4868_v50, 0  ;;  %v3960_v61 = vsel %vm707_vm0, %v5095_v2, 0  ;;  %v1762_v4 = vrot.slane %v1760_v55, 5  ;;  %v1022_v50 = vld [vmem:[%s5290_s27 + $0x18] sm:$0xe] }
  0x64   : > { %v645_v57 = vpack.c.b16 %v617_v46, %v616_v34  ;;  %v1217_v43 = vpack.c.b16 %v1186_v52, %v1185_v37  ;;  %2630 = vmatpush.bf16.msra.mxu1 %v2621_v60  ;;  %v1748_v62 = vrot.slane %v1747_v53, 4  ;;  %3969 = vmatpush.bf16.msra.mxu0 %v3960_v61  ;;  %v1080_v7 = vrot.slane %v5361_v28, 5  ;;  %v4778_v46 = vld [vmem:[%s5290_s27 + $0x28] sm:$0xf] }
  0x65   : > { %v1757_v59 = vor.u32 %v1756_v54, %v1752_v41  ;;  %v1765_v9 = vshrl.u32 %v4774_v5, 16  ;;  %v1768_v10 = vshll.u32 %v4774_v5, 16  ;;  %v1774_v13 = vshll.u32 %v4775_v6, 16 }
  0x66   : > { %4532 = vmatmul.msk.bf16.gmra.mxu0 %vm658_vm4, %v645_v57  ;;  %v1753_v11 = vsel %vm5302_vm3, %v1748_v62, %v1752_v41  ;;  %v1778_v14 = vshrl.u32 %v4775_v6, 16  ;;  %v4626_v16 = vrot.slane %v1021_v8, 9  ;;  %v1082_v17 = vrot.slane %v1080_v7, 4  ;;  %v4777_v41 = vld [vmem:[%s5290_s27 + $0x24] sm:$0xf] }
  0x67   : > { %4609 = vmatmul.msk.bf16.vlgmr.msrb.gmra.mxu1 %vm658_vm4, %v5115_v51  ;;  %v1758_v3 = vrot.slane %v1757_v59, 4  ;;  %v1083_v28 = vrot.slane %v5364_v32, 5  ;;  %v2126_v19 = vunpack.c.l.b16 %v1753_v11  ;;  %v1767_v23 = vrot.slane %v1765_v9, 4  ;;  %v4779_v6 = vld [vmem:[%s5290_s27 + $0x2c] sm:$0x1] }
  0x68   : > { %v1770_v24 = vrot.slane %v1768_v10, 5  ;;  %v1776_v26 = vrot.slane %v1774_v13, 5  ;;  %v1780_v29 = vrot.slane %v1778_v14, 4  ;;  %v1081_v31 = vsel %vm5476_vm7, %v4626_v16, %v1080_v7 }
  0x69   : > { %v1763_v12 = vsel %vm5302_vm3, %v1758_v3, %v1762_v4  ;;  %v1084_v33 = vsel %vm5476_vm7, %v1082_v17, %v1083_v28  ;;  %v1784_v38 = vshll.u32 %v4776_v30, 16  ;;  %v1187_v1 = vunpack.c.l.b16 %v1081_v31 }
  0x6a   : > { %v2127_v22 = vunpack.c.l.b16 %v1763_v12  ;;  %v1771_v32 = vor.u32 %v1770_v24, %v1767_v23  ;;  %v1781_v37 = vor.u32 %v1780_v29, %v1776_v26  ;;  %v1188_v39 = vunpack.c.l.b16 %v1084_v33  ;;  %v5117_v12 = vld [vmem:[%s5290_s27 + $0x18] sm:$0xff]  ;;  %v1023_v29 = vld [vmem:[%s5290_s27 + $0x24] sm:$0xe] }
  0x6b   : > { %v1786_v45 = vrot.slane %v1784_v38, 5  ;;  %v1087_v51 = vrot.slane %v5407_v63, 5  ;;  %v1789_v52 = vshrl.u32 %v4777_v41, 16  ;;  %v1792_v54 = vshll.u32 %v4777_v41, 16 }
  0x6c   : > { %4642 = vmatmul.msk.bf16.vlgmr.msrb.gmra.mxu2 %vm658_vm4, %v1217_v43  ;;  %v2158_v34 = vpack.c.b16 %v2127_v22, %v2126_v19  ;;  %v1772_v40 = vrot.slane %v1771_v32, 4  ;;  %v1782_v44 = vrot.slane %v1781_v37, 4  ;;  %v1218_v49 = vpack.c.b16 %v1188_v39, %v1187_v1  ;;  %v5132_v43 = vld [vmem:[%s5290_s27 + $0x18] sm:$0xff]  ;;  %v4780_v19 = vld [vmem:[%s5290_s27 + $0x30] sm:$0xf]  ;;  %v5133_v32 = vld [vmem:[%s5290_s27 + $0x24] sm:$0xff] }
  0x6d   : > { %v1798_v55 = vshll.u32 %v4778_v46, 16  ;;  %v1802_v2 = vshrl.u32 %v4778_v46, 16  ;;  %v4627_v58 = vrot.slane %v1022_v50, 9  ;;  %v1089_v60 = vrot.slane %v1087_v51, 4  ;;  %v4781_v22 = vld [vmem:[%s5290_s27 + $0x34] sm:$0xf] }
  0x6e   : > { %v1777_v53 = vsel %vm5302_vm3, %v1772_v40, %v1776_v26  ;;  %v1787_v57 = vsel %vm5302_vm3, %v1782_v44, %v1786_v45  ;;  %v1090_v63 = vrot.slane %v5410_v0, 5  ;;  %v1791_v61 = vrot.slane %v1789_v52, 4  ;;  %v4782_v45 = vld [vmem:[%s5290_s27 + $0x38] sm:$0x1] }
  0x6f   : > { %v2128_v59 = vunpack.c.l.b16 %v1777_v53  ;;  %v2129_v62 = vunpack.c.l.b16 %v1787_v57  ;;  %v1794_v3 = vrot.slane %v1792_v54, 5  ;;  %v1800_v4 = vrot.slane %v1798_v55, 5  ;;  %v4784_v57 = vld [vmem:[%s5290_s27 + $0x40] sm:$0xf] }
  0x70   : > { %v1804_v5 = vrot.slane %v1802_v2, 4  ;;  %v1088_v7 = vsel %vm5476_vm7, %v4627_v58, %v1087_v51  ;;  %v1091_v8 = vsel %vm5476_vm7, %v1089_v60, %v1090_v63  ;;  %v1808_v0 = vshll.u32 %v4779_v6, 16  ;;  %v4783_v2 = vld [vmem:[%s5290_s27 + $0x3c] sm:$0xf]  ;;  %v5178_v63 = vld [vmem:[%s5290_s27 + $0x34] sm:$0xf] }
  0x71   : > { %4755 = vmatmul.msk.bf16.vlgmr.msrb.gmra.mxu3 %vm658_vm4, %v5131_v15  ;;  %v2159_v9 = vpack.c.b16 %v2129_v62, %v2128_v59  ;;  %v1795_v10 = vor.u32 %v1794_v3, %v1791_v61  ;;  %v1189_v13 = vunpack.c.l.b16 %v1088_v7  ;;  %v1190_v14 = vunpack.c.l.b16 %v1091_v8  ;;  %v1024_v62 = vld [vmem:[%s5290_s27 + $0x30] sm:$0xe] }
  0x72   : > { %v1805_v11 = vor.u32 %v1804_v5, %v1800_v4  ;;  %v1810_v17 = vrot.slane %v1808_v0, 5  ;;  %v1094_v23 = vrot.slane %v5453_v42, 5  ;;  %v1813_v30 = vshrl.u32 %v4780_v19, 16  ;;  %v5179_v0 = vld [vmem:[%s5290_s27 + $0x38] sm:$0x1] }
  0x73   : > { %v1796_v15 = vrot.slane %v1795_v10, 4  ;;  %v1219_v28 = vpack.c.b16 %v1190_v14, %v1189_v13  ;;  %v1816_v31 = vshll.u32 %v4780_v19, 16  ;;  %v1822_v33 = vshll.u32 %v4781_v22, 16  ;;  %v5134_v13 = vld [vmem:[%s5290_s27 + $0x30] sm:$0xff] }
  0x74   : > { %v1806_v16 = vrot.slane %v1805_v11, 4  ;;  %v1096_v37 = vrot.slane %v1094_v23, 4  ;;  %v1097_v42 = vrot.slane %v5457_v48, 5  ;;  %v1815_v39 = vrot.slane %v1813_v30, 4  ;;  %v5118_v48 = vld [vmem:[%s5290_s27 + $0x24] sm:$0xff] }
  0x75   : > { %v1801_v24 = vsel %vm5302_vm3, %v1796_v15, %v1800_v4  ;;  %v1818_v40 = vrot.slane %v1816_v31, 5  ;;  %v1824_v41 = vrot.slane %v1822_v33, 5  ;;  %v1832_v53 = vshll.u32 %v4782_v45, 16  ;;  %v5119_v33 = vld [vmem:[%s5290_s27 + $0x30] sm:$0xff] }
  0x76   : > { %4820 = vmatmul.msk.bf16.vlgmr.msrb.gmra.mxu0 %vm658_vm4, %v2158_v34  ;;  %v1811_v26 = vsel %vm5302_vm3, %v1806_v16, %v1810_v17  ;;  %v1826_v34 = vshrl.u32 %v4781_v22, 16  ;;  %v2130_v38 = vunpack.c.l.b16 %v1801_v24  ;;  %v1101_v61 = vrot.slane %v5178_v63, 5  ;;  %v4785_v22 = vld [vmem:[%s5290_s27 + $0x44] sm:$0x1] }
  0x77   : > { %4610 = vmatmul.msk.bf16.gmra.mxu1 %vm658_vm4, %v5116_v35  ;;  %v4628_v35 = vrot.slane %v1023_v29, 9  ;;  %v2131_v1 = vunpack.c.l.b16 %v1811_v26  ;;  %v1819_v51 = vor.u32 %v1818_v40, %v1815_v39  ;;  %v1834_v59 = vrot.slane %v1832_v53, 5  ;;  %v4786_v39 = vld [vmem:[%s5290_s27 + $0x48] sm:$0xf]  ;;  %v4787_v40 = vld [vmem:[%s5290_s27 + $0x4c] sm:$0xf] }
  0x78   : > { %v1828_v44 = vrot.slane %v1826_v34, 4  ;;  %v1837_v3 = vshrl.u32 %v4783_v2, 16  ;;  %v1840_v4 = vshll.u32 %v4783_v2, 16  ;;  %v1846_v5 = vshll.u32 %v4784_v57, 16  ;;  %v5135_v2 = vld [vmem:[%s5290_s27 + $0x3c] sm:$0xff] }
  0x79   : > { %v1095_v46 = vsel %vm5476_vm7, %v4628_v35, %v1094_v23  ;;  %v2160_v50 = vpack.c.b16 %v2131_v1, %v2130_v38  ;;  %v1820_v58 = vrot.slane %v1819_v51, 4  ;;  %v1850_v6 = vshrl.u32 %v4784_v57, 16 }
  0x7a   : > { %v1829_v52 = vor.u32 %v1828_v44, %v1824_v41  ;;  %v1191_v54 = vunpack.c.l.b16 %v1095_v46  ;;  %v4629_v10 = vrot.slane %v1024_v62, 9  ;;  %v1103_v11 = vrot.slane %v1101_v61, 4 }
  0x7b   : > { %v1825_v8 = vsel %vm5302_vm3, %v1820_v58, %v1824_v41  ;;  %v1839_v14 = vrot.slane %v1837_v3, 4  ;;  %v1842_v15 = vrot.slane %v1840_v4, 5  ;;  %v1848_v16 = vrot.slane %v1846_v5, 5  ;;  %v4788_v4 = vld [vmem:[%s5290_s27 + $0x50] sm:$0x1] }
  0x7c   : > { %4643 = vmatmul.msk.bf16.gmra.mxu2 %vm658_vm4, %v1218_v49  ;;  %v1098_v49 = vsel %vm5476_vm7, %v1096_v37, %v1097_v42  ;;  %v1852_v17 = vrot.slane %v1850_v6, 4  ;;  %v1102_v23 = vsel %vm5476_vm7, %v4629_v10, %v1101_v61  ;;  %v1856_v30 = vshll.u32 %v4785_v22, 16 }
  0x7d   : > { %v1192_v55 = vunpack.c.l.b16 %v1098_v49  ;;  %v1843_v26 = vor.u32 %v1842_v15, %v1839_v14  ;;  %v1861_v51 = vshrl.u32 %v4786_v39, 16  ;;  %v1870_v53 = vshll.u32 %v4787_v40, 16 }
  0x7e   : > { %v1853_v29 = vor.u32 %v1852_v17, %v1848_v16  ;;  %v1858_v1 = vrot.slane %v1856_v30, 5 }
  0x7f   : > { %v1220_v60 = vpack.c.b16 %v1192_v55, %v1191_v54  ;;  %v1844_v42 = vrot.slane %v1843_v26, 4  ;;  %v1874_v54 = vshrl.u32 %v4787_v40, 16  ;;  %v1872_v62 = vrot.slane %v1870_v53, 5 }
  0x80   : > { %v1854_v38 = vrot.slane %v1853_v29, 4  ;;  %v1115_v26 = vrot.slane %v5374_v47, 5 }
  0x81   : > { %4756 = vmatmul.msk.bf16.gmra.mxu3 %vm658_vm4, %v5132_v43  ;;  %v1830_v43 = vrot.slane %v1829_v52, 4  ;;  %v1849_v45 = vsel %vm5302_vm3, %v1844_v42, %v1848_v16  ;;  %v1864_v52 = vshll.u32 %v4786_v39, 16  ;;  %v1876_v3 = vrot.slane %v1874_v54, 4  ;;  %v4791_v54 = vld [vmem:[%s5290_s27 + $0x5c] sm:$0x1] }
  0x82   : > { %v1859_v46 = vsel %vm5302_vm3, %v1854_v38, %v1858_v1  ;;  %v2134_v55 = vunpack.c.l.b16 %v1849_v45  ;;  %v5136_v1 = vld [vmem:[%s5290_s27 + $0x48] sm:$0xff]  ;;  %v1117_v40 = vrot.slane %v1115_v26, 4 }
  0x83   : > { %v2135_v57 = vunpack.c.l.b16 %v1859_v46  ;;  %v1866_v61 = vrot.slane %v1864_v52, 5  ;;  %v1877_v10 = vor.u32 %v1876_v3, %v1872_v62 }
  0x85   : > { %v1878_v16 = vrot.slane %v1877_v10, 4 }
  0x86   : > { %4821 = vmatmul.msk.bf16.gmra.mxu0 %vm658_vm4, %v2159_v9  ;;  %v1835_v9 = vsel %vm5302_vm3, %v1830_v43, %v1834_v59 }
  0x87   : > { %4611 = vmatmul.msk.bf16.gmra.mxu1 %vm658_vm4, %v5117_v12  ;;  %v1104_v12 = vrot.slane %v5179_v0, 5  ;;  %v2133_v19 = vunpack.c.l.b16 %v1835_v9 }
  0x89   : > { %v1105_v24 = vsel %vm5476_vm7, %v1103_v11, %v1104_v12  ;;  %v1880_v11 = vshll.u32 %v4788_v4, 16  ;;  %v5120_v12 = vld [vmem:[%s5290_s27 + $0x3c] sm:$0xff] }
  0x8a   : > { %v1194_v35 = vunpack.c.l.b16 %v1105_v24  ;;  %v4790_v24 = vld [vmem:[%s5290_s27 + $0x58] sm:$0xf]  ;;  %v4792_v4 = vld [vmem:[%s5290_s27 + $0x60] sm:$0xf] }
  0x8b   : > { %v1882_v17 = vrot.slane %v1880_v11, 5  ;;  %v1898_v42 = vshrl.u32 %v4790_v24, 16 }
  0x8c   : > { %4644 = vmatmul.msk.bf16.gmra.mxu2 %vm658_vm4, %v1219_v28  ;;  %v2132_v28 = vunpack.c.l.b16 %v1825_v8  ;;  %v2162_v8 = vpack.c.b16 %v2135_v57, %v2134_v55 }
  0x8d   : > { %v1883_v30 = vsel %vm5302_vm3, %v1878_v16, %v1882_v17  ;;  %v1900_v52 = vrot.slane %v1898_v42, 4 }
  0x8e   : > { %v2161_v31 = vpack.c.b16 %v2133_v19, %v2132_v28  ;;  %v2137_v46 = vunpack.c.l.b16 %v1883_v30 }
  0x91   : > { %4757 = vmatmul.msk.bf16.gmra.mxu3 %vm658_vm4, %v5133_v32  ;;  %v1193_v32 = vunpack.c.l.b16 %v1102_v23  ;;  %v4789_v23 = vld [vmem:[%s5290_s27 + $0x54] sm:$0xf] }
  0x93   : > { %v1221_v44 = vpack.c.b16 %v1194_v35, %v1193_v32  ;;  %v1888_v32 = vshll.u32 %v4789_v23, 16  ;;  %v1894_v35 = vshll.u32 %v4790_v24, 16 }
  0x96   : > { %4822 = vmatmul.msk.bf16.gmra.mxu0 %vm658_vm4, %v2160_v50  ;;  %v1108_v50 = vrot.slane %v5330_v20, 5  ;;  %v1863_v20 = vrot.slane %v1861_v51, 4  ;;  %v1896_v51 = vrot.slane %v1894_v35, 5  ;;  %v1125_v35 = vrot.slane %v5425_v27, 5 }
  0x97   : > { %4612 = vmatmul.msk.bf16.gmra.mxu1 %vm658_vm4, %v5118_v48  ;;  %v1025_v48 = vld [vmem:[%s5290_s27 + $0x3c] sm:$0xe] }
  0x98   : > { %v4630_v43 = vrot.slane %v1025_v48, 9  ;;  %v1110_v59 = vrot.slane %v1108_v50, 4  ;;  %v1890_v48 = vrot.slane %v1888_v32, 5 }
  0x9a   : > { %v1109_v5 = vsel %vm5476_vm7, %v4630_v43, %v1108_v50  ;;  %v5121_v43 = vld [vmem:[%s5290_s27 + $0x48] sm:$0xff] }
  0x9c   : > { %v5571_v7 = vpop.f32.mrf.mxu1  ;;  %4645 = vmatmul.msk.bf16.gmra.mxu2 %vm658_vm4, %v1220_v60  ;;  %v1111_v60 = vrot.slane %v5335_v25, 5  ;;  %v1867_v25 = vor.u32 %v1866_v61, %v1863_v20  ;;  %v1904_v20 = vshll.u32 %v4791_v54, 16  ;;  %v5122_v54 = vld [vmem:[%s5290_s27 + $0x54] sm:$0xff] }
  0x9e   : > { %v1112_v6 = vsel %vm5476_vm7, %v1110_v59, %v1111_v60  ;;  %v1868_v15 = vrot.slane %v1867_v25, 4  ;;  %v1901_v60 = vor.u32 %v1900_v52, %v1896_v51  ;;  %v1906_v10 = vrot.slane %v1904_v20, 5 }
  0x9f   : > { %v1196_v14 = vunpack.c.l.b16 %v1112_v6 }
  0xa0   : > { %v1873_v29 = vsel %vm5302_vm3, %v1868_v15, %v1872_v62  ;;  %v1902_v25 = vrot.slane %v1901_v60, 4  ;;  %v1122_v15 = vrot.slane %v5420_v21, 5 }
  0xa1   : > { %4758 = vmatmul.msk.bf16.gmra.mxu3 %vm658_vm4, %v5134_v13  ;;  %v1195_v13 = vunpack.c.l.b16 %v1109_v5  ;;  %v2136_v45 = vunpack.c.l.b16 %v1873_v29  ;;  %v4793_v5 = vld [vmem:[%s5290_s27 + $0x64] sm:$0xf] }
  0xa2   : > { %v1922_v16 = vshrl.u32 %v4793_v5, 16  ;;  %v1907_v24 = vsel %vm5302_vm3, %v1902_v25, %v1906_v10  ;;  %v1124_v32 = vrot.slane %v1122_v15, 4  ;;  %v5180_v10 = vld [vmem:[%s5290_s27 + $0x64] sm:$0xf] }
  0xa3   : > { %v1222_v19 = vpack.c.b16 %v1196_v14, %v1195_v13  ;;  %v2163_v57 = vpack.c.b16 %v2137_v46, %v2136_v45  ;;  %v1912_v13 = vshll.u32 %v4792_v4, 16  ;;  %v1918_v14 = vshll.u32 %v4793_v5, 16 }
  0xa4   : > { %v5587_v34 = vpop.f32.mrf.mxu1  ;;  %v1924_v42 = vrot.slane %v1922_v16, 4 }
  0xa5   : > { %v1914_v30 = vrot.slane %v1912_v13, 5  ;;  %v1028_v13 = vld [vmem:[%s5290_s27 + $0x60] sm:$0xe] }
  0xa6   : > { %v5589_v37 = vpop.f32.mrf.mxu2  ;;  %4823 = vmatmul.msk.bf16.gmra.mxu0 %vm658_vm4, %v2161_v31  ;;  %v1026_v31 = vld [vmem:[%s5290_s27 + $0x48] sm:$0xe] }
  0xa7   : > { %4613 = vmatmul.msk.bf16.gmra.mxu1 %vm658_vm4, %v5119_v33  ;;  %v1885_v33 = vshrl.u32 %v4789_v23, 16  ;;  %v4631_v47 = vrot.slane %v1026_v31, 9  ;;  %v1920_v31 = vrot.slane %v1918_v14, 5 }
  0xa9   : > { %v5595_v41 = vpop.f32.mrf.mxu0  ;;  %v1887_v50 = vrot.slane %v1885_v33, 4  ;;  %v5137_v33 = vld [vmem:[%s5290_s27 + $0x54] sm:$0xff]  ;;  %v1925_v27 = vor.u32 %v1924_v42, %v1920_v31 }
  0xaa   : > { %v5601_v49 = vpop.f32.mrf.mxu3 }
  0xab   : > { %v1891_v59 = vor.u32 %v1890_v48, %v1887_v50  ;;  %v1126_v48 = vsel %vm5476_vm7, %v1124_v32, %v1125_v35  ;;  %v1926_v60 = vrot.slane %v1925_v27, 4 }
  0xac   : > { %4646 = vmatmul.msk.bf16.gmra.mxu2 %vm658_vm4, %v1221_v44  ;;  %v1118_v44 = vrot.slane %v5379_v56, 5 }
  0xae   : > { %v5607_v58 = vpop.f32.mrf.mxu1  ;;  %v5610_v63 = vpop.f32.mrf.mxu2  ;;  %v1119_v56 = vsel %vm5476_vm7, %v1117_v40, %v1118_v44  ;;  %v4794_v40 = vld [vmem:[%s5290_s27 + $0x68] sm:$0x1] }
  0xaf   : > { %v1198_v62 = vunpack.c.l.b16 %v1119_v56 }
  0xb1   : > { %4759 = vmatmul.msk.bf16.gmra.mxu3 %vm658_vm4, %v5135_v2  ;;  %v5618_v9 = vpop.f32.mrf.mxu0  ;;  %v1116_v2 = vsel %vm5476_vm7, %v4631_v47, %v1115_v26  ;;  %v2139_v47 = vunpack.c.l.b16 %v1907_v24 }
  0xb2   : > { %v5620_v0 = vpop.f32.mrf.mxu3  ;;  %v1197_v61 = vunpack.c.l.b16 %v1116_v2 }
  0xb4   : > { %v1223_v11 = vpack.c.b16 %v1198_v62, %v1197_v61  ;;  %v4795_v61 = vld [vmem:[%s5290_s27 + $0x6c] sm:$0xf]  ;;  %v4796_v62 = vld [vmem:[%s5290_s27 + $0x70] sm:$0xf] }
  0xb5   : > { %v1933_v14 = vshrl.u32 %v4795_v61, 16  ;;  %v1942_v16 = vshll.u32 %v4796_v62, 16 }
  0xb6   : > { %4824 = vmatmul.msk.bf16.gmra.mxu0 %vm658_vm4, %v2162_v8  ;;  %v5624_v28 = vpop.f32.mrf.mxu1  ;;  %v1892_v8 = vrot.slane %v1891_v59, 4 }
  0xb7   : > { %4614 = vmatmul.msk.bf16.gmra.mxu1 %vm658_vm4, %v5120_v12  ;;  %v1909_v12 = vshrl.u32 %v4792_v4, 16  ;;  %v1935_v35 = vrot.slane %v1933_v14, 4  ;;  %v4799_v14 = vld [vmem:[%s5290_s27 + $0x7c] sm:$0xf] }
  0xb8   : > { %v1897_v23 = vsel %vm5302_vm3, %v1892_v8, %v1896_v51  ;;  %v1928_v51 = vshll.u32 %v4794_v40, 16 }
  0xb9   : > { %v5627_v22 = vpop.f32.mrf.mxu2  ;;  %v1911_v29 = vrot.slane %v1909_v12, 4 }
  0xba   : > { %v1930_v20 = vrot.slane %v1928_v51, 5 }
  0xbb   : > { %v1915_v46 = vor.u32 %v1914_v30, %v1911_v29  ;;  %v5138_v30 = vld [vmem:[%s5290_s27 + $0x60] sm:$0xff] }
  0xbc   : > { %4647 = vmatmul.msk.bf16.gmra.mxu2 %vm658_vm4, %v1222_v19  ;;  %v1027_v19 = vld [vmem:[%s5290_s27 + $0x54] sm:$0xe]  ;;  %v1931_v25 = vsel %vm5302_vm3, %v1926_v60, %v1930_v20 }
  0xbd   : > { %v5637_v38 = vpop.f32.mrf.mxu0  ;;  %v4632_v21 = vrot.slane %v1027_v19, 9  ;;  %v1916_v59 = vrot.slane %v1915_v46, 4  ;;  %v1946_v19 = vshrl.u32 %v4796_v62, 16  ;;  %v4797_v46 = vld [vmem:[%s5290_s27 + $0x74] sm:$0x1] }
  0xbe   : > { %v5641_v39 = vpop.f32.mrf.mxu3 }
  0xbf   : > { %v1123_v50 = vsel %vm5476_vm7, %v4632_v21, %v1122_v15  ;;  %v1921_v8 = vsel %vm5302_vm3, %v1916_v59, %v1920_v31  ;;  %v1936_v15 = vshll.u32 %v4795_v61, 16  ;;  %v4633_v21 = vrot.slane %v1028_v13, 9  ;;  %v4798_v13 = vld [vmem:[%s5290_s27 + $0x78] sm:$0xf] }
  0xc0   : > { %v5644_v53 = vpop.f32.mrf.mxu1  ;;  %v1199_v56 = vunpack.c.l.b16 %v1123_v50  ;;  %v2140_v31 = vunpack.c.l.b16 %v1921_v8 }
  0xc1   : > { %4760 = vmatmul.msk.bf16.gmra.mxu3 %vm658_vm4, %v5136_v1  ;;  %v5648_v55 = vpop.f32.mrf.mxu2  ;;  %v2138_v1 = vunpack.c.l.b16 %v1897_v23  ;;  %v5181_v23 = vld [vmem:[%s5290_s27 + $0x68] sm:$0x1]  ;;  %v1938_v42 = vrot.slane %v1936_v15, 5  ;;  %v5182_v15 = vld [vmem:[%s5290_s27 + $0x70] sm:$0xf] }
  0xc2   : > { %v1132_v24 = vrot.slane %v5181_v23, 5  ;;  %v1029_v23 = vld [vmem:[%s5290_s27 + $0x6c] sm:$0xe] }
  0xc3   : > { %v2164_v52 = vpack.c.b16 %v2139_v47, %v2138_v1  ;;  %v1944_v1 = vrot.slane %v1942_v16, 5  ;;  %v1948_v47 = vrot.slane %v1946_v19, 4  ;;  %v1939_v51 = vor.u32 %v1938_v42, %v1935_v35  ;;  %v5183_v42 = vld [vmem:[%s5290_s27 + $0x74] sm:$0x1] }
  0xc4   : > { %v1136_v16 = vrot.slane %v5182_v15, 5 }
  0xc5   : > { %v5655_v3 = vpop.f32.mrf.mxu0 }
  0xc6   : > { %4825 = vmatmul.msk.bf16.gmra.mxu0 %vm658_vm4, %v2163_v57  ;;  %v5660_v6 = vpop.f32.mrf.mxu3  ;;  %v1200_v57 = vunpack.c.l.b16 %v1126_v48 }
  0xc7   : > { %4615 = vmatmul.msk.bf16.gmra.mxu1 %vm658_vm4, %v5121_v43 }
  0xc8   : > { %v5664_v17 = vpop.f32.mrf.mxu1  ;;  %v1224_v4 = vpack.c.b16 %v1200_v57, %v1199_v56  ;;  %v5123_v57 = vld [vmem:[%s5290_s27 + $0x60] sm:$0xff] }
  0xcc   : > { %v5671_v26 = vpop.f32.mrf.mxu2  ;;  %4648 = vmatmul.msk.bf16.gmra.mxu2 %vm658_vm4, %v1223_v11  ;;  %v1129_v11 = vrot.slane %v5180_v10, 5 }
  0xce   : > { %v1131_v32 = vrot.slane %v1129_v11, 4  ;;  %v1130_v50 = vsel %vm5476_vm7, %v4633_v21, %v1129_v11  ;;  %v1970_v21 = vshrl.u32 %v4799_v14, 16 }
  0xcf   : > { %v5677_v44 = vpop.f32.mrf.mxu0  ;;  %v1201_v20 = vunpack.c.l.b16 %v1130_v50  ;;  %v4634_v50 = vrot.slane %v1029_v23, 9 }
  0xd0   : > { %v5679_v45 = vpop.f32.mrf.mxu3  ;;  %v1133_v48 = vsel %vm5476_vm7, %v1131_v32, %v1132_v24 }
  0xd1   : > { %4761 = vmatmul.msk.bf16.gmra.mxu3 %vm658_vm4, %v5137_v33  ;;  %v2141_v33 = vunpack.c.l.b16 %v1931_v25  ;;  %v1202_v61 = vunpack.c.l.b16 %v1133_v48  ;;  %v1138_v48 = vrot.slane %v1136_v16, 4 }
  0xd3   : > { %v2165_v27 = vpack.c.b16 %v2141_v33, %v2140_v31  ;;  %v1225_v11 = vpack.c.b16 %v1202_v61, %v1201_v20  ;;  %v1960_v31 = vshll.u32 %v4798_v13, 16  ;;  %v1966_v33 = vshll.u32 %v4799_v14, 16 }
  0xd4   : > { %v5687_v2 = vpop.f32.mrf.mxu1  ;;  %v5689_v43 = vpop.f32.mrf.mxu2  ;;  %v1972_v20 = vrot.slane %v1970_v21, 4 }
  0xd6   : > { %4826 = vmatmul.msk.bf16.gmra.mxu0 %vm658_vm4, %v2164_v52  ;;  %v1949_v52 = vor.u32 %v1948_v47, %v1944_v1  ;;  %v1139_v47 = vrot.slane %v5183_v42, 5 }
  0xd7   : > { %4616 = vmatmul.msk.bf16.gmra.mxu1 %vm658_vm4, %v5122_v54  ;;  %v5695_v5 = vpop.f32.mrf.mxu0  ;;  %v1952_v54 = vshll.u32 %v4797_v46, 16  ;;  %v5139_v46 = vld [vmem:[%s5290_s27 + $0x6c] sm:$0xff] }
  0xd8   : > { %v5702_v12 = vpop.f32.mrf.mxu3  ;;  %v1950_v8 = vrot.slane %v1949_v52, 4 }
  0xd9   : > { %v1954_v25 = vrot.slane %v1952_v54, 5 }
  0xdc   : > { %4649 = vmatmul.msk.bf16.gmra.mxu2 %vm658_vm4, %v1224_v4  ;;  %v5707_v29 = vpop.f32.mrf.mxu1  ;;  %v1940_v4 = vrot.slane %v1939_v51, 4 }
  0xde   : > { %v1945_v19 = vsel %vm5302_vm3, %v1940_v4, %v1944_v1  ;;  %v4800_v4 = vld [vmem:[%s5290_s27 + $0x80] sm:$0x1] }
  0xdf   : > { %v5710_v40 = vpop.f32.mrf.mxu2 }
  0xe1   : > { %4762 = vmatmul.msk.bf16.gmra.mxu3 %vm658_vm4, %v5138_v30  ;;  %v1957_v30 = vshrl.u32 %v4798_v13, 16  ;;  %v5124_v13 = vld [vmem:[%s5290_s27 + $0x6c] sm:$0xff] }
  0xe3   : > { %v5718_v56 = vpop.f32.mrf.mxu0  ;;  %v1959_v54 = vrot.slane %v1957_v30, 4 }
  0xe4   : > { %v5721_v59 = vpop.f32.mrf.mxu3  ;;  %v940_v60 = vpop.f32.mrf.mxu1 }
  0xe5   : > { %v941_v62 = vadd.f32 %v940_v60, %v5595_v41  ;;  %v1955_v41 = vsel %vm5302_vm3, %v1950_v8, %v1954_v25  ;;  %v1968_v60 = vrot.slane %v1966_v33, 5  ;;  %v1137_v8 = vsel %vm5476_vm7, %v4634_v50, %v1136_v16 }
  0xe6   : > { %4827 = vmatmul.msk.bf16.gmra.mxu0 %vm658_vm4, %v2165_v27  ;;  %v2142_v27 = vunpack.c.l.b16 %v1945_v19  ;;  %v2143_v51 = vunpack.c.l.b16 %v1955_v41  ;;  %v1976_v19 = vshll.u32 %v4800_v4, 16 }
  0xe7   : > { %v5725_v10 = vpop.f32.mrf.mxu2  ;;  %4617 = vmatmul.msk.bf16.gmra.mxu1 %vm658_vm4, %v5123_v57  ;;  %v1962_v57 = vrot.slane %v1960_v31, 5  ;;  %v1973_v15 = vor.u32 %v1972_v20, %v1968_v60 }
  0xe8   : > { %v2166_v25 = vpack.c.b16 %v2143_v51, %v2142_v27  ;;  %v1978_v42 = vrot.slane %v1976_v19, 5  ;;  %v4802_v27 = vld [vmem:[%s5290_s27 + $0x88] sm:$0xf]  ;;  %v5184_v51 = vld [vmem:[%s5290_s27 + $0x7c] sm:$0xf] }
  0xe9   : > { %v1963_v14 = vor.u32 %v1962_v57, %v1959_v54  ;;  %v1030_v54 = vld [vmem:[%s5290_s27 + $0x78] sm:$0xe] }
  0xeb   : > { %v5736_v24 = vpop.f32.mrf.mxu0  ;;  %v1964_v21 = vrot.slane %v1963_v14, 4 }
  0xec   : > { %v5738_v32 = vpop.f32.mrf.mxu3  ;;  %4650 = vmatmul.msk.bf16.gmra.mxu2 %vm658_vm4, %v1225_v11  ;;  %v942_v35 = vpop.f32.mrf.mxu1 }
  0xed   : > { %v943_v1 = vadd.f32 %v942_v35, %v5618_v9  ;;  %v1140_v9 = vsel %vm5476_vm7, %v1138_v48, %v1139_v47  ;;  %v1974_v35 = vrot.slane %v1973_v15, 4  ;;  %v4801_v47 = vld [vmem:[%s5290_s27 + $0x84] sm:$0xf]  ;;  %v5140_v15 = vld [vmem:[%s5290_s27 + $0x78] sm:$0xff] }
  0xee   : > { %v1204_v30 = vunpack.c.l.b16 %v1140_v9  ;;  %v1984_v57 = vshll.u32 %v4801_v47, 16  ;;  %v1994_v9 = vshrl.u32 %v4802_v27, 16 }
  0xef   : > { %v1293_v52 = vpop.f32.mrf.mxu2  ;;  %v1979_v4 = vsel %vm5302_vm3, %v1974_v35, %v1978_v42 }
  0xf0   : > { %v1373_v61 = vadd.f32 %v1293_v52, %v941_v62  ;;  %v1203_v62 = vunpack.c.l.b16 %v1137_v8  ;;  %v1143_v52 = vrot.slane %v5184_v51, 5  ;;  %v1990_v8 = vshll.u32 %v4802_v27, 16 }
  0xf1   : > { %4763 = vmatmul.msk.bf16.gmra.mxu3 %vm658_vm4, %v5139_v46  ;;  %v1996_v35 = vrot.slane %v1994_v9, 4 }
  0xf2   : > { %v1226_v48 = vpack.c.b16 %v1204_v30, %v1203_v62 }
  0xf3   : > { %v2234_v11 = vpop.f32.mrf.mxu0 }
  0xf4   : > { %v1580_v41 = vpop.f32.mrf.mxu3  ;;  %v945_v23 = vpop.f32.mrf.mxu1 }
  0xf5   : > { %v1660_v31 = vadd.f32 %v1580_v41, %v1373_v61  ;;  %v946_v16 = vadd.f32 %v945_v23, %v5637_v38  ;;  %v1981_v38 = vshrl.u32 %v4801_v47, 16  ;;  %v1969_v61 = vsel %vm5302_vm3, %v1964_v21, %v1968_v60 }
  0xf6   : > { %4828 = vmatmul.msk.bf16.gmra.mxu0 %vm658_vm4, %v2166_v25  ;;  %v5185_v25 = vld [vmem:[%s5290_s27 + $0x80] sm:$0x1]  ;;  %v4635_v41 = vrot.slane %v1030_v54, 9  ;;  %v1145_v23 = vrot.slane %v1143_v52, 4  ;;  %v2144_v62 = vunpack.c.l.b16 %v1969_v61  ;;  %v2145_v60 = vunpack.c.l.b16 %v1979_v4 }
  0xf7   : > { %v1295_v33 = vpop.f32.mrf.mxu2  ;;  %4618 = vmatmul.msk.bf16.gmra.mxu1 %vm658_vm4, %v5124_v13  ;;  %v5755_v46 = vadd.f32 %v2234_v11, %v1660_v31  ;;  %v1146_v11 = vrot.slane %v5185_v25, 5  ;;  %v1983_v30 = vrot.slane %v1981_v38, 4  ;;  %v1986_v31 = vrot.slane %v1984_v57, 5  ;;  %v5125_v38 = vld [vmem:[%s5290_s27 + $0x78] sm:$0xff] }
  0xf8   : > { %v1374_v50 = vadd.f32 %v1295_v33, %v943_v1  ;;  %v1992_v21 = vrot.slane %v1990_v8, 5  ;;  %v2167_v27 = vpack.c.b16 %v2145_v60, %v2144_v62  ;;  %v4805_v62 = vld [vmem:[%s5290_s27 + $0x94] sm:$0xf]  ;;  %v5186_v60 = vld [vmem:[%s5290_s27 + $0x88] sm:$0xf] }
  0xf9   : > { %v1987_v51 = vor.u32 %v1986_v31, %v1983_v30  ;;  %v1150_v30 = vrot.slane %v5186_v60, 5  ;;  %v1031_v31 = vld [vmem:[%s5290_s27 + $0x84] sm:$0xe] }
  0xfa   : > { %v1997_v57 = vor.u32 %v1996_v35, %v1992_v21 }
  0xfb   : > { %v2236_v20 = vpop.f32.mrf.mxu0  ;;  %v1988_v25 = vrot.slane %v1987_v51, 4 }
  0xfc   : > { %v1582_v1 = vpop.f32.mrf.mxu3  ;;  %4651 = vmatmul.msk.bf16.gmra.mxu2 %vm658_vm4, %v1226_v48  ;;  %v947_v13 = vpop.f32.mrf.mxu1  ;;  %v4803_v48 = vld [vmem:[%s5290_s27 + $0x8c] sm:$0x1] }
  0xfd   : > { %v1661_v14 = vadd.f32 %v1582_v1, %v1374_v50  ;;  %v948_v19 = vadd.f32 %v947_v13, %v5655_v3  ;;  %v1144_v50 = vsel %vm5476_vm7, %v4635_v41, %v1143_v52  ;;  %v1147_v3 = vsel %vm5476_vm7, %v1145_v23, %v1146_v11 }
  0xfe   : > { %v2000_v61 = vshll.u32 %v4803_v48, 16  ;;  %v1206_v8 = vunpack.c.l.b16 %v1147_v3  ;;  %v1998_v1 = vrot.slane %v1997_v57, 4  ;;  %v2018_v3 = vshrl.u32 %v4805_v62, 16  ;;  %v5141_v57 = vld [vmem:[%s5290_s27 + $0x84] sm:$0xff] }
  0xff   : > { %v1298_v33 = vpop.f32.mrf.mxu2  ;;  %v5768_v42 = vadd.f32 %v2236_v20, %v1661_v14  ;;  %v4804_v14 = vld [vmem:[%s5290_s27 + $0x90] sm:$0xf] }
 0x100   : > { %v1375_v47 = vadd.f32 %v1298_v33, %v946_v16  ;;  %v1205_v16 = vunpack.c.l.b16 %v1144_v50  ;;  %v2002_v13 = vrot.slane %v2000_v61, 5  ;;  %v2005_v33 = vshrl.u32 %v4804_v14, 16 }
 0x101   : > { %4764 = vmatmul.msk.bf16.gmra.mxu3 %vm658_vm4, %v5140_v15  ;;  %v2008_v48 = vshll.u32 %v4804_v14, 16  ;;  %v2014_v50 = vshll.u32 %v4805_v62, 16  ;;  %v4636_v61 = vrot.slane %v1031_v31, 9 }
 0x102   : > { %v1227_v23 = vpack.c.b16 %v1206_v8, %v1205_v16  ;;  %v2007_v8 = vrot.slane %v2005_v33, 4 }
 0x103   : > { %v2239_v54 = vpop.f32.mrf.mxu0 }
 0x104   : > { %v1585_v4 = vpop.f32.mrf.mxu3  ;;  %v950_v20 = vpop.f32.mrf.mxu1 }
 0x105   : > { %v1662_v9 = vadd.f32 %v1585_v4, %v1375_v47  ;;  %v951_v52 = vadd.f32 %v950_v20, %v5677_v44  ;;  %v1993_v44 = vsel %vm5302_vm3, %v1988_v25, %v1992_v21  ;;  %v2003_v47 = vsel %vm5302_vm3, %v1998_v1, %v2002_v13 }
 0x106   : > { %4829 = vmatmul.msk.bf16.gmra.mxu0 %vm658_vm4, %v2167_v27  ;;  %v5187_v27 = vld [vmem:[%s5290_s27 + $0x8c] sm:$0x1]  ;;  %v1152_v4 = vrot.slane %v1150_v30, 4  ;;  %v2146_v20 = vunpack.c.l.b16 %v1993_v44  ;;  %v2147_v16 = vunpack.c.l.b16 %v2003_v47  ;;  %v2010_v25 = vrot.slane %v2008_v48, 5  ;;  %v5126_v44 = vld [vmem:[%s5290_s27 + $0x84] sm:$0xff] }
 0x107   : > { %v1300_v11 = vpop.f32.mrf.mxu2  ;;  %4619 = vmatmul.msk.bf16.gmra.mxu1 %vm658_vm4, %v5125_v38  ;;  %v5781_v15 = vadd.f32 %v2239_v54, %v1662_v9  ;;  %v1153_v51 = vrot.slane %v5187_v27, 5  ;;  %v2020_v1 = vrot.slane %v2018_v3, 4 }
 0x108   : > { %v1376_v41 = vadd.f32 %v1300_v11, %v948_v19  ;;  %v2016_v11 = vrot.slane %v2014_v50, 5  ;;  %v2168_v62 = vpack.c.b16 %v2147_v16, %v2146_v20  ;;  %v2011_v31 = vor.u32 %v2010_v25, %v2007_v8  ;;  %v4808_v20 = vld [vmem:[%s5290_s27 + $0xa0] sm:$0xf]  ;;  %v1032_v25 = vld [vmem:[%s5290_s27 + $0x90] sm:$0xe] }
 0x10a   : > { %v2021_v33 = vor.u32 %v2020_v1, %v2016_v11 }
 0x10b   : > { %v2241_v35 = vpop.f32.mrf.mxu0 }
 0x10c   : > { %v1587_v19 = vpop.f32.mrf.mxu3  ;;  %4652 = vmatmul.msk.bf16.gmra.mxu2 %vm658_vm4, %v1227_v23  ;;  %v952_v54 = vpop.f32.mrf.mxu1  ;;  %v4806_v23 = vld [vmem:[%s5290_s27 + $0x98] sm:$0x1] }
 0x10d   : > { %v1663_v38 = vadd.f32 %v1587_v19, %v1376_v41  ;;  %v953_v21 = vadd.f32 %v952_v54, %v5695_v5  ;;  %v1151_v5 = vsel %vm5476_vm7, %v4636_v61, %v1150_v30  ;;  %v1154_v41 = vsel %vm5476_vm7, %v1152_v4, %v1153_v51  ;;  %v4807_v30 = vld [vmem:[%s5290_s27 + $0x9c] sm:$0xf] }
 0x10e   : > { %v2024_v47 = vshll.u32 %v4806_v23, 16  ;;  %v1208_v50 = vunpack.c.l.b16 %v1154_v41  ;;  %v2012_v19 = vrot.slane %v2011_v31, 4  ;;  %v2022_v54 = vrot.slane %v2021_v33, 4 }
 0x10f   : > { %v1303_v9 = vpop.f32.mrf.mxu2  ;;  %v5794_v13 = vadd.f32 %v2241_v35, %v1663_v38  ;;  %v2029_v16 = vshrl.u32 %v4807_v30, 16  ;;  %v2032_v8 = vshll.u32 %v4807_v30, 16  ;;  %v2042_v41 = vshrl.u32 %v4808_v20, 16 }
 0x110   : > { %v1377_v14 = vadd.f32 %v1303_v9, %v951_v52  ;;  %v1207_v52 = vunpack.c.l.b16 %v1151_v5  ;;  %v2026_v38 = vrot.slane %v2024_v47, 5  ;;  %v5188_v9 = vld [vmem:[%s5290_s27 + $0x94] sm:$0xf]  ;;  %v2038_v5 = vshll.u32 %v4808_v20, 16 }
 0x111   : > { %4765 = vmatmul.msk.bf16.gmra.mxu3 %vm658_vm4, %v5141_v57  ;;  %v2031_v31 = vrot.slane %v2029_v16, 4  ;;  %v2034_v33 = vrot.slane %v2032_v8, 5 }
 0x112   : > { %v1228_v4 = vpack.c.b16 %v1208_v50, %v1207_v52  ;;  %v2027_v23 = vsel %vm5302_vm3, %v2022_v54, %v2026_v38  ;;  %v4637_v52 = vrot.slane %v1032_v25, 9 }
 0x113   : > { %v2244_v60 = vpop.f32.mrf.mxu0  ;;  %v2035_v20 = vor.u32 %v2034_v33, %v2031_v31  ;;  %v4811_v31 = vld [vmem:[%s5290_s27 + $0xac] sm:$0xf] }
 0x114   : > { %v1590_v48 = vpop.f32.mrf.mxu3  ;;  %v955_v35 = vpop.f32.mrf.mxu1 }
 0x115   : > { %v1664_v3 = vadd.f32 %v1590_v48, %v1377_v14  ;;  %v956_v27 = vadd.f32 %v955_v35, %v5718_v56  ;;  %v1157_v56 = vrot.slane %v5188_v9, 5  ;;  %v2017_v14 = vsel %vm5302_vm3, %v2012_v19, %v2016_v11  ;;  %v5142_v48 = vld [vmem:[%s5290_s27 + $0x90] sm:$0xff] }
 0x116   : > { %4830 = vmatmul.msk.bf16.gmra.mxu0 %vm658_vm4, %v2168_v62  ;;  %v5189_v62 = vld [vmem:[%s5290_s27 + $0x98] sm:$0x1]  ;;  %v2148_v50 = vunpack.c.l.b16 %v2017_v14  ;;  %v2044_v19 = vrot.slane %v2042_v41, 4  ;;  %v5127_v9 = vld [vmem:[%s5290_s27 + $0x90] sm:$0xff] }
 0x117   : > { %v1305_v51 = vpop.f32.mrf.mxu2  ;;  %4620 = vmatmul.msk.bf16.gmra.mxu1 %vm658_vm4, %v5126_v44  ;;  %v5807_v57 = vadd.f32 %v2244_v60, %v1664_v3  ;;  %v1160_v60 = vrot.slane %v5189_v62, 5  ;;  %v1159_v11 = vrot.slane %v1157_v56, 4  ;;  %v2149_v3 = vunpack.c.l.b16 %v2027_v23 }
 0x118   : > { %v1378_v61 = vadd.f32 %v1305_v51, %v953_v21  ;;  %v2040_v51 = vrot.slane %v2038_v5, 5  ;;  %v2036_v62 = vrot.slane %v2035_v20, 4  ;;  %v5191_v20 = vld [vmem:[%s5290_s27 + $0xa4] sm:$0x1] }
 0x119   : > { %v2169_v16 = vpack.c.b16 %v2149_v3, %v2148_v50  ;;  %v5190_v50 = vld [vmem:[%s5290_s27 + $0xa0] sm:$0xf] }
 0x11a   : > { %v2045_v25 = vor.u32 %v2044_v19, %v2040_v51  ;;  %v1164_v3 = vrot.slane %v5190_v50, 5  ;;  %v1033_v19 = vld [vmem:[%s5290_s27 + $0x9c] sm:$0xe] }
 0x11b   : > { %v2246_v1 = vpop.f32.mrf.mxu0 }
 0x11c   : > { %v1592_v21 = vpop.f32.mrf.mxu3  ;;  %4653 = vmatmul.msk.bf16.gmra.mxu2 %vm658_vm4, %v1228_v4  ;;  %v957_v44 = vpop.f32.mrf.mxu1  ;;  %v4809_v4 = vld [vmem:[%s5290_s27 + $0xa4] sm:$0x1] }
 0x11d   : > { %v1665_v47 = vadd.f32 %v1592_v21, %v1378_v61  ;;  %v958_v35 = vadd.f32 %v957_v44, %v5736_v24  ;;  %v1158_v61 = vsel %vm5476_vm7, %v4637_v52, %v1157_v56  ;;  %v1161_v24 = vsel %vm5476_vm7, %v1159_v11, %v1160_v60  ;;  %v4810_v21 = vld [vmem:[%s5290_s27 + $0xa8] sm:$0xf] }
 0x11e   : > { %v2048_v14 = vshll.u32 %v4809_v4, 16  ;;  %v1210_v5 = vunpack.c.l.b16 %v1161_v24  ;;  %v2046_v60 = vrot.slane %v2045_v25, 4  ;;  %v2053_v52 = vshrl.u32 %v4810_v21, 16 }
 0x11f   : > { %v1308_v30 = vpop.f32.mrf.mxu2  ;;  %v5820_v54 = vadd.f32 %v2246_v1, %v1665_v47  ;;  %v2041_v11 = vsel %vm5302_vm3, %v2036_v62, %v2040_v51  ;;  %v2066_v4 = vshrl.u32 %v4811_v31, 16 }
 0x120   : > { %v1379_v38 = vadd.f32 %v1308_v30, %v956_v27  ;;  %v1209_v27 = vunpack.c.l.b16 %v1158_v61  ;;  %v2050_v44 = vrot.slane %v2048_v14, 5  ;;  %v2056_v30 = vshll.u32 %v4810_v21, 16  ;;  %v5143_v14 = vld [vmem:[%s5290_s27 + $0x9c] sm:$0xff] }
 0x121   : > { %4766 = vmatmul.msk.bf16.gmra.mxu3 %vm658_vm4, %v5142_v48  ;;  %v2055_v51 = vrot.slane %v2053_v52, 4 }
 0x122   : > { %v1229_v48 = vpack.c.b16 %v1210_v5, %v1209_v27  ;;  %v2051_v24 = vsel %vm5302_vm3, %v2046_v60, %v2050_v44  ;;  %v1166_v27 = vrot.slane %v1164_v3, 4  ;;  %v2058_v5 = vrot.slane %v2056_v30, 5  ;;  %v4812_v44 = vld [vmem:[%s5290_s27 + $0xb0] sm:$0x1] }
 0x123   : > { %v2249_v8 = vpop.f32.mrf.mxu0  ;;  %v2151_v62 = vunpack.c.l.b16 %v2051_v24 }
 0x124   : > { %v1595_v1 = vpop.f32.mrf.mxu3  ;;  %v960_v23 = vpop.f32.mrf.mxu1  ;;  %v2059_v52 = vor.u32 %v2058_v5, %v2055_v51 }
 0x125   : > { %v1666_v41 = vadd.f32 %v1595_v1, %v1379_v38  ;;  %v2062_v38 = vshll.u32 %v4811_v31, 16  ;;  %v4638_v1 = vrot.slane %v1033_v19, 9  ;;  %v5128_v19 = vld [vmem:[%s5290_s27 + $0x9c] sm:$0xff] }
 0x126   : > { %4831 = vmatmul.msk.bf16.gmra.mxu0 %vm658_vm4, %v2169_v16  ;;  %v1167_v16 = vrot.slane %v5191_v20, 5 }
 0x127   : > { %v1310_v56 = vpop.f32.mrf.mxu2  ;;  %4621 = vmatmul.msk.bf16.gmra.mxu1 %vm658_vm4, %v5127_v9  ;;  %v5833_v33 = vadd.f32 %v2249_v8, %v1666_v41  ;;  %v2150_v8 = vunpack.c.l.b16 %v2041_v11  ;;  %v961_v41 = vadd.f32 %v960_v23, %v5571_v7  ;;  %v2064_v21 = vrot.slane %v2062_v38, 5 }
 0x128   : > { %v1380_v47 = vadd.f32 %v1310_v56, %v958_v35  ;;  %v2068_v56 = vrot.slane %v2066_v4, 4  ;;  %v2072_v11 = vshll.u32 %v4812_v44, 16 }
 0x129   : > { %v2170_v7 = vpack.c.b16 %v2151_v62, %v2150_v8  ;;  %v4813_v8 = vld [vmem:[%s5290_s27 + $0xb4] sm:$0xf] }
 0x12a   : > { %v2069_v23 = vor.u32 %v2068_v56, %v2064_v21  ;;  %v2074_v51 = vrot.slane %v2072_v11, 5  ;;  %v2080_v44 = vshll.u32 %v4813_v8, 16 }
 0x12b   : > { %v2251_v61 = vpop.f32.mrf.mxu0 }
 0x12c   : > { %v1597_v35 = vpop.f32.mrf.mxu3  ;;  %4654 = vmatmul.msk.bf16.gmra.mxu2 %vm658_vm4, %v1229_v48  ;;  %v962_v9 = vpop.f32.mrf.mxu1  ;;  %v1168_v48 = vsel %vm5476_vm7, %v1166_v27, %v1167_v16  ;;  %v2070_v16 = vrot.slane %v2069_v23, 4 }
 0x12d   : > { %v1667_v25 = vadd.f32 %v1597_v35, %v1380_v47  ;;  %v1165_v47 = vsel %vm5476_vm7, %v4638_v1, %v1164_v3  ;;  %v1212_v24 = vunpack.c.l.b16 %v1168_v48  ;;  %v2060_v35 = vrot.slane %v2059_v52, 4  ;;  %v5193_v52 = vld [vmem:[%s5290_s27 + $0xb0] sm:$0x1] }
 0x12e   : > { %v963_v3 = vadd.f32 %v962_v9, %v5587_v34  ;;  %v2077_v34 = vshrl.u32 %v4813_v8, 16  ;;  %v2075_v9 = vsel %vm5302_vm3, %v2070_v16, %v2074_v51 }
 0x12f   : > { %v1313_v60 = vpop.f32.mrf.mxu2  ;;  %v5846_v31 = vadd.f32 %v2251_v61, %v1667_v25  ;;  %v1211_v61 = vunpack.c.l.b16 %v1165_v47  ;;  %v2065_v56 = vsel %vm5302_vm3, %v2060_v35, %v2064_v21 }
 0x130   : > { %v1381_v50 = vadd.f32 %v1313_v60, %v961_v41  ;;  %v5192_v41 = vld [vmem:[%s5290_s27 + $0xac] sm:$0xf]  ;;  %v1034_v60 = vld [vmem:[%s5290_s27 + $0xa8] sm:$0xe] }
 0x131   : > { %4767 = vmatmul.msk.bf16.gmra.mxu3 %vm658_vm4, %v5143_v14  ;;  %v4814_v14 = vld [vmem:[%s5290_s27 + $0xb8] sm:$0xf]  ;;  %v1230_v5 = vpack.c.b16 %v1212_v24, %v1211_v61  ;;  %v1171_v62 = vrot.slane %v5192_v41, 5  ;;  %v2152_v61 = vunpack.c.l.b16 %v2065_v56  ;;  %v2153_v24 = vunpack.c.l.b16 %v2075_v9  ;;  %v4815_v41 = vld [vmem:[%s5290_s27 + $0xbc] sm:$0x1] }
 0x132   : > { %v2090_v47 = vshrl.u32 %v4814_v14, 16 }
 0x133   : > { %v2254_v30 = vpop.f32.mrf.mxu0 }
 0x134   : > { %v1600_v38 = vpop.f32.mrf.mxu3  ;;  %v965_v4 = vpop.f32.mrf.mxu1  ;;  %v2092_v51 = vrot.slane %v2090_v47, 4 }
 0x135   : > { %v1668_v20 = vadd.f32 %v1600_v38, %v1381_v50  ;;  %v2086_v50 = vshll.u32 %v4814_v14, 16  ;;  %v5144_v38 = vld [vmem:[%s5290_s27 + $0xa8] sm:$0xff]  ;;  %v966_v35 = vadd.f32 %v965_v4, %v5607_v58  ;;  %v2171_v58 = vpack.c.b16 %v2153_v24, %v2152_v61 }
 0x136   : > { %4832 = vmatmul.msk.bf16.gmra.mxu0 %vm658_vm4, %v2170_v7  ;;  %v1174_v7 = vrot.slane %v5193_v52, 5 }
 0x137   : > { %v1315_v25 = vpop.f32.mrf.mxu2  ;;  %4622 = vmatmul.msk.bf16.gmra.mxu1 %vm658_vm4, %v5128_v19  ;;  %v5859_v1 = vadd.f32 %v2254_v30, %v1668_v20  ;;  %v4639_v30 = vrot.slane %v1034_v60, 9  ;;  %v1173_v19 = vrot.slane %v1171_v62, 4  ;;  %v2079_v20 = vrot.slane %v2077_v34, 4  ;;  %v5129_v34 = vld [vmem:[%s5290_s27 + $0xa8] sm:$0xff] }
 0x138   : > { %v1382_v27 = vadd.f32 %v1315_v25, %v963_v3  ;;  %v2082_v3 = vrot.slane %v2080_v44, 5  ;;  %v5871_v16 = vrot.slane %v2086_v50, 5  ;;  %v2096_v50 = vshll.u32 %v4815_v41, 16 }
 0x13a   : > { %v2083_v4 = vor.u32 %v2082_v3, %v2079_v20  ;;  %v2093_v56 = vor.u32 %v2092_v51, %v5871_v16  ;;  %v2098_v20 = vrot.slane %v2096_v50, 5 }
 0x13b   : > { %v2256_v48 = vpop.f32.mrf.mxu0 }
 0x13c   : > { %v1602_v23 = vpop.f32.mrf.mxu3  ;;  %4655 = vmatmul.msk.bf16.gmra.mxu2 %vm658_vm4, %v1230_v5  ;;  %v967_v11 = vpop.f32.mrf.mxu1  ;;  %v1172_v5 = vsel %vm5476_vm7, %v4639_v30, %v1171_v62  ;;  %v4816_v62 = vld [vmem:[%s5290_s27 + $0xc0] sm:$0xf]  ;;  %v5194_v30 = vld [vmem:[%s5290_s27 + $0x10] sm:$0xf] }
 0x13d   : > { %v1669_v21 = vadd.f32 %v1602_v23, %v1382_v27  ;;  %v1175_v27 = vsel %vm5476_vm7, %v1173_v19, %v1174_v7  ;;  %v1213_v9 = vunpack.c.l.b16 %v1172_v5  ;;  %v4817_v23 = vld [vmem:[%s5290_s27 + $0xc4] sm:$0xf]  ;;  %v2412_v7 = vrot.slane %v5194_v30, 5 }
 0x13e   : > { %v1214_v44 = vunpack.c.l.b16 %v1175_v27  ;;  %v968_v19 = vadd.f32 %v967_v11, %v5624_v28  ;;  %v2104_v3 = vshll.u32 %v4816_v62, 16  ;;  %v5195_v27 = vld [vmem:[%s5290_s27 + $0xb8] sm:$0xf]  ;;  %v1035_v11 = vld [vmem:[%s5290_s27 + $0xb4] sm:$0xe] }
 0x13f   : > { %v1318_v8 = vpop.f32.mrf.mxu2  ;;  %v5873_v25 = vadd.f32 %v2256_v48, %v1669_v21  ;;  %v2084_v21 = vrot.slane %v2083_v4, 4  ;;  %v1178_v41 = vrot.slane %v5195_v27, 5  ;;  %v2414_v4 = vrot.slane %v2412_v7, 4  ;;  %v5145_v27 = vld [vmem:[%s5290_s27 + $0xb4] sm:$0xff] }
 0x140   : > { %v1383_v14 = vadd.f32 %v1318_v8, %v966_v35  ;;  %v1231_v24 = vpack.c.b16 %v1214_v44, %v1213_v9  ;;  %v2101_v35 = vshrl.u32 %v4816_v62, 16  ;;  %v2110_v8 = vshll.u32 %v4817_v23, 16 }
 0x141   : > { %4768 = vmatmul.msk.bf16.gmra.mxu3 %vm658_vm4, %v5144_v38  ;;  %v2094_v38 = vrot.slane %v2093_v56, 4  ;;  %v5197_v56 = vld [vmem:[%s5290_s27 + $0x14] sm:$0x1]  ;;  %v2089_v9 = vsel %vm5302_vm3, %v2084_v21, %v5871_v16 }
 0x142   : > { %v2103_v62 = vrot.slane %v2101_v35, 4  ;;  %v2154_v21 = vunpack.c.l.b16 %v2089_v9 }
 0x143   : > { %v2259_v60 = vpop.f32.mrf.mxu0  ;;  %v2099_v44 = vsel %vm5302_vm3, %v2094_v38, %v2098_v20 }
 0x144   : > { %v1605_v47 = vpop.f32.mrf.mxu3  ;;  %v970_v48 = vpop.f32.mrf.mxu1  ;;  %v2155_v38 = vunpack.c.l.b16 %v2099_v44 }
 0x145   : > { %v1670_v52 = vadd.f32 %v1605_v47, %v1383_v14  ;;  %v2114_v14 = vshrl.u32 %v4817_v23, 16  ;;  %v2415_v47 = vrot.slane %v5197_v56, 5  ;;  %v5901_v23 = vrot.slane %v2110_v8, 5 }
 0x146   : > { %4833 = vmatmul.msk.bf16.gmra.mxu0 %vm658_vm4, %v2171_v58  ;;  %v5196_v58 = vld [vmem:[%s5290_s27 + $0xbc] sm:$0x1]  ;;  %v1180_v56 = vrot.slane %v1178_v41, 4  ;;  %v971_v16 = vadd.f32 %v970_v48, %v5644_v53 }
 0x147   : > { %v1320_v61 = vpop.f32.mrf.mxu2  ;;  %4623 = vmatmul.msk.bf16.gmra.mxu1 %vm658_vm4, %v5129_v34  ;;  %v5889_v5 = vadd.f32 %v2259_v60, %v1670_v52  ;;  %v1181_v28 = vrot.slane %v5196_v58, 5  ;;  %v2106_v52 = vrot.slane %v2104_v3, 5  ;;  %v2116_v30 = vrot.slane %v2114_v14, 4 }
 0x148   : > { %v1384_v51 = vadd.f32 %v1320_v61, %v968_v19  ;;  %v4836_v19 = vld [vmem:[%s5290_s27 + $0xc] sm:$0xe]  ;;  %v4640_v58 = vrot.slane %v1035_v11, 9  ;;  %v2416_v3 = vsel %vm5476_vm7, %v2414_v4, %v2415_v47  ;;  %v4998_v4 = vld [vmem:[%s5290_s27 + $0x18] sm:$0xf] }
 0x149   : > { %7159 = vst [vmem:[#allocation2_spill] sm:$0xff] %v5889_v5  ;;  %v4852_v5 = vrot.slane %v4836_v19, 9  ;;  %v2107_v8 = vor.u32 %v2106_v52, %v2103_v62  ;;  %v2525_v11 = vunpack.c.l.b16 %v2416_v3  ;;  %v1182_v48 = vsel %vm5476_vm7, %v1180_v56, %v1181_v28  ;;  %v5130_v62 = vld [vmem:[%s5290_s27 + $0xb4] sm:$0xff]  ;;  %v5924_v52 = vld [vmem:[%s5290_s27 + $0x1c] sm:$0xf] }
 0x14a   : > { %v1179_v53 = vsel %vm5476_vm7, %v4640_v58, %v1178_v41  ;;  %v2117_v9 = vor.u32 %v2116_v30, %v5901_v23  ;;  %v1216_v41 = vunpack.c.l.b16 %v1182_v48  ;;  %v3080_v56 = vshrl.u32 %v4998_v4, 16 }
 0x14b   : > { %v2261_v34 = vpop.f32.mrf.mxu0  ;;  %v2413_v35 = vsel %vm5476_vm7, %v4852_v5, %v2412_v7  ;;  %v2172_v7 = vpack.c.b16 %v2155_v38, %v2154_v21  ;;  %v2108_v58 = vrot.slane %v2107_v8, 4  ;;  %v3083_v30 = vshll.u32 %v4998_v4, 16 }
 0x14c   : > { %v1607_v60 = vpop.f32.mrf.mxu3  ;;  %4656 = vmatmul.msk.bf16.gmra.mxu2 %vm658_vm4, %v1231_v24  ;;  %v972_v50 = vpop.f32.mrf.mxu1  ;;  %v4818_v24 = vld [vmem:[%s5290_s27 + $0xc8] sm:$0x1]  ;;  %v2524_v14 = vunpack.c.l.b16 %v2413_v35  ;;  %v2118_v28 = vrot.slane %v2117_v9, 4  ;;  %v3093_v38 = vshrl.u32 %v5924_v52, 16  ;;  %v3082_v8 = vrot.slane %v3080_v56, 4 }
 0x14d   : > { %v1671_v61 = vadd.f32 %v1607_v60, %v1384_v51  ;;  %v2120_v5 = vshll.u32 %v4818_v24, 16  ;;  %v973_v21 = vadd.f32 %v972_v50, %v5664_v17  ;;  %v2113_v17 = vsel %vm5302_vm3, %v2108_v58, %v5901_v23  ;;  %v5000_v9 = vld [vmem:[%s5290_s27 + $0x20] sm:$0x1]  ;;  %v5001_v56 = vld [vmem:[%s5290_s27 + $0x24] sm:$0xf] }
 0x14e   : > { %v5917_v44 = vpack.c.b16 %v2525_v11, %v2524_v14  ;;  %v3085_v14 = vrot.slane %v3083_v30, 5  ;;  %v3099_v58 = vshll.u32 %v5000_v9, 16  ;;  %v5944_v30 = vld [vmem:[%s5290_s27 + $0x28] sm:$0xf] }
 0x14f   : > { %v1323_v20 = vpop.f32.mrf.mxu2  ;;  %v5920_v47 = vadd.f32 %v2261_v34, %v1671_v61  ;;  %v2122_v34 = vrot.slane %v2120_v5, 5  ;;  %v3089_v61 = vshll.u32 %v5924_v52, 16 }
 0x150   : > { %v1385_v51 = vadd.f32 %v1323_v20, %v971_v16  ;;  %v1215_v16 = vunpack.c.l.b16 %v1179_v53  ;;  %v3095_v53 = vrot.slane %v3093_v38, 4  ;;  %v3101_v38 = vrot.slane %v3099_v58, 5 }
 0x151   : > { %4769 = vmatmul.msk.bf16.gmra.mxu3 %vm658_vm4, %v5145_v27  ;;  %v2123_v50 = vsel %vm5302_vm3, %v2118_v28, %v2122_v34  ;;  %v3091_v11 = vrot.slane %v3089_v61, 5 }
 0x152   : > { %v1232_v3 = vpack.c.b16 %v1216_v41, %v1215_v16  ;;  %v3086_v16 = vor.u32 %v3085_v14, %v3082_v8  ;;  %v3107_v8 = vshll.u32 %v5001_v56, 16  ;;  %v3113_v14 = vshll.u32 %v5944_v30, 16 }
 0x153   : > { %v2264_v60 = vpop.f32.mrf.mxu0  ;;  %v3096_v41 = vor.u32 %v3095_v53, %v3091_v11 }
 0x154   : > { %v1610_v19 = vpop.f32.mrf.mxu3  ;;  %v975_v27 = vpop.f32.mrf.mxu1  ;;  %v3087_v34 = vrot.slane %v3086_v16, 4 }
 0x155   : > { %v1672_v20 = vadd.f32 %v1610_v19, %v1385_v51  ;;  %v2157_v19 = vunpack.c.l.b16 %v2123_v50  ;;  %v976_v23 = vadd.f32 %v975_v27, %v5687_v2  ;;  %v3097_v61 = vrot.slane %v3096_v41, 4 }
 0x156   : > { %4834 = vmatmul.msk.bf16.gmra.mxu0 %vm658_vm4, %v2172_v7 }
 0x157   : > { %v1325_v24 = vpop.f32.mrf.mxu2  ;;  %4624 = vmatmul.msk.bf16.gmra.mxu1 %vm658_vm4, %v5130_v62  ;;  %v5931_v51 = vadd.f32 %v2264_v60, %v1672_v20  ;;  %v5146_v60 = vld [vmem:[%s5290_s27 + $0xc0] sm:$0xff]  ;;  %v2156_v62 = vunpack.c.l.b16 %v2113_v17  ;;  %v3117_v17 = vshrl.u32 %v5944_v30, 16  ;;  %v3102_v41 = vsel %vm5302_vm3, %v3097_v61, %v3101_v38  ;;  %v5970_v38 = vld [vmem:[%s5290_s27 + $0x2c] sm:$0x1] }
 0x158   : > { %v1386_v35 = vadd.f32 %v1325_v24, %v973_v21  ;;  %v5063_v24 = vld [vmem:[%s5290_s27 + $0x18] sm:$0xe]  ;;  %v3466_v61 = vunpack.c.l.b16 %v3102_v41 }
 0x159   : > { %v2173_v21 = vpack.c.b16 %v2157_v19, %v2156_v62  ;;  %v5199_v62 = vld [vmem:[%s5290_s27 + $0x20] sm:$0x1] }
 0x15a   : > { %v2422_v19 = vrot.slane %v5199_v62, 5 }
 0x15b   : > { %v2266_v48 = vpop.f32.mrf.mxu0 }
 0x15c   : > { %v1612_v7 = vpop.f32.mrf.mxu3  ;;  %4657 = vmatmul.msk.bf16.gmra.mxu2 %vm658_vm4, %v1232_v3  ;;  %v977_v5 = vpop.f32.mrf.mxu1  ;;  %v3104_v3 = vshrl.u32 %v5001_v56, 16 }
 0x15d   : > { %v1673_v4 = vadd.f32 %v1612_v7, %v1386_v35  ;;  %v3751_v35 = vrot.slane %v5924_v52, 5  ;;  %v5198_v7 = vld [vmem:[%s5290_s27 + $0x1c] sm:$0xf]  ;;  %v3092_v52 = vsel %vm5302_vm3, %v3087_v34, %v3091_v11  ;;  %v3119_v11 = vrot.slane %v3117_v17, 4 }
 0x15f   : > { %v1328_v20 = vpop.f32.mrf.mxu2  ;;  %v5949_v2 = vadd.f32 %v2266_v48, %v1673_v4  ;;  %v5079_v48 = vrot.slane %v5063_v24, 9  ;;  %v4837_v4 = vld [vmem:[%s5290_s27 + $0x18] sm:$0xe]  ;;  %v3753_v58 = vrot.slane %v3751_v35, 4 }
 0x160   : > { %v1387_v28 = vadd.f32 %v1328_v20, %v976_v23  ;;  %v978_v23 = vadd.f32 %v977_v5, %v5707_v29  ;;  %v3754_v20 = vrot.slane %v5000_v9, 5  ;;  %v5147_v24 = vld [vmem:[%s5290_s27 + $0x18] sm:$0xff]  ;;  %v3465_v5 = vunpack.c.l.b16 %v3092_v52 }
 0x161   : > { %4770 = vmatmul.msk.bf16.gmra.mxu3 %vm658_vm4, %v5146_v60  ;;  %7160 = vst [vmem:[#allocation3_spill] sm:$0xff] %v5949_v2  ;;  %v2419_v60 = vrot.slane %v5198_v7, 5  ;;  %v5964_v7 = vrot.slane %v3113_v14, 5  ;;  %v3752_v2 = vsel %vm5476_vm7, %v5079_v48, %v3751_v35  ;;  %v3123_v35 = vshll.u32 %v5970_v38, 16 }
 0x162   : > { %v3497_v48 = vpack.c.b16 %v3466_v61, %v3465_v5  ;;  %v5200_v5 = vld [vmem:[%s5290_s27 + $0x28] sm:$0xf] }
 0x163   : > { %v2269_v27 = vpop.f32.mrf.mxu0  ;;  %v2421_v62 = vrot.slane %v2419_v60, 4  ;;  %v2426_v61 = vrot.slane %v5200_v5, 5 }
 0x164   : > { %v1615_v50 = vpop.f32.mrf.mxu3  ;;  %v980_v53 = vpop.f32.mrf.mxu1 }
 0x165   : > { %v1674_v16 = vadd.f32 %v1615_v50, %v1387_v28  ;;  %v3106_v28 = vrot.slane %v3104_v3, 4  ;;  %v3109_v50 = vrot.slane %v3107_v8, 5  ;;  %v2423_v17 = vsel %vm5476_vm7, %v2421_v62, %v2422_v19  ;;  %v5989_v62 = vld [vmem:[%s5290_s27 + $0x34] sm:$0xf] }
 0x166   : > { %4835 = vmatmul.msk.bf16.gmra.mxu0 %vm658_vm4, %v2173_v21  ;;  %v4853_v21 = vrot.slane %v4837_v4, 9  ;;  %v981_v4 = vadd.f32 %v980_v53, %v5589_v37 }
 0x167   : > { %v1330_v56 = vpop.f32.mrf.mxu2  ;;  %4869 = vmatmul.msk.bf16.vlgmr.msra.gmra.mxu1 %vm658_vm4, %v5917_v44  ;;  %v5967_v29 = vadd.f32 %v2269_v27, %v1674_v16  ;;  %v3755_v44 = vsel %vm5476_vm7, %v3753_v58, %v3754_v20  ;;  %v3110_v3 = vor.u32 %v3109_v50, %v3106_v28  ;;  %v3120_v16 = vor.u32 %v3119_v11, %v5964_v7  ;;  %v5064_v11 = vld [vmem:[%s5290_s27 + $0x24] sm:$0xe] }
 0x168   : > { %v1388_v34 = vadd.f32 %v1330_v56, %v978_v23  ;;  %v2420_v27 = vsel %vm5476_vm7, %v4853_v21, %v2419_v60  ;;  %v3863_v23 = vunpack.c.l.b16 %v3752_v2  ;;  %v3864_v41 = vunpack.c.l.b16 %v3755_v44 }
 0x169   : > { %v2526_v20 = vunpack.c.l.b16 %v2420_v27  ;;  %v2527_v60 = vunpack.c.l.b16 %v2423_v17  ;;  %v3111_v28 = vrot.slane %v3110_v3, 4  ;;  %v3121_v19 = vrot.slane %v3120_v16, 4 }
 0x16a   : > { %v3125_v50 = vrot.slane %v3123_v35, 5  ;;  %v3758_v21 = vrot.slane %v5944_v30, 5  ;;  %v5080_v17 = vrot.slane %v5064_v11, 9  ;;  %v4838_v30 = vld [vmem:[%s5290_s27 + $0x24] sm:$0xe] }
 0x16b   : > { %v2271_v9 = vpop.f32.mrf.mxu0  ;;  %v2557_v53 = vpack.c.b16 %v2527_v60, %v2526_v20 }
 0x16c   : > { %v1617_v8 = vpop.f32.mrf.mxu3  ;;  %4982 = vmatmul.msk.bf16.vlgmr.msra.gmra.mxu2 %vm658_vm4, %v5147_v24  ;;  %v982_v14 = vpop.f32.mrf.mxu1  ;;  %v5004_v24 = vld [vmem:[%s5290_s27 + $0x30] sm:$0xf]  ;;  %v3126_v27 = vsel %vm5302_vm3, %v3121_v19, %v3125_v50  ;;  %v5148_v50 = vld [vmem:[%s5290_s27 + $0x24] sm:$0xff] }
 0x16d   : > { %v1675_v52 = vadd.f32 %v1617_v8, %v1388_v34  ;;  %v3895_v34 = vpack.c.b16 %v3864_v41, %v3863_v23  ;;  %v3116_v8 = vsel %vm5302_vm3, %v3111_v28, %v5964_v7  ;;  %v3128_v16 = vshrl.u32 %v5004_v24, 16  ;;  %v5201_v41 = vld [vmem:[%s5290_s27 + $0x2c] sm:$0x1] }
 0x16e   : > { %v3760_v23 = vrot.slane %v3758_v21, 4  ;;  %v3761_v7 = vrot.slane %v5970_v38, 5  ;;  %v3467_v60 = vunpack.c.l.b16 %v3116_v8  ;;  %v2428_v28 = vrot.slane %v2426_v61, 4 }
 0x16f   : > { %v1333_v58 = vpop.f32.mrf.mxu2  ;;  %v5991_v37 = vadd.f32 %v2271_v9, %v1675_v52  ;;  %v3131_v9 = vshll.u32 %v5004_v24, 16  ;;  %v3137_v52 = vshll.u32 %v5989_v62, 16  ;;  %v3468_v11 = vunpack.c.l.b16 %v3126_v27 }
 0x170   : > { %v1389_v56 = vadd.f32 %v1333_v58, %v981_v4  ;;  %v983_v4 = vadd.f32 %v982_v14, %v5610_v63  ;;  %v2429_v58 = vrot.slane %v5201_v41, 5  ;;  %v3759_v24 = vsel %vm5476_vm7, %v5080_v17, %v3758_v21 }
 0x171   : > { %5047 = vmatmul.msk.bf16.vlgmr.msra.gmra.mxu3 %vm658_vm4, %v3497_v48  ;;  %v3141_v48 = vshrl.u32 %v5989_v62, 16  ;;  %v3130_v63 = vrot.slane %v3128_v16, 4  ;;  %v3133_v14 = vrot.slane %v3131_v9, 5  ;;  %v6012_v38 = vrot.slane %v3137_v52, 5 }
 0x172   : > { %v2430_v27 = vsel %vm5476_vm7, %v2428_v28, %v2429_v58  ;;  %v3865_v17 = vunpack.c.l.b16 %v3759_v24  ;;  %v5065_v24 = vld [vmem:[%s5290_s27 + $0x30] sm:$0xe] }
 0x173   : > { %v2274_v2 = vpop.f32.mrf.mxu0  ;;  %v3143_v5 = vrot.slane %v3141_v48, 4  ;;  %v3134_v52 = vor.u32 %v3133_v14, %v3130_v63 }
 0x174   : > { %v1620_v44 = vpop.f32.mrf.mxu3  ;;  %v985_v3 = vpop.f32.mrf.mxu1 }
 0x175   : > { %v1676_v35 = vadd.f32 %v1620_v44, %v1389_v56  ;;  %v4854_v56 = vrot.slane %v4838_v30, 9  ;;  %v6021_v30 = vld [vmem:[%s5290_s27 + $0x38] sm:$0x1]  ;;  %v3144_v48 = vor.u32 %v3143_v5, %v6012_v38  ;;  %v3135_v28 = vrot.slane %v3134_v52, 4 }
 0x176   : > { %5096 = vmatmul.msk.bf16.vlgmr.msra.gmra.mxu0 %vm658_vm4, %v3895_v34 }
 0x177   : > { %v1335_v20 = vpop.f32.mrf.mxu2  ;;  %4870 = vmatmul.msk.bf16.gmra.mxu1 %vm658_vm4, %v2557_v53  ;;  %v6010_v34 = vadd.f32 %v2274_v2, %v1676_v35  ;;  %v3762_v53 = vsel %vm5476_vm7, %v3760_v23, %v3761_v7  ;;  %v2427_v8 = vsel %vm5476_vm7, %v4854_v56, %v2426_v61  ;;  %v3498_v2 = vpack.c.b16 %v3468_v11, %v3467_v60  ;;  %v6029_v56 = vld [vmem:[%s5290_s27 + $0x40] sm:$0xf] }
 0x178   : > { %v1390_v19 = vadd.f32 %v1335_v20, %v983_v4  ;;  %v3866_v9 = vunpack.c.l.b16 %v3762_v53  ;;  %v986_v61 = vadd.f32 %v985_v3, %v5627_v22  ;;  %v2528_v4 = vunpack.c.l.b16 %v2427_v8  ;;  %v5007_v20 = vld [vmem:[%s5290_s27 + $0x3c] sm:$0xf] }
 0x179   : > { %v2529_v23 = vunpack.c.l.b16 %v2430_v27  ;;  %v3147_v7 = vshll.u32 %v6021_v30, 16  ;;  %v3765_v22 = vrot.slane %v5989_v62, 5  ;;  %v3152_v14 = vshrl.u32 %v5007_v20, 16 }
 0x17a   : > { %v3896_v60 = vpack.c.b16 %v3866_v9, %v3865_v17  ;;  %v3155_v5 = vshll.u32 %v5007_v20, 16  ;;  %v3161_v53 = vshll.u32 %v6029_v56, 16  ;;  %v3165_v8 = vshrl.u32 %v6029_v56, 16  ;;  %v5203_v9 = vld [vmem:[%s5290_s27 + $0x38] sm:$0x1] }
 0x17b   : > { %v2276_v44 = vpop.f32.mrf.mxu0  ;;  %v3149_v11 = vrot.slane %v3147_v7, 5  ;;  %v2436_v52 = vrot.slane %v5203_v9, 5  ;;  %v3768_v62 = vrot.slane %v6021_v30, 5  ;;  %v3767_v7 = vrot.slane %v3765_v22, 4  ;;  %v6056_v9 = vld [vmem:[%s5290_s27 + $0x44] sm:$0x1] }
 0x17c   : > { %v1622_v21 = vpop.f32.mrf.mxu3  ;;  %4983 = vmatmul.msk.bf16.gmra.mxu2 %vm658_vm4, %v5148_v50  ;;  %v987_v16 = vpop.f32.mrf.mxu1  ;;  %v2558_v50 = vpack.c.b16 %v2529_v23, %v2528_v4  ;;  %v3140_v4 = vsel %vm5302_vm3, %v3135_v28, %v6012_v38  ;;  %v3157_v20 = vrot.slane %v3155_v5, 5  ;;  %v6050_v30 = vrot.slane %v3161_v53, 5 }
 0x17d   : > { %v1677_v35 = vadd.f32 %v1622_v21, %v1390_v19  ;;  %v3145_v19 = vrot.slane %v3144_v48, 4  ;;  %v3469_v38 = vunpack.c.l.b16 %v3140_v4 }
 0x17f   : > { %v1338_v41 = vpop.f32.mrf.mxu2  ;;  %v6034_v3 = vadd.f32 %v2276_v44, %v1677_v35  ;;  %v4839_v44 = vld [vmem:[%s5290_s27 + $0x30] sm:$0xe]  ;;  %v988_v35 = vadd.f32 %v987_v16, %v5648_v55  ;;  %v3150_v23 = vsel %vm5302_vm3, %v3145_v19, %v3149_v11 }
 0x180   : > { %v1391_v58 = vadd.f32 %v1338_v41, %v986_v61  ;;  %v5081_v61 = vrot.slane %v5065_v24, 9  ;;  %v3167_v24 = vrot.slane %v3165_v8, 4  ;;  %v4855_v55 = vrot.slane %v4839_v44, 9 }
 0x181   : > { %5048 = vmatmul.msk.bf16.gmra.mxu3 %vm658_vm4, %v3498_v2  ;;  %v5202_v2 = vld [vmem:[%s5290_s27 + $0x34] sm:$0xf]  ;;  %v3470_v28 = vunpack.c.l.b16 %v3150_v23 }
 0x182   : > { %v2433_v17 = vrot.slane %v5202_v2, 5  ;;  %v3766_v11 = vsel %vm5476_vm7, %v5081_v61, %v3765_v22  ;;  %v3171_v22 = vshll.u32 %v6056_v9, 16 }
 0x183   : > { %v2279_v63 = vpop.f32.mrf.mxu0  ;;  %v3499_v44 = vpack.c.b16 %v3470_v28, %v3469_v38  ;;  %v5204_v28 = vld [vmem:[%s5290_s27 + $0x40] sm:$0xf] }
 0x184   : > { %v1625_v27 = vpop.f32.mrf.mxu3  ;;  %v990_v21 = vpop.f32.mrf.mxu1  ;;  %v2435_v16 = vrot.slane %v2433_v17, 4 }
 0x185   : > { %v1678_v48 = vadd.f32 %v1625_v27, %v1391_v58  ;;  %v3154_v58 = vrot.slane %v3152_v14, 4  ;;  %v5149_v27 = vld [vmem:[%s5290_s27 + $0x30] sm:$0xff] }
 0x186   : > { %5097 = vmatmul.msk.bf16.gmra.mxu0 %vm658_vm4, %v3896_v60  ;;  %v2437_v8 = vsel %vm5476_vm7, %v2435_v16, %v2436_v52  ;;  %v6075_v16 = vld [vmem:[%s5290_s27 + $0x4c] sm:$0xf] }
 0x187   : > { %v1340_v41 = vpop.f32.mrf.mxu2  ;;  %4871 = vmatmul.msk.bf16.gmra.mxu1 %vm658_vm4, %v2558_v50  ;;  %v6053_v2 = vadd.f32 %v2279_v63, %v1678_v48  ;;  %v3769_v50 = vsel %vm5476_vm7, %v3767_v7, %v3768_v62  ;;  %v3158_v14 = vor.u32 %v3157_v20, %v3154_v58  ;;  %v2434_v63 = vsel %vm5476_vm7, %v4855_v55, %v2433_v17 }
 0x188   : > { %v1392_v60 = vadd.f32 %v1340_v41, %v988_v35  ;;  %v3168_v48 = vor.u32 %v3167_v24, %v6050_v30  ;;  %v991_v62 = vadd.f32 %v990_v21, %v5671_v26  ;;  %v3867_v35 = vunpack.c.l.b16 %v3766_v11  ;;  %v5066_v24 = vld [vmem:[%s5290_s27 + $0x3c] sm:$0xe] }
 0x189   : > { %v3868_v4 = vunpack.c.l.b16 %v3769_v50  ;;  %v2530_v7 = vunpack.c.l.b16 %v2434_v63  ;;  %v2531_v17 = vunpack.c.l.b16 %v2437_v8  ;;  %v3159_v58 = vrot.slane %v3158_v14, 4 }
 0x18a   : > { %v3169_v52 = vrot.slane %v3168_v48, 4  ;;  %v3173_v20 = vrot.slane %v3171_v22, 5  ;;  %v3772_v55 = vrot.slane %v6029_v56, 5  ;;  %v2440_v11 = vrot.slane %v5204_v28, 5  ;;  %v4840_v56 = vld [vmem:[%s5290_s27 + $0x3c] sm:$0xe] }
 0x18b   : > { %v2281_v19 = vpop.f32.mrf.mxu0  ;;  %v2559_v38 = vpack.c.b16 %v2531_v17, %v2530_v7  ;;  %v5082_v8 = vrot.slane %v5066_v24, 9 }
 0x18c   : > { %v1627_v5 = vpop.f32.mrf.mxu3  ;;  %4984 = vmatmul.msk.bf16.gmra.mxu2 %vm658_vm4, %v5149_v27  ;;  %v992_v53 = vpop.f32.mrf.mxu1  ;;  %v5010_v27 = vld [vmem:[%s5290_s27 + $0x48] sm:$0xf]  ;;  %v3174_v63 = vsel %vm5302_vm3, %v3169_v52, %v3173_v20  ;;  %v5150_v20 = vld [vmem:[%s5290_s27 + $0x3c] sm:$0xff] }
 0x18d   : > { %v1679_v61 = vadd.f32 %v1627_v5, %v1392_v60  ;;  %v3897_v60 = vpack.c.b16 %v3868_v4, %v3867_v35  ;;  %v3164_v5 = vsel %vm5302_vm3, %v3159_v58, %v6050_v30  ;;  %v3176_v48 = vshrl.u32 %v5010_v27, 16  ;;  %v5205_v4 = vld [vmem:[%s5290_s27 + $0x44] sm:$0x1] }
 0x18e   : > { %v3774_v35 = vrot.slane %v3772_v55, 4  ;;  %v3775_v30 = vrot.slane %v6056_v9, 5  ;;  %v3471_v17 = vunpack.c.l.b16 %v3164_v5  ;;  %v2442_v58 = vrot.slane %v2440_v11, 4 }
 0x18f   : > { %v1343_v23 = vpop.f32.mrf.mxu2  ;;  %v6077_v26 = vadd.f32 %v2281_v19, %v1679_v61  ;;  %v3179_v19 = vshll.u32 %v5010_v27, 16  ;;  %v3185_v61 = vshll.u32 %v6075_v16, 16  ;;  %v3472_v24 = vunpack.c.l.b16 %v3174_v63 }
 0x190   : > { %v1393_v41 = vadd.f32 %v1343_v23, %v991_v62  ;;  %v993_v62 = vadd.f32 %v992_v53, %v5689_v43  ;;  %v2443_v23 = vrot.slane %v5205_v4, 5  ;;  %v3773_v27 = vsel %vm5476_vm7, %v5082_v8, %v3772_v55 }
 0x191   : > { %5049 = vmatmul.msk.bf16.gmra.mxu3 %vm658_vm4, %v3499_v44  ;;  %v3189_v44 = vshrl.u32 %v6075_v16, 16  ;;  %v3178_v43 = vrot.slane %v3176_v48, 4  ;;  %v3181_v53 = vrot.slane %v3179_v19, 5  ;;  %v6098_v9 = vrot.slane %v3185_v61, 5 }
 0x192   : > { %v2444_v63 = vsel %vm5476_vm7, %v2442_v58, %v2443_v23  ;;  %v3869_v8 = vunpack.c.l.b16 %v3773_v27  ;;  %v5067_v27 = vld [vmem:[%s5290_s27 + $0x48] sm:$0xe] }
 0x193   : > { %v2284_v21 = vpop.f32.mrf.mxu0  ;;  %v3191_v28 = vrot.slane %v3189_v44, 4  ;;  %v3182_v61 = vor.u32 %v3181_v53, %v3178_v43 }
 0x194   : > { %v1630_v50 = vpop.f32.mrf.mxu3  ;;  %v995_v14 = vpop.f32.mrf.mxu1 }
 0x195   : > { %v1680_v22 = vadd.f32 %v1630_v50, %v1393_v41  ;;  %v4856_v41 = vrot.slane %v4840_v56, 9  ;;  %v6107_v56 = vld [vmem:[%s5290_s27 + $0x50] sm:$0x1]  ;;  %v3192_v44 = vor.u32 %v3191_v28, %v6098_v9  ;;  %v3183_v58 = vrot.slane %v3182_v61, 4 }
 0x196   : > { %5098 = vmatmul.msk.bf16.gmra.mxu0 %vm658_vm4, %v3897_v60 }
 0x197   : > { %v1345_v7 = vpop.f32.mrf.mxu2  ;;  %4872 = vmatmul.msk.bf16.gmra.mxu1 %vm658_vm4, %v2559_v38  ;;  %v6096_v60 = vadd.f32 %v2284_v21, %v1680_v22  ;;  %v3776_v38 = vsel %vm5476_vm7, %v3774_v35, %v3775_v30  ;;  %v2441_v5 = vsel %vm5476_vm7, %v4856_v41, %v2440_v11  ;;  %v3500_v21 = vpack.c.b16 %v3472_v24, %v3471_v17  ;;  %v6115_v41 = vld [vmem:[%s5290_s27 + $0x58] sm:$0xf] }
 0x198   : > { %v1394_v52 = vadd.f32 %v1345_v7, %v993_v62  ;;  %v3870_v19 = vunpack.c.l.b16 %v3776_v38  ;;  %v996_v11 = vadd.f32 %v995_v14, %v5710_v40  ;;  %v2532_v62 = vunpack.c.l.b16 %v2441_v5  ;;  %v5013_v7 = vld [vmem:[%s5290_s27 + $0x54] sm:$0xf] }
 0x199   : > { %v2533_v35 = vunpack.c.l.b16 %v2444_v63  ;;  %v3195_v30 = vshll.u32 %v6107_v56, 16  ;;  %v3779_v40 = vrot.slane %v6075_v16, 5  ;;  %v3200_v53 = vshrl.u32 %v5013_v7, 16 }
 0x19a   : > { %v3898_v17 = vpack.c.b16 %v3870_v19, %v3869_v8  ;;  %v3203_v28 = vshll.u32 %v5013_v7, 16  ;;  %v3209_v38 = vshll.u32 %v6115_v41, 16  ;;  %v3213_v5 = vshrl.u32 %v6115_v41, 16  ;;  %v5207_v19 = vld [vmem:[%s5290_s27 + $0x50] sm:$0x1] }
 0x19b   : > { %v2286_v50 = vpop.f32.mrf.mxu0  ;;  %v3197_v24 = vrot.slane %v3195_v30, 5  ;;  %v2450_v61 = vrot.slane %v5207_v19, 5  ;;  %v3782_v16 = vrot.slane %v6107_v56, 5  ;;  %v3781_v30 = vrot.slane %v3779_v40, 4  ;;  %v6142_v19 = vld [vmem:[%s5290_s27 + $0x5c] sm:$0x1] }
 0x19c   : > { %v1632_v55 = vpop.f32.mrf.mxu3  ;;  %4985 = vmatmul.msk.bf16.gmra.mxu2 %vm658_vm4, %v5150_v20  ;;  %v997_v48 = vpop.f32.mrf.mxu1  ;;  %v2560_v20 = vpack.c.b16 %v2533_v35, %v2532_v62  ;;  %v3188_v62 = vsel %vm5302_vm3, %v3183_v58, %v6098_v9  ;;  %v3205_v7 = vrot.slane %v3203_v28, 5  ;;  %v6136_v56 = vrot.slane %v3209_v38, 5 }
 0x19d   : > { %v1681_v22 = vadd.f32 %v1632_v55, %v1394_v52  ;;  %v3193_v52 = vrot.slane %v3192_v44, 4  ;;  %v3473_v9 = vunpack.c.l.b16 %v3188_v62 }
 0x19f   : > { %v1348_v4 = vpop.f32.mrf.mxu2  ;;  %v6120_v14 = vadd.f32 %v2286_v50, %v1681_v22  ;;  %v4841_v50 = vld [vmem:[%s5290_s27 + $0x48] sm:$0xe]  ;;  %v998_v22 = vadd.f32 %v997_v48, %v5725_v10  ;;  %v3198_v35 = vsel %vm5302_vm3, %v3193_v52, %v3197_v24 }
 0x1a0   : > { %v1395_v23 = vadd.f32 %v1348_v4, %v996_v11  ;;  %v5083_v11 = vrot.slane %v5067_v27, 9  ;;  %v3215_v27 = vrot.slane %v3213_v5, 4  ;;  %v4857_v10 = vrot.slane %v4841_v50, 9 }
 0x1a1   : > { %5050 = vmatmul.msk.bf16.gmra.mxu3 %vm658_vm4, %v3500_v21  ;;  %v5206_v21 = vld [vmem:[%s5290_s27 + $0x4c] sm:$0xf]  ;;  %v3474_v58 = vunpack.c.l.b16 %v3198_v35 }
 0x1a2   : > { %v2447_v8 = vrot.slane %v5206_v21, 5  ;;  %v3780_v24 = vsel %vm5476_vm7, %v5083_v11, %v3779_v40  ;;  %v3219_v40 = vshll.u32 %v6142_v19, 16 }
 0x1a3   : > { %v2289_v43 = vpop.f32.mrf.mxu0  ;;  %v3501_v50 = vpack.c.b16 %v3474_v58, %v3473_v9  ;;  %v5208_v58 = vld [vmem:[%s5290_s27 + $0x58] sm:$0xf] }
 0x1a4   : > { %v1635_v63 = vpop.f32.mrf.mxu3  ;;  %v1000_v55 = vpop.f32.mrf.mxu1  ;;  %v2449_v48 = vrot.slane %v2447_v8, 4 }
 0x1a5   : > { %v1682_v44 = vadd.f32 %v1635_v63, %v1395_v23  ;;  %v3202_v23 = vrot.slane %v3200_v53, 4  ;;  %v5151_v63 = vld [vmem:[%s5290_s27 + $0x48] sm:$0xff] }
 0x1a6   : > { %5099 = vmatmul.msk.bf16.gmra.mxu0 %vm658_vm4, %v3898_v17  ;;  %v2451_v5 = vsel %vm5476_vm7, %v2449_v48, %v2450_v61  ;;  %v6161_v48 = vld [vmem:[%s5290_s27 + $0x64] sm:$0xf] }
 0x1a7   : > { %v1350_v4 = vpop.f32.mrf.mxu2  ;;  %4873 = vmatmul.msk.bf16.gmra.mxu1 %vm658_vm4, %v2560_v20  ;;  %v6139_v21 = vadd.f32 %v2289_v43, %v1682_v44  ;;  %v3783_v20 = vsel %vm5476_vm7, %v3781_v30, %v3782_v16  ;;  %v3206_v53 = vor.u32 %v3205_v7, %v3202_v23  ;;  %v2448_v43 = vsel %vm5476_vm7, %v4857_v10, %v2447_v8 }
 0x1a8   : > { %v1396_v17 = vadd.f32 %v1350_v4, %v998_v22  ;;  %v3216_v44 = vor.u32 %v3215_v27, %v6136_v56  ;;  %v1001_v16 = vadd.f32 %v1000_v55, %v5601_v49  ;;  %v3871_v22 = vunpack.c.l.b16 %v3780_v24  ;;  %v5068_v27 = vld [vmem:[%s5290_s27 + $0x54] sm:$0xe] }
 0x1a9   : > { %v3872_v62 = vunpack.c.l.b16 %v3783_v20  ;;  %v2534_v30 = vunpack.c.l.b16 %v2448_v43  ;;  %v2535_v8 = vunpack.c.l.b16 %v2451_v5  ;;  %v3207_v23 = vrot.slane %v3206_v53, 4 }
 0x1aa   : > { %v3217_v61 = vrot.slane %v3216_v44, 4  ;;  %v3221_v7 = vrot.slane %v3219_v40, 5  ;;  %v3786_v10 = vrot.slane %v6115_v41, 5  ;;  %v2454_v24 = vrot.slane %v5208_v58, 5  ;;  %v4842_v41 = vld [vmem:[%s5290_s27 + $0x54] sm:$0xe] }
 0x1ab   : > { %v2291_v52 = vpop.f32.mrf.mxu0  ;;  %v2561_v9 = vpack.c.b16 %v2535_v8, %v2534_v30  ;;  %v5084_v5 = vrot.slane %v5068_v27, 9 }
 0x1ac   : > { %v1637_v28 = vpop.f32.mrf.mxu3  ;;  %4986 = vmatmul.msk.bf16.gmra.mxu2 %vm658_vm4, %v5151_v63  ;;  %v1002_v38 = vpop.f32.mrf.mxu1  ;;  %v5016_v63 = vld [vmem:[%s5290_s27 + $0x60] sm:$0xf]  ;;  %v3222_v43 = vsel %vm5302_vm3, %v3217_v61, %v3221_v7  ;;  %v5152_v7 = vld [vmem:[%s5290_s27 + $0x54] sm:$0xff] }
 0x1ad   : > { %v1683_v11 = vadd.f32 %v1637_v28, %v1396_v17  ;;  %v3899_v17 = vpack.c.b16 %v3872_v62, %v3871_v22  ;;  %v3212_v28 = vsel %vm5302_vm3, %v3207_v23, %v6136_v56  ;;  %v3224_v44 = vshrl.u32 %v5016_v63, 16  ;;  %v5209_v62 = vld [vmem:[%s5290_s27 + $0x5c] sm:$0x1] }
 0x1ae   : > { %v3788_v22 = vrot.slane %v3786_v10, 4  ;;  %v3789_v56 = vrot.slane %v6142_v19, 5  ;;  %v3475_v8 = vunpack.c.l.b16 %v3212_v28  ;;  %v2456_v23 = vrot.slane %v2454_v24, 4 }
 0x1af   : > { %v1353_v35 = vpop.f32.mrf.mxu2  ;;  %v6163_v49 = vadd.f32 %v2291_v52, %v1683_v11  ;;  %v3227_v52 = vshll.u32 %v5016_v63, 16  ;;  %v3233_v11 = vshll.u32 %v6161_v48, 16  ;;  %v3476_v27 = vunpack.c.l.b16 %v3222_v43 }
 0x1b0   : > { %v1397_v4 = vadd.f32 %v1353_v35, %v1001_v16  ;;  %v1003_v16 = vadd.f32 %v1002_v38, %v5620_v0  ;;  %v2457_v35 = vrot.slane %v5209_v62, 5  ;;  %v3787_v63 = vsel %vm5476_vm7, %v5084_v5, %v3786_v10 }
 0x1b1   : > { %5051 = vmatmul.msk.bf16.gmra.mxu3 %vm658_vm4, %v3501_v50  ;;  %v3237_v50 = vshrl.u32 %v6161_v48, 16  ;;  %v3226_v0 = vrot.slane %v3224_v44, 4  ;;  %v3229_v38 = vrot.slane %v3227_v52, 5  ;;  %v6184_v19 = vrot.slane %v3233_v11, 5 }
 0x1b2   : > { %v2458_v43 = vsel %vm5476_vm7, %v2456_v23, %v2457_v35  ;;  %v3873_v5 = vunpack.c.l.b16 %v3787_v63  ;;  %v5069_v63 = vld [vmem:[%s5290_s27 + $0x60] sm:$0xe] }
 0x1b3   : > { %v2294_v55 = vpop.f32.mrf.mxu0  ;;  %v3239_v58 = vrot.slane %v3237_v50, 4  ;;  %v3230_v11 = vor.u32 %v3229_v38, %v3226_v0 }
 0x1b4   : > { %v1640_v20 = vpop.f32.mrf.mxu3  ;;  %v1005_v53 = vpop.f32.mrf.mxu1 }
 0x1b5   : > { %v1684_v40 = vadd.f32 %v1640_v20, %v1397_v4  ;;  %v4858_v4 = vrot.slane %v4842_v41, 9  ;;  %v6193_v41 = vld [vmem:[%s5290_s27 + $0x68] sm:$0x1]  ;;  %v3240_v50 = vor.u32 %v3239_v58, %v6184_v19  ;;  %v3231_v23 = vrot.slane %v3230_v11, 4 }
 0x1b6   : > { %5100 = vmatmul.msk.bf16.gmra.mxu0 %vm658_vm4, %v3899_v17 }
 0x1b7   : > { %v1355_v30 = vpop.f32.mrf.mxu2  ;;  %4874 = vmatmul.msk.bf16.gmra.mxu1 %vm658_vm4, %v2561_v9  ;;  %v6182_v17 = vadd.f32 %v2294_v55, %v1684_v40  ;;  %v3790_v9 = vsel %vm5476_vm7, %v3788_v22, %v3789_v56  ;;  %v2455_v28 = vsel %vm5476_vm7, %v4858_v4, %v2454_v24  ;;  %v3502_v55 = vpack.c.b16 %v3476_v27, %v3475_v8  ;;  %v6201_v4 = vld [vmem:[%s5290_s27 + $0x70] sm:$0xf] }
 0x1b8   : > { %v1398_v61 = vadd.f32 %v1355_v30, %v1003_v16  ;;  %v3874_v52 = vunpack.c.l.b16 %v3790_v9  ;;  %v1006_v24 = vadd.f32 %v1005_v53, %v5641_v39  ;;  %v2536_v16 = vunpack.c.l.b16 %v2455_v28  ;;  %v5019_v30 = vld [vmem:[%s5290_s27 + $0x6c] sm:$0xf] }
 0x1b9   : > { %v2537_v22 = vunpack.c.l.b16 %v2458_v43  ;;  %v3243_v56 = vshll.u32 %v6193_v41, 16  ;;  %v3793_v39 = vrot.slane %v6161_v48, 5  ;;  %v3248_v38 = vshrl.u32 %v5019_v30, 16 }
 0x1ba   : > { %v3900_v8 = vpack.c.b16 %v3874_v52, %v3873_v5  ;;  %v3251_v58 = vshll.u32 %v5019_v30, 16  ;;  %v3257_v9 = vshll.u32 %v6201_v4, 16  ;;  %v3261_v28 = vshrl.u32 %v6201_v4, 16  ;;  %v5211_v52 = vld [vmem:[%s5290_s27 + $0x68] sm:$0x1] }
 0x1bb   : > { %v2296_v20 = vpop.f32.mrf.mxu0  ;;  %v3245_v27 = vrot.slane %v3243_v56, 5  ;;  %v2464_v11 = vrot.slane %v5211_v52, 5  ;;  %v3796_v48 = vrot.slane %v6193_v41, 5  ;;  %v3795_v56 = vrot.slane %v3793_v39, 4 }
 0x1bc   : > { %v1642_v10 = vpop.f32.mrf.mxu3  ;;  %4987 = vmatmul.msk.bf16.gmra.mxu2 %vm658_vm4, %v5152_v7  ;;  %v1007_v44 = vpop.f32.mrf.mxu1  ;;  %v2562_v7 = vpack.c.b16 %v2537_v22, %v2536_v16  ;;  %v3236_v16 = vsel %vm5302_vm3, %v3231_v23, %v6184_v19  ;;  %v3253_v30 = vrot.slane %v3251_v58, 5  ;;  %v3259_v41 = vrot.slane %v3257_v9, 5  ;;  %v6226_v23 = vld [vmem:[%s5290_s27 + $0x74] sm:$0x1] }
 0x1bd   : > { %v1685_v40 = vadd.f32 %v1642_v10, %v1398_v61  ;;  %v3241_v61 = vrot.slane %v3240_v50, 4  ;;  %v3477_v52 = vunpack.c.l.b16 %v3236_v16 }
 0x1bf   : > { %v1358_v62 = vpop.f32.mrf.mxu2  ;;  %v6206_v53 = vadd.f32 %v2296_v20, %v1685_v40  ;;  %v4843_v20 = vld [vmem:[%s5290_s27 + $0x60] sm:$0xe]  ;;  %v1008_v40 = vadd.f32 %v1007_v44, %v5660_v6  ;;  %v3246_v22 = vsel %vm5302_vm3, %v3241_v61, %v3245_v27 }
 0x1c0   : > { %v1399_v35 = vadd.f32 %v1358_v62, %v1006_v24  ;;  %v5085_v24 = vrot.slane %v5069_v63, 9  ;;  %v3263_v63 = vrot.slane %v3261_v28, 4  ;;  %v3478_v19 = vunpack.c.l.b16 %v3246_v22 }
 0x1c1   : > { %5052 = vmatmul.msk.bf16.gmra.mxu3 %vm658_vm4, %v3502_v55  ;;  %7161 = vst [vmem:[#allocation4_spill] sm:$0xff] %v6206_v53  ;;  %v5210_v55 = vld [vmem:[%s5290_s27 + $0x64] sm:$0xf] }
 0x1c2   : > { %v2461_v5 = vrot.slane %v5210_v55, 5  ;;  %v4859_v55 = vrot.slane %v4843_v20, 9  ;;  %v3794_v61 = vsel %vm5476_vm7, %v5085_v24, %v3793_v39  ;;  %v3264_v28 = vor.u32 %v3263_v63, %v3259_v41  ;;  %v5022_v63 = vld [vmem:[%s5290_s27 + $0x78] sm:$0xf] }
 0x1c3   : > { %v2299_v0 = vpop.f32.mrf.mxu0  ;;  %v3503_v24 = vpack.c.b16 %v3478_v19, %v3477_v52  ;;  %v3875_v20 = vunpack.c.l.b16 %v3794_v61 }
 0x1c4   : > { %v1645_v43 = vpop.f32.mrf.mxu3  ;;  %v1010_v10 = vpop.f32.mrf.mxu1  ;;  %v2463_v6 = vrot.slane %v2461_v5, 4 }
 0x1c5   : > { %v1686_v50 = vadd.f32 %v1645_v43, %v1399_v35  ;;  %v3250_v35 = vrot.slane %v3248_v38, 4 }
 0x1c6   : > { %5101 = vmatmul.msk.bf16.gmra.mxu0 %vm658_vm4, %v3900_v8  ;;  %v5153_v8 = vld [vmem:[%s5290_s27 + $0x60] sm:$0xff]  ;;  %v2465_v9 = vsel %vm5476_vm7, %v2463_v6, %v2464_v11  ;;  %v5070_v11 = vld [vmem:[%s5290_s27 + $0x6c] sm:$0xe] }
 0x1c7   : > { %v1360_v62 = vpop.f32.mrf.mxu2  ;;  %4875 = vmatmul.msk.bf16.gmra.mxu1 %vm658_vm4, %v2562_v7  ;;  %v6223_v44 = vadd.f32 %v2299_v0, %v1686_v50  ;;  %v3797_v7 = vsel %vm5476_vm7, %v3795_v56, %v3796_v48  ;;  %v3254_v27 = vor.u32 %v3253_v30, %v3250_v35  ;;  %v2462_v0 = vsel %vm5476_vm7, %v4859_v55, %v2461_v5  ;;  %v6244_v55 = vld [vmem:[%s5290_s27 + $0x7c] sm:$0xf] }
 0x1c8   : > { %v1400_v43 = vadd.f32 %v1360_v62, %v1008_v40  ;;  %v3267_v50 = vshll.u32 %v6226_v23, 16  ;;  %v1011_v48 = vadd.f32 %v1010_v10, %v5679_v45  ;;  %v3876_v40 = vunpack.c.l.b16 %v3797_v7 }
 0x1c9   : > { %v2538_v22 = vunpack.c.l.b16 %v2462_v0  ;;  %v2539_v56 = vunpack.c.l.b16 %v2465_v9  ;;  %v3255_v5 = vrot.slane %v3254_v27, 4  ;;  %v3265_v35 = vrot.slane %v3264_v28, 4  ;;  %v5212_v0 = vld [vmem:[%s5290_s27 + $0x70] sm:$0xf] }
 0x1ca   : > { %v3269_v30 = vrot.slane %v3267_v50, 5  ;;  %v5086_v52 = vrot.slane %v5070_v11, 9  ;;  %v2468_v9 = vrot.slane %v5212_v0, 5  ;;  %v3272_v28 = vshrl.u32 %v5022_v63, 16 }
 0x1cb   : > { %v2301_v53 = vpop.f32.mrf.mxu0  ;;  %v2563_v6 = vpack.c.b16 %v2539_v56, %v2538_v22  ;;  %v3260_v7 = vsel %vm5302_vm3, %v3255_v5, %v3259_v41  ;;  %v3275_v50 = vshll.u32 %v5022_v63, 16  ;;  %v5154_v5 = vld [vmem:[%s5290_s27 + $0x6c] sm:$0xff] }
 0x1cc   : > { %v1647_v38 = vpop.f32.mrf.mxu3  ;;  %4988 = vmatmul.msk.bf16.gmra.mxu2 %vm658_vm4, %v5153_v8  ;;  %v1012_v58 = vpop.f32.mrf.mxu1  ;;  %v3800_v8 = vrot.slane %v6201_v4, 5  ;;  %v3270_v27 = vsel %vm5302_vm3, %v3265_v35, %v3269_v30  ;;  %v2470_v35 = vrot.slane %v2468_v9, 4  ;;  %v5213_v30 = vld [vmem:[%s5290_s27 + $0x74] sm:$0x1] }
 0x1cd   : > { %v1687_v39 = vadd.f32 %v1647_v38, %v1400_v43  ;;  %v3901_v43 = vpack.c.b16 %v3876_v40, %v3875_v20  ;;  %v4844_v38 = vld [vmem:[%s5290_s27 + $0x6c] sm:$0xe]  ;;  %v3479_v40 = vunpack.c.l.b16 %v3260_v7  ;;  %v2471_v11 = vrot.slane %v5213_v30, 5  ;;  %v6271_v7 = vld [vmem:[%s5290_s27 + $0x80] sm:$0x1] }
 0x1ce   : > { %v3802_v41 = vrot.slane %v3800_v8, 4  ;;  %v3801_v22 = vsel %vm5476_vm7, %v5086_v52, %v3800_v8  ;;  %v4860_v56 = vrot.slane %v4844_v38, 9 }
 0x1cf   : > { %v1363_v16 = vpop.f32.mrf.mxu2  ;;  %v6246_v45 = vadd.f32 %v2301_v53, %v1687_v39  ;;  %v3281_v53 = vshll.u32 %v6244_v55, 16  ;;  %v3285_v39 = vshrl.u32 %v6244_v55, 16  ;;  %v2472_v0 = vsel %vm5476_vm7, %v2470_v35, %v2471_v11 }
 0x1d0   : > { %v1401_v62 = vadd.f32 %v1363_v16, %v1011_v48  ;;  %v3803_v48 = vrot.slane %v6226_v23, 5  ;;  %v3480_v16 = vunpack.c.l.b16 %v3270_v27  ;;  %v3877_v27 = vunpack.c.l.b16 %v3801_v22  ;;  %v6283_v22 = vld [vmem:[%s5290_s27 + $0x88] sm:$0xf] }
 0x1d1   : > { %5053 = vmatmul.msk.bf16.gmra.mxu3 %vm658_vm4, %v3503_v24  ;;  %v1013_v24 = vadd.f32 %v1012_v58, %v5702_v12  ;;  %v3274_v12 = vrot.slane %v3272_v28, 4  ;;  %v3277_v58 = vrot.slane %v3275_v50, 5  ;;  %v6266_v23 = vrot.slane %v3281_v53, 5 }
 0x1d2   : > { %v3504_v52 = vpack.c.b16 %v3480_v16, %v3479_v40  ;;  %v2469_v38 = vsel %vm5476_vm7, %v4860_v56, %v2468_v9  ;;  %v5025_v40 = vld [vmem:[%s5290_s27 + $0x84] sm:$0xf] }
 0x1d3   : > { %v2304_v10 = vpop.f32.mrf.mxu0  ;;  %v3278_v50 = vor.u32 %v3277_v58, %v3274_v12  ;;  %v3299_v58 = vshll.u32 %v5025_v40, 16 }
 0x1d4   : > { %v1650_v19 = vpop.f32.mrf.mxu3  ;;  %v1015_v61 = vpop.f32.mrf.mxu1 }
 0x1d5   : > { %v1688_v4 = vadd.f32 %v1650_v19, %v1401_v62  ;;  %v3279_v56 = vrot.slane %v3278_v50, 4 }
 0x1d6   : > { %5102 = vmatmul.msk.bf16.gmra.mxu0 %vm658_vm4, %v3901_v43  ;;  %v3287_v43 = vrot.slane %v3285_v39, 4  ;;  %v1016_v39 = vadd.f32 %v1015_v61, %v5721_v59  ;;  %v3807_v59 = vrot.slane %v6244_v55, 5  ;;  %v3296_v61 = vshrl.u32 %v5025_v40, 16 }
 0x1d7   : > { %v1365_v20 = vpop.f32.mrf.mxu2  ;;  %4876 = vmatmul.msk.bf16.gmra.mxu1 %vm658_vm4, %v2563_v6  ;;  %v6264_v63 = vadd.f32 %v2304_v10, %v1688_v4  ;;  %v3804_v6 = vsel %vm5476_vm7, %v3802_v41, %v3803_v48  ;;  %v2540_v48 = vunpack.c.l.b16 %v2469_v38  ;;  %v4845_v38 = vld [vmem:[%s5290_s27 + $0x78] sm:$0xe] }
 0x1d8   : > { %v1402_v62 = vadd.f32 %v1365_v20, %v1013_v24  ;;  %v3878_v4 = vunpack.c.l.b16 %v3804_v6  ;;  %v3288_v53 = vor.u32 %v3287_v43, %v6266_v23  ;;  %v3291_v24 = vshll.u32 %v6271_v7, 16 }
 0x1d9   : > { %v2541_v20 = vunpack.c.l.b16 %v2472_v0  ;;  %v3305_v43 = vshll.u32 %v6283_v22, 16  ;;  %v3309_v6 = vshrl.u32 %v6283_v22, 16  ;;  %v5214_v0 = vld [vmem:[%s5290_s27 + $0x7c] sm:$0xf] }
 0x1da   : > { %v3902_v9 = vpack.c.b16 %v3878_v4, %v3877_v27  ;;  %v3293_v35 = vrot.slane %v3291_v24, 5  ;;  %v2475_v4 = vrot.slane %v5214_v0, 5  ;;  %v3809_v24 = vrot.slane %v3807_v59, 4 }
 0x1db   : > { %v2306_v19 = vpop.f32.mrf.mxu0  ;;  %v2564_v12 = vpack.c.b16 %v2541_v20, %v2540_v48  ;;  %v3301_v20 = vrot.slane %v3299_v58, 5  ;;  %v3307_v40 = vrot.slane %v3305_v43, 5 }
 0x1dc   : > { %v1652_v8 = vpop.f32.mrf.mxu3  ;;  %4989 = vmatmul.msk.bf16.gmra.mxu2 %vm658_vm4, %v5154_v5  ;;  %v1017_v10 = vpop.f32.mrf.mxu1  ;;  %v5071_v5 = vld [vmem:[%s5290_s27 + $0x78] sm:$0xe] }
 0x1dd   : > { %v1689_v28 = vadd.f32 %v1652_v8, %v1402_v62  ;;  %v3289_v62 = vrot.slane %v3288_v53, 4  ;;  %v5087_v27 = vrot.slane %v5071_v5, 9  ;;  %v1018_v53 = vadd.f32 %v1017_v10, %v5738_v32  ;;  %v5215_v5 = vld [vmem:[%s5290_s27 + $0x80] sm:$0x1] }
 0x1df   : > { %v1368_v41 = vpop.f32.mrf.mxu2  ;;  %v6288_v30 = vadd.f32 %v2306_v19, %v1689_v28  ;;  %v3284_v19 = vsel %vm5302_vm3, %v3279_v56, %v6266_v23  ;;  %v3810_v28 = vrot.slane %v6271_v7, 5  ;;  %v3311_v23 = vrot.slane %v3309_v6, 4  ;;  %v5155_v56 = vld [vmem:[%s5290_s27 + $0x78] sm:$0xff] }
 0x1e0   : > { %v1403_v16 = vadd.f32 %v1368_v41, %v1016_v39  ;;  %v3294_v39 = vsel %vm5302_vm3, %v3289_v62, %v3293_v35  ;;  %v3298_v41 = vrot.slane %v3296_v61, 4  ;;  %v2477_v7 = vrot.slane %v2475_v4, 4  ;;  %v6309_v62 = vld [vmem:[%s5290_s27 + $0x8c] sm:$0x1] }
 0x1e1   : > { %5054 = vmatmul.msk.bf16.gmra.mxu3 %vm658_vm4, %v3504_v52  ;;  %v3481_v32 = vunpack.c.l.b16 %v3284_v19  ;;  %v3482_v10 = vunpack.c.l.b16 %v3294_v39  ;;  %v3808_v61 = vsel %vm5476_vm7, %v5087_v27, %v3807_v59  ;;  %v3315_v0 = vshll.u32 %v6309_v62, 16 }
 0x1e2   : > { %v3302_v58 = vor.u32 %v3301_v20, %v3298_v41  ;;  %v3879_v19 = vunpack.c.l.b16 %v3808_v61 }
 0x1e3   : > { %v2309_v11 = vpop.f32.mrf.mxu0  ;;  %v3505_v27 = vpack.c.b16 %v3482_v10, %v3481_v32  ;;  %v3317_v20 = vrot.slane %v3315_v0, 5  ;;  %v4846_v0 = vld [vmem:[%s5290_s27 + $0x84] sm:$0xe] }
 0x1e4   : > { %v1655_v8 = vpop.f32.mrf.mxu3  ;;  %v2632_v52 = vpop.f32.mrf.mxu1  ;;  %v3303_v41 = vrot.slane %v3302_v58, 4 }
 0x1e5   : > { %v1690_v50 = vadd.f32 %v1655_v8, %v1403_v16  ;;  %v2712_v55 = vadd.f32 %v2632_v52, %v5755_v46  ;;  %v4861_v46 = vrot.slane %v4845_v38, 9  ;;  %v3312_v38 = vor.u32 %v3311_v23, %v3307_v40 }
 0x1e6   : > { %5103 = vmatmul.msk.bf16.gmra.mxu0 %vm658_vm4, %v3902_v9  ;;  %v2478_v9 = vrot.slane %v5215_v5, 5  ;;  %v3814_v23 = vrot.slane %v6283_v22, 5 }
 0x1e7   : > { %v1370_v48 = vpop.f32.mrf.mxu2  ;;  %4877 = vmatmul.msk.bf16.gmra.mxu1 %vm658_vm4, %v2564_v12  ;;  %v6306_v8 = vadd.f32 %v2309_v11, %v1690_v50  ;;  %v3811_v12 = vsel %vm5476_vm7, %v3809_v24, %v3810_v28  ;;  %v2476_v11 = vsel %vm5476_vm7, %v4861_v46, %v2475_v4  ;;  %v3313_v46 = vrot.slane %v3312_v38, 4 }
 0x1e8   : > { %v1404_v16 = vadd.f32 %v1370_v48, %v1018_v53  ;;  %v2479_v52 = vsel %vm5476_vm7, %v2477_v7, %v2478_v9  ;;  %v3880_v28 = vunpack.c.l.b16 %v3811_v12  ;;  %v2542_v39 = vunpack.c.l.b16 %v2476_v11  ;;  %v5072_v48 = vld [vmem:[%s5290_s27 + $0x84] sm:$0xe]  ;;  %v5216_v11 = vld [vmem:[%s5290_s27 + $0x88] sm:$0xf] }
 0x1e9   : > { %v2543_v24 = vunpack.c.l.b16 %v2479_v52  ;;  %v5088_v7 = vrot.slane %v5072_v48, 9  ;;  %v3318_v58 = vsel %vm5302_vm3, %v3313_v46, %v3317_v20  ;;  %v2482_v52 = vrot.slane %v5216_v11, 5  ;;  %v5217_v46 = vld [vmem:[%s5290_s27 + $0x8c] sm:$0x1] }
 0x1ea   : > { %v4862_v48 = vrot.slane %v4846_v0, 9  ;;  %v2485_v20 = vrot.slane %v5217_v46, 5 }
 0x1eb   : > { %v2311_v35 = vpop.f32.mrf.mxu0  ;;  %v2565_v32 = vpack.c.b16 %v2543_v24, %v2542_v39 }
 0x1ec   : > { %v1657_v43 = vpop.f32.mrf.mxu3  ;;  %4990 = vmatmul.msk.bf16.gmra.mxu2 %vm658_vm4, %v5155_v56  ;;  %v2634_v6 = vpop.f32.mrf.mxu1  ;;  %v5028_v56 = vld [vmem:[%s5290_s27 + $0x90] sm:$0xf] }
 0x1ed   : > { %v1691_v59 = vadd.f32 %v1657_v43, %v1404_v16  ;;  %v2713_v50 = vadd.f32 %v2634_v6, %v5768_v42  ;;  %v3903_v16 = vpack.c.b16 %v3880_v28, %v3879_v19  ;;  %v6327_v42 = vld [vmem:[%s5290_s27 + $0x94] sm:$0xf]  ;;  %v3320_v10 = vshrl.u32 %v5028_v56, 16 }
 0x1ee   : > { %v3323_v61 = vshll.u32 %v5028_v56, 16  ;;  %v3816_v43 = vrot.slane %v3814_v23, 4  ;;  %v3817_v6 = vrot.slane %v6309_v62, 5  ;;  %v3815_v19 = vsel %vm5476_vm7, %v5088_v7, %v3814_v23  ;;  %v6354_v7 = vld [vmem:[%s5290_s27 + $0x98] sm:$0x1] }
 0x1ef   : > { %v2919_v53 = vpop.f32.mrf.mxu2  ;;  %v6329_v5 = vadd.f32 %v2311_v35, %v1691_v59  ;;  %v3333_v59 = vshrl.u32 %v6327_v42, 16 }
 0x1f0   : > { %v2999_v4 = vadd.f32 %v2919_v53, %v2712_v55  ;;  %v3308_v55 = vsel %vm5302_vm3, %v3303_v41, %v3307_v40  ;;  %v3329_v40 = vshll.u32 %v6327_v42, 16  ;;  %v3484_v53 = vunpack.c.l.b16 %v3318_v58  ;;  %v5156_v41 = vld [vmem:[%s5290_s27 + $0x84] sm:$0xff] }
 0x1f1   : > { %5055 = vmatmul.msk.bf16.gmra.mxu3 %vm658_vm4, %v3505_v27  ;;  %7162 = vst [vmem:[#allocation5_spill] sm:$0xff] %v6329_v5  ;;  %v3483_v27 = vunpack.c.l.b16 %v3308_v55  ;;  %v3325_v39 = vrot.slane %v3323_v61, 5  ;;  %v3818_v56 = vsel %vm5476_vm7, %v3816_v43, %v3817_v6  ;;  %v3335_v23 = vrot.slane %v3333_v59, 4 }
 0x1f3   : > { %v3971_v9 = vpop.f32.mrf.mxu0  ;;  %v3506_v55 = vpack.c.b16 %v3484_v53, %v3483_v27 }
 0x1f4   : > { %v3573_v12 = vpop.f32.mrf.mxu3  ;;  %v2637_v22 = vpop.f32.mrf.mxu1 }
 0x1f5   : > { %v3653_v35 = vadd.f32 %v3573_v12, %v2999_v4  ;;  %v2714_v38 = vadd.f32 %v2637_v22, %v5781_v15  ;;  %v3322_v15 = vrot.slane %v3320_v10, 4  ;;  %v2484_v4 = vrot.slane %v2482_v52, 4 }
 0x1f6   : > { %5104 = vmatmul.msk.bf16.gmra.mxu0 %vm658_vm4, %v3903_v16  ;;  %v6351_v16 = vrot.slane %v3329_v40, 5  ;;  %v2483_v12 = vsel %vm5476_vm7, %v4862_v48, %v2482_v52 }
 0x1f7   : > { %v6344_v62 = vadd.f32 %v3971_v9, %v3653_v35  ;;  %v2921_v28 = vpop.f32.mrf.mxu2  ;;  %4878 = vmatmul.msk.bf16.gmra.mxu1 %vm658_vm4, %v2565_v32  ;;  %v3881_v32 = vunpack.c.l.b16 %v3815_v19  ;;  %v2486_v22 = vsel %vm5476_vm7, %v2484_v4, %v2485_v20  ;;  %v3326_v58 = vor.u32 %v3325_v39, %v3322_v15  ;;  %v5031_v19 = vld [vmem:[%s5290_s27 + $0x9c] sm:$0xf] }
 0x1f8   : > { %v3000_v24 = vadd.f32 %v2921_v28, %v2713_v50  ;;  %v3882_v50 = vunpack.c.l.b16 %v3818_v56  ;;  %v3336_v11 = vor.u32 %v3335_v23, %v6351_v16  ;;  %v3339_v35 = vshll.u32 %v6354_v7, 16  ;;  %v6368_v28 = vld [vmem:[%s5290_s27 + $0xa0] sm:$0xf] }
 0x1f9   : > { %v2544_v59 = vunpack.c.l.b16 %v2483_v12  ;;  %v2545_v27 = vunpack.c.l.b16 %v2486_v22  ;;  %v3327_v15 = vrot.slane %v3326_v58, 4  ;;  %v3353_v48 = vshll.u32 %v6368_v28, 16  ;;  %v4847_v22 = vld [vmem:[%s5290_s27 + $0x90] sm:$0xe] }
 0x1fa   : > { %v3904_v53 = vpack.c.b16 %v3882_v50, %v3881_v32  ;;  %v3341_v39 = vrot.slane %v3339_v35, 5  ;;  %v3357_v4 = vshrl.u32 %v6368_v28, 16  ;;  %v3821_v56 = vrot.slane %v6327_v42, 5 }
 0x1fb   : > { %v3973_v9 = vpop.f32.mrf.mxu0  ;;  %v2566_v20 = vpack.c.b16 %v2545_v27, %v2544_v59  ;;  %v3824_v59 = vrot.slane %v6354_v7, 5 }
 0x1fc   : > { %v3575_v10 = vpop.f32.mrf.mxu3  ;;  %4991 = vmatmul.msk.bf16.gmra.mxu2 %vm658_vm4, %v5156_v41  ;;  %v2639_v61 = vpop.f32.mrf.mxu1  ;;  %v3347_v41 = vshll.u32 %v5031_v19, 16 }
 0x1fd   : > { %v3654_v43 = vadd.f32 %v3575_v10, %v3000_v24  ;;  %v2715_v6 = vadd.f32 %v2639_v61, %v5794_v13  ;;  %v3337_v13 = vrot.slane %v3336_v11, 4  ;;  %v3344_v24 = vshrl.u32 %v5031_v19, 16  ;;  %v5218_v10 = vld [vmem:[%s5290_s27 + $0x94] sm:$0xf] }
 0x1fe   : > { %v3332_v61 = vsel %vm5302_vm3, %v3327_v15, %v6351_v16  ;;  %v3349_v58 = vrot.slane %v3347_v41, 5  ;;  %v3359_v11 = vrot.slane %v3357_v4, 4  ;;  %v3823_v16 = vrot.slane %v3821_v56, 4  ;;  %v5157_v19 = vld [vmem:[%s5290_s27 + $0x90] sm:$0xff] }
 0x1ff   : > { %v6364_v0 = vadd.f32 %v3973_v9, %v3654_v43  ;;  %v2924_v40 = vpop.f32.mrf.mxu2  ;;  %v5073_v9 = vld [vmem:[%s5290_s27 + $0x90] sm:$0xe]  ;;  %v3342_v12 = vsel %vm5302_vm3, %v3337_v13, %v3341_v39  ;;  %v3346_v42 = vrot.slane %v3344_v24, 4  ;;  %v6384_v43 = vrot.slane %v3353_v48, 5  ;;  %v6393_v39 = vld [vmem:[%s5290_s27 + $0xa4] sm:$0x1] }
 0x200   : > { %v3001_v52 = vadd.f32 %v2924_v40, %v2714_v38  ;;  %v5089_v40 = vrot.slane %v5073_v9, 9  ;;  %v3485_v24 = vunpack.c.l.b16 %v3332_v61  ;;  %v3486_v41 = vunpack.c.l.b16 %v3342_v12 }
 0x201   : > { %5056 = vmatmul.msk.bf16.gmra.mxu3 %vm658_vm4, %v3506_v55  ;;  %v2489_v55 = vrot.slane %v5218_v10, 5  ;;  %v3350_v48 = vor.u32 %v3349_v58, %v3346_v42  ;;  %v3360_v4 = vor.u32 %v3359_v11, %v6384_v43  ;;  %v3825_v7 = vsel %vm5476_vm7, %v3823_v16, %v3824_v59 }
 0x202   : > { %v3507_v61 = vpack.c.b16 %v3486_v41, %v3485_v24 }
 0x203   : > { %v3976_v46 = vpop.f32.mrf.mxu0  ;;  %v2491_v15 = vrot.slane %v2489_v55, 4  ;;  %v3351_v42 = vrot.slane %v3350_v48, 4  ;;  %v3361_v58 = vrot.slane %v3360_v4, 4 }
 0x204   : > { %v3578_v23 = vpop.f32.mrf.mxu3  ;;  %v2642_v38 = vpop.f32.mrf.mxu1 }
 0x205   : > { %v3655_v32 = vadd.f32 %v3578_v23, %v3001_v52  ;;  %v2716_v50 = vadd.f32 %v2642_v38, %v5807_v57  ;;  %v4863_v52 = vrot.slane %v4847_v22, 9  ;;  %v3884_v22 = vunpack.c.l.b16 %v3825_v7 }
 0x206   : > { %5105 = vmatmul.msk.bf16.gmra.mxu0 %vm658_vm4, %v3904_v53  ;;  %v5219_v53 = vld [vmem:[%s5290_s27 + $0x98] sm:$0x1]  ;;  %v3831_v7 = vrot.slane %v6393_v39, 5 }
 0x207   : > { %v6386_v35 = vadd.f32 %v3976_v46, %v3655_v32  ;;  %v2926_v57 = vpop.f32.mrf.mxu2  ;;  %4879 = vmatmul.msk.bf16.gmra.mxu1 %vm658_vm4, %v2566_v20  ;;  %v2492_v13 = vrot.slane %v5219_v53, 5  ;;  %v3822_v20 = vsel %vm5476_vm7, %v5089_v40, %v3821_v56  ;;  %v2490_v9 = vsel %vm5476_vm7, %v4863_v52, %v2489_v55  ;;  %v5074_v55 = vld [vmem:[%s5290_s27 + $0x9c] sm:$0xe] }
 0x208   : > { %v3002_v27 = vadd.f32 %v2926_v57, %v2715_v6  ;;  %v3363_v6 = vshll.u32 %v6393_v39, 16  ;;  %v3883_v12 = vunpack.c.l.b16 %v3822_v20  ;;  %v2546_v40 = vunpack.c.l.b16 %v2490_v9  ;;  %v4848_v9 = vld [vmem:[%s5290_s27 + $0x9c] sm:$0xe] }
 0x209   : > { %v2493_v10 = vsel %vm5476_vm7, %v2491_v15, %v2492_v13  ;;  %v3828_v52 = vrot.slane %v6368_v28, 5  ;;  %v3356_v15 = vsel %vm5302_vm3, %v3351_v42, %v6384_v43  ;;  %v5090_v53 = vrot.slane %v5074_v55, 9  ;;  %v6417_v13 = vld [vmem:[%s5290_s27 + $0xac] sm:$0xf]  ;;  %v5221_v55 = vld [vmem:[%s5290_s27 + $0xa4] sm:$0x1] }
 0x20a   : > { %v2547_v16 = vunpack.c.l.b16 %v2493_v10  ;;  %v3365_v59 = vrot.slane %v3363_v6, 5  ;;  %v5220_v6 = vld [vmem:[%s5290_s27 + $0xa0] sm:$0xf]  ;;  %v3377_v10 = vshll.u32 %v6417_v13, 16 }
 0x20b   : > { %v3978_v46 = vpop.f32.mrf.mxu0  ;;  %v3830_v20 = vrot.slane %v3828_v52, 4  ;;  %v3829_v42 = vsel %vm5476_vm7, %v5090_v53, %v3828_v52 }
 0x20c   : > { %v3580_v23 = vpop.f32.mrf.mxu3  ;;  %4992 = vmatmul.msk.bf16.gmra.mxu2 %vm658_vm4, %v5157_v19  ;;  %v2644_v38 = vpop.f32.mrf.mxu1  ;;  %v2567_v41 = vpack.c.b16 %v2547_v16, %v2546_v40  ;;  %v5158_v40 = vld [vmem:[%s5290_s27 + $0x9c] sm:$0xff]  ;;  %v4864_v16 = vrot.slane %v4848_v9, 9 }
 0x20d   : > { %v3656_v32 = vadd.f32 %v3580_v23, %v3002_v27  ;;  %v2717_v56 = vadd.f32 %v2644_v38, %v5820_v54  ;;  %v5034_v27 = vld [vmem:[%s5290_s27 + $0xa8] sm:$0xf]  ;;  %v3905_v54 = vpack.c.b16 %v3884_v22, %v3883_v12  ;;  %v2496_v23 = vrot.slane %v5220_v6, 5 }
 0x20e   : > { %v3368_v48 = vshrl.u32 %v5034_v27, 16  ;;  %v3371_v28 = vshll.u32 %v5034_v27, 16  ;;  %v3832_v27 = vsel %vm5476_vm7, %v3830_v20, %v3831_v7 }
 0x20f   : > { %v6407_v11 = vadd.f32 %v3978_v46, %v3656_v32  ;;  %v2929_v57 = vpop.f32.mrf.mxu2  ;;  %v3381_v32 = vshrl.u32 %v6417_v13, 16 }
 0x210   : > { %v3003_v19 = vadd.f32 %v2929_v57, %v2716_v50  ;;  %v3366_v50 = vsel %vm5302_vm3, %v3361_v58, %v3365_v59  ;;  %v3373_v58 = vrot.slane %v3371_v28, 5  ;;  %v2498_v59 = vrot.slane %v2496_v23, 4 }
 0x211   : > { %5057 = vmatmul.msk.bf16.gmra.mxu3 %vm658_vm4, %v3507_v61  ;;  %v3487_v61 = vunpack.c.l.b16 %v3356_v15  ;;  %v3488_v12 = vunpack.c.l.b16 %v3366_v50  ;;  %v3383_v15 = vrot.slane %v3381_v32, 4 }
 0x213   : > { %v3981_v24 = vpop.f32.mrf.mxu0  ;;  %v3508_v50 = vpack.c.b16 %v3488_v12, %v3487_v61  ;;  %v5037_v12 = vld [vmem:[%s5290_s27 + $0xb4] sm:$0xf] }
 0x214   : > { %v3583_v4 = vpop.f32.mrf.mxu3  ;;  %v2647_v46 = vpop.f32.mrf.mxu1 }
 0x215   : > { %v3657_v43 = vadd.f32 %v3583_v4, %v3003_v19  ;;  %v2718_v38 = vadd.f32 %v2647_v46, %v5833_v33  ;;  %v3370_v33 = vrot.slane %v3368_v48, 4  ;;  %v2499_v19 = vrot.slane %v5221_v55, 5 }
 0x216   : > { %5106 = vmatmul.msk.bf16.gmra.mxu0 %vm658_vm4, %v3905_v54  ;;  %v6437_v54 = vrot.slane %v3377_v10, 5  ;;  %v3885_v4 = vunpack.c.l.b16 %v3829_v42  ;;  %v2497_v48 = vsel %vm5476_vm7, %v4864_v16, %v2496_v23  ;;  %v3395_v16 = vshll.u32 %v5037_v12, 16 }
 0x217   : > { %v6428_v22 = vadd.f32 %v3981_v24, %v3657_v43  ;;  %v2931_v39 = vpop.f32.mrf.mxu2  ;;  %4880 = vmatmul.msk.bf16.gmra.mxu1 %vm658_vm4, %v2567_v41  ;;  %v6440_v24 = vld [vmem:[%s5290_s27 + $0xb0] sm:$0x1]  ;;  %v2500_v28 = vsel %vm5476_vm7, %v2498_v59, %v2499_v19  ;;  %v3374_v46 = vor.u32 %v3373_v58, %v3370_v33  ;;  %v2548_v32 = vunpack.c.l.b16 %v2497_v48 }
 0x218   : > { %v3004_v57 = vadd.f32 %v2931_v39, %v2717_v56  ;;  %v3886_v56 = vunpack.c.l.b16 %v3832_v27  ;;  %v3384_v6 = vor.u32 %v3383_v15, %v6437_v54  ;;  %v3387_v43 = vshll.u32 %v6440_v24, 16  ;;  %v6454_v39 = vld [vmem:[%s5290_s27 + $0xb8] sm:$0xf] }
 0x219   : > { %v2549_v61 = vunpack.c.l.b16 %v2500_v28  ;;  %v3375_v42 = vrot.slane %v3374_v46, 4  ;;  %v3401_v59 = vshll.u32 %v6454_v39, 16  ;;  %v3405_v55 = vshrl.u32 %v6454_v39, 16  ;;  %v4849_v46 = vld [vmem:[%s5290_s27 + $0xa8] sm:$0xe] }
 0x21a   : > { %v3906_v33 = vpack.c.b16 %v3886_v56, %v3885_v4  ;;  %v3385_v58 = vrot.slane %v3384_v6, 4  ;;  %v3835_v15 = vrot.slane %v6417_v13, 5  ;;  %v5222_v4 = vld [vmem:[%s5290_s27 + $0xac] sm:$0xf] }
 0x21b   : > { %v3983_v41 = vpop.f32.mrf.mxu0  ;;  %v2568_v27 = vpack.c.b16 %v2549_v61, %v2548_v32  ;;  %v3403_v6 = vrot.slane %v3401_v59, 5  ;;  %v6475_v61 = vld [vmem:[%s5290_s27 + $0xbc] sm:$0x1] }
 0x21c   : > { %v3585_v52 = vpop.f32.mrf.mxu3  ;;  %4993 = vmatmul.msk.bf16.gmra.mxu2 %vm658_vm4, %v5158_v40  ;;  %v2649_v53 = vpop.f32.mrf.mxu1  ;;  %v3392_v40 = vshrl.u32 %v5037_v12, 16  ;;  %v3837_v32 = vrot.slane %v3835_v15, 4 }
 0x21d   : > { %v3658_v20 = vadd.f32 %v3585_v52, %v3004_v57  ;;  %v2719_v7 = vadd.f32 %v2649_v53, %v5846_v31  ;;  %v3389_v31 = vrot.slane %v3387_v43, 5  ;;  %v5075_v57 = vld [vmem:[%s5290_s27 + $0xa8] sm:$0xe]  ;;  %v2503_v52 = vrot.slane %v5222_v4, 5 }
 0x21e   : > { %v5091_v28 = vrot.slane %v5075_v57, 9  ;;  %v3394_v13 = vrot.slane %v3392_v40, 4  ;;  %v3407_v43 = vrot.slane %v3405_v55, 4 }
 0x21f   : > { %v6450_v9 = vadd.f32 %v3983_v41, %v3658_v20  ;;  %v2934_v10 = vpop.f32.mrf.mxu2  ;;  %v3390_v48 = vsel %vm5302_vm3, %v3385_v58, %v3389_v31  ;;  %v3397_v20 = vrot.slane %v3395_v16, 5  ;;  %v2505_v58 = vrot.slane %v2503_v52, 4  ;;  %v5223_v31 = vld [vmem:[%s5290_s27 + $0xb0] sm:$0x1] }
 0x220   : > { %v3005_v23 = vadd.f32 %v2934_v10, %v2718_v38  ;;  %v3490_v40 = vunpack.c.l.b16 %v3390_v48  ;;  %v3836_v16 = vsel %vm5476_vm7, %v5091_v28, %v3835_v15  ;;  %v3408_v55 = vor.u32 %v3407_v43, %v3403_v6 }
 0x221   : > { %5058 = vmatmul.msk.bf16.gmra.mxu3 %vm658_vm4, %v3508_v50  ;;  %v3380_v50 = vsel %vm5302_vm3, %v3375_v42, %v6437_v54  ;;  %v4865_v42 = vrot.slane %v4849_v46, 9  ;;  %v3398_v59 = vor.u32 %v3397_v20, %v3394_v13 }
 0x222   : > { %v3489_v57 = vunpack.c.l.b16 %v3380_v50  ;;  %v3409_v13 = vrot.slane %v3408_v55, 4 }
 0x223   : > { %v3986_v19 = vpop.f32.mrf.mxu0  ;;  %v3399_v46 = vrot.slane %v3398_v59, 4 }
 0x224   : > { %v3588_v38 = vpop.f32.mrf.mxu3  ;;  %v2652_v41 = vpop.f32.mrf.mxu1  ;;  %v3509_v4 = vpack.c.b16 %v3490_v40, %v3489_v57  ;;  %v5076_v57 = vld [vmem:[%s5290_s27 + $0xb4] sm:$0xe]  ;;  %v3842_v40 = vrot.slane %v6454_v39, 5 }
 0x225   : > { %v3659_v56 = vadd.f32 %v3588_v38, %v3005_v23  ;;  %v2720_v53 = vadd.f32 %v2652_v41, %v5859_v1  ;;  %v3838_v1 = vrot.slane %v6440_v24, 5  ;;  %v5159_v23 = vld [vmem:[%s5290_s27 + $0xa8] sm:$0xff]  ;;  %v2504_v41 = vsel %vm5476_vm7, %v4865_v42, %v2503_v52 }
 0x226   : > { %5107 = vmatmul.msk.bf16.gmra.mxu0 %vm658_vm4, %v3906_v33  ;;  %v2506_v33 = vrot.slane %v5223_v31, 5 }
 0x227   : > { %v6470_v54 = vadd.f32 %v3986_v19, %v3659_v56  ;;  %v2936_v10 = vpop.f32.mrf.mxu2  ;;  %4881 = vmatmul.msk.bf16.gmra.mxu1 %vm658_vm4, %v2568_v27  ;;  %v3411_v19 = vshll.u32 %v6475_v61, 16  ;;  %v3839_v24 = vsel %vm5476_vm7, %v3837_v32, %v3838_v1  ;;  %v3887_v56 = vunpack.c.l.b16 %v3836_v16 }
 0x228   : > { %v3006_v12 = vadd.f32 %v2936_v10, %v2719_v7  ;;  %v2507_v50 = vsel %vm5476_vm7, %v2505_v58, %v2506_v33  ;;  %v3888_v28 = vunpack.c.l.b16 %v3839_v24  ;;  %v2550_v32 = vunpack.c.l.b16 %v2504_v41  ;;  %v6499_v58 = vld [vmem:[%s5290_s27 + $0xc4] sm:$0xf] }
 0x229   : > { %v3413_v20 = vrot.slane %v3411_v19, 5  ;;  %v2551_v1 = vunpack.c.l.b16 %v2507_v50  ;;  %v5224_v19 = vld [vmem:[%s5290_s27 + $0xb8] sm:$0xf]  ;;  %v3425_v41 = vshll.u32 %v6499_v58, 16  ;;  %v3429_v50 = vshrl.u32 %v6499_v58, 16 }
 0x22b   : > { %v3988_v27 = vpop.f32.mrf.mxu0  ;;  %v3414_v42 = vsel %vm5302_vm3, %v3409_v13, %v3413_v20  ;;  %v2569_v33 = vpack.c.b16 %v2551_v1, %v2550_v32  ;;  %v3844_v13 = vrot.slane %v3842_v40, 4  ;;  %v5160_v1 = vld [vmem:[%s5290_s27 + $0xb4] sm:$0xff] }
 0x22c   : > { %v3590_v38 = vpop.f32.mrf.mxu3  ;;  %4994 = vmatmul.msk.bf16.gmra.mxu2 %vm658_vm4, %v5159_v23  ;;  %v2654_v7 = vpop.f32.mrf.mxu1  ;;  %v5040_v23 = vld [vmem:[%s5290_s27 + $0xc0] sm:$0xf]  ;;  %v3492_v39 = vunpack.c.l.b16 %v3414_v42  ;;  %v3431_v42 = vrot.slane %v3429_v50, 4 }
 0x22d   : > { %v3660_v15 = vadd.f32 %v3590_v38, %v3006_v12  ;;  %v2721_v48 = vadd.f32 %v2654_v7, %v5873_v25  ;;  %v3907_v12 = vpack.c.b16 %v3888_v28, %v3887_v56  ;;  %v3404_v25 = vsel %vm5302_vm3, %v3399_v46, %v3403_v6  ;;  %v7163_v38 = vld [vmem:[#allocation2_spill] sm:$0xff]  ;;  %v4850_v6 = vld [vmem:[%s5290_s27 + $0xb4] sm:$0xe] }
 0x22e   : > { %v3416_v16 = vshrl.u32 %v5040_v23, 16  ;;  %v3845_v56 = vrot.slane %v6475_v61, 5 }
 0x22f   : > { %v6490_v43 = vadd.f32 %v3988_v27, %v3660_v15  ;;  %v2939_v10 = vpop.f32.mrf.mxu2  ;;  %v2510_v27 = vrot.slane %v5224_v19, 5  ;;  %v3491_v15 = vunpack.c.l.b16 %v3404_v25  ;;  %v3427_v25 = vrot.slane %v3425_v41, 5 }
 0x230   : > { %v3007_v52 = vadd.f32 %v2939_v10, %v2720_v53  ;;  %v3419_v53 = vshll.u32 %v5040_v23, 16  ;;  %v3418_v20 = vrot.slane %v3416_v16, 4 }
 0x231   : > { %5059 = vmatmul.msk.bf16.gmra.mxu3 %vm658_vm4, %v3509_v4  ;;  %v5092_v4 = vrot.slane %v5076_v57, 9  ;;  %v2512_v23 = vrot.slane %v2510_v27, 4  ;;  %v6516_v57 = vld [vmem:[%s5290_s27 + $0xc8] sm:$0x1] }
 0x232   : > { %v3421_v10 = vrot.slane %v3419_v53, 5  ;;  %v3435_v41 = vshll.u32 %v6516_v57, 16 }
 0x233   : > { %v3991_v31 = vpop.f32.mrf.mxu0  ;;  %v3843_v61 = vsel %vm5476_vm7, %v5092_v4, %v3842_v40  ;;  %v3432_v40 = vor.u32 %v3431_v42, %v3427_v25 }
 0x234   : > { %v3593_v59 = vpop.f32.mrf.mxu3  ;;  %v2657_v55 = vpop.f32.mrf.mxu1  ;;  %v3889_v50 = vunpack.c.l.b16 %v3843_v61  ;;  %v5226_v61 = vld [vmem:[%s5290_s27 + $0xc4] sm:$0xf] }
 0x235   : > { %v3661_v24 = vadd.f32 %v3593_v59, %v3007_v52  ;;  %v2722_v7 = vadd.f32 %v2657_v55, %v7163_v38  ;;  %v4866_v52 = vrot.slane %v4850_v6, 9  ;;  %v5225_v59 = vld [vmem:[%s5290_s27 + $0xbc] sm:$0x1] }
 0x236   : > { %5108 = vmatmul.msk.bf16.gmra.mxu0 %vm658_vm4, %v3907_v12  ;;  %v2513_v12 = vrot.slane %v5225_v59, 5  ;;  %v5043_v59 = vld [vmem:[%s5290_s27 + $0xcc] sm:$0xf] }
 0x237   : > { %v6510_v28 = vadd.f32 %v3991_v31, %v3661_v24  ;;  %v2941_v46 = vpop.f32.mrf.mxu2  ;;  %4882 = vmatmul.msk.bf16.gmra.mxu1 %vm658_vm4, %v2569_v33  ;;  %v3846_v31 = vsel %vm5476_vm7, %v3844_v13, %v3845_v56  ;;  %v2511_v53 = vsel %vm5476_vm7, %v4866_v52, %v2510_v27  ;;  %v3422_v24 = vor.u32 %v3421_v10, %v3418_v20 }
 0x238   : > { %v3008_v32 = vadd.f32 %v2941_v46, %v2721_v48  ;;  %v3510_v48 = vpack.c.b16 %v3492_v39, %v3491_v15  ;;  %v2514_v19 = vsel %vm5476_vm7, %v2512_v23, %v2513_v12  ;;  %v3890_v4 = vunpack.c.l.b16 %v3846_v31  ;;  %v6536_v12 = vld [vmem:[%s5290_s27 + $0xd0] sm:$0xf] }
 0x239   : > { %v2552_v56 = vunpack.c.l.b16 %v2511_v53  ;;  %v2553_v27 = vunpack.c.l.b16 %v2514_v19  ;;  %v3423_v13 = vrot.slane %v3422_v24, 4  ;;  %v3433_v20 = vrot.slane %v3432_v40, 4 }
 0x23a   : > { %v3437_v10 = vrot.slane %v3435_v41, 5  ;;  %v3849_v23 = vrot.slane %v6499_v58, 5  ;;  %v2517_v31 = vrot.slane %v5226_v61, 5  ;;  %v4851_v58 = vld [vmem:[%s5290_s27 + $0xc0] sm:$0xe]  ;;  %v3440_v19 = vshrl.u32 %v5043_v59, 16 }
 0x23b   : > { %v3993_v55 = vpop.f32.mrf.mxu0  ;;  %v2570_v52 = vpack.c.b16 %v2553_v27, %v2552_v56  ;;  %v3443_v24 = vshll.u32 %v5043_v59, 16  ;;  %v4867_v56 = vrot.slane %v4851_v58, 9  ;;  %v7164_v58 = vld [vmem:[#allocation3_spill] sm:$0xff] }
 0x23c   : > { %v3595_v33 = vpop.f32.mrf.mxu3  ;;  %4995 = vmatmul.msk.bf16.gmra.mxu2 %vm658_vm4, %v5160_v1  ;;  %v2659_v16 = vpop.f32.mrf.mxu1  ;;  %v2519_v27 = vrot.slane %v2517_v31, 4 }
 0x23d   : > { %v3662_v38 = vadd.f32 %v3595_v33, %v3008_v32  ;;  %v2723_v6 = vadd.f32 %v2659_v16, %v5920_v47  ;;  %v3908_v47 = vpack.c.b16 %v3890_v4, %v3889_v50  ;;  %v5077_v32 = vld [vmem:[%s5290_s27 + $0xc0] sm:$0xe]  ;;  %v3438_v16 = vsel %vm5302_vm3, %v3433_v20, %v3437_v10 }
 0x23e   : > { %v5093_v53 = vrot.slane %v5077_v32, 9  ;;  %v3852_v50 = vrot.slane %v6516_v57, 5  ;;  %v3494_v10 = vunpack.c.l.b16 %v3438_v16  ;;  %v3442_v32 = vrot.slane %v3440_v19, 4 }
 0x23f   : > { %v6529_v15 = vadd.f32 %v3993_v55, %v3662_v38  ;;  %v2944_v39 = vpop.f32.mrf.mxu2  ;;  %v3449_v38 = vshll.u32 %v6536_v12, 16 }
 0x240   : > { %v3009_v46 = vadd.f32 %v2944_v39, %v2722_v7  ;;  %v3428_v7 = vsel %vm5302_vm3, %v3423_v13, %v3427_v25  ;;  %v3453_v25 = vshrl.u32 %v6536_v12, 16  ;;  %v5161_v39 = vld [vmem:[%s5290_s27 + $0xc0] sm:$0xff] }
 0x241   : > { %5060 = vmatmul.msk.bf16.gmra.mxu3 %vm658_vm4, %v3510_v48  ;;  %v3493_v20 = vunpack.c.l.b16 %v3428_v7  ;;  %v3451_v59 = vrot.slane %v3449_v38, 5  ;;  %v2518_v7 = vsel %vm5476_vm7, %v4867_v56, %v2517_v31 }
 0x243   : > { %v3996_v1 = vpop.f32.mrf.mxu0  ;;  %v3511_v16 = vpack.c.b16 %v3494_v10, %v3493_v20  ;;  %v3856_v10 = vrot.slane %v6536_v12, 5 }
 0x244   : > { %v3598_v42 = vpop.f32.mrf.mxu3  ;;  %v2662_v55 = vpop.f32.mrf.mxu1 }
 0x245   : > { %v3663_v33 = vadd.f32 %v3598_v42, %v3009_v46  ;;  %v2724_v48 = vadd.f32 %v2662_v55, %v5931_v51  ;;  %v3851_v51 = vrot.slane %v3849_v23, 4  ;;  %v5227_v46 = vld [vmem:[%s5290_s27 + $0xc8] sm:$0x1]  ;;  %v3455_v42 = vrot.slane %v3453_v25, 4  ;;  %v5045_v55 = vld [vmem:[%s5290_s27 + $0xd4] sm:$0x1] }
 0x246   : > { %5109 = vmatmul.msk.bf16.gmra.mxu0 %vm658_vm4, %v3908_v47  ;;  %v2520_v13 = vrot.slane %v5227_v46, 5  ;;  %v3850_v47 = vsel %vm5476_vm7, %v5093_v53, %v3849_v23 }
 0x247   : > { %v6548_v40 = vadd.f32 %v3996_v1, %v3663_v33  ;;  %v2946_v41 = vpop.f32.mrf.mxu2  ;;  %4883 = vmatmul.msk.bf16.gmra.mxu1 %vm658_vm4, %v2570_v52  ;;  %v3445_v1 = vrot.slane %v3443_v24, 5  ;;  %v3853_v57 = vsel %vm5476_vm7, %v3851_v51, %v3852_v50  ;;  %v3891_v53 = vunpack.c.l.b16 %v3850_v47 }
 0x248   : > { %v3010_v4 = vadd.f32 %v2946_v41, %v2723_v6  ;;  %v2521_v33 = vsel %vm5476_vm7, %v2519_v27, %v2520_v13  ;;  %v3892_v24 = vunpack.c.l.b16 %v3853_v57  ;;  %v3456_v25 = vor.u32 %v3455_v42, %v3451_v59 }
 0x249   : > { %v3446_v38 = vor.u32 %v3445_v1, %v3442_v32  ;;  %v3459_v41 = vshll.u32 %v5045_v55, 16  ;;  %v2555_v46 = vunpack.c.l.b16 %v2521_v33  ;;  %v5078_v1 = vld [vmem:[%s5290_s27 + $0xcc] sm:$0xe]  ;;  %v3859_v33 = vrot.slane %v5045_v55, 5 }
 0x24a   : > { %v3909_v31 = vpack.c.b16 %v3892_v24, %v3891_v53  ;;  %v5094_v12 = vrot.slane %v5078_v1, 9 }
 0x24b   : > { %v3998_v52 = vpop.f32.mrf.mxu0  ;;  %v3447_v56 = vrot.slane %v3446_v38, 4  ;;  %v3461_v27 = vrot.slane %v3459_v41, 5 }
 0x24c   : > { %v3600_v6 = vpop.f32.mrf.mxu3  ;;  %4996 = vmatmul.msk.bf16.gmra.mxu2 %vm658_vm4, %v5161_v39  ;;  %v2664_v61 = vpop.f32.mrf.mxu1  ;;  %v2554_v39 = vunpack.c.l.b16 %v2518_v7  ;;  %v3858_v7 = vrot.slane %v3856_v10, 4 }
 0x24d   : > { %v3664_v23 = vadd.f32 %v3600_v6, %v3010_v4  ;;  %v2725_v19 = vadd.f32 %v2664_v61, %v7164_v58  ;;  %v3457_v4 = vrot.slane %v3456_v25, 4  ;;  %v3857_v58 = vsel %vm5476_vm7, %v5094_v12, %v3856_v10 }
 0x24e   : > { %v2571_v20 = vpack.c.b16 %v2555_v46, %v2554_v39  ;;  %v3860_v36 = vsel %vm5476_vm7, %v3858_v7, %v3859_v33  ;;  %v3893_v55 = vunpack.c.l.b16 %v3857_v58 }
 0x24f   : > { %v6565_v51 = vadd.f32 %v3998_v52, %v3664_v23  ;;  %v2949_v50 = vpop.f32.mrf.mxu2  ;;  %v3462_v57 = vsel %vm5302_vm3, %v3457_v4, %v3461_v27 }
 0x250   : > { %v3011_v5 = vadd.f32 %v2949_v50, %v2724_v48  ;;  %v3452_v48 = vsel %vm5302_vm3, %v3447_v56, %v3451_v59 }
 0x251   : > { %5061 = vmatmul.msk.bf16.gmra.mxu3 %vm658_vm4, %v3511_v16  ;;  %v3495_v16 = vunpack.c.l.b16 %v3452_v48 }
 0x253   : > { %v4001_v13 = vpop.f32.mrf.mxu0 }
 0x254   : > { %v3603_v47 = vpop.f32.mrf.mxu3  ;;  %v2667_v32 = vpop.f32.mrf.mxu1 }
 0x255   : > { %v3665_v42 = vadd.f32 %v3603_v47, %v3011_v5  ;;  %v2726_v52 = vadd.f32 %v2667_v32, %v5967_v29  ;;  %v5162_v5 = vld [vmem:[%s5290_s27 + $0xcc] sm:$0xff]  ;;  %v3496_v29 = vunpack.c.l.b16 %v3462_v57 }
 0x256   : > { %5110 = vmatmul.msk.bf16.gmra.mxu0 %vm658_vm4, %v3909_v31 }
 0x257   : > { %v6576_v6 = vadd.f32 %v4001_v13, %v3665_v42  ;;  %v2951_v61 = vpop.f32.mrf.mxu2  ;;  %4884 = vmatmul.msk.bf16.gmra.mxu1 %vm658_vm4, %v2571_v20  ;;  %v3512_v25 = vpack.c.b16 %v3496_v29, %v3495_v16 }
 0x258   : > { %v3012_v23 = vadd.f32 %v2951_v61, %v2725_v19  ;;  %v3894_v19 = vunpack.c.l.b16 %v3860_v36 }
 0x25a   : > { %v3910_v31 = vpack.c.b16 %v3894_v19, %v3893_v55 }
 0x25b   : > { %v4003_v53 = vpop.f32.mrf.mxu0 }
 0x25c   : > { %v3605_v59 = vpop.f32.mrf.mxu3  ;;  %4997 = vmatmul.msk.bf16.gmra.mxu2 %vm658_vm4, %v5162_v5  ;;  %v2669_v24 = vpop.f32.mrf.mxu1 }
 0x25d   : > { %v3666_v38 = vadd.f32 %v3605_v59, %v3012_v23  ;;  %v2727_v41 = vadd.f32 %v2669_v24, %v5991_v37 }
 0x25f   : > { %v6586_v50 = vadd.f32 %v4003_v53, %v3666_v38  ;;  %v2954_v39 = vpop.f32.mrf.mxu2 }
 0x260   : > { %v3013_v46 = vadd.f32 %v2954_v39, %v2726_v52 }
 0x261   : > { %5062 = vmatmul.msk.bf16.gmra.mxu3 %vm658_vm4, %v3512_v25 }
 0x263   : > { %v4006_v56 = vpop.f32.mrf.mxu0 }
 0x264   : > { %v3608_v18 = vpop.f32.mrf.mxu3  ;;  %v2672_v4 = vpop.f32.mrf.mxu1 }
 0x265   : > { %v3667_v27 = vadd.f32 %v3608_v18, %v3013_v46  ;;  %v2728_v13 = vadd.f32 %v2672_v4, %v6010_v34 }
 0x266   : > { %5111 = vmatmul.msk.bf16.gmra.mxu0 %vm658_vm4, %v3910_v31 }
 0x267   : > { %v6591_v20 = vadd.f32 %v4006_v56, %v3667_v27  ;;  %v2956_v37 = vpop.f32.mrf.mxu2 }
 0x268   : > { %v3014_v10 = vadd.f32 %v2956_v37, %v2727_v41 }
 0x26b   : > { %v4008_v47 = vpop.f32.mrf.mxu0 }
 0x26c   : > { %v3610_v32 = vpop.f32.mrf.mxu3  ;;  %v2674_v1 = vpop.f32.mrf.mxu1 }
 0x26d   : > { %v3668_v42 = vadd.f32 %v3610_v32, %v3014_v10  ;;  %v2729_v52 = vadd.f32 %v2674_v1, %v6034_v3 }
 0x26f   : > { %v6594_v48 = vadd.f32 %v4008_v47, %v3668_v42  ;;  %v2959_v57 = vpop.f32.mrf.mxu2  ;;  %v6612_v47 = vld [vmem:[%s7153_s2] ss:$0 sm:$0xff] }
 0x270   : > { %v3015_v61 = vadd.f32 %v2959_v57, %v2728_v13  ;;  %v6618_v42 = vadd.f32 %v6612_v47, %v6364_v0  ;;  %v6622_v57 = vadd.f32 %v6612_v47, %v6344_v62  ;;  %v6636_v0 = vadd.f32 %v6612_v47, %v6407_v11 }
 0x272   : > { %v4120_v62 = vsel %vm658_vm4, %v6618_v42, 0.0 }
 0x273   : > { %v4011_v12 = vpop.f32.mrf.mxu0 }
 0x274   : > { %v3613_v7 = vpop.f32.mrf.mxu3  ;;  %v2677_v33 = vpop.f32.mrf.mxu1 }
 0x275   : > { %v3669_v34 = vadd.f32 %v3613_v7, %v3015_v61  ;;  %v2730_v23 = vadd.f32 %v2677_v33, %v6053_v2  ;;  %v6626_v61 = vadd.f32 %v6612_v47, %v6386_v35  ;;  %v4189_v33 = vmul.f32 %v6618_v42, %v6618_v42 }
 0x277   : > { %v6597_v5 = vadd.f32 %v4011_v12, %v3669_v34  ;;  %v2961_v16 = vpop.f32.mrf.mxu2  ;;  %v4188_v34 = vmul.f32 %v6622_v57, %v6622_v57  ;;  %v4190_v35 = vmul.f32 %v6626_v61, %v6626_v61 }
 0x278   : > { %v3016_v29 = vadd.f32 %v2961_v16, %v2729_v52 }
 0x27b   : > { %v4013_v53 = vpop.f32.mrf.mxu0 }
 0x27c   : > { %v3615_v58 = vpop.f32.mrf.mxu3  ;;  %v2679_v36 = vpop.f32.mrf.mxu1 }
 0x27d   : > { %v3670_v59 = vadd.f32 %v3615_v58, %v3016_v29  ;;  %v2731_v3 = vadd.f32 %v2679_v36, %v6077_v26  ;;  %v4119_v29 = vsel %vm658_vm4, %v6622_v57, 0.0  ;;  %v4221_v58 = vsel %vm658_vm4, %v4189_v33, 0.0 }
 0x27e   : > { %v4122_v36 = vsel %vm658_vm4, %v6626_v61, 0.0 }
 0x27f   : > { %v6600_v24 = vadd.f32 %v4013_v53, %v3670_v59  ;;  %v2964_v38 = vpop.f32.mrf.mxu2  ;;  %v4191_v59 = vmul.f32 %v6636_v0, %v6636_v0 }
 0x280   : > { %v3017_v25 = vadd.f32 %v2964_v38, %v2730_v23  ;;  %v6646_v23 = vadd.f32 %v6612_v47, %v6428_v22  ;;  %v6663_v22 = vadd.f32 %v6612_v47, %v6450_v9  ;;  %v4121_v38 = vadd.f32 %v4120_v62, %v4119_v29 }
 0x282   : > { %v4123_v9 = vadd.f32 %v4122_v36, %v4121_v38 }
 0x283   : > { %v4016_v41 = vpop.f32.mrf.mxu0 }
 0x284   : > { %v3618_v55 = vpop.f32.mrf.mxu3  ;;  %v2682_v19 = vpop.f32.mrf.mxu1 }
 0x285   : > { %v3671_v39 = vadd.f32 %v3618_v55, %v3017_v25  ;;  %v2732_v2 = vadd.f32 %v2682_v19, %v6096_v60  ;;  %v4223_v25 = vsel %vm658_vm4, %v4190_v35, 0.0  ;;  %v4192_v55 = vmul.f32 %v6646_v23, %v6646_v23 }
 0x286   : > { %v6673_v19 = vadd.f32 %v6612_v47, %v6470_v54 }
 0x287   : > { %v6603_v46 = vadd.f32 %v4016_v41, %v3671_v39  ;;  %v2966_v31 = vpop.f32.mrf.mxu2  ;;  %v4124_v41 = vsel %vm658_vm4, %v6636_v0, 0.0  ;;  %v4227_v54 = vsel %vm658_vm4, %v4192_v55, 0.0 }
 0x288   : > { %v3018_v56 = vadd.f32 %v2966_v31, %v2731_v3  ;;  %v4220_v3 = vsel %vm658_vm4, %v4188_v34, 0.0  ;;  %v4225_v31 = vsel %vm658_vm4, %v4191_v59, 0.0  ;;  %v4130_v29 = vsel %vm658_vm4, %v6673_v19, 0.0 }
 0x28b   : > { %v4018_v18 = vpop.f32.mrf.mxu0 }
 0x28c   : > { %v3620_v4 = vpop.f32.mrf.mxu3  ;;  %v6605_v27 = vpop.f32.mrf.mxu1 }
 0x28d   : > { %v3672_v13 = vadd.f32 %v3620_v4, %v3018_v56  ;;  %v4126_v56 = vsel %vm658_vm4, %v6646_v23, 0.0  ;;  %v6684_v4 = vadd.f32 %v6612_v47, %v6490_v43 }
 0x28f   : > { %v6607_v26 = vadd.f32 %v4018_v18, %v3672_v13  ;;  %v2969_v37 = vpop.f32.mrf.mxu2  ;;  %v4193_v18 = vmul.f32 %v6663_v22, %v6663_v22  ;;  %v4132_v38 = vsel %vm658_vm4, %v6684_v4, 0.0 }
 0x290   : > { %v3019_v10 = vadd.f32 %v2969_v37, %v2732_v2  ;;  %v4222_v2 = vadd.f32 %v4221_v58, %v4220_v3  ;;  %v4125_v37 = vadd.f32 %v4124_v41, %v4123_v9  ;;  %v4195_v58 = vmul.f32 %v6684_v4, %v6684_v4 }
 0x291   : > { %v4229_v35 = vsel %vm658_vm4, %v4193_v18, 0.0  ;;  %v6717_v41 = vadd.f32 %v6612_v47, %v6548_v40  ;;  %v6726_v18 = vadd.f32 %v6612_v47, %v6565_v51 }
 0x292   : > { %v4224_v13 = vadd.f32 %v4223_v25, %v4222_v2  ;;  %v4127_v34 = vadd.f32 %v4126_v56, %v4125_v37 }
 0x293   : > { %v4021_v32 = vpop.f32.mrf.mxu0 }
 0x294   : > { %v3623_v60 = vpop.f32.mrf.mxu3  ;;  %v6614_v1 = vpop.f32.mrf.mxu1  ;;  %v4226_v33 = vadd.f32 %v4225_v31, %v4224_v13 }
 0x295   : > { %v3673_v52 = vadd.f32 %v3623_v60, %v3019_v10  ;;  %v4128_v10 = vsel %vm658_vm4, %v6663_v22, 0.0  ;;  %v6693_v60 = vadd.f32 %v6612_v47, %v6510_v28  ;;  %v6708_v28 = vadd.f32 %v6612_v47, %v6529_v15 }
 0x296   : > { %v4228_v36 = vadd.f32 %v4227_v54, %v4226_v33  ;;  %v4129_v59 = vadd.f32 %v4128_v10, %v4127_v34  ;;  %v4233_v15 = vsel %vm658_vm4, %v4195_v58, 0.0  ;;  %v4198_v10 = vmul.f32 %v6717_v41, %v6717_v41 }
 0x297   : > { %v6628_v12 = vadd.f32 %v4021_v32, %v3673_v52  ;;  %v6630_v7 = vpop.f32.mrf.mxu2  ;;  %v4194_v32 = vmul.f32 %v6673_v19, %v6673_v19  ;;  %v4196_v25 = vmul.f32 %v6693_v60, %v6693_v60  ;;  %v4134_v31 = vsel %vm658_vm4, %v6693_v60, 0.0 }
 0x298   : > { %v4230_v2 = vadd.f32 %v4229_v35, %v4228_v36  ;;  %v4131_v9 = vadd.f32 %v4130_v29, %v4129_v59  ;;  %v4197_v56 = vmul.f32 %v6708_v28, %v6708_v28  ;;  %v4136_v54 = vsel %vm658_vm4, %v6708_v28, 0.0 }
 0x299   : > { %v4231_v3 = vsel %vm658_vm4, %v4194_v32, 0.0  ;;  %v4235_v40 = vsel %vm658_vm4, %v4196_v25, 0.0  ;;  %v6735_v32 = vadd.f32 %v6612_v47, %v6576_v6  ;;  %v4138_v36 = vsel %vm658_vm4, %v6717_v41, 0.0 }
 0x29a   : > { %v4232_v13 = vadd.f32 %v4231_v3, %v4230_v2  ;;  %v4133_v37 = vadd.f32 %v4132_v38, %v4131_v9  ;;  %v4237_v58 = vsel %vm658_vm4, %v4197_v56, 0.0  ;;  %v4199_v59 = vmul.f32 %v6726_v18, %v6726_v18 }
 0x29b   : > { %v6648_v16 = vpop.f32.mrf.mxu0  ;;  %v6746_v3 = vadd.f32 %v6612_v47, %v6586_v50  ;;  %v4239_v25 = vsel %vm658_vm4, %v4198_v10, 0.0  ;;  %v4140_v2 = vsel %vm658_vm4, %v6726_v18, 0.0  ;;  %v4200_v9 = vmul.f32 %v6735_v32, %v6735_v32 }
 0x29c   : > { %v6652_v11 = vpop.f32.mrf.mxu3  ;;  %v6654_v53 = vpop.f32.mrf.mxu1  ;;  %v4234_v34 = vadd.f32 %v4233_v15, %v4232_v13  ;;  %v4135_v35 = vadd.f32 %v4134_v31, %v4133_v37  ;;  %v6755_v15 = vadd.f32 %v6612_v47, %v6591_v20  ;;  %v2733_v50 = vadd.f32 %v6605_v27, %v6120_v14 }
 0x29d   : > { %v4241_v37 = vsel %vm658_vm4, %v4199_v59, 0.0  ;;  %v6766_v10 = vadd.f32 %v6612_v47, %v6594_v48  ;;  %v4243_v14 = vsel %vm658_vm4, %v4200_v9, 0.0  ;;  %v4144_v27 = vsel %vm658_vm4, %v6746_v3, 0.0 }
 0x29e   : > { %v4236_v6 = vadd.f32 %v4235_v40, %v4234_v34  ;;  %v4137_v38 = vadd.f32 %v4136_v54, %v4135_v35  ;;  %v4142_v40 = vsel %vm658_vm4, %v6735_v32, 0.0  ;;  %v4201_v54 = vmul.f32 %v6746_v3, %v6746_v3 }
 0x29f   : > { %v6675_v39 = vpop.f32.mrf.mxu2  ;;  %v3020_v35 = vadd.f32 %v6630_v7, %v2733_v50  ;;  %v2735_v9 = vadd.f32 %v6654_v53, %v6163_v49  ;;  %v6788_v50 = vadd.f32 %v6612_v47, %v6600_v24  ;;  %v4148_v49 = vsel %vm658_vm4, %v6766_v10, 0.0 }
 0x2a0   : > { %v4238_v56 = vadd.f32 %v4237_v58, %v4236_v6  ;;  %v4139_v13 = vadd.f32 %v4138_v36, %v4137_v38  ;;  %v2734_v58 = vadd.f32 %v6614_v1, %v6139_v21  ;;  %v4202_v36 = vmul.f32 %v6755_v15, %v6755_v15 }
 0x2a1   : > { %v4245_v7 = vsel %vm658_vm4, %v4201_v54, 0.0  ;;  %v4203_v21 = vmul.f32 %v6766_v10, %v6766_v10  ;;  %v6782_v1 = vadd.f32 %v6612_v47, %v6597_v5  ;;  %v6800_v24 = vadd.f32 %v6612_v47, %v6603_v46 }
 0x2a2   : > { %v4240_v20 = vadd.f32 %v4239_v25, %v4238_v56  ;;  %v4141_v34 = vadd.f32 %v4140_v2, %v4139_v13  ;;  %v3021_v48 = vadd.f32 %v6675_v39, %v2734_v58  ;;  %v3674_v39 = vadd.f32 %v6652_v11, %v3020_v35  ;;  %v7165_v58 = vld [vmem:[#allocation4_spill] sm:$0xff] }
 0x2a3   : > { %v6695_v52 = vpop.f32.mrf.mxu0  ;;  %v4249_v53 = vsel %vm658_vm4, %v4203_v21, 0.0  ;;  %v4204_v35 = vmul.f32 %v6782_v1, %v6782_v1  ;;  %v4150_v46 = vsel %vm658_vm4, %v6782_v1, 0.0 }
 0x2a4   : > { %v6697_v43 = vpop.f32.mrf.mxu3  ;;  %v6699_v62 = vpop.f32.mrf.mxu1  ;;  %v4242_v6 = vadd.f32 %v4241_v37, %v4240_v20  ;;  %v4143_v38 = vadd.f32 %v4142_v40, %v4141_v34  ;;  %v4146_v37 = vsel %vm658_vm4, %v6755_v15, 0.0  ;;  %v4247_v40 = vsel %vm658_vm4, %v4202_v36, 0.0 }
 0x2a5   : > { %v2736_v5 = vadd.f32 %v6699_v62, %v6182_v17  ;;  %v3675_v11 = vadd.f32 %v6697_v43, %v3021_v48  ;;  %v4072_v36 = vadd.f32 %v6648_v16, %v3674_v39  ;;  %v6814_v43 = vadd.f32 %v6612_v47, %v6607_v26 }
 0x2a6   : > { %v4244_v56 = vadd.f32 %v4243_v14, %v4242_v6  ;;  %v4145_v13 = vadd.f32 %v4144_v27, %v4143_v38  ;;  %v4205_v27 = vmul.f32 %v6788_v50, %v6788_v50  ;;  %v4251_v16 = vsel %vm658_vm4, %v4204_v35, 0.0 }
 0x2a7   : > { %v2976_v55 = vpop.f32.mrf.mxu2  ;;  %v4073_v21 = vadd.f32 %v6695_v52, %v3675_v11  ;;  %v6824_v26 = vadd.f32 %v6612_v47, %v6628_v12  ;;  %v6830_v52 = vadd.f32 %v6612_v47, %v4072_v36  ;;  %v4156_v35 = vsel %vm658_vm4, %v6814_v43, 0.0 }
 0x2a8   : > { %v3022_v54 = vadd.f32 %v2976_v55, %v2735_v9  ;;  %v4246_v34 = vadd.f32 %v4245_v7, %v4244_v56  ;;  %v4147_v17 = vadd.f32 %v4146_v37, %v4145_v13  ;;  %v4152_v13 = vsel %vm658_vm4, %v6788_v50, 0.0 }
 0x2a9   : > { %v4253_v37 = vsel %vm658_vm4, %v4205_v27, 0.0 }
 0x2aa   : > { %v4248_v62 = vadd.f32 %v4247_v40, %v4246_v34  ;;  %v4154_v40 = vsel %vm658_vm4, %v6800_v24, 0.0 }
 0x2ab   : > { %v6737_v33 = vpop.f32.mrf.mxu0 }
 0x2ac   : > { %v3630_v51 = vpop.f32.mrf.mxu3  ;;  %v2694_v29 = vpop.f32.mrf.mxu1  ;;  %v4250_v7 = vadd.f32 %v4249_v53, %v4248_v62  ;;  %v6838_v53 = vadd.f32 %v6612_v47, %v4073_v21  ;;  %v4158_v62 = vsel %vm658_vm4, %v6824_v26, 0.0 }
 0x2ad   : > { %v2737_v14 = vadd.f32 %v2694_v29, %v7165_v58  ;;  %v3676_v6 = vadd.f32 %v3630_v51, %v3022_v54  ;;  %v4206_v29 = vmul.f32 %v6800_v24, %v6800_v24  ;;  %v4207_v54 = vmul.f32 %v6814_v43, %v6814_v43 }
 0x2af   : > { %v2979_v31 = vpop.f32.mrf.mxu2  ;;  %v4255_v11 = vsel %vm658_vm4, %v4206_v29, 0.0  ;;  %v4160_v29 = vsel %vm658_vm4, %v6830_v52, 0.0 }
 0x2b0   : > { %v3023_v55 = vadd.f32 %v2979_v31, %v2736_v5  ;;  %v4149_v31 = vadd.f32 %v4148_v49, %v4147_v17  ;;  %v4074_v5 = vadd.f32 %v6737_v33, %v3676_v6  ;;  %v4252_v49 = vadd.f32 %v4251_v16, %v4250_v7 }
 0x2b2   : > { %v4151_v39 = vadd.f32 %v4150_v46, %v4149_v31  ;;  %v4254_v33 = vadd.f32 %v4253_v37, %v4252_v49  ;;  %v6850_v27 = vadd.f32 %v6612_v47, %v4074_v5 }
 0x2b3   : > { %v4031_v59 = vpop.f32.mrf.mxu0 }
 0x2b4   : > { %v3633_v25 = vpop.f32.mrf.mxu3  ;;  %v2697_v2 = vpop.f32.mrf.mxu1  ;;  %v4256_v6 = vadd.f32 %v4255_v11, %v4254_v33  ;;  %v4211_v37 = vmul.f32 %v6850_v27, %v6850_v27 }
 0x2b5   : > { %v3677_v51 = vadd.f32 %v3633_v25, %v3023_v55  ;;  %v2738_v34 = vadd.f32 %v2697_v2, %v6223_v44  ;;  %v4153_v25 = vadd.f32 %v4152_v13, %v4151_v39  ;;  %v4208_v55 = vmul.f32 %v6824_v26, %v6824_v26 }
 0x2b6   : > { %v4209_v44 = vmul.f32 %v6830_v52, %v6830_v52  ;;  %v4257_v2 = vsel %vm658_vm4, %v4207_v54, 0.0  ;;  %v4162_v39 = vsel %vm658_vm4, %v6838_v53, 0.0  ;;  %v4265_v33 = vsel %vm658_vm4, %v4211_v37, 0.0 }
 0x2b7   : > { %v2981_v20 = vpop.f32.mrf.mxu2  ;;  %v4075_v58 = vadd.f32 %v4031_v59, %v3677_v51  ;;  %v4155_v17 = vadd.f32 %v4154_v40, %v4153_v25  ;;  %v4210_v59 = vmul.f32 %v6838_v53, %v6838_v53  ;;  %v4259_v7 = vsel %vm658_vm4, %v4208_v55, 0.0 }
 0x2b8   : > { %v3024_v48 = vadd.f32 %v2981_v20, %v2737_v14  ;;  %v4258_v13 = vadd.f32 %v4257_v2, %v4256_v6  ;;  %v4164_v25 = vsel %vm658_vm4, %v6850_v27, 0.0 }
 0x2b9   : > { %v6858_v21 = vadd.f32 %v6612_v47, %v4075_v58  ;;  %v4263_v49 = vsel %vm658_vm4, %v4210_v59, 0.0 }
 0x2bb   : > { %v4033_v38 = vpop.f32.mrf.mxu0  ;;  %v4212_v11 = vmul.f32 %v6858_v21, %v6858_v21 }
 0x2bc   : > { %v3635_v9 = vpop.f32.mrf.mxu3  ;;  %v2699_v56 = vpop.f32.mrf.mxu1 }
 0x2bd   : > { %v3678_v20 = vadd.f32 %v3635_v9, %v3024_v48  ;;  %v4157_v48 = vadd.f32 %v4156_v35, %v4155_v17  ;;  %v2739_v5 = vadd.f32 %v2699_v56, %v6246_v45  ;;  %v4166_v45 = vsel %vm658_vm4, %v6858_v21, 0.0 }
 0x2bf   : > { %v2984_v12 = vpop.f32.mrf.mxu2  ;;  %v4076_v36 = vadd.f32 %v4033_v38, %v3678_v20  ;;  %v4159_v51 = vadd.f32 %v4158_v62, %v4157_v48  ;;  %v4261_v38 = vsel %vm658_vm4, %v4209_v44, 0.0 }
 0x2c0   : > { %v3025_v14 = vadd.f32 %v2984_v12, %v2738_v34  ;;  %v4260_v34 = vadd.f32 %v4259_v7, %v4258_v13 }
 0x2c1   : > { %v6866_v40 = vadd.f32 %v6612_v47, %v4076_v36  ;;  %v4161_v12 = vadd.f32 %v4160_v29, %v4159_v51  ;;  %v4267_v36 = vsel %vm658_vm4, %v4212_v11, 0.0 }
 0x2c2   : > { %v4262_v58 = vadd.f32 %v4261_v38, %v4260_v34 }
 0x2c3   : > { %v4036_v46 = vpop.f32.mrf.mxu0  ;;  %v4213_v56 = vmul.f32 %v6866_v40, %v6866_v40 }
 0x2c4   : > { %v3638_v31 = vpop.f32.mrf.mxu3  ;;  %v2702_v16 = vpop.f32.mrf.mxu1  ;;  %v4264_v44 = vadd.f32 %v4263_v49, %v4262_v58 }
 0x2c5   : > { %v3679_v9 = vadd.f32 %v3638_v31, %v3025_v14  ;;  %v4163_v14 = vadd.f32 %v4162_v39, %v4161_v12  ;;  %v4269_v7 = vsel %vm658_vm4, %v4213_v56, 0.0  ;;  %v2740_v13 = vadd.f32 %v2702_v16, %v6264_v63 }
 0x2c6   : > { %v4266_v59 = vadd.f32 %v4265_v33, %v4264_v44 }
 0x2c7   : > { %v4077_v54 = vadd.f32 %v4036_v46, %v3679_v9  ;;  %v2986_v20 = vpop.f32.mrf.mxu2  ;;  %v4165_v2 = vadd.f32 %v4164_v25, %v4163_v14  ;;  %v4168_v46 = vsel %vm658_vm4, %v6866_v40, 0.0 }
 0x2c8   : > { %v3026_v55 = vadd.f32 %v2986_v20, %v2739_v5  ;;  %v4268_v39 = vadd.f32 %v4267_v36, %v4266_v59 }
 0x2c9   : > { %v6875_v35 = vadd.f32 %v6612_v47, %v4077_v54  ;;  %v4167_v31 = vadd.f32 %v4166_v45, %v4165_v2 }
 0x2ca   : > { %v4270_v34 = vadd.f32 %v4269_v7, %v4268_v39 }
 0x2cb   : > { %v4038_v17 = vpop.f32.mrf.mxu0  ;;  %v4214_v6 = vmul.f32 %v6875_v35, %v6875_v35  ;;  %v4170_v29 = vsel %vm658_vm4, %v6875_v35, 0.0  ;;  %v4169_v37 = vadd.f32 %v4168_v46, %v4167_v31 }
 0x2cc   : > { %v3640_v62 = vpop.f32.mrf.mxu3  ;;  %v2704_v38 = vpop.f32.mrf.mxu1 }
 0x2cd   : > { %v3680_v48 = vadd.f32 %v3640_v62, %v3026_v55  ;;  %v4271_v54 = vsel %vm658_vm4, %v4214_v6, 0.0  ;;  %v4171_v12 = vadd.f32 %v4170_v29, %v4169_v37  ;;  %v2741_v56 = vadd.f32 %v2704_v38, %v6288_v30 }
 0x2ce   : > { %v4272_v63 = vadd.f32 %v4271_v54, %v4270_v34 }
 0x2cf   : > { %v4078_v9 = vadd.f32 %v4038_v17, %v3680_v48  ;;  %v2989_v51 = vpop.f32.mrf.mxu2 }
 0x2d0   : > { %v3027_v20 = vadd.f32 %v2989_v51, %v2740_v13 }
 0x2d1   : > { %v6893_v5 = vadd.f32 %v6612_v47, %v4078_v9 }
 0x2d3   : > { %v4172_v49 = vsel %vm658_vm4, %v6893_v5, 0.0  ;;  %v4215_v25 = vmul.f32 %v6893_v5, %v6893_v5  ;;  %v4041_v11 = vpop.f32.mrf.mxu0 }
 0x2d4   : > { %v4173_v16 = vadd.f32 %v4172_v49, %v4171_v12  ;;  %v3643_v55 = vpop.f32.mrf.mxu3  ;;  %v2707_v62 = vpop.f32.mrf.mxu1 }
 0x2d5   : > { %v4273_v58 = vsel %vm658_vm4, %v4215_v25, 0.0  ;;  %v3681_v14 = vadd.f32 %v3643_v55, %v3027_v20  ;;  %v2742_v9 = vadd.f32 %v2707_v62, %v6306_v8 }
 0x2d6   : > { %v4274_v33 = vadd.f32 %v4273_v58, %v4272_v63  ;;  %v7166_v63 = vld [vmem:[#allocation5_spill] sm:$0xff] }
 0x2d7   : > { %v4079_v45 = vadd.f32 %v4041_v11, %v3681_v14  ;;  %v2991_v17 = vpop.f32.mrf.mxu2 }
 0x2d8   : > { %v3028_v2 = vadd.f32 %v2991_v17, %v2741_v56 }
 0x2d9   : > { %v6902_v44 = vadd.f32 %v6612_v47, %v4079_v45 }
 0x2db   : > { %v4174_v36 = vsel %vm658_vm4, %v6902_v44, 0.0  ;;  %v4216_v46 = vmul.f32 %v6902_v44, %v6902_v44  ;;  %v4043_v6 = vpop.f32.mrf.mxu0 }
 0x2dc   : > { %v4175_v48 = vadd.f32 %v4174_v36, %v4173_v16  ;;  %v3645_v59 = vpop.f32.mrf.mxu3  ;;  %v2709_v54 = vpop.f32.mrf.mxu1 }
 0x2dd   : > { %v4275_v31 = vsel %vm658_vm4, %v4216_v46, 0.0  ;;  %v3682_v7 = vadd.f32 %v3645_v59, %v3028_v2  ;;  %v2743_v16 = vadd.f32 %v2709_v54, %v7166_v63 }
 0x2de   : > { %v4276_v29 = vadd.f32 %v4275_v31, %v4274_v33 }
 0x2df   : > { %v4080_v30 = vadd.f32 %v4043_v6, %v3682_v7  ;;  %v2994_v13 = vpop.f32.mrf.mxu2 }
 0x2e0   : > { %v3029_v38 = vadd.f32 %v2994_v13, %v2742_v9 }
 0x2e1   : > { %v6911_v51 = vadd.f32 %v6612_v47, %v4080_v30 }
 0x2e3   : > { %v4176_v39 = vsel %vm658_vm4, %v6911_v51, 0.0  ;;  %v4217_v37 = vmul.f32 %v6911_v51, %v6911_v51  ;;  %v4046_v34 = vpop.f32.mrf.mxu0 }
 0x2e4   : > { %v4177_v20 = vadd.f32 %v4176_v39, %v4175_v48  ;;  %v3648_v12 = vpop.f32.mrf.mxu3 }
 0x2e5   : > { %v4277_v49 = vsel %vm658_vm4, %v4217_v37, 0.0  ;;  %v3683_v25 = vadd.f32 %v3648_v12, %v3029_v38 }
 0x2e6   : > { %v4278_v11 = vadd.f32 %v4277_v49, %v4276_v29 }
 0x2e7   : > { %v4081_v8 = vadd.f32 %v4046_v34, %v3683_v25  ;;  %v2996_v55 = vpop.f32.mrf.mxu2 }
 0x2e8   : > { %v3030_v14 = vadd.f32 %v2996_v55, %v2743_v16 }
 0x2e9   : > { %v6920_v58 = vadd.f32 %v6612_v47, %v4081_v8 }
 0x2eb   : > { %v4178_v33 = vsel %vm658_vm4, %v6920_v58, 0.0  ;;  %v4218_v45 = vmul.f32 %v6920_v58, %v6920_v58  ;;  %v4048_v46 = vpop.f32.mrf.mxu0 }
 0x2ec   : > { %v4179_v56 = vadd.f32 %v4178_v33, %v4177_v20  ;;  %v3650_v17 = vpop.f32.mrf.mxu3 }
 0x2ed   : > { %v4279_v2 = vsel %vm658_vm4, %v4218_v45, 0.0  ;;  %v3684_v62 = vadd.f32 %v3650_v17, %v3030_v14 }
 0x2ee   : > { %v4280_v36 = vadd.f32 %v4279_v2, %v4278_v11 }
 0x2ef   : > { %v4082_v6 = vadd.f32 %v4048_v46, %v3684_v62 }
 0x2f1   : > { %v6928_v48 = vadd.f32 %v6612_v47, %v4082_v6 }
 0x2f3   : > { %v4180_v59 = vsel %vm658_vm4, %v6928_v48, 0.0  ;;  %v4219_v31 = vmul.f32 %v6928_v48, %v6928_v48 }
 0x2f4   : > { %v4181_v7 = vadd.f32 %v4180_v59, %v4179_v56 }
 0x2f5   : > { %v4281_v29 = vsel %vm658_vm4, %v4219_v31, 0.0 }
 0x2f6   : > { %v4182_v30 = vrot.slane %v4181_v7, 4  ;;  %v4282_v9 = vadd.f32 %v4281_v29, %v4280_v36 }
 0x2f8   : > { %v4183_v13 = vadd.f32 %v4182_v30, %v4181_v7  ;;  %v4283_v38 = vrot.slane %v4282_v9, 4 }
 0x2fa   : > { %v4184_v39 = vrot.slane %v4183_v13, 2  ;;  %v4284_v37 = vadd.f32 %v4283_v38, %v4282_v9 }
 0x2fc   : > { %v4185_v54 = vadd.f32 %v4184_v39, %v4183_v13  ;;  %v4285_v20 = vrot.slane %v4284_v37, 2 }
 0x2fe   : > { %v4186_v34 = vrot.slane %v4185_v54, 1  ;;  %v4286_v47 = vadd.f32 %v4285_v20, %v4284_v37 }
 0x300   : > { %v4187_v12 = vadd.f32 %v4186_v34, %v4185_v54  ;;  %v4287_v49 = vrot.slane %v4286_v47, 1 }
 0x302   : > { %v4288_v25 = vadd.f32 %v4287_v49, %v4286_v47  ;;  %v6935_v11 = vmul.f32 0.00390625, %v4187_v12 }
 0x304   : > { %v4290_v8 = vmul.f32 0.00390625, %v4288_v25  ;;  %v4291_v63 = vmul.f32 %v6935_v11, %v6935_v11  ;;  %v4319_v55 = vsub.f32 %v6875_v35, %v6935_v11  ;;  %v4320_v14 = vsub.f32 %v6893_v5, %v6935_v11 }
 0x305   : > { %v4321_v33 = vsub.f32 %v6902_v44, %v6935_v11  ;;  %v4322_v45 = vsub.f32 %v6911_v51, %v6935_v11  ;;  %v4323_v56 = vsub.f32 %v6920_v58, %v6935_v11  ;;  %v4324_v17 = vsub.f32 %v6928_v48, %v6935_v11 }
 0x306   : > { %v4292_v16 = vsub.f32 %v4290_v8, %v4291_v63  ;;  %v4293_v6 = vsub.f32 %v6622_v57, %v6935_v11  ;;  %v4294_v59 = vsub.f32 %v6618_v42, %v6935_v11  ;;  %v4295_v31 = vsub.f32 %v6626_v61, %v6935_v11 }
 0x307   : > { %v4296_v7 = vsub.f32 %v6636_v0, %v6935_v11  ;;  %v4297_v29 = vsub.f32 %v6646_v23, %v6935_v11  ;;  %v4298_v30 = vsub.f32 %v6663_v22, %v6935_v11  ;;  %v4299_v9 = vsub.f32 %v6673_v19, %v6935_v11 }
 0x308   : > { %v4325_v2 = vadd.f32 1e-05, %v4292_v16  ;;  %v4300_v57 = vsub.f32 %v6684_v4, %v6935_v11  ;;  %v4301_v42 = vsub.f32 %v6693_v60, %v6935_v11  ;;  %v4302_v61 = vsub.f32 %v6708_v28, %v6935_v11 }
 0x309   : > { %v4303_v0 = vsub.f32 %v6717_v41, %v6935_v11  ;;  %v4304_v23 = vsub.f32 %v6726_v18, %v6935_v11  ;;  %v4305_v22 = vsub.f32 %v6735_v32, %v6935_v11  ;;  %v4306_v4 = vsub.f32 %v6746_v3, %v6935_v11 }
 0x30a   : > { %5176 = vrsqrt.f32 %v4325_v2  ;;  %v4307_v60 = vsub.f32 %v6755_v15, %v6935_v11  ;;  %v4308_v28 = vsub.f32 %v6766_v10, %v6935_v11  ;;  %v4309_v41 = vsub.f32 %v6782_v1, %v6935_v11 }
 0x30b   : > { %v4310_v18 = vsub.f32 %v6788_v50, %v6935_v11  ;;  %v4311_v32 = vsub.f32 %v6800_v24, %v6935_v11  ;;  %vm4332_vm9 = vweird.f32 %v4325_v2  ;;  %v4312_v3 = vsub.f32 %v6814_v43, %v6935_v11 }
 0x30c   : > { %v4313_v15 = vsub.f32 %v6824_v26, %v6935_v11  ;;  %v4314_v10 = vsub.f32 %v6830_v52, %v6935_v11  ;;  %v4315_v1 = vsub.f32 %v6838_v53, %v6935_v11  ;;  %v4316_v50 = vsub.f32 %v6850_v27, %v6935_v11 }
 0x30d   : > { %v4317_v24 = vsub.f32 %v6858_v21, %v6935_v11  ;;  %v4318_v39 = vsub.f32 %v6866_v40, %v6935_v11 }
 0x310   : > { %v5177_v62 = vpop.eup %5176 }
 0x311   : > { %v4327_v36 = vmul.f32 %v5177_v62, %v4325_v2  ;;  %vm4333_vm8 = vweird.f32 %v5177_v62 }
 0x312   : > { %vm4334_vm10 = vmor %vm4332_vm9, %vm4333_vm8 }
 0x313   : > { %v4328_v46 = vmul.f32 %v5177_v62, %v4327_v36 }
 0x315   : > { %v4329_v13 = vmul.f32 0.5, %v4328_v46 }
 0x317   : > { %v4330_v19 = vsub.f32 1.5, %v4329_v13 }
 0x319   : > { %v4331_v38 = vmul.f32 %v5177_v62, %v4330_v19 }
 0x31b   : > { %v4335_v43 = vsel %vm4334_vm10, %v5177_v62, %v4331_v38 }
 0x31c   : > { %v4336_v37 = vmul.f32 %v4335_v43, %v4293_v6  ;;  %v4337_v54 = vmul.f32 %v4335_v43, %v4294_v59  ;;  %v4338_v26 = vmul.f32 %v4335_v43, %v4295_v31  ;;  %v4339_v20 = vmul.f32 %v4335_v43, %v4296_v7 }
 0x31d   : > { %v4340_v34 = vmul.f32 %v4335_v43, %v4297_v29  ;;  %v4341_v52 = vmul.f32 %v4335_v43, %v4298_v30  ;;  %v4342_v47 = vmul.f32 %v4335_v43, %v4299_v9  ;;  %v4343_v12 = vmul.f32 %v4335_v43, %v4300_v57 }
 0x31e   : > { %v4344_v53 = vmul.f32 %v4335_v43, %v4301_v42  ;;  %v4345_v49 = vmul.f32 %v4335_v43, %v4302_v61  ;;  %v4346_v25 = vmul.f32 %v4335_v43, %v4303_v0  ;;  %v4347_v8 = vmul.f32 %v4335_v43, %v4304_v23 }
 0x31f   : > { %v4348_v27 = vmul.f32 %v4335_v43, %v4305_v22  ;;  %v7003_v63 = vmul.f32 %v4335_v43, %v4306_v4  ;;  %v7005_v21 = vmul.f32 %v4335_v43, %v4307_v60  ;;  %v7007_v16 = vmul.f32 %v4335_v43, %v4308_v28 }
 0x320   : > { %v7009_v40 = vmul.f32 %v4335_v43, %v4309_v41  ;;  %v7011_v2 = vmul.f32 %v4335_v43, %v4310_v18  ;;  %v7013_v62 = vmul.f32 %v4335_v43, %v4311_v32  ;;  %v7015_v36 = vmul.f32 %v4335_v43, %v4312_v3 }
 0x321   : > { %v7017_v46 = vmul.f32 %v4335_v43, %v4313_v15  ;;  %v7019_v6 = vmul.f32 %v4335_v43, %v4314_v10  ;;  %v7021_v59 = vmul.f32 %v4335_v43, %v4315_v1  ;;  %v7023_v31 = vmul.f32 %v4335_v43, %v4316_v50 }
 0x322   : > { %v7025_v7 = vmul.f32 %v4335_v43, %v4317_v24  ;;  %v7027_v29 = vmul.f32 %v4335_v43, %v4318_v39  ;;  %v7032_v30 = vmul.f32 %v4335_v43, %v4319_v55  ;;  %v7037_v9 = vmul.f32 %v4335_v43, %v4320_v14 }
 0x323   : > { %v7042_v13 = vmul.f32 %v4335_v43, %v4321_v33  ;;  %v7047_v57 = vmul.f32 %v4335_v43, %v4322_v45  ;;  %v7052_v35 = vmul.f32 %v4335_v43, %v4323_v56  ;;  %v7057_v5 = vmul.f32 %v4335_v43, %v4324_v17 }
 0x324   : > { %v4368_v55 = vmax.f32 %v4336_v37, 0.0  ;;  %v4369_v44 = vmax.f32 %v4337_v54, 0.0  ;;  %v4370_v14 = vmax.f32 %v4338_v26, 0.0  ;;  %v4371_v33 = vmax.f32 %v4339_v20, 0.0 }
 0x325   : > { %v4372_v42 = vmax.f32 %v4340_v34, 0.0  ;;  %v4373_v51 = vmax.f32 %v4341_v52, 0.0  ;;  %v4374_v58 = vmax.f32 %v4342_v47, 0.0  ;;  %v4375_v56 = vmax.f32 %v4343_v12, 0.0 }
 0x326   : > { %v4400_v48 = vpack.c.bf16 %v4368_v55, %v4368_v55  ;;  %v4401_v11 = vpack.c.bf16 %v4369_v44, %v4369_v44  ;;  %v4402_v45 = vpack.c.bf16 %v4370_v14, %v4370_v14  ;;  %v4403_v17 = vpack.c.bf16 %v4371_v33, %v4371_v33 }
 0x327   : > { %v4376_v61 = vmax.f32 %v4344_v53, 0.0  ;;  %v4404_v0 = vpack.c.bf16 %v4372_v42, %v4372_v42  ;;  %v4377_v23 = vmax.f32 %v4345_v49, 0.0  ;;  %v4405_v22 = vpack.c.bf16 %v4373_v51, %v4373_v51 }
 0x328   : > { %4433 = vst.msk [vmem:[%s7063_s16] sm:$0xf] %vm4432_vm11, %v4400_v48  ;;  %v4378_v19 = vmax.f32 %v4346_v25, 0.0  ;;  %v4406_v4 = vpack.c.bf16 %v4374_v58, %v4374_v58  ;;  %v4379_v60 = vmax.f32 %v4347_v8, 0.0  ;;  %v4407_v28 = vpack.c.bf16 %v4375_v56, %v4375_v56 }
 0x329   : > { %4434 = vst.msk [vmem:[%s7063_s16 + $0x4] sm:$0xf] %vm4432_vm11, %v4401_v11  ;;  %v4380_v41 = vmax.f32 %v4348_v27, 0.0  ;;  %v4408_v18 = vpack.c.bf16 %v4376_v61, %v4376_v61  ;;  %v4381_v32 = vmax.f32 %v7003_v63, 0.0  ;;  %v4409_v38 = vpack.c.bf16 %v4377_v23, %v4377_v23 }
 0x32a   : > { %4435 = vst.msk [vmem:[%s7063_s16 + $0x8] sm:$0xf] %vm4432_vm11, %v4402_v45  ;;  %v4382_v3 = vmax.f32 %v7005_v21, 0.0  ;;  %v4410_v15 = vpack.c.bf16 %v4378_v19, %v4378_v19  ;;  %v4383_v10 = vmax.f32 %v7007_v16, 0.0  ;;  %v4411_v1 = vpack.c.bf16 %v4379_v60, %v4379_v60 }
 0x32b   : > { %4436 = vst.msk [vmem:[%s7063_s16 + $0xc] sm:$0xf] %vm4432_vm11, %v4403_v17  ;;  %v4384_v50 = vmax.f32 %v7009_v40, 0.0  ;;  %v4412_v24 = vpack.c.bf16 %v4380_v41, %v4380_v41  ;;  %v4385_v39 = vmax.f32 %v7011_v2, 0.0  ;;  %v4413_v43 = vpack.c.bf16 %v4381_v32, %v4381_v32 }
 0x32c   : > { %4437 = vst.msk [vmem:[%s7063_s16 + $0x10] sm:$0xf] %vm4432_vm11, %v4404_v0  ;;  %v4386_v37 = vmax.f32 %v7013_v62, 0.0  ;;  %v4414_v54 = vpack.c.bf16 %v4382_v3, %v4382_v3  ;;  %v4387_v26 = vmax.f32 %v7015_v36, 0.0  ;;  %v4415_v20 = vpack.c.bf16 %v4383_v10, %v4383_v10 }
 0x32d   : > { %4438 = vst.msk [vmem:[%s7063_s16 + $0x14] sm:$0xf] %vm4432_vm11, %v4405_v22  ;;  %v4388_v34 = vmax.f32 %v7017_v46, 0.0  ;;  %v4416_v52 = vpack.c.bf16 %v4384_v50, %v4384_v50  ;;  %v4389_v47 = vmax.f32 %v7019_v6, 0.0  ;;  %v4417_v12 = vpack.c.bf16 %v4385_v39, %v4385_v39 }
 0x32e   : > { %4439 = vst.msk [vmem:[%s7063_s16 + $0x18] sm:$0xf] %vm4432_vm11, %v4406_v4  ;;  %v4390_v53 = vmax.f32 %v7021_v59, 0.0  ;;  %v4418_v49 = vpack.c.bf16 %v4386_v37, %v4386_v37  ;;  %v4391_v25 = vmax.f32 %v7023_v31, 0.0  ;;  %v4419_v8 = vpack.c.bf16 %v4387_v26, %v4387_v26 }
 0x32f   : > { %4440 = vst.msk [vmem:[%s7063_s16 + $0x1c] sm:$0xf] %vm4432_vm11, %v4407_v28  ;;  %v4392_v27 = vmax.f32 %v7025_v7, 0.0  ;;  %v4420_v63 = vpack.c.bf16 %v4388_v34, %v4388_v34  ;;  %v4393_v21 = vmax.f32 %v7027_v29, 0.0  ;;  %v4421_v16 = vpack.c.bf16 %v4389_v47, %v4389_v47 }
 0x330   : > { %4441 = vst.msk [vmem:[%s7063_s16 + $0x20] sm:$0xf] %vm4432_vm11, %v4408_v18  ;;  %v4394_v40 = vmax.f32 %v7032_v30, 0.0  ;;  %v4422_v2 = vpack.c.bf16 %v4390_v53, %v4390_v53  ;;  %v4395_v62 = vmax.f32 %v7037_v9, 0.0  ;;  %v4423_v36 = vpack.c.bf16 %v4391_v25, %v4391_v25 }
 0x331   : > { %4442 = vst.msk [vmem:[%s7063_s16 + $0x24] sm:$0xf] %vm4432_vm11, %v4409_v38  ;;  %v4396_v46 = vmax.f32 %v7042_v13, 0.0  ;;  %v4424_v6 = vpack.c.bf16 %v4392_v27, %v4392_v27  ;;  %v4397_v59 = vmax.f32 %v7047_v57, 0.0  ;;  %v4425_v31 = vpack.c.bf16 %v4393_v21, %v4393_v21 }
 0x332   : > { %4443 = vst.msk [vmem:[%s7063_s16 + $0x28] sm:$0xf] %vm4432_vm11, %v4410_v15  ;;  %v4398_v7 = vmax.f32 %v7052_v35, 0.0  ;;  %v4426_v29 = vpack.c.bf16 %v4394_v40, %v4394_v40  ;;  %v4399_v30 = vmax.f32 %v7057_v5, 0.0  ;;  %v4427_v9 = vpack.c.bf16 %v4395_v62, %v4395_v62 }
 0x333   : > { %4444 = vst.msk [vmem:[%s7063_s16 + $0x2c] sm:$0xf] %vm4432_vm11, %v4411_v1  ;;  %v4428_v13 = vpack.c.bf16 %v4396_v46, %v4396_v46  ;;  %v4429_v57 = vpack.c.bf16 %v4397_v59, %v4397_v59 }
 0x334   : > { %4445 = vst.msk [vmem:[%s7063_s16 + $0x30] sm:$0xf] %vm4432_vm11, %v4412_v24  ;;  %v4430_v55 = vpack.c.bf16 %v4398_v7, %v4398_v7  ;;  %v4431_v35 = vpack.c.bf16 %v4399_v30, %v4399_v30 }
 0x335   : > { %4446 = vst.msk [vmem:[%s7063_s16 + $0x34] sm:$0xf] %vm4432_vm11, %v4413_v43 }
 0x336   : > { %4447 = vst.msk [vmem:[%s7063_s16 + $0x38] sm:$0xf] %vm4432_vm11, %v4414_v54 }
 0x337   : > { %4448 = vst.msk [vmem:[%s7063_s16 + $0x3c] sm:$0xf] %vm4432_vm11, %v4415_v20 }
 0x338   : > { %4449 = vst.msk [vmem:[%s7063_s16 + $0x40] sm:$0xf] %vm4432_vm11, %v4416_v52 }
 0x339   : > { %4450 = vst.msk [vmem:[%s7063_s16 + $0x44] sm:$0xf] %vm4432_vm11, %v4417_v12 }
 0x33a   : > { %4451 = vst.msk [vmem:[%s7063_s16 + $0x48] sm:$0xf] %vm4432_vm11, %v4418_v49 }
 0x33b   : > { %4452 = vst.msk [vmem:[%s7063_s16 + $0x4c] sm:$0xf] %vm4432_vm11, %v4419_v8 }
 0x33c   : > { %4453 = vst.msk [vmem:[%s7063_s16 + $0x50] sm:$0xf] %vm4432_vm11, %v4420_v63 }
 0x33d   : > { %4454 = vst.msk [vmem:[%s7063_s16 + $0x54] sm:$0xf] %vm4432_vm11, %v4421_v16 }
 0x33e   : > { %4455 = vst.msk [vmem:[%s7063_s16 + $0x58] sm:$0xf] %vm4432_vm11, %v4422_v2 }
 0x33f   : > { %4456 = vst.msk [vmem:[%s7063_s16 + $0x5c] sm:$0xf] %vm4432_vm11, %v4423_v36 }
 0x340   : > { %4457 = vst.msk [vmem:[%s7063_s16 + $0x60] sm:$0xf] %vm4432_vm11, %v4424_v6 }
 0x341   : > { %4458 = vst.msk [vmem:[%s7063_s16 + $0x64] sm:$0xf] %vm4432_vm11, %v4425_v31 }
 0x342   : > { %4459 = vst.msk [vmem:[%s7063_s16 + $0x68] sm:$0xf] %vm4432_vm11, %v4426_v29 }
 0x343   : > { %4460 = vst.msk [vmem:[%s7063_s16 + $0x6c] sm:$0xf] %vm4432_vm11, %v4427_v9 }
 0x344   : > { %4461 = vst.msk [vmem:[%s7063_s16 + $0x70] sm:$0xf] %vm4432_vm11, %v4428_v13 }
 0x345   : > { %4462 = vst.msk [vmem:[%s7063_s16 + $0x74] sm:$0xf] %vm4432_vm11, %v4429_v57 }
 0x346   : > { %4463 = vst.msk [vmem:[%s7063_s16 + $0x78] sm:$0xf] %vm4432_vm11, %v4430_v55 }
 0x347   : > { %4464 = vst.msk [vmem:[%s7063_s16 + $0x7c] sm:$0xf] %vm4432_vm11, %v4431_v35 }
 0x348 PF: > { %s13_s12 = sadd.s32 1, %s5234_s12  }
 0x349   : > { %p10_p4 = scmp.ge.s32.totalorder %s13_s12, 4  }
 0x34b   :  { %12 = sbr.rel (!%p10_p4) target bundleno = 1 (0x1), region = 72 }

// kernel: resblock_forward.3
= control target key start
LH: loop header
LB: loop body
LE: loop exit
PB: predicated region body
PF: predicated region fallthrough
CT: control target
= control target key end

     0   :  { %s5322_s15 = smov 0   ;;  %s7252_s0 = inlined_call_operand.vmem [shape: bf16[2,18,18,8], index: 0, kind: input, shape index: {}]   ;;  %s7253_s1 = inlined_call_operand.vmem [shape: bf16[9,8,8], index: 1, kind: input, shape index: {}]   ;;  %s7254_s2 = inlined_call_operand.vmem [shape: f32[1,8], index: 2, kind: input, shape index: {}]   ;;  %s7255_s3 = inlined_call_operand.vmem [shape: f32[2,256,8], index: 3, kind: input, shape index: {}]   ;;  %s7256_s4 = inlined_call_operand.vmem [shape: f32[2,256,8], index: 4, kind: output, shape index: {}]  }
   0x1 LB: > { %s4578_s16 = sadd.s32 4294967295, %s5295_s15   ;;  %p4582_p0 = scmp.ge.s32.totalorder %s5295_s15, 1  ;;  %s5295_s15 = sphi %s5322_s15, %s14_s15  }
   0x2   : > { %p172_p1 = scmp.lt.s32.totalorder %s5295_s15, 3 }
   0x4   : > { %p173_p2 = pnand %p4582_p0, %p172_p1 }
   0x6   : > { %176 = sbr.rel (%p173_p2) target bundleno = 838 (0x346), region = 36 }
   0xb   : > { %v4588_v0 = vld [vmem:[%s7253_s1 + $0x4] sm:$0xf]  ;;  %vm754_vm0 = vcmask 1043456   ;;  %p203_p3 = scmp.lt.s32.totalorder %s4578_s16, 1  ;;  %v4701_v2 = vld [vmem:[%s7253_s1 + $0x8] sm:$0xf] }
   0xc   : > { %v756_v1 = vsel %vm754_vm0, %v4588_v0, 0  ;;  %v1329_v3 = vsel %vm754_vm0, %v4701_v2, 0  ;;  %v4750_v4 = vld [vmem:[%s7253_s1 + $0xc] sm:$0xf]  ;;  %v251_v5 = vld [vmem:[%s7253_s1] sm:$0xf] }
   0xd   : > { %5224 = vmatpush.bf16.msra.mxu1 %v756_v1  ;;  %5225 = vmatpush.bf16.msra.mxu2 %v756_v1  ;;  %s7270_s16 = smov (!%p203_p3, %s4578_s16), 1  ;;  %v4879_v6 = vld [vmem:[%s7253_s1 + $0x10] sm:$0xf]  ;;  %v1616_v7 = vsel %vm754_vm0, %v4750_v4, 0  ;;  %v976_v8 = vsel %vm754_vm0, %v251_v5, 0  ;;  %vm705_vm4 = vcmask 64512  }
   0xe   : > { %5226 = vmatpush.bf16.msra.mxu3 %v756_v1  ;;  %765 = vmatpush.bf16.msra.mxu0 %v756_v1  ;;  %s5227_s27 = smul.u32 216, %s7270_s16  ;;  %v2270_v9 = vsel %vm754_vm0, %v4879_v6, 0  ;;  %vm268_vm1 = vsmask.f32 3328  ;;  %vm269_vm2 = vsmask.f32 7440 }
   0xf   : > { %vm5368_vm3 = vmor %vm268_vm1, %vm269_vm2  ;;  %vm1115_vm5 = vcmask 1042432   ;;  %vm1116_vm6 = vcmask 1046532   ;;  %s5174_s17 = sshll.u32 %s7270_s16, 8 }
  0x10   : > { %s5356_s30 = scalar_lea.vmem %s7252_s0, %s5227_s27  ;;  %vm5542_vm7 = vmor %vm1115_vm5, %vm1116_vm6  ;;  %s7075_s20 = scalar_lea.vmem %s7255_s3, %s5174_s17 }
  0x11   : > { %1338 = vmatpush.bf16.msrb.mxu2 %v1329_v3  ;;  %985 = vmatpush.bf16.msrb.mxu1 %v976_v8  ;;  %v227_v10 = vld [vmem:[%s5356_s30 + $0x30] sm:$0xf]  ;;  %v228_v11 = vld [vmem:[%s5356_s30 + $0x34] sm:$0xf]  ;;  %v256_v12 = vld [vmem:[%s5356_s30 + $0x38] sm:$0x1]  ;;  %s7118_s23 = scalar_lea.vmem %s7256_s4, %s5174_s17 }
  0x12   : > { %1625 = vmatpush.bf16.msrb.mxu3 %v1616_v7  ;;  %2279 = vmatpush.bf16.msrb.mxu0 %v2270_v9  ;;  %v368_v13 = vshrl.u32 %v227_v10, 16  ;;  %v371_v14 = vshll.u32 %v227_v10, 16  ;;  %v377_v15 = vshll.u32 %v228_v11, 16  ;;  %v381_v16 = vshrl.u32 %v228_v11, 16  ;;  %v235_v17 = vld [vmem:[%s5356_s30 + $0x60] sm:$0xf] }
  0x13   : > { %v387_v18 = vshll.u32 %v256_v12, 16  ;;  %v236_v19 = vld [vmem:[%s5356_s30 + $0x64] sm:$0xf]  ;;  %v260_v20 = vld [vmem:[%s5356_s30 + $0x68] sm:$0x1]  ;;  %v464_v21 = vshrl.u32 %v235_v17, 16 }
  0x14   : > { %v370_v22 = vrot.slane %v368_v13, 4  ;;  %v373_v23 = vrot.slane %v371_v14, 5  ;;  %v379_v24 = vrot.slane %v377_v15, 5  ;;  %v383_v25 = vrot.slane %v381_v16, 4  ;;  %v243_v26 = vld [vmem:[%s5356_s30 + $0x90] sm:$0xf] }
  0x15   : > { %v389_v27 = vrot.slane %v387_v18, 5  ;;  %v466_v28 = vrot.slane %v464_v21, 4  ;;  %v467_v29 = vshll.u32 %v235_v17, 16  ;;  %v473_v30 = vshll.u32 %v236_v19, 16  ;;  %v244_v35 = vld [vmem:[%s5356_s30 + $0x94] sm:$0xf] }
  0x16   : > { %v374_v31 = vor.u32 %v373_v23, %v370_v22  ;;  %v384_v32 = vor.u32 %v383_v25, %v379_v24  ;;  %v477_v33 = vshrl.u32 %v236_v19, 16  ;;  %v483_v34 = vshll.u32 %v260_v20, 16  ;;  %v264_v45 = vld [vmem:[%s5356_s30 + $0x98] sm:$0x1]  ;;  %v219_v61 = vld [vmem:[%s5356_s30] sm:$0xf] }
  0x17   : > { %v469_v37 = vrot.slane %v467_v29, 5  ;;  %v475_v38 = vrot.slane %v473_v30, 5  ;;  %v560_v39 = vshrl.u32 %v243_v26, 16  ;;  %v563_v47 = vshll.u32 %v243_v26, 16  ;;  %v5381_v1 = vld [vmem:[%s5356_s30 + $0x4] sm:$0xf] }
  0x18   : > { %v375_v40 = vrot.slane %v374_v31, 4  ;;  %v385_v41 = vrot.slane %v384_v32, 4  ;;  %v479_v42 = vrot.slane %v477_v33, 4  ;;  %v485_v43 = vrot.slane %v483_v34, 5  ;;  %v5384_v2 = vld [vmem:[%s5356_s30 + $0x8] sm:$0x1] }
  0x19   : > { %v470_v44 = vor.u32 %v469_v37, %v466_v28  ;;  %v562_v46 = vrot.slane %v560_v39, 4  ;;  %v569_v48 = vshll.u32 %v244_v35, 16  ;;  %v573_v52 = vshrl.u32 %v244_v35, 16  ;;  %v229_v19 = vld [vmem:[%s5356_s30 + $0x3c] sm:$0xf] }
  0x1a   : > { %v380_v49 = vsel %vm5368_vm3, %v375_v40, %v379_v24  ;;  %v390_v50 = vsel %vm5368_vm3, %v385_v41, %v389_v27  ;;  %v480_v51 = vor.u32 %v479_v42, %v475_v38  ;;  %v565_v56 = vrot.slane %v563_v47, 5  ;;  %v5396_v20 = vld [vmem:[%s5356_s30 + $0x40] sm:$0xf]  ;;  %v5401_v25 = vld [vmem:[%s5356_s30 + $0x44] sm:$0x1] }
  0x1b   : > { %v665_v53 = vunpack.c.l.b16 %v380_v49  ;;  %v666_v54 = vunpack.c.l.b16 %v390_v50  ;;  %v471_v55 = vrot.slane %v470_v44, 4  ;;  %v571_v58 = vrot.slane %v569_v48, 5  ;;  %v237_v33 = vld [vmem:[%s5356_s30 + $0x6c] sm:$0xf]  ;;  %v261_v47 = vld [vmem:[%s5356_s30 + $0x74] sm:$0x1] }
  0x1c   : > { %v481_v57 = vrot.slane %v480_v51, 4  ;;  %v575_v59 = vrot.slane %v573_v52, 4  ;;  %v579_v60 = vshll.u32 %v264_v45, 16  ;;  %v566_v0 = vor.u32 %v565_v56, %v562_v46 }
  0x1d   : > { %v693_v62 = vpack.c.b16 %v666_v54, %v665_v53  ;;  %v476_v63 = vsel %vm5368_vm3, %v471_v55, %v475_v38  ;;  %v272_v9 = vshrl.u32 %v219_v61, 16  ;;  %v275_v10 = vshll.u32 %v219_v61, 16  ;;  %v245_v61 = vld [vmem:[%s5356_s30 + $0x9c] sm:$0xf] }
  0x1e   : > { %v486_v3 = vsel %vm5368_vm3, %v481_v57, %v485_v43  ;;  %v673_v4 = vunpack.c.l.b16 %v476_v63  ;;  %v576_v5 = vor.u32 %v575_v59, %v571_v58  ;;  %v581_v6 = vrot.slane %v579_v60, 5  ;;  %v238_v43 = vld [vmem:[%s5356_s30 + $0x70] sm:$0xf] }
  0x1f   : > { %4593 = vmatmul.msk.bf16.vlgmr.msra.gmra.mxu1 %vm705_vm4, %v693_v62  ;;  %v674_v7 = vunpack.c.l.b16 %v486_v3  ;;  %v567_v8 = vrot.slane %v566_v0, 4  ;;  %v281_v12 = vshll.u32 %v5381_v1, 16  ;;  %v285_v13 = vshrl.u32 %v5381_v1, 16  ;;  %v246_v3 = vld [vmem:[%s5356_s30 + $0xa0] sm:$0xf] }
  0x20   : > { %v577_v11 = vrot.slane %v576_v5, 4  ;;  %v291_v14 = vshll.u32 %v5384_v2, 16  ;;  %v274_v17 = vrot.slane %v272_v9, 4  ;;  %v277_v18 = vrot.slane %v275_v10, 5 }
  0x21   : > { %v697_v15 = vpack.c.b16 %v674_v7, %v673_v4  ;;  %v572_v16 = vsel %vm5368_vm3, %v567_v8, %v571_v58  ;;  %v283_v23 = vrot.slane %v281_v12, 5  ;;  %v287_v24 = vrot.slane %v285_v13, 4  ;;  %v265_v8 = vld [vmem:[%s5356_s30 + $0xa4] sm:$0x1] }
  0x22   : > { %v582_v21 = vsel %vm5368_vm3, %v577_v11, %v581_v6  ;;  %v681_v22 = vunpack.c.l.b16 %v572_v16  ;;  %v278_v27 = vor.u32 %v277_v18, %v274_v17  ;;  %v293_v28 = vrot.slane %v291_v14, 5 }
  0x23   : > { %4597 = vmatmul.msk.bf16.vlgmr.msra.gmra.mxu2 %vm705_vm4, %v697_v15  ;;  %v682_v26 = vunpack.c.l.b16 %v582_v21  ;;  %v288_v29 = vor.u32 %v287_v24, %v283_v23  ;;  %v392_v30 = vshrl.u32 %v229_v19, 16  ;;  %v395_v31 = vshll.u32 %v229_v19, 16 }
  0x24   : > { %v401_v32 = vshll.u32 %v5396_v20, 16  ;;  %v279_v35 = vrot.slane %v278_v27, 4  ;;  %v405_v37 = vshrl.u32 %v5396_v20, 16  ;;  %v411_v38 = vshll.u32 %v5401_v25, 16 }
  0x25   : > { %v701_v34 = vpack.c.b16 %v682_v26, %v681_v22  ;;  %v289_v39 = vrot.slane %v288_v29, 4  ;;  %v394_v40 = vrot.slane %v392_v30, 4  ;;  %v397_v41 = vrot.slane %v395_v31, 5  ;;  %v221_v22 = vld [vmem:[%s5356_s30 + $0xc] sm:$0xf] }
  0x26   : > { %v403_v42 = vrot.slane %v401_v32, 5  ;;  %v284_v44 = vsel %vm5368_vm3, %v279_v35, %v283_v23  ;;  %v407_v45 = vrot.slane %v405_v37, 4  ;;  %v413_v46 = vrot.slane %v411_v38, 5  ;;  %v5430_v32 = vld [vmem:[%s5356_s30 + $0x14] sm:$0x1] }
  0x27   : > { %4601 = vmatmul.msk.bf16.vlgmr.msra.gmra.mxu3 %vm705_vm4, %v701_v34  ;;  %v488_v48 = vshrl.u32 %v237_v33, 16  ;;  %v294_v49 = vsel %vm5368_vm3, %v289_v39, %v293_v28  ;;  %v657_v50 = vunpack.c.l.b16 %v284_v44  ;;  %v398_v51 = vor.u32 %v397_v41, %v394_v40  ;;  %v5427_v28 = vld [vmem:[%s5356_s30 + $0x10] sm:$0xf] }
  0x28   : > { %v491_v52 = vshll.u32 %v237_v33, 16  ;;  %v658_v53 = vunpack.c.l.b16 %v294_v49  ;;  %v408_v54 = vor.u32 %v407_v45, %v403_v42  ;;  %v497_v56 = vshll.u32 %v238_v43, 16 }
  0x29   : > { %v490_v55 = vrot.slane %v488_v48, 4  ;;  %v399_v57 = vrot.slane %v398_v51, 4  ;;  %v501_v59 = vshrl.u32 %v238_v43, 16  ;;  %v507_v60 = vshll.u32 %v261_v47, 16  ;;  %v5440_v47 = vld [vmem:[%s5356_s30 + $0x4c] sm:$0xf] }
  0x2a   : > { %v493_v58 = vrot.slane %v491_v52, 5  ;;  %v689_v62 = vpack.c.b16 %v658_v53, %v657_v50  ;;  %v409_v63 = vrot.slane %v408_v54, 4  ;;  %v499_v0 = vrot.slane %v497_v56, 5  ;;  %v5445_v56 = vld [vmem:[%s5356_s30 + $0x50] sm:$0x1] }
  0x2b   : > { %v404_v4 = vsel %vm5368_vm3, %v399_v57, %v403_v42  ;;  %v503_v6 = vrot.slane %v501_v59, 4  ;;  %v509_v7 = vrot.slane %v507_v60, 5  ;;  %v584_v11 = vshrl.u32 %v245_v61, 16  ;;  %v231_v42 = vld [vmem:[%s5356_s30 + $0x48] sm:$0xf] }
  0x2c   : > { %v494_v5 = vor.u32 %v493_v58, %v490_v55  ;;  %4589 = vmatmul.msk.bf16.vlgmr.msra.gmra.mxu0 %vm705_vm4, %v689_v62  ;;  %v414_v9 = vsel %vm5368_vm3, %v409_v63, %v413_v46  ;;  %v667_v10 = vunpack.c.l.b16 %v404_v4  ;;  %v587_v12 = vshll.u32 %v245_v61, 16 }
  0x2d   : > { %v668_v13 = vunpack.c.l.b16 %v414_v9  ;;  %v504_v15 = vor.u32 %v503_v6, %v499_v0  ;;  %v593_v16 = vshll.u32 %v246_v3, 16  ;;  %v586_v17 = vrot.slane %v584_v11, 4 }
  0x2e   : > { %v495_v14 = vrot.slane %v494_v5, 4  ;;  %v589_v18 = vrot.slane %v587_v12, 5  ;;  %v597_v19 = vshrl.u32 %v246_v3, 16  ;;  %v603_v21 = vshll.u32 %v265_v8, 16  ;;  %v239_v3 = vld [vmem:[%s5356_s30 + $0x78] sm:$0xf] }
  0x2f   : > { %v694_v23 = vpack.c.b16 %v668_v13, %v667_v10  ;;  %v505_v26 = vrot.slane %v504_v15, 4  ;;  %v595_v27 = vrot.slane %v593_v16, 5  ;;  %v296_v35 = vshrl.u32 %v221_v22, 16  ;;  %v240_v8 = vld [vmem:[%s5356_s30 + $0x7c] sm:$0xf] }
  0x30   : > { %v500_v24 = vsel %vm5368_vm3, %v495_v14, %v499_v0  ;;  %v590_v30 = vor.u32 %v589_v18, %v586_v17  ;;  %v599_v31 = vrot.slane %v597_v19, 4  ;;  %v605_v34 = vrot.slane %v603_v21, 5  ;;  %v262_v16 = vld [vmem:[%s5356_s30 + $0x80] sm:$0x1] }
  0x31   : > { %v675_v29 = vunpack.c.l.b16 %v500_v24  ;;  %4594 = vmatmul.msk.bf16.gmra.mxu1 %vm705_vm4, %v694_v23  ;;  %v510_v33 = vsel %vm5368_vm3, %v505_v26, %v509_v7  ;;  %v299_v37 = vshll.u32 %v221_v22, 16  ;;  %v305_v41 = vshll.u32 %v5427_v28, 16 }
  0x32   : > { %v676_v38 = vunpack.c.l.b16 %v510_v33  ;;  %v591_v39 = vrot.slane %v590_v30, 4  ;;  %v600_v40 = vor.u32 %v599_v31, %v595_v27  ;;  %v298_v43 = vrot.slane %v296_v35, 4 }
  0x33   : > { %v301_v44 = vrot.slane %v299_v37, 5  ;;  %v309_v45 = vshrl.u32 %v5427_v28, 16  ;;  %v315_v46 = vshll.u32 %v5430_v32, 16  ;;  %v307_v51 = vrot.slane %v305_v41, 5 }
  0x34   : > { %v698_v48 = vpack.c.b16 %v676_v38, %v675_v29  ;;  %v596_v49 = vsel %vm5368_vm3, %v591_v39, %v595_v27  ;;  %v601_v50 = vrot.slane %v600_v40, 4  ;;  %v416_v58 = vshrl.u32 %v231_v42, 16  ;;  %v248_v39 = vld [vmem:[%s5356_s30 + $0xac] sm:$0xf]  ;;  %v266_v40 = vld [vmem:[%s5356_s30 + $0xb0] sm:$0x1] }
  0x35   : > { %v683_v52 = vunpack.c.l.b16 %v596_v49  ;;  %v302_v53 = vor.u32 %v301_v44, %v298_v43  ;;  %v311_v54 = vrot.slane %v309_v45, 4  ;;  %v317_v55 = vrot.slane %v315_v46, 5 }
  0x36   : > { %4598 = vmatmul.msk.bf16.gmra.mxu2 %vm705_vm4, %v698_v48  ;;  %v606_v57 = vsel %vm5368_vm3, %v601_v50, %v605_v34  ;;  %v419_v59 = vshll.u32 %v231_v42, 16  ;;  %v425_v60 = vshll.u32 %v5440_v47, 16  ;;  %v429_v0 = vshrl.u32 %v5440_v47, 16  ;;  %v247_v34 = vld [vmem:[%s5356_s30 + $0xa8] sm:$0xf] }
  0x37   : > { %v684_v61 = vunpack.c.l.b16 %v606_v57  ;;  %v303_v62 = vrot.slane %v302_v53, 4  ;;  %v312_v63 = vor.u32 %v311_v54, %v307_v51  ;;  %v418_v4 = vrot.slane %v416_v58, 4 }
  0x38   : > { %v421_v5 = vrot.slane %v419_v59, 5  ;;  %v427_v6 = vrot.slane %v425_v60, 5  ;;  %v435_v7 = vshll.u32 %v5445_v56, 16  ;;  %v431_v12 = vrot.slane %v429_v0, 4  ;;  %v223_v59 = vld [vmem:[%s5356_s30 + $0x18] sm:$0xf] }
  0x39   : > { %v702_v9 = vpack.c.b16 %v684_v61, %v683_v52  ;;  %v308_v10 = vsel %vm5368_vm3, %v303_v62, %v307_v51  ;;  %v313_v11 = vrot.slane %v312_v63, 4  ;;  %v512_v17 = vshrl.u32 %v239_v3, 16  ;;  %v5473_v63 = vld [vmem:[%s5356_s30 + $0x1c] sm:$0xf]  ;;  %v5476_v0 = vld [vmem:[%s5356_s30 + $0x20] sm:$0x1] }
  0x3a   : > { %v659_v13 = vunpack.c.l.b16 %v308_v10  ;;  %v422_v14 = vor.u32 %v421_v5, %v418_v4  ;;  %v437_v15 = vrot.slane %v435_v7, 5  ;;  %v432_v19 = vor.u32 %v431_v12, %v427_v6 }
  0x3b   : > { %4602 = vmatmul.msk.bf16.gmra.mxu3 %vm705_vm4, %v702_v9  ;;  %v318_v18 = vsel %vm5368_vm3, %v313_v11, %v317_v55  ;;  %v515_v21 = vshll.u32 %v239_v3, 16  ;;  %v521_v22 = vshll.u32 %v240_v8, 16  ;;  %v514_v26 = vrot.slane %v512_v17, 4 }
  0x3c   : > { %v660_v23 = vunpack.c.l.b16 %v318_v18  ;;  %v423_v24 = vrot.slane %v422_v14, 4  ;;  %v525_v27 = vshrl.u32 %v240_v8, 16  ;;  %v433_v29 = vrot.slane %v432_v19, 4 }
  0x3d   : > { %v517_v30 = vrot.slane %v515_v21, 5  ;;  %v523_v31 = vrot.slane %v521_v22, 5  ;;  %v531_v33 = vshll.u32 %v262_v16, 16  ;;  %v608_v48 = vshrl.u32 %v247_v34, 16  ;;  %v5486_v21 = vld [vmem:[%s5356_s30 + $0x58] sm:$0xf] }
  0x3e   : > { %v690_v35 = vpack.c.b16 %v660_v23, %v659_v13  ;;  %v428_v37 = vsel %vm5368_vm3, %v423_v24, %v427_v6  ;;  %v527_v38 = vrot.slane %v525_v27, 4  ;;  %v438_v41 = vsel %vm5368_vm3, %v433_v29, %v437_v15  ;;  %v233_v15 = vld [vmem:[%s5356_s30 + $0x54] sm:$0xf]  ;;  %v5491_v27 = vld [vmem:[%s5356_s30 + $0x5c] sm:$0x1] }
  0x3f   : > { %v669_v42 = vunpack.c.l.b16 %v428_v37  ;;  %v518_v43 = vor.u32 %v517_v30, %v514_v26  ;;  %v533_v44 = vrot.slane %v531_v33, 5  ;;  %v670_v45 = vunpack.c.l.b16 %v438_v41 }
  0x40   : > { %4590 = vmatmul.msk.bf16.gmra.mxu0 %vm705_vm4, %v690_v35  ;;  %v528_v46 = vor.u32 %v527_v38, %v523_v31  ;;  %v611_v49 = vshll.u32 %v247_v34, 16  ;;  %v617_v51 = vshll.u32 %v248_v39, 16  ;;  %v621_v52 = vshrl.u32 %v248_v39, 16  ;;  %v241_v39 = vld [vmem:[%s5356_s30 + $0x84] sm:$0xf] }
  0x41   : > { %v519_v50 = vrot.slane %v518_v43, 4  ;;  %v627_v53 = vshll.u32 %v266_v40, 16  ;;  %v695_v54 = vpack.c.b16 %v670_v45, %v669_v42  ;;  %v610_v57 = vrot.slane %v608_v48, 4 }
  0x42   : > { %v529_v55 = vrot.slane %v528_v46, 4  ;;  %v613_v58 = vrot.slane %v611_v49, 5  ;;  %v619_v61 = vrot.slane %v617_v51, 5  ;;  %v623_v62 = vrot.slane %v621_v52, 4  ;;  %v242_v49 = vld [vmem:[%s5356_s30 + $0x88] sm:$0xf] }
  0x43   : > { %v524_v60 = vsel %vm5368_vm3, %v519_v50, %v523_v31  ;;  %4595 = vmatmul.msk.bf16.gmra.mxu1 %vm705_vm4, %v695_v54  ;;  %v629_v6 = vrot.slane %v627_v53, 5  ;;  %v320_v9 = vshrl.u32 %v223_v59, 16  ;;  %v323_v10 = vshll.u32 %v223_v59, 16  ;;  %v263_v53 = vld [vmem:[%s5356_s30 + $0x8c] sm:$0x1] }
  0x44   : > { %v534_v3 = vsel %vm5368_vm3, %v529_v55, %v533_v44  ;;  %v677_v4 = vunpack.c.l.b16 %v524_v60  ;;  %v614_v5 = vor.u32 %v613_v58, %v610_v57  ;;  %v624_v8 = vor.u32 %v623_v62, %v619_v61 }
  0x45   : > { %v678_v7 = vunpack.c.l.b16 %v534_v3  ;;  %v329_v12 = vshll.u32 %v5473_v63, 16  ;;  %v333_v13 = vshrl.u32 %v5473_v63, 16  ;;  %v339_v14 = vshll.u32 %v5476_v0, 16 }
  0x46   : > { %v615_v11 = vrot.slane %v614_v5, 4  ;;  %v625_v17 = vrot.slane %v624_v8, 4  ;;  %v322_v18 = vrot.slane %v320_v9, 4  ;;  %v325_v19 = vrot.slane %v323_v10, 5  ;;  %v249_v8 = vld [vmem:[%s5356_s30 + $0xb4] sm:$0xf] }
  0x47   : > { %v699_v16 = vpack.c.b16 %v678_v7, %v677_v4  ;;  %v331_v23 = vrot.slane %v329_v12, 5  ;;  %v335_v24 = vrot.slane %v333_v13, 4  ;;  %v341_v26 = vrot.slane %v339_v14, 5  ;;  %v250_v12 = vld [vmem:[%s5356_s30 + $0xb8] sm:$0xf] }
  0x48   : > { %v620_v22 = vsel %vm5368_vm3, %v615_v11, %v619_v61  ;;  %v630_v29 = vsel %vm5368_vm3, %v625_v17, %v629_v6  ;;  %v326_v31 = vor.u32 %v325_v19, %v322_v18  ;;  %v440_v33 = vshrl.u32 %v233_v15, 16  ;;  %v267_v17 = vld [vmem:[%s5356_s30 + $0xbc] sm:$0x1] }
  0x49   : > { %4599 = vmatmul.msk.bf16.gmra.mxu2 %vm705_vm4, %v699_v16  ;;  %v685_v30 = vunpack.c.l.b16 %v620_v22  ;;  %v686_v34 = vunpack.c.l.b16 %v630_v29  ;;  %v336_v35 = vor.u32 %v335_v24, %v331_v23  ;;  %v443_v37 = vshll.u32 %v233_v15, 16 }
  0x4a   : > { %v449_v38 = vshll.u32 %v5486_v21, 16  ;;  %v327_v40 = vrot.slane %v326_v31, 4  ;;  %v442_v41 = vrot.slane %v440_v33, 4  ;;  %v453_v42 = vshrl.u32 %v5486_v21, 16 }
  0x4b   : > { %v459_v43 = vshll.u32 %v5491_v27, 16  ;;  %v703_v44 = vpack.c.b16 %v686_v34, %v685_v30  ;;  %v337_v45 = vrot.slane %v336_v35, 4  ;;  %v445_v46 = vrot.slane %v443_v37, 5  ;;  %v225_v37 = vld [vmem:[%s5356_s30 + $0x24] sm:$0xf] }
  0x4c   : > { %v451_v48 = vrot.slane %v449_v38, 5  ;;  %v332_v50 = vsel %vm5368_vm3, %v327_v40, %v331_v23  ;;  %v455_v51 = vrot.slane %v453_v42, 4  ;;  %v536_v54 = vshrl.u32 %v241_v39, 16  ;;  %v5519_v42 = vld [vmem:[%s5356_s30 + $0x28] sm:$0xf] }
  0x4d   : > { %v461_v52 = vrot.slane %v459_v43, 5  ;;  %4603 = vmatmul.msk.bf16.gmra.mxu3 %vm705_vm4, %v703_v44  ;;  %v342_v55 = vsel %vm5368_vm3, %v337_v45, %v341_v26  ;;  %v661_v57 = vunpack.c.l.b16 %v332_v50  ;;  %v446_v58 = vor.u32 %v445_v46, %v442_v41 }
  0x4e   : > { %v539_v59 = vshll.u32 %v241_v39, 16  ;;  %v662_v60 = vunpack.c.l.b16 %v342_v55  ;;  %v456_v61 = vor.u32 %v455_v51, %v451_v48  ;;  %v538_v62 = vrot.slane %v536_v54, 4 }
  0x4f   : > { %v545_v3 = vshll.u32 %v242_v49, 16  ;;  %v447_v4 = vrot.slane %v446_v58, 4  ;;  %v549_v6 = vshrl.u32 %v242_v49, 16  ;;  %v555_v7 = vshll.u32 %v263_v53, 16 }
  0x50   : > { %v541_v5 = vrot.slane %v539_v59, 5  ;;  %v691_v9 = vpack.c.b16 %v662_v60, %v661_v57  ;;  %v457_v10 = vrot.slane %v456_v61, 4  ;;  %v632_v22 = vshrl.u32 %v249_v8, 16  ;;  %v1067_v61 = vld [vmem:[%s5356_s30] sm:$0xe] }
  0x51   : > { %v547_v11 = vrot.slane %v545_v3, 5  ;;  %v452_v13 = vsel %vm5368_vm3, %v447_v4, %v451_v48  ;;  %v551_v15 = vrot.slane %v549_v6, 4  ;;  %v557_v16 = vrot.slane %v555_v7, 5  ;;  %v5523_v48 = vld [vmem:[%s5356_s30 + $0x2c] sm:$0x1] }
  0x52   : > { %v542_v14 = vor.u32 %v541_v5, %v538_v62  ;;  %4591 = vmatmul.msk.bf16.gmra.mxu0 %vm705_vm4, %v691_v9  ;;  %v462_v18 = vsel %vm5368_vm3, %v457_v10, %v461_v52  ;;  %v671_v19 = vunpack.c.l.b16 %v452_v13  ;;  %v635_v23 = vshll.u32 %v249_v8, 16  ;;  %v4831_v6 = vld [vmem:[%s5356_s30 + $0xc] sm:$0xf] }
  0x53   : > { %v672_v24 = vunpack.c.l.b16 %v462_v18  ;;  %v552_v29 = vor.u32 %v551_v15, %v547_v11  ;;  %v641_v30 = vshll.u32 %v250_v12, 16  ;;  %v634_v31 = vrot.slane %v632_v22, 4 }
  0x54   : > { %v543_v26 = vrot.slane %v542_v14, 4  ;;  %v637_v33 = vrot.slane %v635_v23, 5  ;;  %v645_v34 = vshrl.u32 %v250_v12, 16  ;;  %v651_v35 = vshll.u32 %v267_v17, 16  ;;  %v4832_v12 = vld [vmem:[%s5356_s30 + $0x10] sm:$0xf] }
  0x55   : > { %v696_v38 = vpack.c.b16 %v672_v24, %v671_v19  ;;  %v553_v40 = vrot.slane %v552_v29, 4  ;;  %v643_v41 = vrot.slane %v641_v30, 5  ;;  %v1123_v43 = vrot.slane %v5384_v2, 5 }
  0x56   : > { %v548_v39 = vsel %vm5368_vm3, %v543_v26, %v547_v11  ;;  %v638_v45 = vor.u32 %v637_v33, %v634_v31  ;;  %v647_v46 = vrot.slane %v645_v34, 4  ;;  %v653_v50 = vrot.slane %v651_v35, 5  ;;  %v4977_v11 = vld [vmem:[%s7253_s1 + $0x18] sm:$0xf] }
  0x57   : > { %v679_v44 = vunpack.c.l.b16 %v548_v39  ;;  %4596 = vmatmul.msk.bf16.gmra.mxu1 %vm705_vm4, %v696_v38  ;;  %v558_v49 = vsel %vm5368_vm3, %v553_v40, %v557_v16  ;;  %v344_v51 = vshrl.u32 %v225_v37, 16  ;;  %v347_v52 = vshll.u32 %v225_v37, 16  ;;  %v4833_v38 = vld [vmem:[%s5356_s30 + $0x14] sm:$0x1] }
  0x58   : > { %v680_v53 = vunpack.c.l.b16 %v558_v49  ;;  %v639_v54 = vrot.slane %v638_v45, 4  ;;  %v648_v55 = vor.u32 %v647_v46, %v643_v41  ;;  %v353_v2 = vshll.u32 %v5519_v42, 16  ;;  %v5106_v45 = vld [vmem:[%s7253_s1 + $0x1c] sm:$0xf] }
  0x59   : > { %v346_v57 = vrot.slane %v344_v51, 4  ;;  %v349_v58 = vrot.slane %v347_v52, 5  ;;  %v357_v59 = vshrl.u32 %v5519_v42, 16  ;;  %v363_v60 = vshll.u32 %v5523_v48, 16  ;;  %v5176_v51 = vld [vmem:[%s5356_s30] sm:$0xff] }
  0x5a   : > { %v700_v62 = vpack.c.b16 %v680_v53, %v679_v44  ;;  %v644_v3 = vsel %vm5368_vm3, %v639_v54, %v643_v41  ;;  %v649_v4 = vrot.slane %v648_v55, 4  ;;  %v355_v5 = vrot.slane %v353_v2, 5  ;;  %v5155_v2 = vld [vmem:[%s7253_s1 + $0x20] sm:$0xf] }
  0x5b   : > { %v687_v7 = vunpack.c.l.b16 %v644_v3  ;;  %v350_v8 = vor.u32 %v349_v58, %v346_v57  ;;  %v359_v9 = vrot.slane %v357_v59, 4  ;;  %v365_v10 = vrot.slane %v363_v60, 5 }
  0x5c   : > { %4600 = vmatmul.msk.bf16.gmra.mxu2 %vm705_vm4, %v700_v62  ;;  %v654_v13 = vsel %vm5368_vm3, %v649_v4, %v653_v50  ;;  %v4685_v14 = vrot.slane %v1067_v61, 9  ;;  %v1120_v19 = vrot.slane %v5381_v1, 5  ;;  %v2955_v22 = vsel %vm754_vm0, %v4977_v11, 0  ;;  %v4928_v50 = vld [vmem:[%s7253_s1 + $0x14] sm:$0xf] }
  0x5d   : > { %v688_v15 = vunpack.c.l.b16 %v654_v13  ;;  %v351_v16 = vrot.slane %v350_v8, 4  ;;  %v360_v17 = vor.u32 %v359_v9, %v355_v5  ;;  %v1788_v23 = vshrl.u32 %v4831_v6, 16  ;;  %2964 = vmatpush.bf16.msra.mxu2 %v2955_v22  ;;  %v1068_v8 = vld [vmem:[%s5356_s30 + $0xc] sm:$0xe] }
  0x5e   : > { %v1791_v24 = vshll.u32 %v4831_v6, 16  ;;  %v1797_v26 = vshll.u32 %v4832_v12, 16  ;;  %v1121_v33 = vsel %vm5542_vm7, %v4685_v14, %v1120_v19  ;;  %v1122_v35 = vrot.slane %v1120_v19, 4  ;;  %v4835_v6 = vld [vmem:[%s5356_s30 + $0x1c] sm:$0xf] }
  0x5f   : > { %v704_v29 = vpack.c.b16 %v688_v15, %v687_v7  ;;  %v356_v30 = vsel %vm5368_vm3, %v351_v16, %v355_v5  ;;  %v361_v31 = vrot.slane %v360_v17, 4  ;;  %v1232_v37 = vunpack.c.l.b16 %v1121_v33  ;;  %v4834_v5 = vld [vmem:[%s5356_s30 + $0x18] sm:$0xf]  ;;  %v5192_v15 = vld [vmem:[%s5356_s30 + $0xc] sm:$0xff] }
  0x60   : > { %v663_v34 = vunpack.c.l.b16 %v356_v30  ;;  %v1790_v1 = vrot.slane %v1788_v23, 4  ;;  %v1793_v40 = vrot.slane %v1791_v24, 5  ;;  %v1799_v41 = vrot.slane %v1797_v26, 5  ;;  %v4836_v30 = vld [vmem:[%s5356_s30 + $0x20] sm:$0x1] }
  0x61   : > { %4604 = vmatmul.msk.bf16.gmra.mxu3 %vm705_vm4, %v704_v29  ;;  %v366_v39 = vsel %vm5368_vm3, %v361_v31, %v365_v10  ;;  %v1801_v44 = vshrl.u32 %v4832_v12, 16  ;;  %v1124_v49 = vsel %vm5542_vm7, %v1122_v35, %v1123_v43  ;;  %v1807_v55 = vshll.u32 %v4833_v38, 16  ;;  %v5177_v35 = vld [vmem:[%s5356_s30 + $0xc] sm:$0xff] }
  0x62   : > { %v664_v46 = vunpack.c.l.b16 %v366_v39  ;;  %v1233_v52 = vunpack.c.l.b16 %v1124_v49  ;;  %v1794_v53 = vor.u32 %v1793_v40, %v1790_v1  ;;  %v3609_v58 = vsel %vm754_vm0, %v5106_v45, 0 }
  0x63   : > { %v1803_v54 = vrot.slane %v1801_v44, 4  ;;  %3618 = vmatpush.bf16.msra.mxu3 %v3609_v58  ;;  %v2668_v60 = vsel %vm754_vm0, %v4928_v50, 0  ;;  %v4007_v61 = vsel %vm754_vm0, %v5155_v2, 0  ;;  %v1809_v4 = vrot.slane %v1807_v55, 5  ;;  %v1069_v50 = vld [vmem:[%s5356_s30 + $0x18] sm:$0xe] }
  0x64   : > { %v692_v57 = vpack.c.b16 %v664_v46, %v663_v34  ;;  %v1264_v43 = vpack.c.b16 %v1233_v52, %v1232_v37  ;;  %2677 = vmatpush.bf16.msra.mxu1 %v2668_v60  ;;  %v1795_v62 = vrot.slane %v1794_v53, 4  ;;  %4016 = vmatpush.bf16.msra.mxu0 %v4007_v61  ;;  %v1127_v7 = vrot.slane %v5427_v28, 5  ;;  %v4838_v46 = vld [vmem:[%s5356_s30 + $0x28] sm:$0xf] }
  0x65   : > { %v1804_v59 = vor.u32 %v1803_v54, %v1799_v41  ;;  %v1812_v9 = vshrl.u32 %v4834_v5, 16  ;;  %v1815_v10 = vshll.u32 %v4834_v5, 16  ;;  %v1821_v13 = vshll.u32 %v4835_v6, 16 }
  0x66   : > { %4592 = vmatmul.msk.bf16.gmra.mxu0 %vm705_vm4, %v692_v57  ;;  %v1800_v11 = vsel %vm5368_vm3, %v1795_v62, %v1799_v41  ;;  %v1825_v14 = vshrl.u32 %v4835_v6, 16  ;;  %v4686_v16 = vrot.slane %v1068_v8, 9  ;;  %v1129_v17 = vrot.slane %v1127_v7, 4  ;;  %v4837_v41 = vld [vmem:[%s5356_s30 + $0x24] sm:$0xf] }
  0x67   : > { %4669 = vmatmul.msk.bf16.vlgmr.msrb.gmra.mxu1 %vm705_vm4, %v5176_v51  ;;  %v1805_v3 = vrot.slane %v1804_v59, 4  ;;  %v1130_v28 = vrot.slane %v5430_v32, 5  ;;  %v2173_v19 = vunpack.c.l.b16 %v1800_v11  ;;  %v1814_v23 = vrot.slane %v1812_v9, 4  ;;  %v4839_v6 = vld [vmem:[%s5356_s30 + $0x2c] sm:$0x1] }
  0x68   : > { %v1817_v24 = vrot.slane %v1815_v10, 5  ;;  %v1823_v26 = vrot.slane %v1821_v13, 5  ;;  %v1827_v29 = vrot.slane %v1825_v14, 4  ;;  %v1128_v31 = vsel %vm5542_vm7, %v4686_v16, %v1127_v7 }
  0x69   : > { %v1810_v12 = vsel %vm5368_vm3, %v1805_v3, %v1809_v4  ;;  %v1131_v33 = vsel %vm5542_vm7, %v1129_v17, %v1130_v28  ;;  %v1831_v38 = vshll.u32 %v4836_v30, 16  ;;  %v1234_v1 = vunpack.c.l.b16 %v1128_v31 }
  0x6a   : > { %v2174_v22 = vunpack.c.l.b16 %v1810_v12  ;;  %v1818_v32 = vor.u32 %v1817_v24, %v1814_v23  ;;  %v1828_v37 = vor.u32 %v1827_v29, %v1823_v26  ;;  %v1235_v39 = vunpack.c.l.b16 %v1131_v33  ;;  %v5178_v12 = vld [vmem:[%s5356_s30 + $0x18] sm:$0xff]  ;;  %v1070_v29 = vld [vmem:[%s5356_s30 + $0x24] sm:$0xe] }
  0x6b   : > { %v1833_v45 = vrot.slane %v1831_v38, 5  ;;  %v1134_v51 = vrot.slane %v5473_v63, 5  ;;  %v1836_v52 = vshrl.u32 %v4837_v41, 16  ;;  %v1839_v54 = vshll.u32 %v4837_v41, 16 }
  0x6c   : > { %4702 = vmatmul.msk.bf16.vlgmr.msrb.gmra.mxu2 %vm705_vm4, %v1264_v43  ;;  %v2205_v34 = vpack.c.b16 %v2174_v22, %v2173_v19  ;;  %v1819_v40 = vrot.slane %v1818_v32, 4  ;;  %v1829_v44 = vrot.slane %v1828_v37, 4  ;;  %v1265_v49 = vpack.c.b16 %v1235_v39, %v1234_v1  ;;  %v5193_v43 = vld [vmem:[%s5356_s30 + $0x18] sm:$0xff]  ;;  %v4840_v19 = vld [vmem:[%s5356_s30 + $0x30] sm:$0xf]  ;;  %v5194_v32 = vld [vmem:[%s5356_s30 + $0x24] sm:$0xff] }
  0x6d   : > { %v1845_v55 = vshll.u32 %v4838_v46, 16  ;;  %v1849_v2 = vshrl.u32 %v4838_v46, 16  ;;  %v4687_v58 = vrot.slane %v1069_v50, 9  ;;  %v1136_v60 = vrot.slane %v1134_v51, 4  ;;  %v4841_v22 = vld [vmem:[%s5356_s30 + $0x34] sm:$0xf] }
  0x6e   : > { %v1824_v53 = vsel %vm5368_vm3, %v1819_v40, %v1823_v26  ;;  %v1834_v57 = vsel %vm5368_vm3, %v1829_v44, %v1833_v45  ;;  %v1137_v63 = vrot.slane %v5476_v0, 5  ;;  %v1838_v61 = vrot.slane %v1836_v52, 4  ;;  %v4842_v45 = vld [vmem:[%s5356_s30 + $0x38] sm:$0x1] }
  0x6f   : > { %v2175_v59 = vunpack.c.l.b16 %v1824_v53  ;;  %v2176_v62 = vunpack.c.l.b16 %v1834_v57  ;;  %v1841_v3 = vrot.slane %v1839_v54, 5  ;;  %v1847_v4 = vrot.slane %v1845_v55, 5  ;;  %v4844_v57 = vld [vmem:[%s5356_s30 + $0x40] sm:$0xf] }
  0x70   : > { %v1851_v5 = vrot.slane %v1849_v2, 4  ;;  %v1135_v7 = vsel %vm5542_vm7, %v4687_v58, %v1134_v51  ;;  %v1138_v8 = vsel %vm5542_vm7, %v1136_v60, %v1137_v63  ;;  %v1855_v0 = vshll.u32 %v4839_v6, 16  ;;  %v4843_v2 = vld [vmem:[%s5356_s30 + $0x3c] sm:$0xf]  ;;  %v5239_v63 = vld [vmem:[%s5356_s30 + $0x34] sm:$0xf] }
  0x71   : > { %4815 = vmatmul.msk.bf16.vlgmr.msrb.gmra.mxu3 %vm705_vm4, %v5192_v15  ;;  %v2206_v9 = vpack.c.b16 %v2176_v62, %v2175_v59  ;;  %v1842_v10 = vor.u32 %v1841_v3, %v1838_v61  ;;  %v1236_v13 = vunpack.c.l.b16 %v1135_v7  ;;  %v1237_v14 = vunpack.c.l.b16 %v1138_v8  ;;  %v1071_v62 = vld [vmem:[%s5356_s30 + $0x30] sm:$0xe] }
  0x72   : > { %v1852_v11 = vor.u32 %v1851_v5, %v1847_v4  ;;  %v1857_v17 = vrot.slane %v1855_v0, 5  ;;  %v1141_v23 = vrot.slane %v5519_v42, 5  ;;  %v1860_v30 = vshrl.u32 %v4840_v19, 16  ;;  %v5240_v0 = vld [vmem:[%s5356_s30 + $0x38] sm:$0x1] }
  0x73   : > { %v1843_v15 = vrot.slane %v1842_v10, 4  ;;  %v1266_v28 = vpack.c.b16 %v1237_v14, %v1236_v13  ;;  %v1863_v31 = vshll.u32 %v4840_v19, 16  ;;  %v1869_v33 = vshll.u32 %v4841_v22, 16  ;;  %v5195_v13 = vld [vmem:[%s5356_s30 + $0x30] sm:$0xff] }
  0x74   : > { %v1853_v16 = vrot.slane %v1852_v11, 4  ;;  %v1143_v37 = vrot.slane %v1141_v23, 4  ;;  %v1144_v42 = vrot.slane %v5523_v48, 5  ;;  %v1862_v39 = vrot.slane %v1860_v30, 4  ;;  %v5179_v48 = vld [vmem:[%s5356_s30 + $0x24] sm:$0xff] }
  0x75   : > { %v1848_v24 = vsel %vm5368_vm3, %v1843_v15, %v1847_v4  ;;  %v1865_v40 = vrot.slane %v1863_v31, 5  ;;  %v1871_v41 = vrot.slane %v1869_v33, 5  ;;  %v1879_v53 = vshll.u32 %v4842_v45, 16  ;;  %v5180_v33 = vld [vmem:[%s5356_s30 + $0x30] sm:$0xff] }
  0x76   : > { %4880 = vmatmul.msk.bf16.vlgmr.msrb.gmra.mxu0 %vm705_vm4, %v2205_v34  ;;  %v1858_v26 = vsel %vm5368_vm3, %v1853_v16, %v1857_v17  ;;  %v1873_v34 = vshrl.u32 %v4841_v22, 16  ;;  %v2177_v38 = vunpack.c.l.b16 %v1848_v24  ;;  %v1148_v61 = vrot.slane %v5239_v63, 5  ;;  %v4845_v22 = vld [vmem:[%s5356_s30 + $0x44] sm:$0x1] }
  0x77   : > { %4670 = vmatmul.msk.bf16.gmra.mxu1 %vm705_vm4, %v5177_v35  ;;  %v4688_v35 = vrot.slane %v1070_v29, 9  ;;  %v2178_v1 = vunpack.c.l.b16 %v1858_v26  ;;  %v1866_v51 = vor.u32 %v1865_v40, %v1862_v39  ;;  %v1881_v59 = vrot.slane %v1879_v53, 5  ;;  %v4846_v39 = vld [vmem:[%s5356_s30 + $0x48] sm:$0xf]  ;;  %v4847_v40 = vld [vmem:[%s5356_s30 + $0x4c] sm:$0xf] }
  0x78   : > { %v1875_v44 = vrot.slane %v1873_v34, 4  ;;  %v1884_v3 = vshrl.u32 %v4843_v2, 16  ;;  %v1887_v4 = vshll.u32 %v4843_v2, 16  ;;  %v1893_v5 = vshll.u32 %v4844_v57, 16  ;;  %v5196_v2 = vld [vmem:[%s5356_s30 + $0x3c] sm:$0xff] }
  0x79   : > { %v1142_v46 = vsel %vm5542_vm7, %v4688_v35, %v1141_v23  ;;  %v2207_v50 = vpack.c.b16 %v2178_v1, %v2177_v38  ;;  %v1867_v58 = vrot.slane %v1866_v51, 4  ;;  %v1897_v6 = vshrl.u32 %v4844_v57, 16 }
  0x7a   : > { %v1876_v52 = vor.u32 %v1875_v44, %v1871_v41  ;;  %v1238_v54 = vunpack.c.l.b16 %v1142_v46  ;;  %v4689_v10 = vrot.slane %v1071_v62, 9  ;;  %v1150_v11 = vrot.slane %v1148_v61, 4 }
  0x7b   : > { %v1872_v8 = vsel %vm5368_vm3, %v1867_v58, %v1871_v41  ;;  %v1886_v14 = vrot.slane %v1884_v3, 4  ;;  %v1889_v15 = vrot.slane %v1887_v4, 5  ;;  %v1895_v16 = vrot.slane %v1893_v5, 5  ;;  %v4848_v4 = vld [vmem:[%s5356_s30 + $0x50] sm:$0x1] }
  0x7c   : > { %4703 = vmatmul.msk.bf16.gmra.mxu2 %vm705_vm4, %v1265_v49  ;;  %v1145_v49 = vsel %vm5542_vm7, %v1143_v37, %v1144_v42  ;;  %v1899_v17 = vrot.slane %v1897_v6, 4  ;;  %v1149_v23 = vsel %vm5542_vm7, %v4689_v10, %v1148_v61  ;;  %v1903_v30 = vshll.u32 %v4845_v22, 16 }
  0x7d   : > { %v1239_v55 = vunpack.c.l.b16 %v1145_v49  ;;  %v1890_v26 = vor.u32 %v1889_v15, %v1886_v14  ;;  %v1908_v51 = vshrl.u32 %v4846_v39, 16  ;;  %v1917_v53 = vshll.u32 %v4847_v40, 16 }
  0x7e   : > { %v1900_v29 = vor.u32 %v1899_v17, %v1895_v16  ;;  %v1905_v1 = vrot.slane %v1903_v30, 5 }
  0x7f   : > { %v1267_v60 = vpack.c.b16 %v1239_v55, %v1238_v54  ;;  %v1891_v42 = vrot.slane %v1890_v26, 4  ;;  %v1921_v54 = vshrl.u32 %v4847_v40, 16  ;;  %v1919_v62 = vrot.slane %v1917_v53, 5 }
  0x80   : > { %v1901_v38 = vrot.slane %v1900_v29, 4  ;;  %v1162_v26 = vrot.slane %v5440_v47, 5 }
  0x81   : > { %4816 = vmatmul.msk.bf16.gmra.mxu3 %vm705_vm4, %v5193_v43  ;;  %v1877_v43 = vrot.slane %v1876_v52, 4  ;;  %v1896_v45 = vsel %vm5368_vm3, %v1891_v42, %v1895_v16  ;;  %v1911_v52 = vshll.u32 %v4846_v39, 16  ;;  %v1923_v3 = vrot.slane %v1921_v54, 4  ;;  %v4851_v54 = vld [vmem:[%s5356_s30 + $0x5c] sm:$0x1] }
  0x82   : > { %v1906_v46 = vsel %vm5368_vm3, %v1901_v38, %v1905_v1  ;;  %v2181_v55 = vunpack.c.l.b16 %v1896_v45  ;;  %v5197_v1 = vld [vmem:[%s5356_s30 + $0x48] sm:$0xff]  ;;  %v1164_v40 = vrot.slane %v1162_v26, 4 }
  0x83   : > { %v2182_v57 = vunpack.c.l.b16 %v1906_v46  ;;  %v1913_v61 = vrot.slane %v1911_v52, 5  ;;  %v1924_v10 = vor.u32 %v1923_v3, %v1919_v62 }
  0x85   : > { %v1925_v16 = vrot.slane %v1924_v10, 4 }
  0x86   : > { %4881 = vmatmul.msk.bf16.gmra.mxu0 %vm705_vm4, %v2206_v9  ;;  %v1882_v9 = vsel %vm5368_vm3, %v1877_v43, %v1881_v59 }
  0x87   : > { %4671 = vmatmul.msk.bf16.gmra.mxu1 %vm705_vm4, %v5178_v12  ;;  %v1151_v12 = vrot.slane %v5240_v0, 5  ;;  %v2180_v19 = vunpack.c.l.b16 %v1882_v9 }
  0x89   : > { %v1152_v24 = vsel %vm5542_vm7, %v1150_v11, %v1151_v12  ;;  %v1927_v11 = vshll.u32 %v4848_v4, 16  ;;  %v5181_v12 = vld [vmem:[%s5356_s30 + $0x3c] sm:$0xff] }
  0x8a   : > { %v1241_v35 = vunpack.c.l.b16 %v1152_v24  ;;  %v4850_v24 = vld [vmem:[%s5356_s30 + $0x58] sm:$0xf]  ;;  %v4852_v4 = vld [vmem:[%s5356_s30 + $0x60] sm:$0xf] }
  0x8b   : > { %v1929_v17 = vrot.slane %v1927_v11, 5  ;;  %v1945_v42 = vshrl.u32 %v4850_v24, 16 }
  0x8c   : > { %4704 = vmatmul.msk.bf16.gmra.mxu2 %vm705_vm4, %v1266_v28  ;;  %v2179_v28 = vunpack.c.l.b16 %v1872_v8  ;;  %v2209_v8 = vpack.c.b16 %v2182_v57, %v2181_v55 }
  0x8d   : > { %v1930_v30 = vsel %vm5368_vm3, %v1925_v16, %v1929_v17  ;;  %v1947_v52 = vrot.slane %v1945_v42, 4 }
  0x8e   : > { %v2208_v31 = vpack.c.b16 %v2180_v19, %v2179_v28  ;;  %v2184_v46 = vunpack.c.l.b16 %v1930_v30 }
  0x91   : > { %4817 = vmatmul.msk.bf16.gmra.mxu3 %vm705_vm4, %v5194_v32  ;;  %v1240_v32 = vunpack.c.l.b16 %v1149_v23  ;;  %v4849_v23 = vld [vmem:[%s5356_s30 + $0x54] sm:$0xf] }
  0x93   : > { %v1268_v44 = vpack.c.b16 %v1241_v35, %v1240_v32  ;;  %v1935_v32 = vshll.u32 %v4849_v23, 16  ;;  %v1941_v35 = vshll.u32 %v4850_v24, 16 }
  0x96   : > { %4882 = vmatmul.msk.bf16.gmra.mxu0 %vm705_vm4, %v2207_v50  ;;  %v1155_v50 = vrot.slane %v5396_v20, 5  ;;  %v1910_v20 = vrot.slane %v1908_v51, 4  ;;  %v1943_v51 = vrot.slane %v1941_v35, 5  ;;  %v1172_v35 = vrot.slane %v5491_v27, 5 }
  0x97   : > { %4672 = vmatmul.msk.bf16.gmra.mxu1 %vm705_vm4, %v5179_v48  ;;  %v1072_v48 = vld [vmem:[%s5356_s30 + $0x3c] sm:$0xe] }
  0x98   : > { %v4690_v43 = vrot.slane %v1072_v48, 9  ;;  %v1157_v59 = vrot.slane %v1155_v50, 4  ;;  %v1937_v48 = vrot.slane %v1935_v32, 5 }
  0x9a   : > { %v1156_v5 = vsel %vm5542_vm7, %v4690_v43, %v1155_v50  ;;  %v5182_v43 = vld [vmem:[%s5356_s30 + $0x48] sm:$0xff] }
  0x9c   : > { %v5637_v7 = vpop.f32.mrf.mxu1  ;;  %4705 = vmatmul.msk.bf16.gmra.mxu2 %vm705_vm4, %v1267_v60  ;;  %v1158_v60 = vrot.slane %v5401_v25, 5  ;;  %v1914_v25 = vor.u32 %v1913_v61, %v1910_v20  ;;  %v1951_v20 = vshll.u32 %v4851_v54, 16  ;;  %v5183_v54 = vld [vmem:[%s5356_s30 + $0x54] sm:$0xff] }
  0x9e   : > { %v1159_v6 = vsel %vm5542_vm7, %v1157_v59, %v1158_v60  ;;  %v1915_v15 = vrot.slane %v1914_v25, 4  ;;  %v1948_v60 = vor.u32 %v1947_v52, %v1943_v51  ;;  %v1953_v10 = vrot.slane %v1951_v20, 5 }
  0x9f   : > { %v1243_v14 = vunpack.c.l.b16 %v1159_v6 }
  0xa0   : > { %v1920_v29 = vsel %vm5368_vm3, %v1915_v15, %v1919_v62  ;;  %v1949_v25 = vrot.slane %v1948_v60, 4  ;;  %v1169_v15 = vrot.slane %v5486_v21, 5 }
  0xa1   : > { %4818 = vmatmul.msk.bf16.gmra.mxu3 %vm705_vm4, %v5195_v13  ;;  %v1242_v13 = vunpack.c.l.b16 %v1156_v5  ;;  %v2183_v45 = vunpack.c.l.b16 %v1920_v29  ;;  %v4853_v5 = vld [vmem:[%s5356_s30 + $0x64] sm:$0xf] }
  0xa2   : > { %v1969_v16 = vshrl.u32 %v4853_v5, 16  ;;  %v1954_v24 = vsel %vm5368_vm3, %v1949_v25, %v1953_v10  ;;  %v1171_v32 = vrot.slane %v1169_v15, 4  ;;  %v5241_v10 = vld [vmem:[%s5356_s30 + $0x64] sm:$0xf] }
  0xa3   : > { %v1269_v19 = vpack.c.b16 %v1243_v14, %v1242_v13  ;;  %v2210_v57 = vpack.c.b16 %v2184_v46, %v2183_v45  ;;  %v1959_v13 = vshll.u32 %v4852_v4, 16  ;;  %v1965_v14 = vshll.u32 %v4853_v5, 16 }
  0xa4   : > { %v5653_v34 = vpop.f32.mrf.mxu1  ;;  %v1971_v42 = vrot.slane %v1969_v16, 4 }
  0xa5   : > { %v1961_v30 = vrot.slane %v1959_v13, 5  ;;  %v1075_v13 = vld [vmem:[%s5356_s30 + $0x60] sm:$0xe] }
  0xa6   : > { %v5655_v37 = vpop.f32.mrf.mxu2  ;;  %4883 = vmatmul.msk.bf16.gmra.mxu0 %vm705_vm4, %v2208_v31  ;;  %v1073_v31 = vld [vmem:[%s5356_s30 + $0x48] sm:$0xe] }
  0xa7   : > { %4673 = vmatmul.msk.bf16.gmra.mxu1 %vm705_vm4, %v5180_v33  ;;  %v1932_v33 = vshrl.u32 %v4849_v23, 16  ;;  %v4691_v47 = vrot.slane %v1073_v31, 9  ;;  %v1967_v31 = vrot.slane %v1965_v14, 5 }
  0xa9   : > { %v5661_v41 = vpop.f32.mrf.mxu0  ;;  %v1934_v50 = vrot.slane %v1932_v33, 4  ;;  %v5198_v33 = vld [vmem:[%s5356_s30 + $0x54] sm:$0xff]  ;;  %v1972_v27 = vor.u32 %v1971_v42, %v1967_v31 }
  0xaa   : > { %v5667_v49 = vpop.f32.mrf.mxu3 }
  0xab   : > { %v1938_v59 = vor.u32 %v1937_v48, %v1934_v50  ;;  %v1173_v48 = vsel %vm5542_vm7, %v1171_v32, %v1172_v35  ;;  %v1973_v60 = vrot.slane %v1972_v27, 4 }
  0xac   : > { %4706 = vmatmul.msk.bf16.gmra.mxu2 %vm705_vm4, %v1268_v44  ;;  %v1165_v44 = vrot.slane %v5445_v56, 5 }
  0xae   : > { %v5673_v58 = vpop.f32.mrf.mxu1  ;;  %v5676_v63 = vpop.f32.mrf.mxu2  ;;  %v1166_v56 = vsel %vm5542_vm7, %v1164_v40, %v1165_v44  ;;  %v4854_v40 = vld [vmem:[%s5356_s30 + $0x68] sm:$0x1] }
  0xaf   : > { %v1245_v62 = vunpack.c.l.b16 %v1166_v56 }
  0xb1   : > { %4819 = vmatmul.msk.bf16.gmra.mxu3 %vm705_vm4, %v5196_v2  ;;  %v5684_v9 = vpop.f32.mrf.mxu0  ;;  %v1163_v2 = vsel %vm5542_vm7, %v4691_v47, %v1162_v26  ;;  %v2186_v47 = vunpack.c.l.b16 %v1954_v24 }
  0xb2   : > { %v5686_v0 = vpop.f32.mrf.mxu3  ;;  %v1244_v61 = vunpack.c.l.b16 %v1163_v2 }
  0xb4   : > { %v1270_v11 = vpack.c.b16 %v1245_v62, %v1244_v61  ;;  %v4855_v61 = vld [vmem:[%s5356_s30 + $0x6c] sm:$0xf]  ;;  %v4856_v62 = vld [vmem:[%s5356_s30 + $0x70] sm:$0xf] }
  0xb5   : > { %v1980_v14 = vshrl.u32 %v4855_v61, 16  ;;  %v1989_v16 = vshll.u32 %v4856_v62, 16 }
  0xb6   : > { %4884 = vmatmul.msk.bf16.gmra.mxu0 %vm705_vm4, %v2209_v8  ;;  %v5690_v28 = vpop.f32.mrf.mxu1  ;;  %v1939_v8 = vrot.slane %v1938_v59, 4 }
  0xb7   : > { %4674 = vmatmul.msk.bf16.gmra.mxu1 %vm705_vm4, %v5181_v12  ;;  %v1956_v12 = vshrl.u32 %v4852_v4, 16  ;;  %v1982_v35 = vrot.slane %v1980_v14, 4  ;;  %v4859_v14 = vld [vmem:[%s5356_s30 + $0x7c] sm:$0xf] }
  0xb8   : > { %v1944_v23 = vsel %vm5368_vm3, %v1939_v8, %v1943_v51  ;;  %v1975_v51 = vshll.u32 %v4854_v40, 16 }
  0xb9   : > { %v5693_v22 = vpop.f32.mrf.mxu2  ;;  %v1958_v29 = vrot.slane %v1956_v12, 4 }
  0xba   : > { %v1977_v20 = vrot.slane %v1975_v51, 5 }
  0xbb   : > { %v1962_v46 = vor.u32 %v1961_v30, %v1958_v29  ;;  %v5199_v30 = vld [vmem:[%s5356_s30 + $0x60] sm:$0xff] }
  0xbc   : > { %4707 = vmatmul.msk.bf16.gmra.mxu2 %vm705_vm4, %v1269_v19  ;;  %v1074_v19 = vld [vmem:[%s5356_s30 + $0x54] sm:$0xe]  ;;  %v1978_v25 = vsel %vm5368_vm3, %v1973_v60, %v1977_v20 }
  0xbd   : > { %v5703_v38 = vpop.f32.mrf.mxu0  ;;  %v4692_v21 = vrot.slane %v1074_v19, 9  ;;  %v1963_v59 = vrot.slane %v1962_v46, 4  ;;  %v1993_v19 = vshrl.u32 %v4856_v62, 16  ;;  %v4857_v46 = vld [vmem:[%s5356_s30 + $0x74] sm:$0x1] }
  0xbe   : > { %v5707_v39 = vpop.f32.mrf.mxu3 }
  0xbf   : > { %v1170_v50 = vsel %vm5542_vm7, %v4692_v21, %v1169_v15  ;;  %v1968_v8 = vsel %vm5368_vm3, %v1963_v59, %v1967_v31  ;;  %v1983_v15 = vshll.u32 %v4855_v61, 16  ;;  %v4693_v21 = vrot.slane %v1075_v13, 9  ;;  %v4858_v13 = vld [vmem:[%s5356_s30 + $0x78] sm:$0xf] }
  0xc0   : > { %v5710_v53 = vpop.f32.mrf.mxu1  ;;  %v1246_v56 = vunpack.c.l.b16 %v1170_v50  ;;  %v2187_v31 = vunpack.c.l.b16 %v1968_v8 }
  0xc1   : > { %4820 = vmatmul.msk.bf16.gmra.mxu3 %vm705_vm4, %v5197_v1  ;;  %v5714_v55 = vpop.f32.mrf.mxu2  ;;  %v2185_v1 = vunpack.c.l.b16 %v1944_v23  ;;  %v5242_v23 = vld [vmem:[%s5356_s30 + $0x68] sm:$0x1]  ;;  %v1985_v42 = vrot.slane %v1983_v15, 5  ;;  %v5243_v15 = vld [vmem:[%s5356_s30 + $0x70] sm:$0xf] }
  0xc2   : > { %v1179_v24 = vrot.slane %v5242_v23, 5  ;;  %v1076_v23 = vld [vmem:[%s5356_s30 + $0x6c] sm:$0xe] }
  0xc3   : > { %v2211_v52 = vpack.c.b16 %v2186_v47, %v2185_v1  ;;  %v1991_v1 = vrot.slane %v1989_v16, 5  ;;  %v1995_v47 = vrot.slane %v1993_v19, 4  ;;  %v1986_v51 = vor.u32 %v1985_v42, %v1982_v35  ;;  %v5244_v42 = vld [vmem:[%s5356_s30 + $0x74] sm:$0x1] }
  0xc4   : > { %v1183_v16 = vrot.slane %v5243_v15, 5 }
  0xc5   : > { %v5721_v3 = vpop.f32.mrf.mxu0 }
  0xc6   : > { %4885 = vmatmul.msk.bf16.gmra.mxu0 %vm705_vm4, %v2210_v57  ;;  %v5726_v6 = vpop.f32.mrf.mxu3  ;;  %v1247_v57 = vunpack.c.l.b16 %v1173_v48 }
  0xc7   : > { %4675 = vmatmul.msk.bf16.gmra.mxu1 %vm705_vm4, %v5182_v43 }
  0xc8   : > { %v5730_v17 = vpop.f32.mrf.mxu1  ;;  %v1271_v4 = vpack.c.b16 %v1247_v57, %v1246_v56  ;;  %v5184_v57 = vld [vmem:[%s5356_s30 + $0x60] sm:$0xff] }
  0xcc   : > { %v5737_v26 = vpop.f32.mrf.mxu2  ;;  %4708 = vmatmul.msk.bf16.gmra.mxu2 %vm705_vm4, %v1270_v11  ;;  %v1176_v11 = vrot.slane %v5241_v10, 5 }
  0xce   : > { %v1178_v32 = vrot.slane %v1176_v11, 4  ;;  %v1177_v50 = vsel %vm5542_vm7, %v4693_v21, %v1176_v11  ;;  %v2017_v21 = vshrl.u32 %v4859_v14, 16 }
  0xcf   : > { %v5743_v44 = vpop.f32.mrf.mxu0  ;;  %v1248_v20 = vunpack.c.l.b16 %v1177_v50  ;;  %v4694_v50 = vrot.slane %v1076_v23, 9 }
  0xd0   : > { %v5745_v45 = vpop.f32.mrf.mxu3  ;;  %v1180_v48 = vsel %vm5542_vm7, %v1178_v32, %v1179_v24 }
  0xd1   : > { %4821 = vmatmul.msk.bf16.gmra.mxu3 %vm705_vm4, %v5198_v33  ;;  %v2188_v33 = vunpack.c.l.b16 %v1978_v25  ;;  %v1249_v61 = vunpack.c.l.b16 %v1180_v48  ;;  %v1185_v48 = vrot.slane %v1183_v16, 4 }
  0xd3   : > { %v2212_v27 = vpack.c.b16 %v2188_v33, %v2187_v31  ;;  %v1272_v11 = vpack.c.b16 %v1249_v61, %v1248_v20  ;;  %v2007_v31 = vshll.u32 %v4858_v13, 16  ;;  %v2013_v33 = vshll.u32 %v4859_v14, 16 }
  0xd4   : > { %v5753_v2 = vpop.f32.mrf.mxu1  ;;  %v5755_v43 = vpop.f32.mrf.mxu2  ;;  %v2019_v20 = vrot.slane %v2017_v21, 4 }
  0xd6   : > { %4886 = vmatmul.msk.bf16.gmra.mxu0 %vm705_vm4, %v2211_v52  ;;  %v1996_v52 = vor.u32 %v1995_v47, %v1991_v1  ;;  %v1186_v47 = vrot.slane %v5244_v42, 5 }
  0xd7   : > { %4676 = vmatmul.msk.bf16.gmra.mxu1 %vm705_vm4, %v5183_v54  ;;  %v5761_v5 = vpop.f32.mrf.mxu0  ;;  %v1999_v54 = vshll.u32 %v4857_v46, 16  ;;  %v5200_v46 = vld [vmem:[%s5356_s30 + $0x6c] sm:$0xff] }
  0xd8   : > { %v5768_v12 = vpop.f32.mrf.mxu3  ;;  %v1997_v8 = vrot.slane %v1996_v52, 4 }
  0xd9   : > { %v2001_v25 = vrot.slane %v1999_v54, 5 }
  0xdc   : > { %4709 = vmatmul.msk.bf16.gmra.mxu2 %vm705_vm4, %v1271_v4  ;;  %v5773_v29 = vpop.f32.mrf.mxu1  ;;  %v1987_v4 = vrot.slane %v1986_v51, 4 }
  0xde   : > { %v1992_v19 = vsel %vm5368_vm3, %v1987_v4, %v1991_v1  ;;  %v4860_v4 = vld [vmem:[%s5356_s30 + $0x80] sm:$0x1] }
  0xdf   : > { %v5776_v40 = vpop.f32.mrf.mxu2 }
  0xe1   : > { %4822 = vmatmul.msk.bf16.gmra.mxu3 %vm705_vm4, %v5199_v30  ;;  %v2004_v30 = vshrl.u32 %v4858_v13, 16  ;;  %v5185_v13 = vld [vmem:[%s5356_s30 + $0x6c] sm:$0xff] }
  0xe3   : > { %v5784_v56 = vpop.f32.mrf.mxu0  ;;  %v2006_v54 = vrot.slane %v2004_v30, 4 }
  0xe4   : > { %v5787_v59 = vpop.f32.mrf.mxu3  ;;  %v987_v60 = vpop.f32.mrf.mxu1 }
  0xe5   : > { %v988_v62 = vadd.f32 %v987_v60, %v5661_v41  ;;  %v2002_v41 = vsel %vm5368_vm3, %v1997_v8, %v2001_v25  ;;  %v2015_v60 = vrot.slane %v2013_v33, 5  ;;  %v1184_v8 = vsel %vm5542_vm7, %v4694_v50, %v1183_v16 }
  0xe6   : > { %4887 = vmatmul.msk.bf16.gmra.mxu0 %vm705_vm4, %v2212_v27  ;;  %v2189_v27 = vunpack.c.l.b16 %v1992_v19  ;;  %v2190_v51 = vunpack.c.l.b16 %v2002_v41  ;;  %v2023_v19 = vshll.u32 %v4860_v4, 16 }
  0xe7   : > { %v5791_v10 = vpop.f32.mrf.mxu2  ;;  %4677 = vmatmul.msk.bf16.gmra.mxu1 %vm705_vm4, %v5184_v57  ;;  %v2009_v57 = vrot.slane %v2007_v31, 5  ;;  %v2020_v15 = vor.u32 %v2019_v20, %v2015_v60 }
  0xe8   : > { %v2213_v25 = vpack.c.b16 %v2190_v51, %v2189_v27  ;;  %v2025_v42 = vrot.slane %v2023_v19, 5  ;;  %v4862_v27 = vld [vmem:[%s5356_s30 + $0x88] sm:$0xf]  ;;  %v5245_v51 = vld [vmem:[%s5356_s30 + $0x7c] sm:$0xf] }
  0xe9   : > { %v2010_v14 = vor.u32 %v2009_v57, %v2006_v54  ;;  %v1077_v54 = vld [vmem:[%s5356_s30 + $0x78] sm:$0xe] }
  0xeb   : > { %v5802_v24 = vpop.f32.mrf.mxu0  ;;  %v2011_v21 = vrot.slane %v2010_v14, 4 }
  0xec   : > { %v5804_v32 = vpop.f32.mrf.mxu3  ;;  %4710 = vmatmul.msk.bf16.gmra.mxu2 %vm705_vm4, %v1272_v11  ;;  %v989_v35 = vpop.f32.mrf.mxu1 }
  0xed   : > { %v990_v1 = vadd.f32 %v989_v35, %v5684_v9  ;;  %v1187_v9 = vsel %vm5542_vm7, %v1185_v48, %v1186_v47  ;;  %v2021_v35 = vrot.slane %v2020_v15, 4  ;;  %v4861_v47 = vld [vmem:[%s5356_s30 + $0x84] sm:$0xf]  ;;  %v5201_v15 = vld [vmem:[%s5356_s30 + $0x78] sm:$0xff] }
  0xee   : > { %v1251_v30 = vunpack.c.l.b16 %v1187_v9  ;;  %v2031_v57 = vshll.u32 %v4861_v47, 16  ;;  %v2041_v9 = vshrl.u32 %v4862_v27, 16 }
  0xef   : > { %v1340_v52 = vpop.f32.mrf.mxu2  ;;  %v2026_v4 = vsel %vm5368_vm3, %v2021_v35, %v2025_v42 }
  0xf0   : > { %v1420_v61 = vadd.f32 %v1340_v52, %v988_v62  ;;  %v1250_v62 = vunpack.c.l.b16 %v1184_v8  ;;  %v1190_v52 = vrot.slane %v5245_v51, 5  ;;  %v2037_v8 = vshll.u32 %v4862_v27, 16 }
  0xf1   : > { %4823 = vmatmul.msk.bf16.gmra.mxu3 %vm705_vm4, %v5200_v46  ;;  %v2043_v35 = vrot.slane %v2041_v9, 4 }
  0xf2   : > { %v1273_v48 = vpack.c.b16 %v1251_v30, %v1250_v62 }
  0xf3   : > { %v2281_v11 = vpop.f32.mrf.mxu0 }
  0xf4   : > { %v1627_v41 = vpop.f32.mrf.mxu3  ;;  %v992_v23 = vpop.f32.mrf.mxu1 }
  0xf5   : > { %v1707_v31 = vadd.f32 %v1627_v41, %v1420_v61  ;;  %v993_v16 = vadd.f32 %v992_v23, %v5703_v38  ;;  %v2028_v38 = vshrl.u32 %v4861_v47, 16  ;;  %v2016_v61 = vsel %vm5368_vm3, %v2011_v21, %v2015_v60 }
  0xf6   : > { %4888 = vmatmul.msk.bf16.gmra.mxu0 %vm705_vm4, %v2213_v25  ;;  %v5246_v25 = vld [vmem:[%s5356_s30 + $0x80] sm:$0x1]  ;;  %v4695_v41 = vrot.slane %v1077_v54, 9  ;;  %v1192_v23 = vrot.slane %v1190_v52, 4  ;;  %v2191_v62 = vunpack.c.l.b16 %v2016_v61  ;;  %v2192_v60 = vunpack.c.l.b16 %v2026_v4 }
  0xf7   : > { %v1342_v33 = vpop.f32.mrf.mxu2  ;;  %4678 = vmatmul.msk.bf16.gmra.mxu1 %vm705_vm4, %v5185_v13  ;;  %v5821_v46 = vadd.f32 %v2281_v11, %v1707_v31  ;;  %v1193_v11 = vrot.slane %v5246_v25, 5  ;;  %v2030_v30 = vrot.slane %v2028_v38, 4  ;;  %v2033_v31 = vrot.slane %v2031_v57, 5  ;;  %v5186_v38 = vld [vmem:[%s5356_s30 + $0x78] sm:$0xff] }
  0xf8   : > { %v1421_v50 = vadd.f32 %v1342_v33, %v990_v1  ;;  %v2039_v21 = vrot.slane %v2037_v8, 5  ;;  %v2214_v27 = vpack.c.b16 %v2192_v60, %v2191_v62  ;;  %v4865_v62 = vld [vmem:[%s5356_s30 + $0x94] sm:$0xf]  ;;  %v5247_v60 = vld [vmem:[%s5356_s30 + $0x88] sm:$0xf] }
  0xf9   : > { %v2034_v51 = vor.u32 %v2033_v31, %v2030_v30  ;;  %v1197_v30 = vrot.slane %v5247_v60, 5  ;;  %v1078_v31 = vld [vmem:[%s5356_s30 + $0x84] sm:$0xe] }
  0xfa   : > { %v2044_v57 = vor.u32 %v2043_v35, %v2039_v21 }
  0xfb   : > { %v2283_v20 = vpop.f32.mrf.mxu0  ;;  %v2035_v25 = vrot.slane %v2034_v51, 4 }
  0xfc   : > { %v1629_v1 = vpop.f32.mrf.mxu3  ;;  %4711 = vmatmul.msk.bf16.gmra.mxu2 %vm705_vm4, %v1273_v48  ;;  %v994_v13 = vpop.f32.mrf.mxu1  ;;  %v4863_v48 = vld [vmem:[%s5356_s30 + $0x8c] sm:$0x1] }
  0xfd   : > { %v1708_v14 = vadd.f32 %v1629_v1, %v1421_v50  ;;  %v995_v19 = vadd.f32 %v994_v13, %v5721_v3  ;;  %v1191_v50 = vsel %vm5542_vm7, %v4695_v41, %v1190_v52  ;;  %v1194_v3 = vsel %vm5542_vm7, %v1192_v23, %v1193_v11 }
  0xfe   : > { %v2047_v61 = vshll.u32 %v4863_v48, 16  ;;  %v1253_v8 = vunpack.c.l.b16 %v1194_v3  ;;  %v2045_v1 = vrot.slane %v2044_v57, 4  ;;  %v2065_v3 = vshrl.u32 %v4865_v62, 16  ;;  %v5202_v57 = vld [vmem:[%s5356_s30 + $0x84] sm:$0xff] }
  0xff   : > { %v1345_v33 = vpop.f32.mrf.mxu2  ;;  %v5834_v42 = vadd.f32 %v2283_v20, %v1708_v14  ;;  %v4864_v14 = vld [vmem:[%s5356_s30 + $0x90] sm:$0xf] }
 0x100   : > { %v1422_v47 = vadd.f32 %v1345_v33, %v993_v16  ;;  %v1252_v16 = vunpack.c.l.b16 %v1191_v50  ;;  %v2049_v13 = vrot.slane %v2047_v61, 5  ;;  %v2052_v33 = vshrl.u32 %v4864_v14, 16 }
 0x101   : > { %4824 = vmatmul.msk.bf16.gmra.mxu3 %vm705_vm4, %v5201_v15  ;;  %v2055_v48 = vshll.u32 %v4864_v14, 16  ;;  %v2061_v50 = vshll.u32 %v4865_v62, 16  ;;  %v4696_v61 = vrot.slane %v1078_v31, 9 }
 0x102   : > { %v1274_v23 = vpack.c.b16 %v1253_v8, %v1252_v16  ;;  %v2054_v8 = vrot.slane %v2052_v33, 4 }
 0x103   : > { %v2286_v54 = vpop.f32.mrf.mxu0 }
 0x104   : > { %v1632_v4 = vpop.f32.mrf.mxu3  ;;  %v997_v20 = vpop.f32.mrf.mxu1 }
 0x105   : > { %v1709_v9 = vadd.f32 %v1632_v4, %v1422_v47  ;;  %v998_v52 = vadd.f32 %v997_v20, %v5743_v44  ;;  %v2040_v44 = vsel %vm5368_vm3, %v2035_v25, %v2039_v21  ;;  %v2050_v47 = vsel %vm5368_vm3, %v2045_v1, %v2049_v13 }
 0x106   : > { %4889 = vmatmul.msk.bf16.gmra.mxu0 %vm705_vm4, %v2214_v27  ;;  %v5248_v27 = vld [vmem:[%s5356_s30 + $0x8c] sm:$0x1]  ;;  %v1199_v4 = vrot.slane %v1197_v30, 4  ;;  %v2193_v20 = vunpack.c.l.b16 %v2040_v44  ;;  %v2194_v16 = vunpack.c.l.b16 %v2050_v47  ;;  %v2057_v25 = vrot.slane %v2055_v48, 5  ;;  %v5187_v44 = vld [vmem:[%s5356_s30 + $0x84] sm:$0xff] }
 0x107   : > { %v1347_v11 = vpop.f32.mrf.mxu2  ;;  %4679 = vmatmul.msk.bf16.gmra.mxu1 %vm705_vm4, %v5186_v38  ;;  %v5847_v15 = vadd.f32 %v2286_v54, %v1709_v9  ;;  %v1200_v51 = vrot.slane %v5248_v27, 5  ;;  %v2067_v1 = vrot.slane %v2065_v3, 4 }
 0x108   : > { %v1423_v41 = vadd.f32 %v1347_v11, %v995_v19  ;;  %v2063_v11 = vrot.slane %v2061_v50, 5  ;;  %v2215_v62 = vpack.c.b16 %v2194_v16, %v2193_v20  ;;  %v2058_v31 = vor.u32 %v2057_v25, %v2054_v8  ;;  %v4868_v20 = vld [vmem:[%s5356_s30 + $0xa0] sm:$0xf]  ;;  %v1079_v25 = vld [vmem:[%s5356_s30 + $0x90] sm:$0xe] }
 0x10a   : > { %v2068_v33 = vor.u32 %v2067_v1, %v2063_v11 }
 0x10b   : > { %v2288_v35 = vpop.f32.mrf.mxu0 }
 0x10c   : > { %v1634_v19 = vpop.f32.mrf.mxu3  ;;  %4712 = vmatmul.msk.bf16.gmra.mxu2 %vm705_vm4, %v1274_v23  ;;  %v999_v54 = vpop.f32.mrf.mxu1  ;;  %v4866_v23 = vld [vmem:[%s5356_s30 + $0x98] sm:$0x1] }
 0x10d   : > { %v1710_v38 = vadd.f32 %v1634_v19, %v1423_v41  ;;  %v1000_v21 = vadd.f32 %v999_v54, %v5761_v5  ;;  %v1198_v5 = vsel %vm5542_vm7, %v4696_v61, %v1197_v30  ;;  %v1201_v41 = vsel %vm5542_vm7, %v1199_v4, %v1200_v51  ;;  %v4867_v30 = vld [vmem:[%s5356_s30 + $0x9c] sm:$0xf] }
 0x10e   : > { %v2071_v47 = vshll.u32 %v4866_v23, 16  ;;  %v1255_v50 = vunpack.c.l.b16 %v1201_v41  ;;  %v2059_v19 = vrot.slane %v2058_v31, 4  ;;  %v2069_v54 = vrot.slane %v2068_v33, 4 }
 0x10f   : > { %v1350_v9 = vpop.f32.mrf.mxu2  ;;  %v5860_v13 = vadd.f32 %v2288_v35, %v1710_v38  ;;  %v2076_v16 = vshrl.u32 %v4867_v30, 16  ;;  %v2079_v8 = vshll.u32 %v4867_v30, 16  ;;  %v2089_v41 = vshrl.u32 %v4868_v20, 16 }
 0x110   : > { %v1424_v14 = vadd.f32 %v1350_v9, %v998_v52  ;;  %v1254_v52 = vunpack.c.l.b16 %v1198_v5  ;;  %v2073_v38 = vrot.slane %v2071_v47, 5  ;;  %v5249_v9 = vld [vmem:[%s5356_s30 + $0x94] sm:$0xf]  ;;  %v2085_v5 = vshll.u32 %v4868_v20, 16 }
 0x111   : > { %4825 = vmatmul.msk.bf16.gmra.mxu3 %vm705_vm4, %v5202_v57  ;;  %v2078_v31 = vrot.slane %v2076_v16, 4  ;;  %v2081_v33 = vrot.slane %v2079_v8, 5 }
 0x112   : > { %v1275_v4 = vpack.c.b16 %v1255_v50, %v1254_v52  ;;  %v2074_v23 = vsel %vm5368_vm3, %v2069_v54, %v2073_v38  ;;  %v4697_v52 = vrot.slane %v1079_v25, 9 }
 0x113   : > { %v2291_v60 = vpop.f32.mrf.mxu0  ;;  %v2082_v20 = vor.u32 %v2081_v33, %v2078_v31  ;;  %v4871_v31 = vld [vmem:[%s5356_s30 + $0xac] sm:$0xf] }
 0x114   : > { %v1637_v48 = vpop.f32.mrf.mxu3  ;;  %v1002_v35 = vpop.f32.mrf.mxu1 }
 0x115   : > { %v1711_v3 = vadd.f32 %v1637_v48, %v1424_v14  ;;  %v1003_v27 = vadd.f32 %v1002_v35, %v5784_v56  ;;  %v1204_v56 = vrot.slane %v5249_v9, 5  ;;  %v2064_v14 = vsel %vm5368_vm3, %v2059_v19, %v2063_v11  ;;  %v5203_v48 = vld [vmem:[%s5356_s30 + $0x90] sm:$0xff] }
 0x116   : > { %4890 = vmatmul.msk.bf16.gmra.mxu0 %vm705_vm4, %v2215_v62  ;;  %v5250_v62 = vld [vmem:[%s5356_s30 + $0x98] sm:$0x1]  ;;  %v2195_v50 = vunpack.c.l.b16 %v2064_v14  ;;  %v2091_v19 = vrot.slane %v2089_v41, 4  ;;  %v5188_v9 = vld [vmem:[%s5356_s30 + $0x90] sm:$0xff] }
 0x117   : > { %v1352_v51 = vpop.f32.mrf.mxu2  ;;  %4680 = vmatmul.msk.bf16.gmra.mxu1 %vm705_vm4, %v5187_v44  ;;  %v5873_v57 = vadd.f32 %v2291_v60, %v1711_v3  ;;  %v1207_v60 = vrot.slane %v5250_v62, 5  ;;  %v1206_v11 = vrot.slane %v1204_v56, 4  ;;  %v2196_v3 = vunpack.c.l.b16 %v2074_v23 }
 0x118   : > { %v1425_v61 = vadd.f32 %v1352_v51, %v1000_v21  ;;  %v2087_v51 = vrot.slane %v2085_v5, 5  ;;  %v2083_v62 = vrot.slane %v2082_v20, 4  ;;  %v5252_v20 = vld [vmem:[%s5356_s30 + $0xa4] sm:$0x1] }
 0x119   : > { %v2216_v16 = vpack.c.b16 %v2196_v3, %v2195_v50  ;;  %v5251_v50 = vld [vmem:[%s5356_s30 + $0xa0] sm:$0xf] }
 0x11a   : > { %v2092_v25 = vor.u32 %v2091_v19, %v2087_v51  ;;  %v1211_v3 = vrot.slane %v5251_v50, 5  ;;  %v1080_v19 = vld [vmem:[%s5356_s30 + $0x9c] sm:$0xe] }
 0x11b   : > { %v2293_v1 = vpop.f32.mrf.mxu0 }
 0x11c   : > { %v1639_v21 = vpop.f32.mrf.mxu3  ;;  %4713 = vmatmul.msk.bf16.gmra.mxu2 %vm705_vm4, %v1275_v4  ;;  %v1004_v44 = vpop.f32.mrf.mxu1  ;;  %v4869_v4 = vld [vmem:[%s5356_s30 + $0xa4] sm:$0x1] }
 0x11d   : > { %v1712_v47 = vadd.f32 %v1639_v21, %v1425_v61  ;;  %v1005_v35 = vadd.f32 %v1004_v44, %v5802_v24  ;;  %v1205_v61 = vsel %vm5542_vm7, %v4697_v52, %v1204_v56  ;;  %v1208_v24 = vsel %vm5542_vm7, %v1206_v11, %v1207_v60  ;;  %v4870_v21 = vld [vmem:[%s5356_s30 + $0xa8] sm:$0xf] }
 0x11e   : > { %v2095_v14 = vshll.u32 %v4869_v4, 16  ;;  %v1257_v5 = vunpack.c.l.b16 %v1208_v24  ;;  %v2093_v60 = vrot.slane %v2092_v25, 4  ;;  %v2100_v52 = vshrl.u32 %v4870_v21, 16 }
 0x11f   : > { %v1355_v30 = vpop.f32.mrf.mxu2  ;;  %v5886_v54 = vadd.f32 %v2293_v1, %v1712_v47  ;;  %v2088_v11 = vsel %vm5368_vm3, %v2083_v62, %v2087_v51  ;;  %v2113_v4 = vshrl.u32 %v4871_v31, 16 }
 0x120   : > { %v1426_v38 = vadd.f32 %v1355_v30, %v1003_v27  ;;  %v1256_v27 = vunpack.c.l.b16 %v1205_v61  ;;  %v2097_v44 = vrot.slane %v2095_v14, 5  ;;  %v2103_v30 = vshll.u32 %v4870_v21, 16  ;;  %v5204_v14 = vld [vmem:[%s5356_s30 + $0x9c] sm:$0xff] }
 0x121   : > { %4826 = vmatmul.msk.bf16.gmra.mxu3 %vm705_vm4, %v5203_v48  ;;  %v2102_v51 = vrot.slane %v2100_v52, 4 }
 0x122   : > { %v1276_v48 = vpack.c.b16 %v1257_v5, %v1256_v27  ;;  %v2098_v24 = vsel %vm5368_vm3, %v2093_v60, %v2097_v44  ;;  %v1213_v27 = vrot.slane %v1211_v3, 4  ;;  %v2105_v5 = vrot.slane %v2103_v30, 5  ;;  %v4872_v44 = vld [vmem:[%s5356_s30 + $0xb0] sm:$0x1] }
 0x123   : > { %v2296_v8 = vpop.f32.mrf.mxu0  ;;  %v2198_v62 = vunpack.c.l.b16 %v2098_v24 }
 0x124   : > { %v1642_v1 = vpop.f32.mrf.mxu3  ;;  %v1007_v23 = vpop.f32.mrf.mxu1  ;;  %v2106_v52 = vor.u32 %v2105_v5, %v2102_v51 }
 0x125   : > { %v1713_v41 = vadd.f32 %v1642_v1, %v1426_v38  ;;  %v2109_v38 = vshll.u32 %v4871_v31, 16  ;;  %v4698_v1 = vrot.slane %v1080_v19, 9  ;;  %v5189_v19 = vld [vmem:[%s5356_s30 + $0x9c] sm:$0xff] }
 0x126   : > { %4891 = vmatmul.msk.bf16.gmra.mxu0 %vm705_vm4, %v2216_v16  ;;  %v1214_v16 = vrot.slane %v5252_v20, 5 }
 0x127   : > { %v1357_v56 = vpop.f32.mrf.mxu2  ;;  %4681 = vmatmul.msk.bf16.gmra.mxu1 %vm705_vm4, %v5188_v9  ;;  %v5899_v33 = vadd.f32 %v2296_v8, %v1713_v41  ;;  %v2197_v8 = vunpack.c.l.b16 %v2088_v11  ;;  %v1008_v41 = vadd.f32 %v1007_v23, %v5637_v7  ;;  %v2111_v21 = vrot.slane %v2109_v38, 5 }
 0x128   : > { %v1427_v47 = vadd.f32 %v1357_v56, %v1005_v35  ;;  %v2115_v56 = vrot.slane %v2113_v4, 4  ;;  %v2119_v11 = vshll.u32 %v4872_v44, 16 }
 0x129   : > { %v2217_v7 = vpack.c.b16 %v2198_v62, %v2197_v8  ;;  %v4873_v8 = vld [vmem:[%s5356_s30 + $0xb4] sm:$0xf] }
 0x12a   : > { %v2116_v23 = vor.u32 %v2115_v56, %v2111_v21  ;;  %v2121_v51 = vrot.slane %v2119_v11, 5  ;;  %v2127_v44 = vshll.u32 %v4873_v8, 16 }
 0x12b   : > { %v2298_v61 = vpop.f32.mrf.mxu0 }
 0x12c   : > { %v1644_v35 = vpop.f32.mrf.mxu3  ;;  %4714 = vmatmul.msk.bf16.gmra.mxu2 %vm705_vm4, %v1276_v48  ;;  %v1009_v9 = vpop.f32.mrf.mxu1  ;;  %v1215_v48 = vsel %vm5542_vm7, %v1213_v27, %v1214_v16  ;;  %v2117_v16 = vrot.slane %v2116_v23, 4 }
 0x12d   : > { %v1714_v25 = vadd.f32 %v1644_v35, %v1427_v47  ;;  %v1212_v47 = vsel %vm5542_vm7, %v4698_v1, %v1211_v3  ;;  %v1259_v24 = vunpack.c.l.b16 %v1215_v48  ;;  %v2107_v35 = vrot.slane %v2106_v52, 4  ;;  %v5254_v52 = vld [vmem:[%s5356_s30 + $0xb0] sm:$0x1] }
 0x12e   : > { %v1010_v3 = vadd.f32 %v1009_v9, %v5653_v34  ;;  %v2124_v34 = vshrl.u32 %v4873_v8, 16  ;;  %v2122_v9 = vsel %vm5368_vm3, %v2117_v16, %v2121_v51 }
 0x12f   : > { %v1360_v60 = vpop.f32.mrf.mxu2  ;;  %v5912_v31 = vadd.f32 %v2298_v61, %v1714_v25  ;;  %v1258_v61 = vunpack.c.l.b16 %v1212_v47  ;;  %v2112_v56 = vsel %vm5368_vm3, %v2107_v35, %v2111_v21 }
 0x130   : > { %v1428_v50 = vadd.f32 %v1360_v60, %v1008_v41  ;;  %v5253_v41 = vld [vmem:[%s5356_s30 + $0xac] sm:$0xf]  ;;  %v1081_v60 = vld [vmem:[%s5356_s30 + $0xa8] sm:$0xe] }
 0x131   : > { %4827 = vmatmul.msk.bf16.gmra.mxu3 %vm705_vm4, %v5204_v14  ;;  %v4874_v14 = vld [vmem:[%s5356_s30 + $0xb8] sm:$0xf]  ;;  %v1277_v5 = vpack.c.b16 %v1259_v24, %v1258_v61  ;;  %v1218_v62 = vrot.slane %v5253_v41, 5  ;;  %v2199_v61 = vunpack.c.l.b16 %v2112_v56  ;;  %v2200_v24 = vunpack.c.l.b16 %v2122_v9  ;;  %v4875_v41 = vld [vmem:[%s5356_s30 + $0xbc] sm:$0x1] }
 0x132   : > { %v2137_v47 = vshrl.u32 %v4874_v14, 16 }
 0x133   : > { %v2301_v30 = vpop.f32.mrf.mxu0 }
 0x134   : > { %v1647_v38 = vpop.f32.mrf.mxu3  ;;  %v1012_v4 = vpop.f32.mrf.mxu1  ;;  %v2139_v51 = vrot.slane %v2137_v47, 4 }
 0x135   : > { %v1715_v20 = vadd.f32 %v1647_v38, %v1428_v50  ;;  %v2133_v50 = vshll.u32 %v4874_v14, 16  ;;  %v5205_v38 = vld [vmem:[%s5356_s30 + $0xa8] sm:$0xff]  ;;  %v1013_v35 = vadd.f32 %v1012_v4, %v5673_v58  ;;  %v2218_v58 = vpack.c.b16 %v2200_v24, %v2199_v61 }
 0x136   : > { %4892 = vmatmul.msk.bf16.gmra.mxu0 %vm705_vm4, %v2217_v7  ;;  %v1221_v7 = vrot.slane %v5254_v52, 5 }
 0x137   : > { %v1362_v25 = vpop.f32.mrf.mxu2  ;;  %4682 = vmatmul.msk.bf16.gmra.mxu1 %vm705_vm4, %v5189_v19  ;;  %v5925_v1 = vadd.f32 %v2301_v30, %v1715_v20  ;;  %v4699_v30 = vrot.slane %v1081_v60, 9  ;;  %v1220_v19 = vrot.slane %v1218_v62, 4  ;;  %v2126_v20 = vrot.slane %v2124_v34, 4  ;;  %v5190_v34 = vld [vmem:[%s5356_s30 + $0xa8] sm:$0xff] }
 0x138   : > { %v1429_v27 = vadd.f32 %v1362_v25, %v1010_v3  ;;  %v2129_v3 = vrot.slane %v2127_v44, 5  ;;  %v5937_v16 = vrot.slane %v2133_v50, 5  ;;  %v2143_v50 = vshll.u32 %v4875_v41, 16 }
 0x13a   : > { %v2130_v4 = vor.u32 %v2129_v3, %v2126_v20  ;;  %v2140_v56 = vor.u32 %v2139_v51, %v5937_v16  ;;  %v2145_v20 = vrot.slane %v2143_v50, 5 }
 0x13b   : > { %v2303_v48 = vpop.f32.mrf.mxu0 }
 0x13c   : > { %v1649_v23 = vpop.f32.mrf.mxu3  ;;  %4715 = vmatmul.msk.bf16.gmra.mxu2 %vm705_vm4, %v1277_v5  ;;  %v1014_v11 = vpop.f32.mrf.mxu1  ;;  %v1219_v5 = vsel %vm5542_vm7, %v4699_v30, %v1218_v62  ;;  %v4876_v62 = vld [vmem:[%s5356_s30 + $0xc0] sm:$0xf]  ;;  %v5255_v30 = vld [vmem:[%s5356_s30 + $0x10] sm:$0xf] }
 0x13d   : > { %v1716_v21 = vadd.f32 %v1649_v23, %v1429_v27  ;;  %v1222_v27 = vsel %vm5542_vm7, %v1220_v19, %v1221_v7  ;;  %v1260_v9 = vunpack.c.l.b16 %v1219_v5  ;;  %v4877_v23 = vld [vmem:[%s5356_s30 + $0xc4] sm:$0xf]  ;;  %v2459_v7 = vrot.slane %v5255_v30, 5 }
 0x13e   : > { %v1261_v44 = vunpack.c.l.b16 %v1222_v27  ;;  %v1015_v19 = vadd.f32 %v1014_v11, %v5690_v28  ;;  %v2151_v3 = vshll.u32 %v4876_v62, 16  ;;  %v5256_v27 = vld [vmem:[%s5356_s30 + $0xb8] sm:$0xf]  ;;  %v1082_v11 = vld [vmem:[%s5356_s30 + $0xb4] sm:$0xe] }
 0x13f   : > { %v1365_v8 = vpop.f32.mrf.mxu2  ;;  %v5939_v25 = vadd.f32 %v2303_v48, %v1716_v21  ;;  %v2131_v21 = vrot.slane %v2130_v4, 4  ;;  %v1225_v41 = vrot.slane %v5256_v27, 5  ;;  %v2461_v4 = vrot.slane %v2459_v7, 4  ;;  %v5206_v27 = vld [vmem:[%s5356_s30 + $0xb4] sm:$0xff] }
 0x140   : > { %v1430_v14 = vadd.f32 %v1365_v8, %v1013_v35  ;;  %v1278_v24 = vpack.c.b16 %v1261_v44, %v1260_v9  ;;  %v2148_v35 = vshrl.u32 %v4876_v62, 16  ;;  %v2157_v8 = vshll.u32 %v4877_v23, 16 }
 0x141   : > { %4828 = vmatmul.msk.bf16.gmra.mxu3 %vm705_vm4, %v5205_v38  ;;  %v2141_v38 = vrot.slane %v2140_v56, 4  ;;  %v5258_v56 = vld [vmem:[%s5356_s30 + $0x14] sm:$0x1]  ;;  %v2136_v9 = vsel %vm5368_vm3, %v2131_v21, %v5937_v16 }
 0x142   : > { %v2150_v62 = vrot.slane %v2148_v35, 4  ;;  %v2201_v21 = vunpack.c.l.b16 %v2136_v9 }
 0x143   : > { %v2306_v60 = vpop.f32.mrf.mxu0  ;;  %v2146_v44 = vsel %vm5368_vm3, %v2141_v38, %v2145_v20 }
 0x144   : > { %v1652_v47 = vpop.f32.mrf.mxu3  ;;  %v1017_v48 = vpop.f32.mrf.mxu1  ;;  %v2202_v38 = vunpack.c.l.b16 %v2146_v44 }
 0x145   : > { %v1717_v52 = vadd.f32 %v1652_v47, %v1430_v14  ;;  %v2161_v14 = vshrl.u32 %v4877_v23, 16  ;;  %v2462_v47 = vrot.slane %v5258_v56, 5  ;;  %v5967_v23 = vrot.slane %v2157_v8, 5 }
 0x146   : > { %4893 = vmatmul.msk.bf16.gmra.mxu0 %vm705_vm4, %v2218_v58  ;;  %v5257_v58 = vld [vmem:[%s5356_s30 + $0xbc] sm:$0x1]  ;;  %v1227_v56 = vrot.slane %v1225_v41, 4  ;;  %v1018_v16 = vadd.f32 %v1017_v48, %v5710_v53 }
 0x147   : > { %v1367_v61 = vpop.f32.mrf.mxu2  ;;  %4683 = vmatmul.msk.bf16.gmra.mxu1 %vm705_vm4, %v5190_v34  ;;  %v5955_v5 = vadd.f32 %v2306_v60, %v1717_v52  ;;  %v1228_v28 = vrot.slane %v5257_v58, 5  ;;  %v2153_v52 = vrot.slane %v2151_v3, 5  ;;  %v2163_v30 = vrot.slane %v2161_v14, 4 }
 0x148   : > { %v1431_v51 = vadd.f32 %v1367_v61, %v1015_v19  ;;  %v4896_v19 = vld [vmem:[%s5356_s30 + $0xc] sm:$0xe]  ;;  %v4700_v58 = vrot.slane %v1082_v11, 9  ;;  %v2463_v3 = vsel %vm5542_vm7, %v2461_v4, %v2462_v47  ;;  %v5058_v4 = vld [vmem:[%s5356_s30 + $0x18] sm:$0xf] }
 0x149   : > { %7261 = vst [vmem:[#allocation2_spill] sm:$0xff] %v5955_v5  ;;  %v4912_v5 = vrot.slane %v4896_v19, 9  ;;  %v2154_v8 = vor.u32 %v2153_v52, %v2150_v62  ;;  %v2572_v11 = vunpack.c.l.b16 %v2463_v3  ;;  %v1229_v48 = vsel %vm5542_vm7, %v1227_v56, %v1228_v28  ;;  %v5191_v62 = vld [vmem:[%s5356_s30 + $0xb4] sm:$0xff]  ;;  %v5990_v52 = vld [vmem:[%s5356_s30 + $0x1c] sm:$0xf] }
 0x14a   : > { %v1226_v53 = vsel %vm5542_vm7, %v4700_v58, %v1225_v41  ;;  %v2164_v9 = vor.u32 %v2163_v30, %v5967_v23  ;;  %v1263_v41 = vunpack.c.l.b16 %v1229_v48  ;;  %v3127_v56 = vshrl.u32 %v5058_v4, 16 }
 0x14b   : > { %v2308_v34 = vpop.f32.mrf.mxu0  ;;  %v2460_v35 = vsel %vm5542_vm7, %v4912_v5, %v2459_v7  ;;  %v2219_v7 = vpack.c.b16 %v2202_v38, %v2201_v21  ;;  %v2155_v58 = vrot.slane %v2154_v8, 4  ;;  %v3130_v30 = vshll.u32 %v5058_v4, 16 }
 0x14c   : > { %v1654_v60 = vpop.f32.mrf.mxu3  ;;  %4716 = vmatmul.msk.bf16.gmra.mxu2 %vm705_vm4, %v1278_v24  ;;  %v1019_v50 = vpop.f32.mrf.mxu1  ;;  %v4878_v24 = vld [vmem:[%s5356_s30 + $0xc8] sm:$0x1]  ;;  %v2571_v14 = vunpack.c.l.b16 %v2460_v35  ;;  %v2165_v28 = vrot.slane %v2164_v9, 4  ;;  %v3140_v38 = vshrl.u32 %v5990_v52, 16  ;;  %v3129_v8 = vrot.slane %v3127_v56, 4 }
 0x14d   : > { %v1718_v61 = vadd.f32 %v1654_v60, %v1431_v51  ;;  %v2167_v5 = vshll.u32 %v4878_v24, 16  ;;  %v1020_v21 = vadd.f32 %v1019_v50, %v5730_v17  ;;  %v2160_v17 = vsel %vm5368_vm3, %v2155_v58, %v5967_v23  ;;  %v5060_v9 = vld [vmem:[%s5356_s30 + $0x20] sm:$0x1]  ;;  %v5061_v56 = vld [vmem:[%s5356_s30 + $0x24] sm:$0xf] }
 0x14e   : > { %v5983_v44 = vpack.c.b16 %v2572_v11, %v2571_v14  ;;  %v3132_v14 = vrot.slane %v3130_v30, 5  ;;  %v3146_v58 = vshll.u32 %v5060_v9, 16  ;;  %v6010_v30 = vld [vmem:[%s5356_s30 + $0x28] sm:$0xf] }
 0x14f   : > { %v1370_v20 = vpop.f32.mrf.mxu2  ;;  %v5986_v47 = vadd.f32 %v2308_v34, %v1718_v61  ;;  %v2169_v34 = vrot.slane %v2167_v5, 5  ;;  %v3136_v61 = vshll.u32 %v5990_v52, 16 }
 0x150   : > { %v1432_v51 = vadd.f32 %v1370_v20, %v1018_v16  ;;  %v1262_v16 = vunpack.c.l.b16 %v1226_v53  ;;  %v3142_v53 = vrot.slane %v3140_v38, 4  ;;  %v3148_v38 = vrot.slane %v3146_v58, 5 }
 0x151   : > { %4829 = vmatmul.msk.bf16.gmra.mxu3 %vm705_vm4, %v5206_v27  ;;  %v2170_v50 = vsel %vm5368_vm3, %v2165_v28, %v2169_v34  ;;  %v3138_v11 = vrot.slane %v3136_v61, 5 }
 0x152   : > { %v1279_v3 = vpack.c.b16 %v1263_v41, %v1262_v16  ;;  %v3133_v16 = vor.u32 %v3132_v14, %v3129_v8  ;;  %v3154_v8 = vshll.u32 %v5061_v56, 16  ;;  %v3160_v14 = vshll.u32 %v6010_v30, 16 }
 0x153   : > { %v2311_v60 = vpop.f32.mrf.mxu0  ;;  %v3143_v41 = vor.u32 %v3142_v53, %v3138_v11 }
 0x154   : > { %v1657_v19 = vpop.f32.mrf.mxu3  ;;  %v1022_v27 = vpop.f32.mrf.mxu1  ;;  %v3134_v34 = vrot.slane %v3133_v16, 4 }
 0x155   : > { %v1719_v20 = vadd.f32 %v1657_v19, %v1432_v51  ;;  %v2204_v19 = vunpack.c.l.b16 %v2170_v50  ;;  %v1023_v23 = vadd.f32 %v1022_v27, %v5753_v2  ;;  %v3144_v61 = vrot.slane %v3143_v41, 4 }
 0x156   : > { %4894 = vmatmul.msk.bf16.gmra.mxu0 %vm705_vm4, %v2219_v7 }
 0x157   : > { %v1372_v24 = vpop.f32.mrf.mxu2  ;;  %4684 = vmatmul.msk.bf16.gmra.mxu1 %vm705_vm4, %v5191_v62  ;;  %v5997_v51 = vadd.f32 %v2311_v60, %v1719_v20  ;;  %v5207_v60 = vld [vmem:[%s5356_s30 + $0xc0] sm:$0xff]  ;;  %v2203_v62 = vunpack.c.l.b16 %v2160_v17  ;;  %v3164_v17 = vshrl.u32 %v6010_v30, 16  ;;  %v3149_v41 = vsel %vm5368_vm3, %v3144_v61, %v3148_v38  ;;  %v6036_v38 = vld [vmem:[%s5356_s30 + $0x2c] sm:$0x1] }
 0x158   : > { %v1433_v35 = vadd.f32 %v1372_v24, %v1020_v21  ;;  %v5123_v24 = vld [vmem:[%s5356_s30 + $0x18] sm:$0xe]  ;;  %v3513_v61 = vunpack.c.l.b16 %v3149_v41 }
 0x159   : > { %v2220_v21 = vpack.c.b16 %v2204_v19, %v2203_v62  ;;  %v5260_v62 = vld [vmem:[%s5356_s30 + $0x20] sm:$0x1] }
 0x15a   : > { %v2469_v19 = vrot.slane %v5260_v62, 5 }
 0x15b   : > { %v2313_v48 = vpop.f32.mrf.mxu0 }
 0x15c   : > { %v1659_v7 = vpop.f32.mrf.mxu3  ;;  %4717 = vmatmul.msk.bf16.gmra.mxu2 %vm705_vm4, %v1279_v3  ;;  %v1024_v5 = vpop.f32.mrf.mxu1  ;;  %v3151_v3 = vshrl.u32 %v5061_v56, 16 }
 0x15d   : > { %v1720_v4 = vadd.f32 %v1659_v7, %v1433_v35  ;;  %v3798_v35 = vrot.slane %v5990_v52, 5  ;;  %v5259_v7 = vld [vmem:[%s5356_s30 + $0x1c] sm:$0xf]  ;;  %v3139_v52 = vsel %vm5368_vm3, %v3134_v34, %v3138_v11  ;;  %v3166_v11 = vrot.slane %v3164_v17, 4 }
 0x15f   : > { %v1375_v20 = vpop.f32.mrf.mxu2  ;;  %v6015_v2 = vadd.f32 %v2313_v48, %v1720_v4  ;;  %v5139_v48 = vrot.slane %v5123_v24, 9  ;;  %v4897_v4 = vld [vmem:[%s5356_s30 + $0x18] sm:$0xe]  ;;  %v3800_v58 = vrot.slane %v3798_v35, 4 }
 0x160   : > { %v1434_v28 = vadd.f32 %v1375_v20, %v1023_v23  ;;  %v1025_v23 = vadd.f32 %v1024_v5, %v5773_v29  ;;  %v3801_v20 = vrot.slane %v5060_v9, 5  ;;  %v5208_v24 = vld [vmem:[%s5356_s30 + $0x18] sm:$0xff]  ;;  %v3512_v5 = vunpack.c.l.b16 %v3139_v52 }
 0x161   : > { %4830 = vmatmul.msk.bf16.gmra.mxu3 %vm705_vm4, %v5207_v60  ;;  %7262 = vst [vmem:[#allocation3_spill] sm:$0xff] %v6015_v2  ;;  %v2466_v60 = vrot.slane %v5259_v7, 5  ;;  %v6030_v7 = vrot.slane %v3160_v14, 5  ;;  %v3799_v2 = vsel %vm5542_vm7, %v5139_v48, %v3798_v35  ;;  %v3170_v35 = vshll.u32 %v6036_v38, 16 }
 0x162   : > { %v3544_v48 = vpack.c.b16 %v3513_v61, %v3512_v5  ;;  %v5261_v5 = vld [vmem:[%s5356_s30 + $0x28] sm:$0xf] }
 0x163   : > { %v2316_v27 = vpop.f32.mrf.mxu0  ;;  %v2468_v62 = vrot.slane %v2466_v60, 4  ;;  %v2473_v61 = vrot.slane %v5261_v5, 5 }
 0x164   : > { %v1662_v50 = vpop.f32.mrf.mxu3  ;;  %v1027_v53 = vpop.f32.mrf.mxu1 }
 0x165   : > { %v1721_v16 = vadd.f32 %v1662_v50, %v1434_v28  ;;  %v3153_v28 = vrot.slane %v3151_v3, 4  ;;  %v3156_v50 = vrot.slane %v3154_v8, 5  ;;  %v2470_v17 = vsel %vm5542_vm7, %v2468_v62, %v2469_v19  ;;  %v6055_v62 = vld [vmem:[%s5356_s30 + $0x34] sm:$0xf] }
 0x166   : > { %4895 = vmatmul.msk.bf16.gmra.mxu0 %vm705_vm4, %v2220_v21  ;;  %v4913_v21 = vrot.slane %v4897_v4, 9  ;;  %v1028_v4 = vadd.f32 %v1027_v53, %v5655_v37 }
 0x167   : > { %v1377_v56 = vpop.f32.mrf.mxu2  ;;  %4929 = vmatmul.msk.bf16.vlgmr.msra.gmra.mxu1 %vm705_vm4, %v5983_v44  ;;  %v6033_v29 = vadd.f32 %v2316_v27, %v1721_v16  ;;  %v3802_v44 = vsel %vm5542_vm7, %v3800_v58, %v3801_v20  ;;  %v3157_v3 = vor.u32 %v3156_v50, %v3153_v28  ;;  %v3167_v16 = vor.u32 %v3166_v11, %v6030_v7  ;;  %v5124_v11 = vld [vmem:[%s5356_s30 + $0x24] sm:$0xe] }
 0x168   : > { %v1435_v34 = vadd.f32 %v1377_v56, %v1025_v23  ;;  %v2467_v27 = vsel %vm5542_vm7, %v4913_v21, %v2466_v60  ;;  %v3910_v23 = vunpack.c.l.b16 %v3799_v2  ;;  %v3911_v41 = vunpack.c.l.b16 %v3802_v44 }
 0x169   : > { %v2573_v20 = vunpack.c.l.b16 %v2467_v27  ;;  %v2574_v60 = vunpack.c.l.b16 %v2470_v17  ;;  %v3158_v28 = vrot.slane %v3157_v3, 4  ;;  %v3168_v19 = vrot.slane %v3167_v16, 4 }
 0x16a   : > { %v3172_v50 = vrot.slane %v3170_v35, 5  ;;  %v3805_v21 = vrot.slane %v6010_v30, 5  ;;  %v5140_v17 = vrot.slane %v5124_v11, 9  ;;  %v4898_v30 = vld [vmem:[%s5356_s30 + $0x24] sm:$0xe] }
 0x16b   : > { %v2318_v9 = vpop.f32.mrf.mxu0  ;;  %v2604_v53 = vpack.c.b16 %v2574_v60, %v2573_v20 }
 0x16c   : > { %v1664_v8 = vpop.f32.mrf.mxu3  ;;  %5042 = vmatmul.msk.bf16.vlgmr.msra.gmra.mxu2 %vm705_vm4, %v5208_v24  ;;  %v1029_v14 = vpop.f32.mrf.mxu1  ;;  %v5064_v24 = vld [vmem:[%s5356_s30 + $0x30] sm:$0xf]  ;;  %v3173_v27 = vsel %vm5368_vm3, %v3168_v19, %v3172_v50  ;;  %v5209_v50 = vld [vmem:[%s5356_s30 + $0x24] sm:$0xff] }
 0x16d   : > { %v1722_v52 = vadd.f32 %v1664_v8, %v1435_v34  ;;  %v3942_v34 = vpack.c.b16 %v3911_v41, %v3910_v23  ;;  %v3163_v8 = vsel %vm5368_vm3, %v3158_v28, %v6030_v7  ;;  %v3175_v16 = vshrl.u32 %v5064_v24, 16  ;;  %v5262_v41 = vld [vmem:[%s5356_s30 + $0x2c] sm:$0x1] }
 0x16e   : > { %v3807_v23 = vrot.slane %v3805_v21, 4  ;;  %v3808_v7 = vrot.slane %v6036_v38, 5  ;;  %v3514_v60 = vunpack.c.l.b16 %v3163_v8  ;;  %v2475_v28 = vrot.slane %v2473_v61, 4 }
 0x16f   : > { %v1380_v58 = vpop.f32.mrf.mxu2  ;;  %v6057_v37 = vadd.f32 %v2318_v9, %v1722_v52  ;;  %v3178_v9 = vshll.u32 %v5064_v24, 16  ;;  %v3184_v52 = vshll.u32 %v6055_v62, 16  ;;  %v3515_v11 = vunpack.c.l.b16 %v3173_v27 }
 0x170   : > { %v1436_v56 = vadd.f32 %v1380_v58, %v1028_v4  ;;  %v1030_v4 = vadd.f32 %v1029_v14, %v5676_v63  ;;  %v2476_v58 = vrot.slane %v5262_v41, 5  ;;  %v3806_v24 = vsel %vm5542_vm7, %v5140_v17, %v3805_v21 }
 0x171   : > { %5107 = vmatmul.msk.bf16.vlgmr.msra.gmra.mxu3 %vm705_vm4, %v3544_v48  ;;  %v3188_v48 = vshrl.u32 %v6055_v62, 16  ;;  %v3177_v63 = vrot.slane %v3175_v16, 4  ;;  %v3180_v14 = vrot.slane %v3178_v9, 5  ;;  %v6078_v38 = vrot.slane %v3184_v52, 5 }
 0x172   : > { %v2477_v27 = vsel %vm5542_vm7, %v2475_v28, %v2476_v58  ;;  %v3912_v17 = vunpack.c.l.b16 %v3806_v24  ;;  %v5125_v24 = vld [vmem:[%s5356_s30 + $0x30] sm:$0xe] }
 0x173   : > { %v2321_v2 = vpop.f32.mrf.mxu0  ;;  %v3190_v5 = vrot.slane %v3188_v48, 4  ;;  %v3181_v52 = vor.u32 %v3180_v14, %v3177_v63 }
 0x174   : > { %v1667_v44 = vpop.f32.mrf.mxu3  ;;  %v1032_v3 = vpop.f32.mrf.mxu1 }
 0x175   : > { %v1723_v35 = vadd.f32 %v1667_v44, %v1436_v56  ;;  %v4914_v56 = vrot.slane %v4898_v30, 9  ;;  %v6087_v30 = vld [vmem:[%s5356_s30 + $0x38] sm:$0x1]  ;;  %v3191_v48 = vor.u32 %v3190_v5, %v6078_v38  ;;  %v3182_v28 = vrot.slane %v3181_v52, 4 }
 0x176   : > { %5156 = vmatmul.msk.bf16.vlgmr.msra.gmra.mxu0 %vm705_vm4, %v3942_v34 }
 0x177   : > { %v1382_v20 = vpop.f32.mrf.mxu2  ;;  %4930 = vmatmul.msk.bf16.gmra.mxu1 %vm705_vm4, %v2604_v53  ;;  %v6076_v34 = vadd.f32 %v2321_v2, %v1723_v35  ;;  %v3809_v53 = vsel %vm5542_vm7, %v3807_v23, %v3808_v7  ;;  %v2474_v8 = vsel %vm5542_vm7, %v4914_v56, %v2473_v61  ;;  %v3545_v2 = vpack.c.b16 %v3515_v11, %v3514_v60  ;;  %v6095_v56 = vld [vmem:[%s5356_s30 + $0x40] sm:$0xf] }
 0x178   : > { %v1437_v19 = vadd.f32 %v1382_v20, %v1030_v4  ;;  %v3913_v9 = vunpack.c.l.b16 %v3809_v53  ;;  %v1033_v61 = vadd.f32 %v1032_v3, %v5693_v22  ;;  %v2575_v4 = vunpack.c.l.b16 %v2474_v8  ;;  %v5067_v20 = vld [vmem:[%s5356_s30 + $0x3c] sm:$0xf] }
 0x179   : > { %v2576_v23 = vunpack.c.l.b16 %v2477_v27  ;;  %v3194_v7 = vshll.u32 %v6087_v30, 16  ;;  %v3812_v22 = vrot.slane %v6055_v62, 5  ;;  %v3199_v14 = vshrl.u32 %v5067_v20, 16 }
 0x17a   : > { %v3943_v60 = vpack.c.b16 %v3913_v9, %v3912_v17  ;;  %v3202_v5 = vshll.u32 %v5067_v20, 16  ;;  %v3208_v53 = vshll.u32 %v6095_v56, 16  ;;  %v3212_v8 = vshrl.u32 %v6095_v56, 16  ;;  %v5264_v9 = vld [vmem:[%s5356_s30 + $0x38] sm:$0x1] }
 0x17b   : > { %v2323_v44 = vpop.f32.mrf.mxu0  ;;  %v3196_v11 = vrot.slane %v3194_v7, 5  ;;  %v2483_v52 = vrot.slane %v5264_v9, 5  ;;  %v3815_v62 = vrot.slane %v6087_v30, 5  ;;  %v3814_v7 = vrot.slane %v3812_v22, 4  ;;  %v6122_v9 = vld [vmem:[%s5356_s30 + $0x44] sm:$0x1] }
 0x17c   : > { %v1669_v21 = vpop.f32.mrf.mxu3  ;;  %5043 = vmatmul.msk.bf16.gmra.mxu2 %vm705_vm4, %v5209_v50  ;;  %v1034_v16 = vpop.f32.mrf.mxu1  ;;  %v2605_v50 = vpack.c.b16 %v2576_v23, %v2575_v4  ;;  %v3187_v4 = vsel %vm5368_vm3, %v3182_v28, %v6078_v38  ;;  %v3204_v20 = vrot.slane %v3202_v5, 5  ;;  %v6116_v30 = vrot.slane %v3208_v53, 5 }
 0x17d   : > { %v1724_v35 = vadd.f32 %v1669_v21, %v1437_v19  ;;  %v3192_v19 = vrot.slane %v3191_v48, 4  ;;  %v3516_v38 = vunpack.c.l.b16 %v3187_v4 }
 0x17f   : > { %v1385_v41 = vpop.f32.mrf.mxu2  ;;  %v6100_v3 = vadd.f32 %v2323_v44, %v1724_v35  ;;  %v4899_v44 = vld [vmem:[%s5356_s30 + $0x30] sm:$0xe]  ;;  %v1035_v35 = vadd.f32 %v1034_v16, %v5714_v55  ;;  %v3197_v23 = vsel %vm5368_vm3, %v3192_v19, %v3196_v11 }
 0x180   : > { %v1438_v58 = vadd.f32 %v1385_v41, %v1033_v61  ;;  %v5141_v61 = vrot.slane %v5125_v24, 9  ;;  %v3214_v24 = vrot.slane %v3212_v8, 4  ;;  %v4915_v55 = vrot.slane %v4899_v44, 9 }
 0x181   : > { %5108 = vmatmul.msk.bf16.gmra.mxu3 %vm705_vm4, %v3545_v2  ;;  %v5263_v2 = vld [vmem:[%s5356_s30 + $0x34] sm:$0xf]  ;;  %v3517_v28 = vunpack.c.l.b16 %v3197_v23 }
 0x182   : > { %v2480_v17 = vrot.slane %v5263_v2, 5  ;;  %v3813_v11 = vsel %vm5542_vm7, %v5141_v61, %v3812_v22  ;;  %v3218_v22 = vshll.u32 %v6122_v9, 16 }
 0x183   : > { %v2326_v63 = vpop.f32.mrf.mxu0  ;;  %v3546_v44 = vpack.c.b16 %v3517_v28, %v3516_v38  ;;  %v5265_v28 = vld [vmem:[%s5356_s30 + $0x40] sm:$0xf] }
 0x184   : > { %v1672_v27 = vpop.f32.mrf.mxu3  ;;  %v1037_v21 = vpop.f32.mrf.mxu1  ;;  %v2482_v16 = vrot.slane %v2480_v17, 4 }
 0x185   : > { %v1725_v48 = vadd.f32 %v1672_v27, %v1438_v58  ;;  %v3201_v58 = vrot.slane %v3199_v14, 4  ;;  %v5210_v27 = vld [vmem:[%s5356_s30 + $0x30] sm:$0xff] }
 0x186   : > { %5157 = vmatmul.msk.bf16.gmra.mxu0 %vm705_vm4, %v3943_v60  ;;  %v2484_v8 = vsel %vm5542_vm7, %v2482_v16, %v2483_v52  ;;  %v6141_v16 = vld [vmem:[%s5356_s30 + $0x4c] sm:$0xf] }
 0x187   : > { %v1387_v41 = vpop.f32.mrf.mxu2  ;;  %4931 = vmatmul.msk.bf16.gmra.mxu1 %vm705_vm4, %v2605_v50  ;;  %v6119_v2 = vadd.f32 %v2326_v63, %v1725_v48  ;;  %v3816_v50 = vsel %vm5542_vm7, %v3814_v7, %v3815_v62  ;;  %v3205_v14 = vor.u32 %v3204_v20, %v3201_v58  ;;  %v2481_v63 = vsel %vm5542_vm7, %v4915_v55, %v2480_v17 }
 0x188   : > { %v1439_v60 = vadd.f32 %v1387_v41, %v1035_v35  ;;  %v3215_v48 = vor.u32 %v3214_v24, %v6116_v30  ;;  %v1038_v62 = vadd.f32 %v1037_v21, %v5737_v26  ;;  %v3914_v35 = vunpack.c.l.b16 %v3813_v11  ;;  %v5126_v24 = vld [vmem:[%s5356_s30 + $0x3c] sm:$0xe] }
 0x189   : > { %v3915_v4 = vunpack.c.l.b16 %v3816_v50  ;;  %v2577_v7 = vunpack.c.l.b16 %v2481_v63  ;;  %v2578_v17 = vunpack.c.l.b16 %v2484_v8  ;;  %v3206_v58 = vrot.slane %v3205_v14, 4 }
 0x18a   : > { %v3216_v52 = vrot.slane %v3215_v48, 4  ;;  %v3220_v20 = vrot.slane %v3218_v22, 5  ;;  %v3819_v55 = vrot.slane %v6095_v56, 5  ;;  %v2487_v11 = vrot.slane %v5265_v28, 5  ;;  %v4900_v56 = vld [vmem:[%s5356_s30 + $0x3c] sm:$0xe] }
 0x18b   : > { %v2328_v19 = vpop.f32.mrf.mxu0  ;;  %v2606_v38 = vpack.c.b16 %v2578_v17, %v2577_v7  ;;  %v5142_v8 = vrot.slane %v5126_v24, 9 }
 0x18c   : > { %v1674_v5 = vpop.f32.mrf.mxu3  ;;  %5044 = vmatmul.msk.bf16.gmra.mxu2 %vm705_vm4, %v5210_v27  ;;  %v1039_v53 = vpop.f32.mrf.mxu1  ;;  %v5070_v27 = vld [vmem:[%s5356_s30 + $0x48] sm:$0xf]  ;;  %v3221_v63 = vsel %vm5368_vm3, %v3216_v52, %v3220_v20  ;;  %v5211_v20 = vld [vmem:[%s5356_s30 + $0x3c] sm:$0xff] }
 0x18d   : > { %v1726_v61 = vadd.f32 %v1674_v5, %v1439_v60  ;;  %v3944_v60 = vpack.c.b16 %v3915_v4, %v3914_v35  ;;  %v3211_v5 = vsel %vm5368_vm3, %v3206_v58, %v6116_v30  ;;  %v3223_v48 = vshrl.u32 %v5070_v27, 16  ;;  %v5266_v4 = vld [vmem:[%s5356_s30 + $0x44] sm:$0x1] }
 0x18e   : > { %v3821_v35 = vrot.slane %v3819_v55, 4  ;;  %v3822_v30 = vrot.slane %v6122_v9, 5  ;;  %v3518_v17 = vunpack.c.l.b16 %v3211_v5  ;;  %v2489_v58 = vrot.slane %v2487_v11, 4 }
 0x18f   : > { %v1390_v23 = vpop.f32.mrf.mxu2  ;;  %v6143_v26 = vadd.f32 %v2328_v19, %v1726_v61  ;;  %v3226_v19 = vshll.u32 %v5070_v27, 16  ;;  %v3232_v61 = vshll.u32 %v6141_v16, 16  ;;  %v3519_v24 = vunpack.c.l.b16 %v3221_v63 }
 0x190   : > { %v1440_v41 = vadd.f32 %v1390_v23, %v1038_v62  ;;  %v1040_v62 = vadd.f32 %v1039_v53, %v5755_v43  ;;  %v2490_v23 = vrot.slane %v5266_v4, 5  ;;  %v3820_v27 = vsel %vm5542_vm7, %v5142_v8, %v3819_v55 }
 0x191   : > { %5109 = vmatmul.msk.bf16.gmra.mxu3 %vm705_vm4, %v3546_v44  ;;  %v3236_v44 = vshrl.u32 %v6141_v16, 16  ;;  %v3225_v43 = vrot.slane %v3223_v48, 4  ;;  %v3228_v53 = vrot.slane %v3226_v19, 5  ;;  %v6164_v9 = vrot.slane %v3232_v61, 5 }
 0x192   : > { %v2491_v63 = vsel %vm5542_vm7, %v2489_v58, %v2490_v23  ;;  %v3916_v8 = vunpack.c.l.b16 %v3820_v27  ;;  %v5127_v27 = vld [vmem:[%s5356_s30 + $0x48] sm:$0xe] }
 0x193   : > { %v2331_v21 = vpop.f32.mrf.mxu0  ;;  %v3238_v28 = vrot.slane %v3236_v44, 4  ;;  %v3229_v61 = vor.u32 %v3228_v53, %v3225_v43 }
 0x194   : > { %v1677_v50 = vpop.f32.mrf.mxu3  ;;  %v1042_v14 = vpop.f32.mrf.mxu1 }
 0x195   : > { %v1727_v22 = vadd.f32 %v1677_v50, %v1440_v41  ;;  %v4916_v41 = vrot.slane %v4900_v56, 9  ;;  %v6173_v56 = vld [vmem:[%s5356_s30 + $0x50] sm:$0x1]  ;;  %v3239_v44 = vor.u32 %v3238_v28, %v6164_v9  ;;  %v3230_v58 = vrot.slane %v3229_v61, 4 }
 0x196   : > { %5158 = vmatmul.msk.bf16.gmra.mxu0 %vm705_vm4, %v3944_v60 }
 0x197   : > { %v1392_v7 = vpop.f32.mrf.mxu2  ;;  %4932 = vmatmul.msk.bf16.gmra.mxu1 %vm705_vm4, %v2606_v38  ;;  %v6162_v60 = vadd.f32 %v2331_v21, %v1727_v22  ;;  %v3823_v38 = vsel %vm5542_vm7, %v3821_v35, %v3822_v30  ;;  %v2488_v5 = vsel %vm5542_vm7, %v4916_v41, %v2487_v11  ;;  %v3547_v21 = vpack.c.b16 %v3519_v24, %v3518_v17  ;;  %v6181_v41 = vld [vmem:[%s5356_s30 + $0x58] sm:$0xf] }
 0x198   : > { %v1441_v52 = vadd.f32 %v1392_v7, %v1040_v62  ;;  %v3917_v19 = vunpack.c.l.b16 %v3823_v38  ;;  %v1043_v11 = vadd.f32 %v1042_v14, %v5776_v40  ;;  %v2579_v62 = vunpack.c.l.b16 %v2488_v5  ;;  %v5073_v7 = vld [vmem:[%s5356_s30 + $0x54] sm:$0xf] }
 0x199   : > { %v2580_v35 = vunpack.c.l.b16 %v2491_v63  ;;  %v3242_v30 = vshll.u32 %v6173_v56, 16  ;;  %v3826_v40 = vrot.slane %v6141_v16, 5  ;;  %v3247_v53 = vshrl.u32 %v5073_v7, 16 }
 0x19a   : > { %v3945_v17 = vpack.c.b16 %v3917_v19, %v3916_v8  ;;  %v3250_v28 = vshll.u32 %v5073_v7, 16  ;;  %v3256_v38 = vshll.u32 %v6181_v41, 16  ;;  %v3260_v5 = vshrl.u32 %v6181_v41, 16  ;;  %v5268_v19 = vld [vmem:[%s5356_s30 + $0x50] sm:$0x1] }
 0x19b   : > { %v2333_v50 = vpop.f32.mrf.mxu0  ;;  %v3244_v24 = vrot.slane %v3242_v30, 5  ;;  %v2497_v61 = vrot.slane %v5268_v19, 5  ;;  %v3829_v16 = vrot.slane %v6173_v56, 5  ;;  %v3828_v30 = vrot.slane %v3826_v40, 4  ;;  %v6208_v19 = vld [vmem:[%s5356_s30 + $0x5c] sm:$0x1] }
 0x19c   : > { %v1679_v55 = vpop.f32.mrf.mxu3  ;;  %5045 = vmatmul.msk.bf16.gmra.mxu2 %vm705_vm4, %v5211_v20  ;;  %v1044_v48 = vpop.f32.mrf.mxu1  ;;  %v2607_v20 = vpack.c.b16 %v2580_v35, %v2579_v62  ;;  %v3235_v62 = vsel %vm5368_vm3, %v3230_v58, %v6164_v9  ;;  %v3252_v7 = vrot.slane %v3250_v28, 5  ;;  %v6202_v56 = vrot.slane %v3256_v38, 5 }
 0x19d   : > { %v1728_v22 = vadd.f32 %v1679_v55, %v1441_v52  ;;  %v3240_v52 = vrot.slane %v3239_v44, 4  ;;  %v3520_v9 = vunpack.c.l.b16 %v3235_v62 }
 0x19f   : > { %v1395_v4 = vpop.f32.mrf.mxu2  ;;  %v6186_v14 = vadd.f32 %v2333_v50, %v1728_v22  ;;  %v4901_v50 = vld [vmem:[%s5356_s30 + $0x48] sm:$0xe]  ;;  %v1045_v22 = vadd.f32 %v1044_v48, %v5791_v10  ;;  %v3245_v35 = vsel %vm5368_vm3, %v3240_v52, %v3244_v24 }
 0x1a0   : > { %v1442_v23 = vadd.f32 %v1395_v4, %v1043_v11  ;;  %v5143_v11 = vrot.slane %v5127_v27, 9  ;;  %v3262_v27 = vrot.slane %v3260_v5, 4  ;;  %v4917_v10 = vrot.slane %v4901_v50, 9 }
 0x1a1   : > { %5110 = vmatmul.msk.bf16.gmra.mxu3 %vm705_vm4, %v3547_v21  ;;  %v5267_v21 = vld [vmem:[%s5356_s30 + $0x4c] sm:$0xf]  ;;  %v3521_v58 = vunpack.c.l.b16 %v3245_v35 }
 0x1a2   : > { %v2494_v8 = vrot.slane %v5267_v21, 5  ;;  %v3827_v24 = vsel %vm5542_vm7, %v5143_v11, %v3826_v40  ;;  %v3266_v40 = vshll.u32 %v6208_v19, 16 }
 0x1a3   : > { %v2336_v43 = vpop.f32.mrf.mxu0  ;;  %v3548_v50 = vpack.c.b16 %v3521_v58, %v3520_v9  ;;  %v5269_v58 = vld [vmem:[%s5356_s30 + $0x58] sm:$0xf] }
 0x1a4   : > { %v1682_v63 = vpop.f32.mrf.mxu3  ;;  %v1047_v55 = vpop.f32.mrf.mxu1  ;;  %v2496_v48 = vrot.slane %v2494_v8, 4 }
 0x1a5   : > { %v1729_v44 = vadd.f32 %v1682_v63, %v1442_v23  ;;  %v3249_v23 = vrot.slane %v3247_v53, 4  ;;  %v5212_v63 = vld [vmem:[%s5356_s30 + $0x48] sm:$0xff] }
 0x1a6   : > { %5159 = vmatmul.msk.bf16.gmra.mxu0 %vm705_vm4, %v3945_v17  ;;  %v2498_v5 = vsel %vm5542_vm7, %v2496_v48, %v2497_v61  ;;  %v6227_v48 = vld [vmem:[%s5356_s30 + $0x64] sm:$0xf] }
 0x1a7   : > { %v1397_v4 = vpop.f32.mrf.mxu2  ;;  %4933 = vmatmul.msk.bf16.gmra.mxu1 %vm705_vm4, %v2607_v20  ;;  %v6205_v21 = vadd.f32 %v2336_v43, %v1729_v44  ;;  %v3830_v20 = vsel %vm5542_vm7, %v3828_v30, %v3829_v16  ;;  %v3253_v53 = vor.u32 %v3252_v7, %v3249_v23  ;;  %v2495_v43 = vsel %vm5542_vm7, %v4917_v10, %v2494_v8 }
 0x1a8   : > { %v1443_v17 = vadd.f32 %v1397_v4, %v1045_v22  ;;  %v3263_v44 = vor.u32 %v3262_v27, %v6202_v56  ;;  %v1048_v16 = vadd.f32 %v1047_v55, %v5667_v49  ;;  %v3918_v22 = vunpack.c.l.b16 %v3827_v24  ;;  %v5128_v27 = vld [vmem:[%s5356_s30 + $0x54] sm:$0xe] }
 0x1a9   : > { %v3919_v62 = vunpack.c.l.b16 %v3830_v20  ;;  %v2581_v30 = vunpack.c.l.b16 %v2495_v43  ;;  %v2582_v8 = vunpack.c.l.b16 %v2498_v5  ;;  %v3254_v23 = vrot.slane %v3253_v53, 4 }
 0x1aa   : > { %v3264_v61 = vrot.slane %v3263_v44, 4  ;;  %v3268_v7 = vrot.slane %v3266_v40, 5  ;;  %v3833_v10 = vrot.slane %v6181_v41, 5  ;;  %v2501_v24 = vrot.slane %v5269_v58, 5  ;;  %v4902_v41 = vld [vmem:[%s5356_s30 + $0x54] sm:$0xe] }
 0x1ab   : > { %v2338_v52 = vpop.f32.mrf.mxu0  ;;  %v2608_v9 = vpack.c.b16 %v2582_v8, %v2581_v30  ;;  %v5144_v5 = vrot.slane %v5128_v27, 9 }
 0x1ac   : > { %v1684_v28 = vpop.f32.mrf.mxu3  ;;  %5046 = vmatmul.msk.bf16.gmra.mxu2 %vm705_vm4, %v5212_v63  ;;  %v1049_v38 = vpop.f32.mrf.mxu1  ;;  %v5076_v63 = vld [vmem:[%s5356_s30 + $0x60] sm:$0xf]  ;;  %v3269_v43 = vsel %vm5368_vm3, %v3264_v61, %v3268_v7  ;;  %v5213_v7 = vld [vmem:[%s5356_s30 + $0x54] sm:$0xff] }
 0x1ad   : > { %v1730_v11 = vadd.f32 %v1684_v28, %v1443_v17  ;;  %v3946_v17 = vpack.c.b16 %v3919_v62, %v3918_v22  ;;  %v3259_v28 = vsel %vm5368_vm3, %v3254_v23, %v6202_v56  ;;  %v3271_v44 = vshrl.u32 %v5076_v63, 16  ;;  %v5270_v62 = vld [vmem:[%s5356_s30 + $0x5c] sm:$0x1] }
 0x1ae   : > { %v3835_v22 = vrot.slane %v3833_v10, 4  ;;  %v3836_v56 = vrot.slane %v6208_v19, 5  ;;  %v3522_v8 = vunpack.c.l.b16 %v3259_v28  ;;  %v2503_v23 = vrot.slane %v2501_v24, 4 }
 0x1af   : > { %v1400_v35 = vpop.f32.mrf.mxu2  ;;  %v6229_v49 = vadd.f32 %v2338_v52, %v1730_v11  ;;  %v3274_v52 = vshll.u32 %v5076_v63, 16  ;;  %v3280_v11 = vshll.u32 %v6227_v48, 16  ;;  %v3523_v27 = vunpack.c.l.b16 %v3269_v43 }
 0x1b0   : > { %v1444_v4 = vadd.f32 %v1400_v35, %v1048_v16  ;;  %v1050_v16 = vadd.f32 %v1049_v38, %v5686_v0  ;;  %v2504_v35 = vrot.slane %v5270_v62, 5  ;;  %v3834_v63 = vsel %vm5542_vm7, %v5144_v5, %v3833_v10 }
 0x1b1   : > { %5111 = vmatmul.msk.bf16.gmra.mxu3 %vm705_vm4, %v3548_v50  ;;  %v3284_v50 = vshrl.u32 %v6227_v48, 16  ;;  %v3273_v0 = vrot.slane %v3271_v44, 4  ;;  %v3276_v38 = vrot.slane %v3274_v52, 5  ;;  %v6250_v19 = vrot.slane %v3280_v11, 5 }
 0x1b2   : > { %v2505_v43 = vsel %vm5542_vm7, %v2503_v23, %v2504_v35  ;;  %v3920_v5 = vunpack.c.l.b16 %v3834_v63  ;;  %v5129_v63 = vld [vmem:[%s5356_s30 + $0x60] sm:$0xe] }
 0x1b3   : > { %v2341_v55 = vpop.f32.mrf.mxu0  ;;  %v3286_v58 = vrot.slane %v3284_v50, 4  ;;  %v3277_v11 = vor.u32 %v3276_v38, %v3273_v0 }
 0x1b4   : > { %v1687_v20 = vpop.f32.mrf.mxu3  ;;  %v1052_v53 = vpop.f32.mrf.mxu1 }
 0x1b5   : > { %v1731_v40 = vadd.f32 %v1687_v20, %v1444_v4  ;;  %v4918_v4 = vrot.slane %v4902_v41, 9  ;;  %v6259_v41 = vld [vmem:[%s5356_s30 + $0x68] sm:$0x1]  ;;  %v3287_v50 = vor.u32 %v3286_v58, %v6250_v19  ;;  %v3278_v23 = vrot.slane %v3277_v11, 4 }
 0x1b6   : > { %5160 = vmatmul.msk.bf16.gmra.mxu0 %vm705_vm4, %v3946_v17 }
 0x1b7   : > { %v1402_v30 = vpop.f32.mrf.mxu2  ;;  %4934 = vmatmul.msk.bf16.gmra.mxu1 %vm705_vm4, %v2608_v9  ;;  %v6248_v17 = vadd.f32 %v2341_v55, %v1731_v40  ;;  %v3837_v9 = vsel %vm5542_vm7, %v3835_v22, %v3836_v56  ;;  %v2502_v28 = vsel %vm5542_vm7, %v4918_v4, %v2501_v24  ;;  %v3549_v55 = vpack.c.b16 %v3523_v27, %v3522_v8  ;;  %v6267_v4 = vld [vmem:[%s5356_s30 + $0x70] sm:$0xf] }
 0x1b8   : > { %v1445_v61 = vadd.f32 %v1402_v30, %v1050_v16  ;;  %v3921_v52 = vunpack.c.l.b16 %v3837_v9  ;;  %v1053_v24 = vadd.f32 %v1052_v53, %v5707_v39  ;;  %v2583_v16 = vunpack.c.l.b16 %v2502_v28  ;;  %v5079_v30 = vld [vmem:[%s5356_s30 + $0x6c] sm:$0xf] }
 0x1b9   : > { %v2584_v22 = vunpack.c.l.b16 %v2505_v43  ;;  %v3290_v56 = vshll.u32 %v6259_v41, 16  ;;  %v3840_v39 = vrot.slane %v6227_v48, 5  ;;  %v3295_v38 = vshrl.u32 %v5079_v30, 16 }
 0x1ba   : > { %v3947_v8 = vpack.c.b16 %v3921_v52, %v3920_v5  ;;  %v3298_v58 = vshll.u32 %v5079_v30, 16  ;;  %v3304_v9 = vshll.u32 %v6267_v4, 16  ;;  %v3308_v28 = vshrl.u32 %v6267_v4, 16  ;;  %v5272_v52 = vld [vmem:[%s5356_s30 + $0x68] sm:$0x1] }
 0x1bb   : > { %v2343_v20 = vpop.f32.mrf.mxu0  ;;  %v3292_v27 = vrot.slane %v3290_v56, 5  ;;  %v2511_v11 = vrot.slane %v5272_v52, 5  ;;  %v3843_v48 = vrot.slane %v6259_v41, 5  ;;  %v3842_v56 = vrot.slane %v3840_v39, 4 }
 0x1bc   : > { %v1689_v10 = vpop.f32.mrf.mxu3  ;;  %5047 = vmatmul.msk.bf16.gmra.mxu2 %vm705_vm4, %v5213_v7  ;;  %v1054_v44 = vpop.f32.mrf.mxu1  ;;  %v2609_v7 = vpack.c.b16 %v2584_v22, %v2583_v16  ;;  %v3283_v16 = vsel %vm5368_vm3, %v3278_v23, %v6250_v19  ;;  %v3300_v30 = vrot.slane %v3298_v58, 5  ;;  %v3306_v41 = vrot.slane %v3304_v9, 5  ;;  %v6292_v23 = vld [vmem:[%s5356_s30 + $0x74] sm:$0x1] }
 0x1bd   : > { %v1732_v40 = vadd.f32 %v1689_v10, %v1445_v61  ;;  %v3288_v61 = vrot.slane %v3287_v50, 4  ;;  %v3524_v52 = vunpack.c.l.b16 %v3283_v16 }
 0x1bf   : > { %v1405_v62 = vpop.f32.mrf.mxu2  ;;  %v6272_v53 = vadd.f32 %v2343_v20, %v1732_v40  ;;  %v4903_v20 = vld [vmem:[%s5356_s30 + $0x60] sm:$0xe]  ;;  %v1055_v40 = vadd.f32 %v1054_v44, %v5726_v6  ;;  %v3293_v22 = vsel %vm5368_vm3, %v3288_v61, %v3292_v27 }
 0x1c0   : > { %v1446_v35 = vadd.f32 %v1405_v62, %v1053_v24  ;;  %v5145_v24 = vrot.slane %v5129_v63, 9  ;;  %v3310_v63 = vrot.slane %v3308_v28, 4  ;;  %v3525_v19 = vunpack.c.l.b16 %v3293_v22 }
 0x1c1   : > { %5112 = vmatmul.msk.bf16.gmra.mxu3 %vm705_vm4, %v3549_v55  ;;  %7263 = vst [vmem:[#allocation4_spill] sm:$0xff] %v6272_v53  ;;  %v5271_v55 = vld [vmem:[%s5356_s30 + $0x64] sm:$0xf] }
 0x1c2   : > { %v2508_v5 = vrot.slane %v5271_v55, 5  ;;  %v4919_v55 = vrot.slane %v4903_v20, 9  ;;  %v3841_v61 = vsel %vm5542_vm7, %v5145_v24, %v3840_v39  ;;  %v3311_v28 = vor.u32 %v3310_v63, %v3306_v41  ;;  %v5082_v63 = vld [vmem:[%s5356_s30 + $0x78] sm:$0xf] }
 0x1c3   : > { %v2346_v0 = vpop.f32.mrf.mxu0  ;;  %v3550_v24 = vpack.c.b16 %v3525_v19, %v3524_v52  ;;  %v3922_v20 = vunpack.c.l.b16 %v3841_v61 }
 0x1c4   : > { %v1692_v43 = vpop.f32.mrf.mxu3  ;;  %v1057_v10 = vpop.f32.mrf.mxu1  ;;  %v2510_v6 = vrot.slane %v2508_v5, 4 }
 0x1c5   : > { %v1733_v50 = vadd.f32 %v1692_v43, %v1446_v35  ;;  %v3297_v35 = vrot.slane %v3295_v38, 4 }
 0x1c6   : > { %5161 = vmatmul.msk.bf16.gmra.mxu0 %vm705_vm4, %v3947_v8  ;;  %v5214_v8 = vld [vmem:[%s5356_s30 + $0x60] sm:$0xff]  ;;  %v2512_v9 = vsel %vm5542_vm7, %v2510_v6, %v2511_v11  ;;  %v5130_v11 = vld [vmem:[%s5356_s30 + $0x6c] sm:$0xe] }
 0x1c7   : > { %v1407_v62 = vpop.f32.mrf.mxu2  ;;  %4935 = vmatmul.msk.bf16.gmra.mxu1 %vm705_vm4, %v2609_v7  ;;  %v6289_v44 = vadd.f32 %v2346_v0, %v1733_v50  ;;  %v3844_v7 = vsel %vm5542_vm7, %v3842_v56, %v3843_v48  ;;  %v3301_v27 = vor.u32 %v3300_v30, %v3297_v35  ;;  %v2509_v0 = vsel %vm5542_vm7, %v4919_v55, %v2508_v5  ;;  %v6310_v55 = vld [vmem:[%s5356_s30 + $0x7c] sm:$0xf] }
 0x1c8   : > { %v1447_v43 = vadd.f32 %v1407_v62, %v1055_v40  ;;  %v3314_v50 = vshll.u32 %v6292_v23, 16  ;;  %v1058_v48 = vadd.f32 %v1057_v10, %v5745_v45  ;;  %v3923_v40 = vunpack.c.l.b16 %v3844_v7 }
 0x1c9   : > { %v2585_v22 = vunpack.c.l.b16 %v2509_v0  ;;  %v2586_v56 = vunpack.c.l.b16 %v2512_v9  ;;  %v3302_v5 = vrot.slane %v3301_v27, 4  ;;  %v3312_v35 = vrot.slane %v3311_v28, 4  ;;  %v5273_v0 = vld [vmem:[%s5356_s30 + $0x70] sm:$0xf] }
 0x1ca   : > { %v3316_v30 = vrot.slane %v3314_v50, 5  ;;  %v5146_v52 = vrot.slane %v5130_v11, 9  ;;  %v2515_v9 = vrot.slane %v5273_v0, 5  ;;  %v3319_v28 = vshrl.u32 %v5082_v63, 16 }
 0x1cb   : > { %v2348_v53 = vpop.f32.mrf.mxu0  ;;  %v2610_v6 = vpack.c.b16 %v2586_v56, %v2585_v22  ;;  %v3307_v7 = vsel %vm5368_vm3, %v3302_v5, %v3306_v41  ;;  %v3322_v50 = vshll.u32 %v5082_v63, 16  ;;  %v5215_v5 = vld [vmem:[%s5356_s30 + $0x6c] sm:$0xff] }
 0x1cc   : > { %v1694_v38 = vpop.f32.mrf.mxu3  ;;  %5048 = vmatmul.msk.bf16.gmra.mxu2 %vm705_vm4, %v5214_v8  ;;  %v1059_v58 = vpop.f32.mrf.mxu1  ;;  %v3847_v8 = vrot.slane %v6267_v4, 5  ;;  %v3317_v27 = vsel %vm5368_vm3, %v3312_v35, %v3316_v30  ;;  %v2517_v35 = vrot.slane %v2515_v9, 4  ;;  %v5274_v30 = vld [vmem:[%s5356_s30 + $0x74] sm:$0x1] }
 0x1cd   : > { %v1734_v39 = vadd.f32 %v1694_v38, %v1447_v43  ;;  %v3948_v43 = vpack.c.b16 %v3923_v40, %v3922_v20  ;;  %v4904_v38 = vld [vmem:[%s5356_s30 + $0x6c] sm:$0xe]  ;;  %v3526_v40 = vunpack.c.l.b16 %v3307_v7  ;;  %v2518_v11 = vrot.slane %v5274_v30, 5  ;;  %v6337_v7 = vld [vmem:[%s5356_s30 + $0x80] sm:$0x1] }
 0x1ce   : > { %v3849_v41 = vrot.slane %v3847_v8, 4  ;;  %v3848_v22 = vsel %vm5542_vm7, %v5146_v52, %v3847_v8  ;;  %v4920_v56 = vrot.slane %v4904_v38, 9 }
 0x1cf   : > { %v1410_v16 = vpop.f32.mrf.mxu2  ;;  %v6312_v45 = vadd.f32 %v2348_v53, %v1734_v39  ;;  %v3328_v53 = vshll.u32 %v6310_v55, 16  ;;  %v3332_v39 = vshrl.u32 %v6310_v55, 16  ;;  %v2519_v0 = vsel %vm5542_vm7, %v2517_v35, %v2518_v11 }
 0x1d0   : > { %v1448_v62 = vadd.f32 %v1410_v16, %v1058_v48  ;;  %v3850_v48 = vrot.slane %v6292_v23, 5  ;;  %v3527_v16 = vunpack.c.l.b16 %v3317_v27  ;;  %v3924_v27 = vunpack.c.l.b16 %v3848_v22  ;;  %v6349_v22 = vld [vmem:[%s5356_s30 + $0x88] sm:$0xf] }
 0x1d1   : > { %5113 = vmatmul.msk.bf16.gmra.mxu3 %vm705_vm4, %v3550_v24  ;;  %v1060_v24 = vadd.f32 %v1059_v58, %v5768_v12  ;;  %v3321_v12 = vrot.slane %v3319_v28, 4  ;;  %v3324_v58 = vrot.slane %v3322_v50, 5  ;;  %v6332_v23 = vrot.slane %v3328_v53, 5 }
 0x1d2   : > { %v3551_v52 = vpack.c.b16 %v3527_v16, %v3526_v40  ;;  %v2516_v38 = vsel %vm5542_vm7, %v4920_v56, %v2515_v9  ;;  %v5085_v40 = vld [vmem:[%s5356_s30 + $0x84] sm:$0xf] }
 0x1d3   : > { %v2351_v10 = vpop.f32.mrf.mxu0  ;;  %v3325_v50 = vor.u32 %v3324_v58, %v3321_v12  ;;  %v3346_v58 = vshll.u32 %v5085_v40, 16 }
 0x1d4   : > { %v1697_v19 = vpop.f32.mrf.mxu3  ;;  %v1062_v61 = vpop.f32.mrf.mxu1 }
 0x1d5   : > { %v1735_v4 = vadd.f32 %v1697_v19, %v1448_v62  ;;  %v3326_v56 = vrot.slane %v3325_v50, 4 }
 0x1d6   : > { %5162 = vmatmul.msk.bf16.gmra.mxu0 %vm705_vm4, %v3948_v43  ;;  %v3334_v43 = vrot.slane %v3332_v39, 4  ;;  %v1063_v39 = vadd.f32 %v1062_v61, %v5787_v59  ;;  %v3854_v59 = vrot.slane %v6310_v55, 5  ;;  %v3343_v61 = vshrl.u32 %v5085_v40, 16 }
 0x1d7   : > { %v1412_v20 = vpop.f32.mrf.mxu2  ;;  %4936 = vmatmul.msk.bf16.gmra.mxu1 %vm705_vm4, %v2610_v6  ;;  %v6330_v63 = vadd.f32 %v2351_v10, %v1735_v4  ;;  %v3851_v6 = vsel %vm5542_vm7, %v3849_v41, %v3850_v48  ;;  %v2587_v48 = vunpack.c.l.b16 %v2516_v38  ;;  %v4905_v38 = vld [vmem:[%s5356_s30 + $0x78] sm:$0xe] }
 0x1d8   : > { %v1449_v62 = vadd.f32 %v1412_v20, %v1060_v24  ;;  %v3925_v4 = vunpack.c.l.b16 %v3851_v6  ;;  %v3335_v53 = vor.u32 %v3334_v43, %v6332_v23  ;;  %v3338_v24 = vshll.u32 %v6337_v7, 16 }
 0x1d9   : > { %v2588_v20 = vunpack.c.l.b16 %v2519_v0  ;;  %v3352_v43 = vshll.u32 %v6349_v22, 16  ;;  %v3356_v6 = vshrl.u32 %v6349_v22, 16  ;;  %v5275_v0 = vld [vmem:[%s5356_s30 + $0x7c] sm:$0xf] }
 0x1da   : > { %v3949_v9 = vpack.c.b16 %v3925_v4, %v3924_v27  ;;  %v3340_v35 = vrot.slane %v3338_v24, 5  ;;  %v2522_v4 = vrot.slane %v5275_v0, 5  ;;  %v3856_v24 = vrot.slane %v3854_v59, 4 }
 0x1db   : > { %v2353_v19 = vpop.f32.mrf.mxu0  ;;  %v2611_v12 = vpack.c.b16 %v2588_v20, %v2587_v48  ;;  %v3348_v20 = vrot.slane %v3346_v58, 5  ;;  %v3354_v40 = vrot.slane %v3352_v43, 5 }
 0x1dc   : > { %v1699_v8 = vpop.f32.mrf.mxu3  ;;  %5049 = vmatmul.msk.bf16.gmra.mxu2 %vm705_vm4, %v5215_v5  ;;  %v1064_v10 = vpop.f32.mrf.mxu1  ;;  %v5131_v5 = vld [vmem:[%s5356_s30 + $0x78] sm:$0xe] }
 0x1dd   : > { %v1736_v28 = vadd.f32 %v1699_v8, %v1449_v62  ;;  %v3336_v62 = vrot.slane %v3335_v53, 4  ;;  %v5147_v27 = vrot.slane %v5131_v5, 9  ;;  %v1065_v53 = vadd.f32 %v1064_v10, %v5804_v32  ;;  %v5276_v5 = vld [vmem:[%s5356_s30 + $0x80] sm:$0x1] }
 0x1df   : > { %v1415_v41 = vpop.f32.mrf.mxu2  ;;  %v6354_v30 = vadd.f32 %v2353_v19, %v1736_v28  ;;  %v3331_v19 = vsel %vm5368_vm3, %v3326_v56, %v6332_v23  ;;  %v3857_v28 = vrot.slane %v6337_v7, 5  ;;  %v3358_v23 = vrot.slane %v3356_v6, 4  ;;  %v5216_v56 = vld [vmem:[%s5356_s30 + $0x78] sm:$0xff] }
 0x1e0   : > { %v1450_v16 = vadd.f32 %v1415_v41, %v1063_v39  ;;  %v3341_v39 = vsel %vm5368_vm3, %v3336_v62, %v3340_v35  ;;  %v3345_v41 = vrot.slane %v3343_v61, 4  ;;  %v2524_v7 = vrot.slane %v2522_v4, 4  ;;  %v6375_v62 = vld [vmem:[%s5356_s30 + $0x8c] sm:$0x1] }
 0x1e1   : > { %5114 = vmatmul.msk.bf16.gmra.mxu3 %vm705_vm4, %v3551_v52  ;;  %v3528_v32 = vunpack.c.l.b16 %v3331_v19  ;;  %v3529_v10 = vunpack.c.l.b16 %v3341_v39  ;;  %v3855_v61 = vsel %vm5542_vm7, %v5147_v27, %v3854_v59  ;;  %v3362_v0 = vshll.u32 %v6375_v62, 16 }
 0x1e2   : > { %v3349_v58 = vor.u32 %v3348_v20, %v3345_v41  ;;  %v3926_v19 = vunpack.c.l.b16 %v3855_v61 }
 0x1e3   : > { %v2356_v11 = vpop.f32.mrf.mxu0  ;;  %v3552_v27 = vpack.c.b16 %v3529_v10, %v3528_v32  ;;  %v3364_v20 = vrot.slane %v3362_v0, 5  ;;  %v4906_v0 = vld [vmem:[%s5356_s30 + $0x84] sm:$0xe] }
 0x1e4   : > { %v1702_v8 = vpop.f32.mrf.mxu3  ;;  %v2679_v52 = vpop.f32.mrf.mxu1  ;;  %v3350_v41 = vrot.slane %v3349_v58, 4 }
 0x1e5   : > { %v1737_v50 = vadd.f32 %v1702_v8, %v1450_v16  ;;  %v2759_v55 = vadd.f32 %v2679_v52, %v5821_v46  ;;  %v4921_v46 = vrot.slane %v4905_v38, 9  ;;  %v3359_v38 = vor.u32 %v3358_v23, %v3354_v40 }
 0x1e6   : > { %5163 = vmatmul.msk.bf16.gmra.mxu0 %vm705_vm4, %v3949_v9  ;;  %v2525_v9 = vrot.slane %v5276_v5, 5  ;;  %v3861_v23 = vrot.slane %v6349_v22, 5 }
 0x1e7   : > { %v1417_v48 = vpop.f32.mrf.mxu2  ;;  %4937 = vmatmul.msk.bf16.gmra.mxu1 %vm705_vm4, %v2611_v12  ;;  %v6372_v8 = vadd.f32 %v2356_v11, %v1737_v50  ;;  %v3858_v12 = vsel %vm5542_vm7, %v3856_v24, %v3857_v28  ;;  %v2523_v11 = vsel %vm5542_vm7, %v4921_v46, %v2522_v4  ;;  %v3360_v46 = vrot.slane %v3359_v38, 4 }
 0x1e8   : > { %v1451_v16 = vadd.f32 %v1417_v48, %v1065_v53  ;;  %v2526_v52 = vsel %vm5542_vm7, %v2524_v7, %v2525_v9  ;;  %v3927_v28 = vunpack.c.l.b16 %v3858_v12  ;;  %v2589_v39 = vunpack.c.l.b16 %v2523_v11  ;;  %v5132_v48 = vld [vmem:[%s5356_s30 + $0x84] sm:$0xe]  ;;  %v5277_v11 = vld [vmem:[%s5356_s30 + $0x88] sm:$0xf] }
 0x1e9   : > { %v2590_v24 = vunpack.c.l.b16 %v2526_v52  ;;  %v5148_v7 = vrot.slane %v5132_v48, 9  ;;  %v3365_v58 = vsel %vm5368_vm3, %v3360_v46, %v3364_v20  ;;  %v2529_v52 = vrot.slane %v5277_v11, 5  ;;  %v5278_v46 = vld [vmem:[%s5356_s30 + $0x8c] sm:$0x1] }
 0x1ea   : > { %v4922_v48 = vrot.slane %v4906_v0, 9  ;;  %v2532_v20 = vrot.slane %v5278_v46, 5 }
 0x1eb   : > { %v2358_v35 = vpop.f32.mrf.mxu0  ;;  %v2612_v32 = vpack.c.b16 %v2590_v24, %v2589_v39 }
 0x1ec   : > { %v1704_v43 = vpop.f32.mrf.mxu3  ;;  %5050 = vmatmul.msk.bf16.gmra.mxu2 %vm705_vm4, %v5216_v56  ;;  %v2681_v6 = vpop.f32.mrf.mxu1  ;;  %v5088_v56 = vld [vmem:[%s5356_s30 + $0x90] sm:$0xf] }
 0x1ed   : > { %v1738_v59 = vadd.f32 %v1704_v43, %v1451_v16  ;;  %v2760_v50 = vadd.f32 %v2681_v6, %v5834_v42  ;;  %v3950_v16 = vpack.c.b16 %v3927_v28, %v3926_v19  ;;  %v6393_v42 = vld [vmem:[%s5356_s30 + $0x94] sm:$0xf]  ;;  %v3367_v10 = vshrl.u32 %v5088_v56, 16 }
 0x1ee   : > { %v3370_v61 = vshll.u32 %v5088_v56, 16  ;;  %v3863_v43 = vrot.slane %v3861_v23, 4  ;;  %v3864_v6 = vrot.slane %v6375_v62, 5  ;;  %v3862_v19 = vsel %vm5542_vm7, %v5148_v7, %v3861_v23  ;;  %v6420_v7 = vld [vmem:[%s5356_s30 + $0x98] sm:$0x1] }
 0x1ef   : > { %v2966_v53 = vpop.f32.mrf.mxu2  ;;  %v6395_v5 = vadd.f32 %v2358_v35, %v1738_v59  ;;  %v3380_v59 = vshrl.u32 %v6393_v42, 16 }
 0x1f0   : > { %v3046_v4 = vadd.f32 %v2966_v53, %v2759_v55  ;;  %v3355_v55 = vsel %vm5368_vm3, %v3350_v41, %v3354_v40  ;;  %v3376_v40 = vshll.u32 %v6393_v42, 16  ;;  %v3531_v53 = vunpack.c.l.b16 %v3365_v58  ;;  %v5217_v41 = vld [vmem:[%s5356_s30 + $0x84] sm:$0xff] }
 0x1f1   : > { %5115 = vmatmul.msk.bf16.gmra.mxu3 %vm705_vm4, %v3552_v27  ;;  %7264 = vst [vmem:[#allocation5_spill] sm:$0xff] %v6395_v5  ;;  %v3530_v27 = vunpack.c.l.b16 %v3355_v55  ;;  %v3372_v39 = vrot.slane %v3370_v61, 5  ;;  %v3865_v56 = vsel %vm5542_vm7, %v3863_v43, %v3864_v6  ;;  %v3382_v23 = vrot.slane %v3380_v59, 4 }
 0x1f3   : > { %v4018_v9 = vpop.f32.mrf.mxu0  ;;  %v3553_v55 = vpack.c.b16 %v3531_v53, %v3530_v27 }
 0x1f4   : > { %v3620_v12 = vpop.f32.mrf.mxu3  ;;  %v2684_v22 = vpop.f32.mrf.mxu1 }
 0x1f5   : > { %v3700_v35 = vadd.f32 %v3620_v12, %v3046_v4  ;;  %v2761_v38 = vadd.f32 %v2684_v22, %v5847_v15  ;;  %v3369_v15 = vrot.slane %v3367_v10, 4  ;;  %v2531_v4 = vrot.slane %v2529_v52, 4 }
 0x1f6   : > { %5164 = vmatmul.msk.bf16.gmra.mxu0 %vm705_vm4, %v3950_v16  ;;  %v6417_v16 = vrot.slane %v3376_v40, 5  ;;  %v2530_v12 = vsel %vm5542_vm7, %v4922_v48, %v2529_v52 }
 0x1f7   : > { %v6410_v62 = vadd.f32 %v4018_v9, %v3700_v35  ;;  %v2968_v28 = vpop.f32.mrf.mxu2  ;;  %4938 = vmatmul.msk.bf16.gmra.mxu1 %vm705_vm4, %v2612_v32  ;;  %v3928_v32 = vunpack.c.l.b16 %v3862_v19  ;;  %v2533_v22 = vsel %vm5542_vm7, %v2531_v4, %v2532_v20  ;;  %v3373_v58 = vor.u32 %v3372_v39, %v3369_v15  ;;  %v5091_v19 = vld [vmem:[%s5356_s30 + $0x9c] sm:$0xf] }
 0x1f8   : > { %v3047_v24 = vadd.f32 %v2968_v28, %v2760_v50  ;;  %v3929_v50 = vunpack.c.l.b16 %v3865_v56  ;;  %v3383_v11 = vor.u32 %v3382_v23, %v6417_v16  ;;  %v3386_v35 = vshll.u32 %v6420_v7, 16  ;;  %v6434_v28 = vld [vmem:[%s5356_s30 + $0xa0] sm:$0xf] }
 0x1f9   : > { %v2591_v59 = vunpack.c.l.b16 %v2530_v12  ;;  %v2592_v27 = vunpack.c.l.b16 %v2533_v22  ;;  %v3374_v15 = vrot.slane %v3373_v58, 4  ;;  %v3400_v48 = vshll.u32 %v6434_v28, 16  ;;  %v4907_v22 = vld [vmem:[%s5356_s30 + $0x90] sm:$0xe] }
 0x1fa   : > { %v3951_v53 = vpack.c.b16 %v3929_v50, %v3928_v32  ;;  %v3388_v39 = vrot.slane %v3386_v35, 5  ;;  %v3404_v4 = vshrl.u32 %v6434_v28, 16  ;;  %v3868_v56 = vrot.slane %v6393_v42, 5 }
 0x1fb   : > { %v4020_v9 = vpop.f32.mrf.mxu0  ;;  %v2613_v20 = vpack.c.b16 %v2592_v27, %v2591_v59  ;;  %v3871_v59 = vrot.slane %v6420_v7, 5 }
 0x1fc   : > { %v3622_v10 = vpop.f32.mrf.mxu3  ;;  %5051 = vmatmul.msk.bf16.gmra.mxu2 %vm705_vm4, %v5217_v41  ;;  %v2686_v61 = vpop.f32.mrf.mxu1  ;;  %v3394_v41 = vshll.u32 %v5091_v19, 16 }
 0x1fd   : > { %v3701_v43 = vadd.f32 %v3622_v10, %v3047_v24  ;;  %v2762_v6 = vadd.f32 %v2686_v61, %v5860_v13  ;;  %v3384_v13 = vrot.slane %v3383_v11, 4  ;;  %v3391_v24 = vshrl.u32 %v5091_v19, 16  ;;  %v5279_v10 = vld [vmem:[%s5356_s30 + $0x94] sm:$0xf] }
 0x1fe   : > { %v3379_v61 = vsel %vm5368_vm3, %v3374_v15, %v6417_v16  ;;  %v3396_v58 = vrot.slane %v3394_v41, 5  ;;  %v3406_v11 = vrot.slane %v3404_v4, 4  ;;  %v3870_v16 = vrot.slane %v3868_v56, 4  ;;  %v5218_v19 = vld [vmem:[%s5356_s30 + $0x90] sm:$0xff] }
 0x1ff   : > { %v6430_v0 = vadd.f32 %v4020_v9, %v3701_v43  ;;  %v2971_v40 = vpop.f32.mrf.mxu2  ;;  %v5133_v9 = vld [vmem:[%s5356_s30 + $0x90] sm:$0xe]  ;;  %v3389_v12 = vsel %vm5368_vm3, %v3384_v13, %v3388_v39  ;;  %v3393_v42 = vrot.slane %v3391_v24, 4  ;;  %v6450_v43 = vrot.slane %v3400_v48, 5  ;;  %v6459_v39 = vld [vmem:[%s5356_s30 + $0xa4] sm:$0x1] }
 0x200   : > { %v3048_v52 = vadd.f32 %v2971_v40, %v2761_v38  ;;  %v5149_v40 = vrot.slane %v5133_v9, 9  ;;  %v3532_v24 = vunpack.c.l.b16 %v3379_v61  ;;  %v3533_v41 = vunpack.c.l.b16 %v3389_v12 }
 0x201   : > { %5116 = vmatmul.msk.bf16.gmra.mxu3 %vm705_vm4, %v3553_v55  ;;  %v2536_v55 = vrot.slane %v5279_v10, 5  ;;  %v3397_v48 = vor.u32 %v3396_v58, %v3393_v42  ;;  %v3407_v4 = vor.u32 %v3406_v11, %v6450_v43  ;;  %v3872_v7 = vsel %vm5542_vm7, %v3870_v16, %v3871_v59 }
 0x202   : > { %v3554_v61 = vpack.c.b16 %v3533_v41, %v3532_v24 }
 0x203   : > { %v4023_v46 = vpop.f32.mrf.mxu0  ;;  %v2538_v15 = vrot.slane %v2536_v55, 4  ;;  %v3398_v42 = vrot.slane %v3397_v48, 4  ;;  %v3408_v58 = vrot.slane %v3407_v4, 4 }
 0x204   : > { %v3625_v23 = vpop.f32.mrf.mxu3  ;;  %v2689_v38 = vpop.f32.mrf.mxu1 }
 0x205   : > { %v3702_v32 = vadd.f32 %v3625_v23, %v3048_v52  ;;  %v2763_v50 = vadd.f32 %v2689_v38, %v5873_v57  ;;  %v4923_v52 = vrot.slane %v4907_v22, 9  ;;  %v3931_v22 = vunpack.c.l.b16 %v3872_v7 }
 0x206   : > { %5165 = vmatmul.msk.bf16.gmra.mxu0 %vm705_vm4, %v3951_v53  ;;  %v5280_v53 = vld [vmem:[%s5356_s30 + $0x98] sm:$0x1]  ;;  %v3878_v7 = vrot.slane %v6459_v39, 5 }
 0x207   : > { %v6452_v35 = vadd.f32 %v4023_v46, %v3702_v32  ;;  %v2973_v57 = vpop.f32.mrf.mxu2  ;;  %4939 = vmatmul.msk.bf16.gmra.mxu1 %vm705_vm4, %v2613_v20  ;;  %v2539_v13 = vrot.slane %v5280_v53, 5  ;;  %v3869_v20 = vsel %vm5542_vm7, %v5149_v40, %v3868_v56  ;;  %v2537_v9 = vsel %vm5542_vm7, %v4923_v52, %v2536_v55  ;;  %v5134_v55 = vld [vmem:[%s5356_s30 + $0x9c] sm:$0xe] }
 0x208   : > { %v3049_v27 = vadd.f32 %v2973_v57, %v2762_v6  ;;  %v3410_v6 = vshll.u32 %v6459_v39, 16  ;;  %v3930_v12 = vunpack.c.l.b16 %v3869_v20  ;;  %v2593_v40 = vunpack.c.l.b16 %v2537_v9  ;;  %v4908_v9 = vld [vmem:[%s5356_s30 + $0x9c] sm:$0xe] }
 0x209   : > { %v2540_v10 = vsel %vm5542_vm7, %v2538_v15, %v2539_v13  ;;  %v3875_v52 = vrot.slane %v6434_v28, 5  ;;  %v3403_v15 = vsel %vm5368_vm3, %v3398_v42, %v6450_v43  ;;  %v5150_v53 = vrot.slane %v5134_v55, 9  ;;  %v6483_v13 = vld [vmem:[%s5356_s30 + $0xac] sm:$0xf]  ;;  %v5282_v55 = vld [vmem:[%s5356_s30 + $0xa4] sm:$0x1] }
 0x20a   : > { %v2594_v16 = vunpack.c.l.b16 %v2540_v10  ;;  %v3412_v59 = vrot.slane %v3410_v6, 5  ;;  %v5281_v6 = vld [vmem:[%s5356_s30 + $0xa0] sm:$0xf]  ;;  %v3424_v10 = vshll.u32 %v6483_v13, 16 }
 0x20b   : > { %v4025_v46 = vpop.f32.mrf.mxu0  ;;  %v3877_v20 = vrot.slane %v3875_v52, 4  ;;  %v3876_v42 = vsel %vm5542_vm7, %v5150_v53, %v3875_v52 }
 0x20c   : > { %v3627_v23 = vpop.f32.mrf.mxu3  ;;  %5052 = vmatmul.msk.bf16.gmra.mxu2 %vm705_vm4, %v5218_v19  ;;  %v2691_v38 = vpop.f32.mrf.mxu1  ;;  %v2614_v41 = vpack.c.b16 %v2594_v16, %v2593_v40  ;;  %v5219_v40 = vld [vmem:[%s5356_s30 + $0x9c] sm:$0xff]  ;;  %v4924_v16 = vrot.slane %v4908_v9, 9 }
 0x20d   : > { %v3703_v32 = vadd.f32 %v3627_v23, %v3049_v27  ;;  %v2764_v56 = vadd.f32 %v2691_v38, %v5886_v54  ;;  %v5094_v27 = vld [vmem:[%s5356_s30 + $0xa8] sm:$0xf]  ;;  %v3952_v54 = vpack.c.b16 %v3931_v22, %v3930_v12  ;;  %v2543_v23 = vrot.slane %v5281_v6, 5 }
 0x20e   : > { %v3415_v48 = vshrl.u32 %v5094_v27, 16  ;;  %v3418_v28 = vshll.u32 %v5094_v27, 16  ;;  %v3879_v27 = vsel %vm5542_vm7, %v3877_v20, %v3878_v7 }
 0x20f   : > { %v6473_v11 = vadd.f32 %v4025_v46, %v3703_v32  ;;  %v2976_v57 = vpop.f32.mrf.mxu2  ;;  %v3428_v32 = vshrl.u32 %v6483_v13, 16 }
 0x210   : > { %v3050_v19 = vadd.f32 %v2976_v57, %v2763_v50  ;;  %v3413_v50 = vsel %vm5368_vm3, %v3408_v58, %v3412_v59  ;;  %v3420_v58 = vrot.slane %v3418_v28, 5  ;;  %v2545_v59 = vrot.slane %v2543_v23, 4 }
 0x211   : > { %5117 = vmatmul.msk.bf16.gmra.mxu3 %vm705_vm4, %v3554_v61  ;;  %v3534_v61 = vunpack.c.l.b16 %v3403_v15  ;;  %v3535_v12 = vunpack.c.l.b16 %v3413_v50  ;;  %v3430_v15 = vrot.slane %v3428_v32, 4 }
 0x213   : > { %v4028_v24 = vpop.f32.mrf.mxu0  ;;  %v3555_v50 = vpack.c.b16 %v3535_v12, %v3534_v61  ;;  %v5097_v12 = vld [vmem:[%s5356_s30 + $0xb4] sm:$0xf] }
 0x214   : > { %v3630_v4 = vpop.f32.mrf.mxu3  ;;  %v2694_v46 = vpop.f32.mrf.mxu1 }
 0x215   : > { %v3704_v43 = vadd.f32 %v3630_v4, %v3050_v19  ;;  %v2765_v38 = vadd.f32 %v2694_v46, %v5899_v33  ;;  %v3417_v33 = vrot.slane %v3415_v48, 4  ;;  %v2546_v19 = vrot.slane %v5282_v55, 5 }
 0x216   : > { %5166 = vmatmul.msk.bf16.gmra.mxu0 %vm705_vm4, %v3952_v54  ;;  %v6503_v54 = vrot.slane %v3424_v10, 5  ;;  %v3932_v4 = vunpack.c.l.b16 %v3876_v42  ;;  %v2544_v48 = vsel %vm5542_vm7, %v4924_v16, %v2543_v23  ;;  %v3442_v16 = vshll.u32 %v5097_v12, 16 }
 0x217   : > { %v6494_v22 = vadd.f32 %v4028_v24, %v3704_v43  ;;  %v2978_v39 = vpop.f32.mrf.mxu2  ;;  %4940 = vmatmul.msk.bf16.gmra.mxu1 %vm705_vm4, %v2614_v41  ;;  %v6506_v24 = vld [vmem:[%s5356_s30 + $0xb0] sm:$0x1]  ;;  %v2547_v28 = vsel %vm5542_vm7, %v2545_v59, %v2546_v19  ;;  %v3421_v46 = vor.u32 %v3420_v58, %v3417_v33  ;;  %v2595_v32 = vunpack.c.l.b16 %v2544_v48 }
 0x218   : > { %v3051_v57 = vadd.f32 %v2978_v39, %v2764_v56  ;;  %v3933_v56 = vunpack.c.l.b16 %v3879_v27  ;;  %v3431_v6 = vor.u32 %v3430_v15, %v6503_v54  ;;  %v3434_v43 = vshll.u32 %v6506_v24, 16  ;;  %v6520_v39 = vld [vmem:[%s5356_s30 + $0xb8] sm:$0xf] }
 0x219   : > { %v2596_v61 = vunpack.c.l.b16 %v2547_v28  ;;  %v3422_v42 = vrot.slane %v3421_v46, 4  ;;  %v3448_v59 = vshll.u32 %v6520_v39, 16  ;;  %v3452_v55 = vshrl.u32 %v6520_v39, 16  ;;  %v4909_v46 = vld [vmem:[%s5356_s30 + $0xa8] sm:$0xe] }
 0x21a   : > { %v3953_v33 = vpack.c.b16 %v3933_v56, %v3932_v4  ;;  %v3432_v58 = vrot.slane %v3431_v6, 4  ;;  %v3882_v15 = vrot.slane %v6483_v13, 5  ;;  %v5283_v4 = vld [vmem:[%s5356_s30 + $0xac] sm:$0xf] }
 0x21b   : > { %v4030_v41 = vpop.f32.mrf.mxu0  ;;  %v2615_v27 = vpack.c.b16 %v2596_v61, %v2595_v32  ;;  %v3450_v6 = vrot.slane %v3448_v59, 5  ;;  %v6541_v61 = vld [vmem:[%s5356_s30 + $0xbc] sm:$0x1] }
 0x21c   : > { %v3632_v52 = vpop.f32.mrf.mxu3  ;;  %5053 = vmatmul.msk.bf16.gmra.mxu2 %vm705_vm4, %v5219_v40  ;;  %v2696_v53 = vpop.f32.mrf.mxu1  ;;  %v3439_v40 = vshrl.u32 %v5097_v12, 16  ;;  %v3884_v32 = vrot.slane %v3882_v15, 4 }
 0x21d   : > { %v3705_v20 = vadd.f32 %v3632_v52, %v3051_v57  ;;  %v2766_v7 = vadd.f32 %v2696_v53, %v5912_v31  ;;  %v3436_v31 = vrot.slane %v3434_v43, 5  ;;  %v5135_v57 = vld [vmem:[%s5356_s30 + $0xa8] sm:$0xe]  ;;  %v2550_v52 = vrot.slane %v5283_v4, 5 }
 0x21e   : > { %v5151_v28 = vrot.slane %v5135_v57, 9  ;;  %v3441_v13 = vrot.slane %v3439_v40, 4  ;;  %v3454_v43 = vrot.slane %v3452_v55, 4 }
 0x21f   : > { %v6516_v9 = vadd.f32 %v4030_v41, %v3705_v20  ;;  %v2981_v10 = vpop.f32.mrf.mxu2  ;;  %v3437_v48 = vsel %vm5368_vm3, %v3432_v58, %v3436_v31  ;;  %v3444_v20 = vrot.slane %v3442_v16, 5  ;;  %v2552_v58 = vrot.slane %v2550_v52, 4  ;;  %v5284_v31 = vld [vmem:[%s5356_s30 + $0xb0] sm:$0x1] }
 0x220   : > { %v3052_v23 = vadd.f32 %v2981_v10, %v2765_v38  ;;  %v3537_v40 = vunpack.c.l.b16 %v3437_v48  ;;  %v3883_v16 = vsel %vm5542_vm7, %v5151_v28, %v3882_v15  ;;  %v3455_v55 = vor.u32 %v3454_v43, %v3450_v6 }
 0x221   : > { %5118 = vmatmul.msk.bf16.gmra.mxu3 %vm705_vm4, %v3555_v50  ;;  %v3427_v50 = vsel %vm5368_vm3, %v3422_v42, %v6503_v54  ;;  %v4925_v42 = vrot.slane %v4909_v46, 9  ;;  %v3445_v59 = vor.u32 %v3444_v20, %v3441_v13 }
 0x222   : > { %v3536_v57 = vunpack.c.l.b16 %v3427_v50  ;;  %v3456_v13 = vrot.slane %v3455_v55, 4 }
 0x223   : > { %v4033_v19 = vpop.f32.mrf.mxu0  ;;  %v3446_v46 = vrot.slane %v3445_v59, 4 }
 0x224   : > { %v3635_v38 = vpop.f32.mrf.mxu3  ;;  %v2699_v41 = vpop.f32.mrf.mxu1  ;;  %v3556_v4 = vpack.c.b16 %v3537_v40, %v3536_v57  ;;  %v5136_v57 = vld [vmem:[%s5356_s30 + $0xb4] sm:$0xe]  ;;  %v3889_v40 = vrot.slane %v6520_v39, 5 }
 0x225   : > { %v3706_v56 = vadd.f32 %v3635_v38, %v3052_v23  ;;  %v2767_v53 = vadd.f32 %v2699_v41, %v5925_v1  ;;  %v3885_v1 = vrot.slane %v6506_v24, 5  ;;  %v5220_v23 = vld [vmem:[%s5356_s30 + $0xa8] sm:$0xff]  ;;  %v2551_v41 = vsel %vm5542_vm7, %v4925_v42, %v2550_v52 }
 0x226   : > { %5167 = vmatmul.msk.bf16.gmra.mxu0 %vm705_vm4, %v3953_v33  ;;  %v2553_v33 = vrot.slane %v5284_v31, 5 }
 0x227   : > { %v6536_v54 = vadd.f32 %v4033_v19, %v3706_v56  ;;  %v2983_v10 = vpop.f32.mrf.mxu2  ;;  %4941 = vmatmul.msk.bf16.gmra.mxu1 %vm705_vm4, %v2615_v27  ;;  %v3458_v19 = vshll.u32 %v6541_v61, 16  ;;  %v3886_v24 = vsel %vm5542_vm7, %v3884_v32, %v3885_v1  ;;  %v3934_v56 = vunpack.c.l.b16 %v3883_v16 }
 0x228   : > { %v3053_v12 = vadd.f32 %v2983_v10, %v2766_v7  ;;  %v2554_v50 = vsel %vm5542_vm7, %v2552_v58, %v2553_v33  ;;  %v3935_v28 = vunpack.c.l.b16 %v3886_v24  ;;  %v2597_v32 = vunpack.c.l.b16 %v2551_v41  ;;  %v6565_v58 = vld [vmem:[%s5356_s30 + $0xc4] sm:$0xf] }
 0x229   : > { %v3460_v20 = vrot.slane %v3458_v19, 5  ;;  %v2598_v1 = vunpack.c.l.b16 %v2554_v50  ;;  %v5285_v19 = vld [vmem:[%s5356_s30 + $0xb8] sm:$0xf]  ;;  %v3472_v41 = vshll.u32 %v6565_v58, 16  ;;  %v3476_v50 = vshrl.u32 %v6565_v58, 16 }
 0x22b   : > { %v4035_v27 = vpop.f32.mrf.mxu0  ;;  %v3461_v42 = vsel %vm5368_vm3, %v3456_v13, %v3460_v20  ;;  %v2616_v33 = vpack.c.b16 %v2598_v1, %v2597_v32  ;;  %v3891_v13 = vrot.slane %v3889_v40, 4  ;;  %v5221_v1 = vld [vmem:[%s5356_s30 + $0xb4] sm:$0xff] }
 0x22c   : > { %v3637_v38 = vpop.f32.mrf.mxu3  ;;  %5054 = vmatmul.msk.bf16.gmra.mxu2 %vm705_vm4, %v5220_v23  ;;  %v2701_v7 = vpop.f32.mrf.mxu1  ;;  %v5100_v23 = vld [vmem:[%s5356_s30 + $0xc0] sm:$0xf]  ;;  %v3539_v39 = vunpack.c.l.b16 %v3461_v42  ;;  %v3478_v42 = vrot.slane %v3476_v50, 4 }
 0x22d   : > { %v3707_v15 = vadd.f32 %v3637_v38, %v3053_v12  ;;  %v2768_v48 = vadd.f32 %v2701_v7, %v5939_v25  ;;  %v3954_v12 = vpack.c.b16 %v3935_v28, %v3934_v56  ;;  %v3451_v25 = vsel %vm5368_vm3, %v3446_v46, %v3450_v6  ;;  %v7265_v38 = vld [vmem:[#allocation2_spill] sm:$0xff]  ;;  %v4910_v6 = vld [vmem:[%s5356_s30 + $0xb4] sm:$0xe] }
 0x22e   : > { %v3463_v16 = vshrl.u32 %v5100_v23, 16  ;;  %v3892_v56 = vrot.slane %v6541_v61, 5 }
 0x22f   : > { %v6556_v43 = vadd.f32 %v4035_v27, %v3707_v15  ;;  %v2986_v10 = vpop.f32.mrf.mxu2  ;;  %v2557_v27 = vrot.slane %v5285_v19, 5  ;;  %v3538_v15 = vunpack.c.l.b16 %v3451_v25  ;;  %v3474_v25 = vrot.slane %v3472_v41, 5 }
 0x230   : > { %v3054_v52 = vadd.f32 %v2986_v10, %v2767_v53  ;;  %v3466_v53 = vshll.u32 %v5100_v23, 16  ;;  %v3465_v20 = vrot.slane %v3463_v16, 4 }
 0x231   : > { %5119 = vmatmul.msk.bf16.gmra.mxu3 %vm705_vm4, %v3556_v4  ;;  %v5152_v4 = vrot.slane %v5136_v57, 9  ;;  %v2559_v23 = vrot.slane %v2557_v27, 4  ;;  %v6582_v57 = vld [vmem:[%s5356_s30 + $0xc8] sm:$0x1] }
 0x232   : > { %v3468_v10 = vrot.slane %v3466_v53, 5  ;;  %v3482_v41 = vshll.u32 %v6582_v57, 16 }
 0x233   : > { %v4038_v31 = vpop.f32.mrf.mxu0  ;;  %v3890_v61 = vsel %vm5542_vm7, %v5152_v4, %v3889_v40  ;;  %v3479_v40 = vor.u32 %v3478_v42, %v3474_v25 }
 0x234   : > { %v3640_v59 = vpop.f32.mrf.mxu3  ;;  %v2704_v55 = vpop.f32.mrf.mxu1  ;;  %v3936_v50 = vunpack.c.l.b16 %v3890_v61  ;;  %v5287_v61 = vld [vmem:[%s5356_s30 + $0xc4] sm:$0xf] }
 0x235   : > { %v3708_v24 = vadd.f32 %v3640_v59, %v3054_v52  ;;  %v2769_v7 = vadd.f32 %v2704_v55, %v7265_v38  ;;  %v4926_v52 = vrot.slane %v4910_v6, 9  ;;  %v5286_v59 = vld [vmem:[%s5356_s30 + $0xbc] sm:$0x1] }
 0x236   : > { %5168 = vmatmul.msk.bf16.gmra.mxu0 %vm705_vm4, %v3954_v12  ;;  %v2560_v12 = vrot.slane %v5286_v59, 5  ;;  %v5103_v59 = vld [vmem:[%s5356_s30 + $0xcc] sm:$0xf] }
 0x237   : > { %v6576_v28 = vadd.f32 %v4038_v31, %v3708_v24  ;;  %v2988_v46 = vpop.f32.mrf.mxu2  ;;  %4942 = vmatmul.msk.bf16.gmra.mxu1 %vm705_vm4, %v2616_v33  ;;  %v3893_v31 = vsel %vm5542_vm7, %v3891_v13, %v3892_v56  ;;  %v2558_v53 = vsel %vm5542_vm7, %v4926_v52, %v2557_v27  ;;  %v3469_v24 = vor.u32 %v3468_v10, %v3465_v20 }
 0x238   : > { %v3055_v32 = vadd.f32 %v2988_v46, %v2768_v48  ;;  %v3557_v48 = vpack.c.b16 %v3539_v39, %v3538_v15  ;;  %v2561_v19 = vsel %vm5542_vm7, %v2559_v23, %v2560_v12  ;;  %v3937_v4 = vunpack.c.l.b16 %v3893_v31  ;;  %v6602_v12 = vld [vmem:[%s5356_s30 + $0xd0] sm:$0xf] }
 0x239   : > { %v2599_v56 = vunpack.c.l.b16 %v2558_v53  ;;  %v2600_v27 = vunpack.c.l.b16 %v2561_v19  ;;  %v3470_v13 = vrot.slane %v3469_v24, 4  ;;  %v3480_v20 = vrot.slane %v3479_v40, 4 }
 0x23a   : > { %v3484_v10 = vrot.slane %v3482_v41, 5  ;;  %v3896_v23 = vrot.slane %v6565_v58, 5  ;;  %v2564_v31 = vrot.slane %v5287_v61, 5  ;;  %v4911_v58 = vld [vmem:[%s5356_s30 + $0xc0] sm:$0xe]  ;;  %v3487_v19 = vshrl.u32 %v5103_v59, 16 }
 0x23b   : > { %v4040_v55 = vpop.f32.mrf.mxu0  ;;  %v2617_v52 = vpack.c.b16 %v2600_v27, %v2599_v56  ;;  %v3490_v24 = vshll.u32 %v5103_v59, 16  ;;  %v4927_v56 = vrot.slane %v4911_v58, 9  ;;  %v7266_v58 = vld [vmem:[#allocation3_spill] sm:$0xff] }
 0x23c   : > { %v3642_v33 = vpop.f32.mrf.mxu3  ;;  %5055 = vmatmul.msk.bf16.gmra.mxu2 %vm705_vm4, %v5221_v1  ;;  %v2706_v16 = vpop.f32.mrf.mxu1  ;;  %v2566_v27 = vrot.slane %v2564_v31, 4 }
 0x23d   : > { %v3709_v38 = vadd.f32 %v3642_v33, %v3055_v32  ;;  %v2770_v6 = vadd.f32 %v2706_v16, %v5986_v47  ;;  %v3955_v47 = vpack.c.b16 %v3937_v4, %v3936_v50  ;;  %v5137_v32 = vld [vmem:[%s5356_s30 + $0xc0] sm:$0xe]  ;;  %v3485_v16 = vsel %vm5368_vm3, %v3480_v20, %v3484_v10 }
 0x23e   : > { %v5153_v53 = vrot.slane %v5137_v32, 9  ;;  %v3899_v50 = vrot.slane %v6582_v57, 5  ;;  %v3541_v10 = vunpack.c.l.b16 %v3485_v16  ;;  %v3489_v32 = vrot.slane %v3487_v19, 4 }
 0x23f   : > { %v6595_v15 = vadd.f32 %v4040_v55, %v3709_v38  ;;  %v2991_v39 = vpop.f32.mrf.mxu2  ;;  %v3496_v38 = vshll.u32 %v6602_v12, 16 }
 0x240   : > { %v3056_v46 = vadd.f32 %v2991_v39, %v2769_v7  ;;  %v3475_v7 = vsel %vm5368_vm3, %v3470_v13, %v3474_v25  ;;  %v3500_v25 = vshrl.u32 %v6602_v12, 16  ;;  %v5222_v39 = vld [vmem:[%s5356_s30 + $0xc0] sm:$0xff] }
 0x241   : > { %5120 = vmatmul.msk.bf16.gmra.mxu3 %vm705_vm4, %v3557_v48  ;;  %v3540_v20 = vunpack.c.l.b16 %v3475_v7  ;;  %v3498_v59 = vrot.slane %v3496_v38, 5  ;;  %v2565_v7 = vsel %vm5542_vm7, %v4927_v56, %v2564_v31 }
 0x243   : > { %v4043_v1 = vpop.f32.mrf.mxu0  ;;  %v3558_v16 = vpack.c.b16 %v3541_v10, %v3540_v20  ;;  %v3903_v10 = vrot.slane %v6602_v12, 5 }
 0x244   : > { %v3645_v42 = vpop.f32.mrf.mxu3  ;;  %v2709_v55 = vpop.f32.mrf.mxu1 }
 0x245   : > { %v3710_v33 = vadd.f32 %v3645_v42, %v3056_v46  ;;  %v2771_v48 = vadd.f32 %v2709_v55, %v5997_v51  ;;  %v3898_v51 = vrot.slane %v3896_v23, 4  ;;  %v5288_v46 = vld [vmem:[%s5356_s30 + $0xc8] sm:$0x1]  ;;  %v3502_v42 = vrot.slane %v3500_v25, 4  ;;  %v5105_v55 = vld [vmem:[%s5356_s30 + $0xd4] sm:$0x1] }
 0x246   : > { %5169 = vmatmul.msk.bf16.gmra.mxu0 %vm705_vm4, %v3955_v47  ;;  %v2567_v13 = vrot.slane %v5288_v46, 5  ;;  %v3897_v47 = vsel %vm5542_vm7, %v5153_v53, %v3896_v23 }
 0x247   : > { %v6614_v40 = vadd.f32 %v4043_v1, %v3710_v33  ;;  %v2993_v41 = vpop.f32.mrf.mxu2  ;;  %4943 = vmatmul.msk.bf16.gmra.mxu1 %vm705_vm4, %v2617_v52  ;;  %v3492_v1 = vrot.slane %v3490_v24, 5  ;;  %v3900_v57 = vsel %vm5542_vm7, %v3898_v51, %v3899_v50  ;;  %v3938_v53 = vunpack.c.l.b16 %v3897_v47 }
 0x248   : > { %v3057_v4 = vadd.f32 %v2993_v41, %v2770_v6  ;;  %v2568_v33 = vsel %vm5542_vm7, %v2566_v27, %v2567_v13  ;;  %v3939_v24 = vunpack.c.l.b16 %v3900_v57  ;;  %v3503_v25 = vor.u32 %v3502_v42, %v3498_v59 }
 0x249   : > { %v3493_v38 = vor.u32 %v3492_v1, %v3489_v32  ;;  %v3506_v41 = vshll.u32 %v5105_v55, 16  ;;  %v2602_v46 = vunpack.c.l.b16 %v2568_v33  ;;  %v5138_v1 = vld [vmem:[%s5356_s30 + $0xcc] sm:$0xe]  ;;  %v3906_v33 = vrot.slane %v5105_v55, 5 }
 0x24a   : > { %v3956_v31 = vpack.c.b16 %v3939_v24, %v3938_v53  ;;  %v5154_v12 = vrot.slane %v5138_v1, 9 }
 0x24b   : > { %v4045_v52 = vpop.f32.mrf.mxu0  ;;  %v3494_v56 = vrot.slane %v3493_v38, 4  ;;  %v3508_v27 = vrot.slane %v3506_v41, 5 }
 0x24c   : > { %v3647_v6 = vpop.f32.mrf.mxu3  ;;  %5056 = vmatmul.msk.bf16.gmra.mxu2 %vm705_vm4, %v5222_v39  ;;  %v2711_v61 = vpop.f32.mrf.mxu1  ;;  %v2601_v39 = vunpack.c.l.b16 %v2565_v7  ;;  %v3905_v7 = vrot.slane %v3903_v10, 4 }
 0x24d   : > { %v3711_v23 = vadd.f32 %v3647_v6, %v3057_v4  ;;  %v2772_v19 = vadd.f32 %v2711_v61, %v7266_v58  ;;  %v3504_v4 = vrot.slane %v3503_v25, 4  ;;  %v3904_v58 = vsel %vm5542_vm7, %v5154_v12, %v3903_v10 }
 0x24e   : > { %v2618_v20 = vpack.c.b16 %v2602_v46, %v2601_v39  ;;  %v3907_v36 = vsel %vm5542_vm7, %v3905_v7, %v3906_v33  ;;  %v3940_v55 = vunpack.c.l.b16 %v3904_v58 }
 0x24f   : > { %v6631_v51 = vadd.f32 %v4045_v52, %v3711_v23  ;;  %v2996_v50 = vpop.f32.mrf.mxu2  ;;  %v3509_v57 = vsel %vm5368_vm3, %v3504_v4, %v3508_v27 }
 0x250   : > { %v3058_v5 = vadd.f32 %v2996_v50, %v2771_v48  ;;  %v3499_v48 = vsel %vm5368_vm3, %v3494_v56, %v3498_v59 }
 0x251   : > { %5121 = vmatmul.msk.bf16.gmra.mxu3 %vm705_vm4, %v3558_v16  ;;  %v3542_v16 = vunpack.c.l.b16 %v3499_v48 }
 0x253   : > { %v4048_v13 = vpop.f32.mrf.mxu0 }
 0x254   : > { %v3650_v47 = vpop.f32.mrf.mxu3  ;;  %v2714_v32 = vpop.f32.mrf.mxu1 }
 0x255   : > { %v3712_v42 = vadd.f32 %v3650_v47, %v3058_v5  ;;  %v2773_v52 = vadd.f32 %v2714_v32, %v6033_v29  ;;  %v5223_v5 = vld [vmem:[%s5356_s30 + $0xcc] sm:$0xff]  ;;  %v3543_v29 = vunpack.c.l.b16 %v3509_v57 }
 0x256   : > { %5170 = vmatmul.msk.bf16.gmra.mxu0 %vm705_vm4, %v3956_v31 }
 0x257   : > { %v6642_v6 = vadd.f32 %v4048_v13, %v3712_v42  ;;  %v2998_v61 = vpop.f32.mrf.mxu2  ;;  %4944 = vmatmul.msk.bf16.gmra.mxu1 %vm705_vm4, %v2618_v20  ;;  %v3559_v25 = vpack.c.b16 %v3543_v29, %v3542_v16 }
 0x258   : > { %v3059_v23 = vadd.f32 %v2998_v61, %v2772_v19  ;;  %v3941_v19 = vunpack.c.l.b16 %v3907_v36 }
 0x25a   : > { %v3957_v31 = vpack.c.b16 %v3941_v19, %v3940_v55 }
 0x25b   : > { %v4050_v53 = vpop.f32.mrf.mxu0 }
 0x25c   : > { %v3652_v59 = vpop.f32.mrf.mxu3  ;;  %5057 = vmatmul.msk.bf16.gmra.mxu2 %vm705_vm4, %v5223_v5  ;;  %v2716_v24 = vpop.f32.mrf.mxu1 }
 0x25d   : > { %v3713_v38 = vadd.f32 %v3652_v59, %v3059_v23  ;;  %v2774_v41 = vadd.f32 %v2716_v24, %v6057_v37 }
 0x25f   : > { %v6652_v50 = vadd.f32 %v4050_v53, %v3713_v38  ;;  %v3001_v39 = vpop.f32.mrf.mxu2 }
 0x260   : > { %v3060_v46 = vadd.f32 %v3001_v39, %v2773_v52 }
 0x261   : > { %5122 = vmatmul.msk.bf16.gmra.mxu3 %vm705_vm4, %v3559_v25 }
 0x263   : > { %v4053_v56 = vpop.f32.mrf.mxu0 }
 0x264   : > { %v3655_v18 = vpop.f32.mrf.mxu3  ;;  %v2719_v4 = vpop.f32.mrf.mxu1 }
 0x265   : > { %v3714_v27 = vadd.f32 %v3655_v18, %v3060_v46  ;;  %v2775_v13 = vadd.f32 %v2719_v4, %v6076_v34 }
 0x266   : > { %5171 = vmatmul.msk.bf16.gmra.mxu0 %vm705_vm4, %v3957_v31 }
 0x267   : > { %v6657_v20 = vadd.f32 %v4053_v56, %v3714_v27  ;;  %v3003_v37 = vpop.f32.mrf.mxu2 }
 0x268   : > { %v3061_v10 = vadd.f32 %v3003_v37, %v2774_v41 }
 0x26b   : > { %v4055_v47 = vpop.f32.mrf.mxu0 }
 0x26c   : > { %v3657_v32 = vpop.f32.mrf.mxu3  ;;  %v2721_v1 = vpop.f32.mrf.mxu1 }
 0x26d   : > { %v3715_v42 = vadd.f32 %v3657_v32, %v3061_v10  ;;  %v2776_v52 = vadd.f32 %v2721_v1, %v6100_v3 }
 0x26f   : > { %v6660_v48 = vadd.f32 %v4055_v47, %v3715_v42  ;;  %v3006_v57 = vpop.f32.mrf.mxu2  ;;  %v6678_v47 = vld [vmem:[%s7254_s2] ss:$0 sm:$0xff] }
 0x270   : > { %v3062_v61 = vadd.f32 %v3006_v57, %v2775_v13  ;;  %v6684_v42 = vadd.f32 %v6678_v47, %v6430_v0  ;;  %v6688_v57 = vadd.f32 %v6678_v47, %v6410_v62  ;;  %v6702_v0 = vadd.f32 %v6678_v47, %v6473_v11 }
 0x272   : > { %v4167_v62 = vsel %vm705_vm4, %v6684_v42, 0.0 }
 0x273   : > { %v4058_v12 = vpop.f32.mrf.mxu0 }
 0x274   : > { %v3660_v7 = vpop.f32.mrf.mxu3  ;;  %v2724_v33 = vpop.f32.mrf.mxu1 }
 0x275   : > { %v3716_v34 = vadd.f32 %v3660_v7, %v3062_v61  ;;  %v2777_v23 = vadd.f32 %v2724_v33, %v6119_v2  ;;  %v6692_v61 = vadd.f32 %v6678_v47, %v6452_v35  ;;  %v4236_v33 = vmul.f32 %v6684_v42, %v6684_v42 }
 0x277   : > { %v6663_v5 = vadd.f32 %v4058_v12, %v3716_v34  ;;  %v3008_v16 = vpop.f32.mrf.mxu2  ;;  %v4235_v34 = vmul.f32 %v6688_v57, %v6688_v57  ;;  %v4237_v35 = vmul.f32 %v6692_v61, %v6692_v61 }
 0x278   : > { %v3063_v29 = vadd.f32 %v3008_v16, %v2776_v52 }
 0x27b   : > { %v4060_v53 = vpop.f32.mrf.mxu0 }
 0x27c   : > { %v3662_v58 = vpop.f32.mrf.mxu3  ;;  %v2726_v36 = vpop.f32.mrf.mxu1 }
 0x27d   : > { %v3717_v59 = vadd.f32 %v3662_v58, %v3063_v29  ;;  %v2778_v3 = vadd.f32 %v2726_v36, %v6143_v26  ;;  %v4166_v29 = vsel %vm705_vm4, %v6688_v57, 0.0  ;;  %v4268_v58 = vsel %vm705_vm4, %v4236_v33, 0.0 }
 0x27e   : > { %v4169_v36 = vsel %vm705_vm4, %v6692_v61, 0.0 }
 0x27f   : > { %v6666_v24 = vadd.f32 %v4060_v53, %v3717_v59  ;;  %v3011_v38 = vpop.f32.mrf.mxu2  ;;  %v4238_v59 = vmul.f32 %v6702_v0, %v6702_v0 }
 0x280   : > { %v3064_v25 = vadd.f32 %v3011_v38, %v2777_v23  ;;  %v6712_v23 = vadd.f32 %v6678_v47, %v6494_v22  ;;  %v6729_v22 = vadd.f32 %v6678_v47, %v6516_v9  ;;  %v4168_v38 = vadd.f32 %v4167_v62, %v4166_v29 }
 0x282   : > { %v4170_v9 = vadd.f32 %v4169_v36, %v4168_v38 }
 0x283   : > { %v4063_v41 = vpop.f32.mrf.mxu0 }
 0x284   : > { %v3665_v55 = vpop.f32.mrf.mxu3  ;;  %v2729_v19 = vpop.f32.mrf.mxu1 }
 0x285   : > { %v3718_v39 = vadd.f32 %v3665_v55, %v3064_v25  ;;  %v2779_v2 = vadd.f32 %v2729_v19, %v6162_v60  ;;  %v4270_v25 = vsel %vm705_vm4, %v4237_v35, 0.0  ;;  %v4239_v55 = vmul.f32 %v6712_v23, %v6712_v23 }
 0x286   : > { %v6739_v19 = vadd.f32 %v6678_v47, %v6536_v54 }
 0x287   : > { %v6669_v46 = vadd.f32 %v4063_v41, %v3718_v39  ;;  %v3013_v31 = vpop.f32.mrf.mxu2  ;;  %v4171_v41 = vsel %vm705_vm4, %v6702_v0, 0.0  ;;  %v4274_v54 = vsel %vm705_vm4, %v4239_v55, 0.0 }
 0x288   : > { %v3065_v56 = vadd.f32 %v3013_v31, %v2778_v3  ;;  %v4267_v3 = vsel %vm705_vm4, %v4235_v34, 0.0  ;;  %v4272_v31 = vsel %vm705_vm4, %v4238_v59, 0.0  ;;  %v4177_v29 = vsel %vm705_vm4, %v6739_v19, 0.0 }
 0x28b   : > { %v4065_v18 = vpop.f32.mrf.mxu0 }
 0x28c   : > { %v3667_v4 = vpop.f32.mrf.mxu3  ;;  %v6671_v27 = vpop.f32.mrf.mxu1 }
 0x28d   : > { %v3719_v13 = vadd.f32 %v3667_v4, %v3065_v56  ;;  %v4173_v56 = vsel %vm705_vm4, %v6712_v23, 0.0  ;;  %v6750_v4 = vadd.f32 %v6678_v47, %v6556_v43 }
 0x28f   : > { %v6673_v26 = vadd.f32 %v4065_v18, %v3719_v13  ;;  %v3016_v37 = vpop.f32.mrf.mxu2  ;;  %v4240_v18 = vmul.f32 %v6729_v22, %v6729_v22  ;;  %v4179_v38 = vsel %vm705_vm4, %v6750_v4, 0.0 }
 0x290   : > { %v3066_v10 = vadd.f32 %v3016_v37, %v2779_v2  ;;  %v4269_v2 = vadd.f32 %v4268_v58, %v4267_v3  ;;  %v4172_v37 = vadd.f32 %v4171_v41, %v4170_v9  ;;  %v4242_v58 = vmul.f32 %v6750_v4, %v6750_v4 }
 0x291   : > { %v4276_v35 = vsel %vm705_vm4, %v4240_v18, 0.0  ;;  %v6783_v41 = vadd.f32 %v6678_v47, %v6614_v40  ;;  %v6792_v18 = vadd.f32 %v6678_v47, %v6631_v51 }
 0x292   : > { %v4271_v13 = vadd.f32 %v4270_v25, %v4269_v2  ;;  %v4174_v34 = vadd.f32 %v4173_v56, %v4172_v37 }
 0x293   : > { %v4068_v32 = vpop.f32.mrf.mxu0 }
 0x294   : > { %v3670_v60 = vpop.f32.mrf.mxu3  ;;  %v6680_v1 = vpop.f32.mrf.mxu1  ;;  %v4273_v33 = vadd.f32 %v4272_v31, %v4271_v13 }
 0x295   : > { %v3720_v52 = vadd.f32 %v3670_v60, %v3066_v10  ;;  %v4175_v10 = vsel %vm705_vm4, %v6729_v22, 0.0  ;;  %v6759_v60 = vadd.f32 %v6678_v47, %v6576_v28  ;;  %v6774_v28 = vadd.f32 %v6678_v47, %v6595_v15 }
 0x296   : > { %v4275_v36 = vadd.f32 %v4274_v54, %v4273_v33  ;;  %v4176_v59 = vadd.f32 %v4175_v10, %v4174_v34  ;;  %v4280_v15 = vsel %vm705_vm4, %v4242_v58, 0.0  ;;  %v4245_v10 = vmul.f32 %v6783_v41, %v6783_v41 }
 0x297   : > { %v6694_v12 = vadd.f32 %v4068_v32, %v3720_v52  ;;  %v6696_v7 = vpop.f32.mrf.mxu2  ;;  %v4241_v32 = vmul.f32 %v6739_v19, %v6739_v19  ;;  %v4243_v25 = vmul.f32 %v6759_v60, %v6759_v60  ;;  %v4181_v31 = vsel %vm705_vm4, %v6759_v60, 0.0 }
 0x298   : > { %v4277_v2 = vadd.f32 %v4276_v35, %v4275_v36  ;;  %v4178_v9 = vadd.f32 %v4177_v29, %v4176_v59  ;;  %v4244_v56 = vmul.f32 %v6774_v28, %v6774_v28  ;;  %v4183_v54 = vsel %vm705_vm4, %v6774_v28, 0.0 }
 0x299   : > { %v4278_v3 = vsel %vm705_vm4, %v4241_v32, 0.0  ;;  %v4282_v40 = vsel %vm705_vm4, %v4243_v25, 0.0  ;;  %v6801_v32 = vadd.f32 %v6678_v47, %v6642_v6  ;;  %v4185_v36 = vsel %vm705_vm4, %v6783_v41, 0.0 }
 0x29a   : > { %v4279_v13 = vadd.f32 %v4278_v3, %v4277_v2  ;;  %v4180_v37 = vadd.f32 %v4179_v38, %v4178_v9  ;;  %v4284_v58 = vsel %vm705_vm4, %v4244_v56, 0.0  ;;  %v4246_v59 = vmul.f32 %v6792_v18, %v6792_v18 }
 0x29b   : > { %v6714_v16 = vpop.f32.mrf.mxu0  ;;  %v6812_v3 = vadd.f32 %v6678_v47, %v6652_v50  ;;  %v4286_v25 = vsel %vm705_vm4, %v4245_v10, 0.0  ;;  %v4187_v2 = vsel %vm705_vm4, %v6792_v18, 0.0  ;;  %v4247_v9 = vmul.f32 %v6801_v32, %v6801_v32 }
 0x29c   : > { %v6718_v11 = vpop.f32.mrf.mxu3  ;;  %v6720_v53 = vpop.f32.mrf.mxu1  ;;  %v4281_v34 = vadd.f32 %v4280_v15, %v4279_v13  ;;  %v4182_v35 = vadd.f32 %v4181_v31, %v4180_v37  ;;  %v6821_v15 = vadd.f32 %v6678_v47, %v6657_v20  ;;  %v2780_v50 = vadd.f32 %v6671_v27, %v6186_v14 }
 0x29d   : > { %v4288_v37 = vsel %vm705_vm4, %v4246_v59, 0.0  ;;  %v6832_v10 = vadd.f32 %v6678_v47, %v6660_v48  ;;  %v4290_v14 = vsel %vm705_vm4, %v4247_v9, 0.0  ;;  %v4191_v27 = vsel %vm705_vm4, %v6812_v3, 0.0 }
 0x29e   : > { %v4283_v6 = vadd.f32 %v4282_v40, %v4281_v34  ;;  %v4184_v38 = vadd.f32 %v4183_v54, %v4182_v35  ;;  %v4189_v40 = vsel %vm705_vm4, %v6801_v32, 0.0  ;;  %v4248_v54 = vmul.f32 %v6812_v3, %v6812_v3 }
 0x29f   : > { %v6741_v39 = vpop.f32.mrf.mxu2  ;;  %v3067_v35 = vadd.f32 %v6696_v7, %v2780_v50  ;;  %v2782_v9 = vadd.f32 %v6720_v53, %v6229_v49  ;;  %v6854_v50 = vadd.f32 %v6678_v47, %v6666_v24  ;;  %v4195_v49 = vsel %vm705_vm4, %v6832_v10, 0.0 }
 0x2a0   : > { %v4285_v56 = vadd.f32 %v4284_v58, %v4283_v6  ;;  %v4186_v13 = vadd.f32 %v4185_v36, %v4184_v38  ;;  %v2781_v58 = vadd.f32 %v6680_v1, %v6205_v21  ;;  %v4249_v36 = vmul.f32 %v6821_v15, %v6821_v15 }
 0x2a1   : > { %v4292_v7 = vsel %vm705_vm4, %v4248_v54, 0.0  ;;  %v4250_v21 = vmul.f32 %v6832_v10, %v6832_v10  ;;  %v6848_v1 = vadd.f32 %v6678_v47, %v6663_v5  ;;  %v6866_v24 = vadd.f32 %v6678_v47, %v6669_v46 }
 0x2a2   : > { %v4287_v20 = vadd.f32 %v4286_v25, %v4285_v56  ;;  %v4188_v34 = vadd.f32 %v4187_v2, %v4186_v13  ;;  %v3068_v48 = vadd.f32 %v6741_v39, %v2781_v58  ;;  %v3721_v39 = vadd.f32 %v6718_v11, %v3067_v35  ;;  %v7267_v58 = vld [vmem:[#allocation4_spill] sm:$0xff] }
 0x2a3   : > { %v6761_v52 = vpop.f32.mrf.mxu0  ;;  %v4296_v53 = vsel %vm705_vm4, %v4250_v21, 0.0  ;;  %v4251_v35 = vmul.f32 %v6848_v1, %v6848_v1  ;;  %v4197_v46 = vsel %vm705_vm4, %v6848_v1, 0.0 }
 0x2a4   : > { %v6763_v43 = vpop.f32.mrf.mxu3  ;;  %v6765_v62 = vpop.f32.mrf.mxu1  ;;  %v4289_v6 = vadd.f32 %v4288_v37, %v4287_v20  ;;  %v4190_v38 = vadd.f32 %v4189_v40, %v4188_v34  ;;  %v4193_v37 = vsel %vm705_vm4, %v6821_v15, 0.0  ;;  %v4294_v40 = vsel %vm705_vm4, %v4249_v36, 0.0 }
 0x2a5   : > { %v2783_v5 = vadd.f32 %v6765_v62, %v6248_v17  ;;  %v3722_v11 = vadd.f32 %v6763_v43, %v3068_v48  ;;  %v4119_v36 = vadd.f32 %v6714_v16, %v3721_v39  ;;  %v6880_v43 = vadd.f32 %v6678_v47, %v6673_v26 }
 0x2a6   : > { %v4291_v56 = vadd.f32 %v4290_v14, %v4289_v6  ;;  %v4192_v13 = vadd.f32 %v4191_v27, %v4190_v38  ;;  %v4252_v27 = vmul.f32 %v6854_v50, %v6854_v50  ;;  %v4298_v16 = vsel %vm705_vm4, %v4251_v35, 0.0 }
 0x2a7   : > { %v3023_v55 = vpop.f32.mrf.mxu2  ;;  %v4120_v21 = vadd.f32 %v6761_v52, %v3722_v11  ;;  %v6890_v26 = vadd.f32 %v6678_v47, %v6694_v12  ;;  %v6896_v52 = vadd.f32 %v6678_v47, %v4119_v36  ;;  %v4203_v35 = vsel %vm705_vm4, %v6880_v43, 0.0 }
 0x2a8   : > { %v3069_v54 = vadd.f32 %v3023_v55, %v2782_v9  ;;  %v4293_v34 = vadd.f32 %v4292_v7, %v4291_v56  ;;  %v4194_v17 = vadd.f32 %v4193_v37, %v4192_v13  ;;  %v4199_v13 = vsel %vm705_vm4, %v6854_v50, 0.0 }
 0x2a9   : > { %v4300_v37 = vsel %vm705_vm4, %v4252_v27, 0.0 }
 0x2aa   : > { %v4295_v62 = vadd.f32 %v4294_v40, %v4293_v34  ;;  %v4201_v40 = vsel %vm705_vm4, %v6866_v24, 0.0 }
 0x2ab   : > { %v6803_v33 = vpop.f32.mrf.mxu0 }
 0x2ac   : > { %v3677_v51 = vpop.f32.mrf.mxu3  ;;  %v2741_v29 = vpop.f32.mrf.mxu1  ;;  %v4297_v7 = vadd.f32 %v4296_v53, %v4295_v62  ;;  %v6904_v53 = vadd.f32 %v6678_v47, %v4120_v21  ;;  %v4205_v62 = vsel %vm705_vm4, %v6890_v26, 0.0 }
 0x2ad   : > { %v2784_v14 = vadd.f32 %v2741_v29, %v7267_v58  ;;  %v3723_v6 = vadd.f32 %v3677_v51, %v3069_v54  ;;  %v4253_v29 = vmul.f32 %v6866_v24, %v6866_v24  ;;  %v4254_v54 = vmul.f32 %v6880_v43, %v6880_v43 }
 0x2af   : > { %v3026_v31 = vpop.f32.mrf.mxu2  ;;  %v4302_v11 = vsel %vm705_vm4, %v4253_v29, 0.0  ;;  %v4207_v29 = vsel %vm705_vm4, %v6896_v52, 0.0 }
 0x2b0   : > { %v3070_v55 = vadd.f32 %v3026_v31, %v2783_v5  ;;  %v4196_v31 = vadd.f32 %v4195_v49, %v4194_v17  ;;  %v4121_v5 = vadd.f32 %v6803_v33, %v3723_v6  ;;  %v4299_v49 = vadd.f32 %v4298_v16, %v4297_v7 }
 0x2b2   : > { %v4198_v39 = vadd.f32 %v4197_v46, %v4196_v31  ;;  %v4301_v33 = vadd.f32 %v4300_v37, %v4299_v49  ;;  %v6916_v27 = vadd.f32 %v6678_v47, %v4121_v5 }
 0x2b3   : > { %v4078_v59 = vpop.f32.mrf.mxu0 }
 0x2b4   : > { %v3680_v25 = vpop.f32.mrf.mxu3  ;;  %v2744_v2 = vpop.f32.mrf.mxu1  ;;  %v4303_v6 = vadd.f32 %v4302_v11, %v4301_v33  ;;  %v4258_v37 = vmul.f32 %v6916_v27, %v6916_v27 }
 0x2b5   : > { %v3724_v51 = vadd.f32 %v3680_v25, %v3070_v55  ;;  %v2785_v34 = vadd.f32 %v2744_v2, %v6289_v44  ;;  %v4200_v25 = vadd.f32 %v4199_v13, %v4198_v39  ;;  %v4255_v55 = vmul.f32 %v6890_v26, %v6890_v26 }
 0x2b6   : > { %v4256_v44 = vmul.f32 %v6896_v52, %v6896_v52  ;;  %v4304_v2 = vsel %vm705_vm4, %v4254_v54, 0.0  ;;  %v4209_v39 = vsel %vm705_vm4, %v6904_v53, 0.0  ;;  %v4312_v33 = vsel %vm705_vm4, %v4258_v37, 0.0 }
 0x2b7   : > { %v3028_v20 = vpop.f32.mrf.mxu2  ;;  %v4122_v58 = vadd.f32 %v4078_v59, %v3724_v51  ;;  %v4202_v17 = vadd.f32 %v4201_v40, %v4200_v25  ;;  %v4257_v59 = vmul.f32 %v6904_v53, %v6904_v53  ;;  %v4306_v7 = vsel %vm705_vm4, %v4255_v55, 0.0 }
 0x2b8   : > { %v3071_v48 = vadd.f32 %v3028_v20, %v2784_v14  ;;  %v4305_v13 = vadd.f32 %v4304_v2, %v4303_v6  ;;  %v4211_v25 = vsel %vm705_vm4, %v6916_v27, 0.0 }
 0x2b9   : > { %v6924_v21 = vadd.f32 %v6678_v47, %v4122_v58  ;;  %v4310_v49 = vsel %vm705_vm4, %v4257_v59, 0.0 }
 0x2bb   : > { %v4080_v38 = vpop.f32.mrf.mxu0  ;;  %v4259_v11 = vmul.f32 %v6924_v21, %v6924_v21 }
 0x2bc   : > { %v3682_v9 = vpop.f32.mrf.mxu3  ;;  %v2746_v56 = vpop.f32.mrf.mxu1 }
 0x2bd   : > { %v3725_v20 = vadd.f32 %v3682_v9, %v3071_v48  ;;  %v4204_v48 = vadd.f32 %v4203_v35, %v4202_v17  ;;  %v2786_v5 = vadd.f32 %v2746_v56, %v6312_v45  ;;  %v4213_v45 = vsel %vm705_vm4, %v6924_v21, 0.0 }
 0x2bf   : > { %v3031_v12 = vpop.f32.mrf.mxu2  ;;  %v4123_v36 = vadd.f32 %v4080_v38, %v3725_v20  ;;  %v4206_v51 = vadd.f32 %v4205_v62, %v4204_v48  ;;  %v4308_v38 = vsel %vm705_vm4, %v4256_v44, 0.0 }
 0x2c0   : > { %v3072_v14 = vadd.f32 %v3031_v12, %v2785_v34  ;;  %v4307_v34 = vadd.f32 %v4306_v7, %v4305_v13 }
 0x2c1   : > { %v6932_v40 = vadd.f32 %v6678_v47, %v4123_v36  ;;  %v4208_v12 = vadd.f32 %v4207_v29, %v4206_v51  ;;  %v4314_v36 = vsel %vm705_vm4, %v4259_v11, 0.0 }
 0x2c2   : > { %v4309_v58 = vadd.f32 %v4308_v38, %v4307_v34 }
 0x2c3   : > { %v4083_v46 = vpop.f32.mrf.mxu0  ;;  %v4260_v56 = vmul.f32 %v6932_v40, %v6932_v40 }
 0x2c4   : > { %v3685_v31 = vpop.f32.mrf.mxu3  ;;  %v2749_v16 = vpop.f32.mrf.mxu1  ;;  %v4311_v44 = vadd.f32 %v4310_v49, %v4309_v58 }
 0x2c5   : > { %v3726_v9 = vadd.f32 %v3685_v31, %v3072_v14  ;;  %v4210_v14 = vadd.f32 %v4209_v39, %v4208_v12  ;;  %v4316_v7 = vsel %vm705_vm4, %v4260_v56, 0.0  ;;  %v2787_v13 = vadd.f32 %v2749_v16, %v6330_v63 }
 0x2c6   : > { %v4313_v59 = vadd.f32 %v4312_v33, %v4311_v44 }
 0x2c7   : > { %v4124_v54 = vadd.f32 %v4083_v46, %v3726_v9  ;;  %v3033_v20 = vpop.f32.mrf.mxu2  ;;  %v4212_v2 = vadd.f32 %v4211_v25, %v4210_v14  ;;  %v4215_v46 = vsel %vm705_vm4, %v6932_v40, 0.0 }
 0x2c8   : > { %v3073_v55 = vadd.f32 %v3033_v20, %v2786_v5  ;;  %v4315_v39 = vadd.f32 %v4314_v36, %v4313_v59 }
 0x2c9   : > { %v6941_v35 = vadd.f32 %v6678_v47, %v4124_v54  ;;  %v4214_v31 = vadd.f32 %v4213_v45, %v4212_v2 }
 0x2ca   : > { %v4317_v34 = vadd.f32 %v4316_v7, %v4315_v39 }
 0x2cb   : > { %v4085_v17 = vpop.f32.mrf.mxu0  ;;  %v4261_v6 = vmul.f32 %v6941_v35, %v6941_v35  ;;  %v4217_v29 = vsel %vm705_vm4, %v6941_v35, 0.0  ;;  %v4216_v37 = vadd.f32 %v4215_v46, %v4214_v31 }
 0x2cc   : > { %v3687_v62 = vpop.f32.mrf.mxu3  ;;  %v2751_v38 = vpop.f32.mrf.mxu1 }
 0x2cd   : > { %v3727_v48 = vadd.f32 %v3687_v62, %v3073_v55  ;;  %v4318_v54 = vsel %vm705_vm4, %v4261_v6, 0.0  ;;  %v4218_v12 = vadd.f32 %v4217_v29, %v4216_v37  ;;  %v2788_v56 = vadd.f32 %v2751_v38, %v6354_v30 }
 0x2ce   : > { %v4319_v63 = vadd.f32 %v4318_v54, %v4317_v34 }
 0x2cf   : > { %v4125_v9 = vadd.f32 %v4085_v17, %v3727_v48  ;;  %v3036_v51 = vpop.f32.mrf.mxu2 }
 0x2d0   : > { %v3074_v20 = vadd.f32 %v3036_v51, %v2787_v13 }
 0x2d1   : > { %v6959_v5 = vadd.f32 %v6678_v47, %v4125_v9 }
 0x2d3   : > { %v4219_v49 = vsel %vm705_vm4, %v6959_v5, 0.0  ;;  %v4262_v25 = vmul.f32 %v6959_v5, %v6959_v5  ;;  %v4088_v11 = vpop.f32.mrf.mxu0 }
 0x2d4   : > { %v4220_v16 = vadd.f32 %v4219_v49, %v4218_v12  ;;  %v3690_v55 = vpop.f32.mrf.mxu3  ;;  %v2754_v62 = vpop.f32.mrf.mxu1 }
 0x2d5   : > { %v4320_v58 = vsel %vm705_vm4, %v4262_v25, 0.0  ;;  %v3728_v14 = vadd.f32 %v3690_v55, %v3074_v20  ;;  %v2789_v9 = vadd.f32 %v2754_v62, %v6372_v8 }
 0x2d6   : > { %v4321_v33 = vadd.f32 %v4320_v58, %v4319_v63  ;;  %v7268_v63 = vld [vmem:[#allocation5_spill] sm:$0xff] }
 0x2d7   : > { %v4126_v45 = vadd.f32 %v4088_v11, %v3728_v14  ;;  %v3038_v17 = vpop.f32.mrf.mxu2 }
 0x2d8   : > { %v3075_v2 = vadd.f32 %v3038_v17, %v2788_v56 }
 0x2d9   : > { %v6968_v44 = vadd.f32 %v6678_v47, %v4126_v45 }
 0x2db   : > { %v4221_v36 = vsel %vm705_vm4, %v6968_v44, 0.0  ;;  %v4263_v46 = vmul.f32 %v6968_v44, %v6968_v44  ;;  %v4090_v6 = vpop.f32.mrf.mxu0 }
 0x2dc   : > { %v4222_v48 = vadd.f32 %v4221_v36, %v4220_v16  ;;  %v3692_v59 = vpop.f32.mrf.mxu3  ;;  %v2756_v54 = vpop.f32.mrf.mxu1 }
 0x2dd   : > { %v4322_v31 = vsel %vm705_vm4, %v4263_v46, 0.0  ;;  %v3729_v7 = vadd.f32 %v3692_v59, %v3075_v2  ;;  %v2790_v16 = vadd.f32 %v2756_v54, %v7268_v63 }
 0x2de   : > { %v4323_v29 = vadd.f32 %v4322_v31, %v4321_v33 }
 0x2df   : > { %v4127_v30 = vadd.f32 %v4090_v6, %v3729_v7  ;;  %v3041_v13 = vpop.f32.mrf.mxu2 }
 0x2e0   : > { %v3076_v38 = vadd.f32 %v3041_v13, %v2789_v9 }
 0x2e1   : > { %v6977_v51 = vadd.f32 %v6678_v47, %v4127_v30 }
 0x2e3   : > { %v4223_v39 = vsel %vm705_vm4, %v6977_v51, 0.0  ;;  %v4264_v37 = vmul.f32 %v6977_v51, %v6977_v51  ;;  %v4093_v34 = vpop.f32.mrf.mxu0 }
 0x2e4   : > { %v4224_v20 = vadd.f32 %v4223_v39, %v4222_v48  ;;  %v3695_v12 = vpop.f32.mrf.mxu3 }
 0x2e5   : > { %v4324_v49 = vsel %vm705_vm4, %v4264_v37, 0.0  ;;  %v3730_v25 = vadd.f32 %v3695_v12, %v3076_v38 }
 0x2e6   : > { %v4325_v11 = vadd.f32 %v4324_v49, %v4323_v29 }
 0x2e7   : > { %v4128_v8 = vadd.f32 %v4093_v34, %v3730_v25  ;;  %v3043_v55 = vpop.f32.mrf.mxu2 }
 0x2e8   : > { %v3077_v14 = vadd.f32 %v3043_v55, %v2790_v16 }
 0x2e9   : > { %v6986_v58 = vadd.f32 %v6678_v47, %v4128_v8 }
 0x2eb   : > { %v4225_v33 = vsel %vm705_vm4, %v6986_v58, 0.0  ;;  %v4265_v45 = vmul.f32 %v6986_v58, %v6986_v58  ;;  %v4095_v46 = vpop.f32.mrf.mxu0 }
 0x2ec   : > { %v4226_v56 = vadd.f32 %v4225_v33, %v4224_v20  ;;  %v3697_v17 = vpop.f32.mrf.mxu3 }
 0x2ed   : > { %v4326_v2 = vsel %vm705_vm4, %v4265_v45, 0.0  ;;  %v3731_v62 = vadd.f32 %v3697_v17, %v3077_v14 }
 0x2ee   : > { %v4327_v36 = vadd.f32 %v4326_v2, %v4325_v11 }
 0x2ef   : > { %v4129_v6 = vadd.f32 %v4095_v46, %v3731_v62 }
 0x2f1   : > { %v6994_v48 = vadd.f32 %v6678_v47, %v4129_v6 }
 0x2f3   : > { %v4227_v59 = vsel %vm705_vm4, %v6994_v48, 0.0  ;;  %v4266_v31 = vmul.f32 %v6994_v48, %v6994_v48 }
 0x2f4   : > { %v4228_v7 = vadd.f32 %v4227_v59, %v4226_v56 }
 0x2f5   : > { %v4328_v29 = vsel %vm705_vm4, %v4266_v31, 0.0 }
 0x2f6   : > { %v4229_v30 = vrot.slane %v4228_v7, 4  ;;  %v4329_v9 = vadd.f32 %v4328_v29, %v4327_v36 }
 0x2f8   : > { %v4230_v13 = vadd.f32 %v4229_v30, %v4228_v7  ;;  %v4330_v38 = vrot.slane %v4329_v9, 4 }
 0x2fa   : > { %v4231_v39 = vrot.slane %v4230_v13, 2  ;;  %v4331_v37 = vadd.f32 %v4330_v38, %v4329_v9 }
 0x2fc   : > { %v4232_v54 = vadd.f32 %v4231_v39, %v4230_v13  ;;  %v4332_v20 = vrot.slane %v4331_v37, 2 }
 0x2fe   : > { %v4233_v34 = vrot.slane %v4232_v54, 1  ;;  %v4333_v47 = vadd.f32 %v4332_v20, %v4331_v37 }
 0x300   : > { %v4234_v12 = vadd.f32 %v4233_v34, %v4232_v54  ;;  %v4334_v49 = vrot.slane %v4333_v47, 1 }
 0x302   : > { %v4335_v25 = vadd.f32 %v4334_v49, %v4333_v47  ;;  %v7001_v11 = vmul.f32 0.00390625, %v4234_v12 }
 0x304   : > { %v4337_v8 = vmul.f32 0.00390625, %v4335_v25  ;;  %v4338_v63 = vmul.f32 %v7001_v11, %v7001_v11  ;;  %v4366_v55 = vsub.f32 %v6941_v35, %v7001_v11  ;;  %v4367_v14 = vsub.f32 %v6959_v5, %v7001_v11 }
 0x305   : > { %v4368_v33 = vsub.f32 %v6968_v44, %v7001_v11  ;;  %v4369_v45 = vsub.f32 %v6977_v51, %v7001_v11  ;;  %v4370_v56 = vsub.f32 %v6986_v58, %v7001_v11  ;;  %v4371_v17 = vsub.f32 %v6994_v48, %v7001_v11  ;;  %v4419_v44 = vld [vmem:[%s7075_s20 + $0x20] sm:$0xff] }
 0x306   : > { %v4339_v16 = vsub.f32 %v4337_v8, %v4338_v63  ;;  %v4340_v6 = vsub.f32 %v6688_v57, %v7001_v11  ;;  %v4341_v59 = vsub.f32 %v6684_v42, %v7001_v11  ;;  %v4342_v31 = vsub.f32 %v6692_v61, %v7001_v11  ;;  %v4423_v48 = vld [vmem:[%s7075_s20 + $0x40] sm:$0xff] }
 0x307   : > { %v4343_v7 = vsub.f32 %v6702_v0, %v7001_v11  ;;  %v4344_v29 = vsub.f32 %v6712_v23, %v7001_v11  ;;  %v4345_v30 = vsub.f32 %v6729_v22, %v7001_v11  ;;  %v4346_v9 = vsub.f32 %v6739_v19, %v7001_v11 }
 0x308   : > { %v4372_v2 = vadd.f32 1e-05, %v4339_v16  ;;  %v4347_v57 = vsub.f32 %v6750_v4, %v7001_v11  ;;  %v4348_v42 = vsub.f32 %v6759_v60, %v7001_v11  ;;  %v4349_v61 = vsub.f32 %v6774_v28, %v7001_v11 }
 0x309   : > { %v4350_v0 = vsub.f32 %v6783_v41, %v7001_v11  ;;  %v4351_v23 = vsub.f32 %v6792_v18, %v7001_v11  ;;  %v4352_v22 = vsub.f32 %v6801_v32, %v7001_v11  ;;  %v4353_v4 = vsub.f32 %v6812_v3, %v7001_v11 }
 0x30a   : > { %5237 = vrsqrt.f32 %v4372_v2  ;;  %v4354_v60 = vsub.f32 %v6821_v15, %v7001_v11  ;;  %v4355_v28 = vsub.f32 %v6832_v10, %v7001_v11  ;;  %v4356_v41 = vsub.f32 %v6848_v1, %v7001_v11 }
 0x30b   : > { %v4357_v18 = vsub.f32 %v6854_v50, %v7001_v11  ;;  %v4358_v32 = vsub.f32 %v6866_v24, %v7001_v11  ;;  %vm4379_vm9 = vweird.f32 %v4372_v2  ;;  %v4359_v3 = vsub.f32 %v6880_v43, %v7001_v11 }
 0x30c   : > { %v4360_v15 = vsub.f32 %v6890_v26, %v7001_v11  ;;  %v4361_v10 = vsub.f32 %v6896_v52, %v7001_v11  ;;  %v4362_v1 = vsub.f32 %v6904_v53, %v7001_v11  ;;  %v4363_v50 = vsub.f32 %v6916_v27, %v7001_v11 }
 0x30d   : > { %v4364_v24 = vsub.f32 %v6924_v21, %v7001_v11  ;;  %v4365_v43 = vsub.f32 %v6932_v40, %v7001_v11 }
 0x310   : > { %v5238_v62 = vpop.eup %5237 }
 0x311   : > { %v4374_v36 = vmul.f32 %v5238_v62, %v4372_v2  ;;  %vm4380_vm8 = vweird.f32 %v5238_v62 }
 0x312   : > { %vm4381_vm10 = vmor %vm4379_vm9, %vm4380_vm8 }
 0x313   : > { %v4375_v46 = vmul.f32 %v5238_v62, %v4374_v36 }
 0x315   : > { %v4376_v13 = vmul.f32 0.5, %v4375_v46 }
 0x317   : > { %v4377_v19 = vsub.f32 1.5, %v4376_v13 }
 0x319   : > { %v4378_v38 = vmul.f32 %v5238_v62, %v4377_v19 }
 0x31b   : > { %v4382_v39 = vsel %vm4381_vm10, %v5238_v62, %v4378_v38  ;;  %v4428_v38 = vld [vmem:[%s7075_s20 + $0x68] sm:$0xff] }
 0x31c   : > { %v4383_v26 = vmul.f32 %v4382_v39, %v4340_v6  ;;  %v4384_v37 = vmul.f32 %v4382_v39, %v4341_v59  ;;  %v4385_v54 = vmul.f32 %v4382_v39, %v4342_v31  ;;  %v4386_v52 = vmul.f32 %v4382_v39, %v4343_v7  ;;  %v4415_v7 = vld [vmem:[%s7075_s20] sm:$0xff] }
 0x31d   : > { %v4387_v20 = vmul.f32 %v4382_v39, %v4344_v29  ;;  %v4388_v34 = vmul.f32 %v4382_v39, %v4345_v30  ;;  %v4389_v47 = vmul.f32 %v4382_v39, %v4346_v9  ;;  %v4390_v53 = vmul.f32 %v4382_v39, %v4347_v57  ;;  %v4416_v29 = vld [vmem:[%s7075_s20 + $0x8] sm:$0xff]  ;;  %v4417_v30 = vld [vmem:[%s7075_s20 + $0x10] sm:$0xff] }
 0x31e   : > { %v4391_v27 = vmul.f32 %v4382_v39, %v4348_v42  ;;  %v4392_v21 = vmul.f32 %v4382_v39, %v4349_v61  ;;  %v4393_v40 = vmul.f32 %v4382_v39, %v4350_v0  ;;  %v4394_v12 = vmul.f32 %v4382_v39, %v4351_v23  ;;  %v4418_v61 = vld [vmem:[%s7075_s20 + $0x18] sm:$0xff]  ;;  %v4421_v23 = vld [vmem:[%s7075_s20 + $0x30] sm:$0xff] }
 0x31f   : > { %v4395_v49 = vmul.f32 %v4382_v39, %v4352_v22  ;;  %v4396_v25 = vmul.f32 %v4382_v39, %v4353_v4  ;;  %v4397_v8 = vmul.f32 %v4382_v39, %v4354_v60  ;;  %v7077_v63 = vmul.f32 %v4382_v39, %v4355_v28  ;;  %v4425_v4 = vld [vmem:[%s7075_s20 + $0x50] sm:$0xff]  ;;  %v4426_v28 = vld [vmem:[%s7075_s20 + $0x58] sm:$0xff] }
 0x320   : > { %v7079_v16 = vmul.f32 %v4382_v39, %v4356_v41  ;;  %v7081_v2 = vmul.f32 %v4382_v39, %v4357_v18  ;;  %v7083_v62 = vmul.f32 %v4382_v39, %v4358_v32  ;;  %v7085_v36 = vmul.f32 %v4382_v39, %v4359_v3  ;;  %v4427_v18 = vld [vmem:[%s7075_s20 + $0x60] sm:$0xff] }
 0x321   : > { %v7087_v46 = vmul.f32 %v4382_v39, %v4360_v15  ;;  %v7089_v6 = vmul.f32 %v4382_v39, %v4361_v10  ;;  %v7091_v59 = vmul.f32 %v4382_v39, %v4362_v1  ;;  %v7093_v31 = vmul.f32 %v4382_v39, %v4363_v50  ;;  %v4429_v15 = vld [vmem:[%s7075_s20 + $0x70] sm:$0xff]  ;;  %v4430_v1 = vld [vmem:[%s7075_s20 + $0x78] sm:$0xff] }
 0x322   : > { %v7098_v9 = vmul.f32 %v4382_v39, %v4364_v24  ;;  %v7100_v13 = vmul.f32 %v4382_v39, %v4365_v43  ;;  %v7105_v57 = vmul.f32 %v4382_v39, %v4366_v55  ;;  %v7110_v42 = vmul.f32 %v4382_v39, %v4367_v14  ;;  %v4431_v24 = vld [vmem:[%s7075_s20 + $0x80] sm:$0xff] }
 0x323   : > { %v7123_v35 = vmul.f32 %v4382_v39, %v4368_v33  ;;  %v7128_v5 = vmul.f32 %v4382_v39, %v4369_v45  ;;  %v7133_v55 = vmul.f32 %v4382_v39, %v4370_v56  ;;  %v7138_v14 = vmul.f32 %v4382_v39, %v4371_v17  ;;  %v4420_v33 = vld [vmem:[%s7075_s20 + $0x28] sm:$0xff]  ;;  %v4422_v56 = vld [vmem:[%s7075_s20 + $0x38] sm:$0xff] }
 0x324   : > { %v4447_v0 = vadd.f32 %v4415_v7, %v4383_v26  ;;  %v4448_v51 = vadd.f32 %v4416_v29, %v4384_v37  ;;  %v4449_v45 = vadd.f32 %v4417_v30, %v4385_v54  ;;  %v4450_v58 = vadd.f32 %v4418_v61, %v4386_v52  ;;  %v4424_v17 = vld [vmem:[%s7075_s20 + $0x48] sm:$0xff]  ;;  %v4433_v37 = vld [vmem:[%s7075_s20 + $0x90] sm:$0xff]  ;;  %v4434_v52 = vld [vmem:[%s7075_s20 + $0x98] sm:$0xff] }
 0x325   : > { %v4451_v22 = vadd.f32 %v4419_v44, %v4387_v20  ;;  %v4452_v11 = vadd.f32 %v4420_v33, %v4388_v34  ;;  %v4453_v19 = vadd.f32 %v4421_v23, %v4389_v47  ;;  %v4454_v60 = vadd.f32 %v4422_v56, %v4390_v53  ;;  %v4432_v39 = vld [vmem:[%s7075_s20 + $0x88] sm:$0xff]  ;;  %v4435_v34 = vld [vmem:[%s7075_s20 + $0xa0] sm:$0xff]  ;;  %v4445_v29 = vld [vmem:[%s7075_s20 + $0xf0] sm:$0xff] }
 0x326   : > { %4479 = vst.msk [vmem:[%s7118_s23] sm:$0xff] %vm705_vm4, %v4447_v0  ;;  %v4455_v41 = vadd.f32 %v4423_v48, %v4391_v27  ;;  %v4456_v32 = vadd.f32 %v4424_v17, %v4392_v21  ;;  %v4457_v3 = vadd.f32 %v4425_v4, %v4393_v40  ;;  %v4458_v10 = vadd.f32 %v4426_v28, %v4394_v12  ;;  %v4436_v53 = vld [vmem:[%s7075_s20 + $0xa8] sm:$0xff]  ;;  %v4437_v21 = vld [vmem:[%s7075_s20 + $0xb0] sm:$0xff]  ;;  %v4438_v12 = vld [vmem:[%s7075_s20 + $0xb8] sm:$0xff] }
 0x327   : > { %4480 = vst.msk [vmem:[%s7118_s23 + $0x8] sm:$0xff] %vm705_vm4, %v4448_v51  ;;  %v4459_v50 = vadd.f32 %v4427_v18, %v4395_v49  ;;  %v4460_v43 = vadd.f32 %v4428_v38, %v4396_v25  ;;  %v4461_v26 = vadd.f32 %v4429_v15, %v4397_v8  ;;  %v4462_v54 = vadd.f32 %v4430_v1, %v7077_v63  ;;  %v4439_v25 = vld [vmem:[%s7075_s20 + $0xc0] sm:$0xff]  ;;  %v4440_v63 = vld [vmem:[%s7075_s20 + $0xc8] sm:$0xff] }
 0x328   : > { %4481 = vst.msk [vmem:[%s7118_s23 + $0x10] sm:$0xff] %vm705_vm4, %v4449_v45  ;;  %v4463_v20 = vadd.f32 %v4431_v24, %v7079_v16  ;;  %v4464_v47 = vadd.f32 %v4432_v39, %v7081_v2  ;;  %v4465_v27 = vadd.f32 %v4433_v37, %v7083_v62  ;;  %v4466_v40 = vadd.f32 %v4434_v52, %v7085_v36  ;;  %v4441_v2 = vld [vmem:[%s7075_s20 + $0xd0] sm:$0xff]  ;;  %v4442_v36 = vld [vmem:[%s7075_s20 + $0xd8] sm:$0xff]  ;;  %v4444_v7 = vld [vmem:[%s7075_s20 + $0xe8] sm:$0xff] }
 0x329   : > { %4482 = vst.msk [vmem:[%s7118_s23 + $0x18] sm:$0xff] %vm705_vm4, %v4450_v58  ;;  %v4467_v49 = vadd.f32 %v4435_v34, %v7087_v46  ;;  %v4468_v8 = vadd.f32 %v4436_v53, %v7089_v6  ;;  %v4469_v16 = vadd.f32 %v4437_v21, %v7091_v59  ;;  %v4470_v62 = vadd.f32 %v4438_v12, %v7093_v31  ;;  %v4443_v6 = vld [vmem:[%s7075_s20 + $0xe0] sm:$0xff] }
 0x32a   : > { %4483 = vst.msk [vmem:[%s7118_s23 + $0x20] sm:$0xff] %vm705_vm4, %v4451_v22  ;;  %v4471_v46 = vadd.f32 %v4439_v25, %v7098_v9  ;;  %v4472_v59 = vadd.f32 %v4440_v63, %v7100_v13  ;;  %v4473_v31 = vadd.f32 %v4441_v2, %v7105_v57  ;;  %v4474_v30 = vadd.f32 %v4442_v36, %v7110_v42  ;;  %v4446_v9 = vld [vmem:[%s7075_s20 + $0xf8] sm:$0xff] }
 0x32b   : > { %4484 = vst.msk [vmem:[%s7118_s23 + $0x28] sm:$0xff] %vm705_vm4, %v4452_v11  ;;  %v4475_v13 = vadd.f32 %v4443_v6, %v7123_v35  ;;  %v4476_v61 = vadd.f32 %v4444_v7, %v7128_v5  ;;  %v4477_v57 = vadd.f32 %v4445_v29, %v7133_v55  ;;  %v4478_v44 = vadd.f32 %v4446_v9, %v7138_v14 }
 0x32c   : > { %4485 = vst.msk [vmem:[%s7118_s23 + $0x30] sm:$0xff] %vm705_vm4, %v4453_v19 }
 0x32d   : > { %4486 = vst.msk [vmem:[%s7118_s23 + $0x38] sm:$0xff] %vm705_vm4, %v4454_v60 }
 0x32e   : > { %4487 = vst.msk [vmem:[%s7118_s23 + $0x40] sm:$0xff] %vm705_vm4, %v4455_v41 }
 0x32f   : > { %4488 = vst.msk [vmem:[%s7118_s23 + $0x48] sm:$0xff] %vm705_vm4, %v4456_v32 }
 0x330   : > { %4489 = vst.msk [vmem:[%s7118_s23 + $0x50] sm:$0xff] %vm705_vm4, %v4457_v3 }
 0x331   : > { %4490 = vst.msk [vmem:[%s7118_s23 + $0x58] sm:$0xff] %vm705_vm4, %v4458_v10 }
 0x332   : > { %4491 = vst.msk [vmem:[%s7118_s23 + $0x60] sm:$0xff] %vm705_vm4, %v4459_v50 }
 0x333   : > { %4492 = vst.msk [vmem:[%s7118_s23 + $0x68] sm:$0xff] %vm705_vm4, %v4460_v43 }
 0x334   : > { %4493 = vst.msk [vmem:[%s7118_s23 + $0x70] sm:$0xff] %vm705_vm4, %v4461_v26 }
 0x335   : > { %4494 = vst.msk [vmem:[%s7118_s23 + $0x78] sm:$0xff] %vm705_vm4, %v4462_v54 }
 0x336   : > { %4495 = vst.msk [vmem:[%s7118_s23 + $0x80] sm:$0xff] %vm705_vm4, %v4463_v20 }
 0x337   : > { %4496 = vst.msk [vmem:[%s7118_s23 + $0x88] sm:$0xff] %vm705_vm4, %v4464_v47 }
 0x338   : > { %4497 = vst.msk [vmem:[%s7118_s23 + $0x90] sm:$0xff] %vm705_vm4, %v4465_v27 }
 0x339   : > { %4498 = vst.msk [vmem:[%s7118_s23 + $0x98] sm:$0xff] %vm705_vm4, %v4466_v40 }
 0x33a   : > { %4499 = vst.msk [vmem:[%s7118_s23 + $0xa0] sm:$0xff] %vm705_vm4, %v4467_v49 }
 0x33b   : > { %4500 = vst.msk [vmem:[%s7118_s23 + $0xa8] sm:$0xff] %vm705_vm4, %v4468_v8 }
 0x33c   : > { %4501 = vst.msk [vmem:[%s7118_s23 + $0xb0] sm:$0xff] %vm705_vm4, %v4469_v16 }
 0x33d   : > { %4502 = vst.msk [vmem:[%s7118_s23 + $0xb8] sm:$0xff] %vm705_vm4, %v4470_v62 }
 0x33e   : > { %4503 = vst.msk [vmem:[%s7118_s23 + $0xc0] sm:$0xff] %vm705_vm4, %v4471_v46 }
 0x33f   : > { %4504 = vst.msk [vmem:[%s7118_s23 + $0xc8] sm:$0xff] %vm705_vm4, %v4472_v59 }
 0x340   : > { %4505 = vst.msk [vmem:[%s7118_s23 + $0xd0] sm:$0xff] %vm705_vm4, %v4473_v31 }
 0x341   : > { %4506 = vst.msk [vmem:[%s7118_s23 + $0xd8] sm:$0xff] %vm705_vm4, %v4474_v30 }
 0x342   : > { %4507 = vst.msk [vmem:[%s7118_s23 + $0xe0] sm:$0xff] %vm705_vm4, %v4475_v13 }
 0x343   : > { %4508 = vst.msk [vmem:[%s7118_s23 + $0xe8] sm:$0xff] %vm705_vm4, %v4476_v61 }
 0x344   : > { %4509 = vst.msk [vmem:[%s7118_s23 + $0xf0] sm:$0xff] %vm705_vm4, %v4477_v57 }
 0x345   : > { %4510 = vst.msk [vmem:[%s7118_s23 + $0xf8] sm:$0xff] %vm705_vm4, %v4478_v44 }
 0x346 PF: > { %s14_s15 = sadd.s32 1, %s5295_s15  }
 0x347   : > { %p11_p4 = scmp.ge.s32.totalorder %s14_s15, 4  }
 0x349   :  { %13 = sbr.rel (!%p11_p4) target bundleno = 1 (0x1), region = 79 }

</bundles_post_ra>
